<compile_context>
chip_gen: v7x
topology: tpu7x:2x2x1
jax: 0.10.0
libtpu: 0.0.40
codegen_flags: <defaults>
</compile_context>

<pallas_src>
import functools

import jax
import jax.numpy as jnp
from jax.experimental import pallas as pl
from jax.experimental.pallas import tpu as pltpu

FEATURE_MAP_STRIDE = 8
VOXEL_SIZE = (0.075, 0.075, 0.2)
PC_RANGE = (-51.2, -51.2, -5.0, 51.2, 51.2, 3.0)

_BOX_PAD = 16  # box regression padded to 16 lanes inside kernel / output row


def _round_up(x, m):
    return ((x + m - 1) // m) * m


# ---------------------------------------------------------------------------
# Fused kernel: MeanVFE + backbone linear + head + projection + mask lookup
#               + generate_3D_box selection reductions.
# ---------------------------------------------------------------------------
def _fused_kernel(n_cls, q, h, w,
                  vox_ref, npts_ref, ch_ref, valid_ref,
                  wbb_ref, bbb_ref, whd_ref, bhd_ref,
                  pw_ref, mask_ref, center_ref,
                  out_ref,
                  bbox_s, bbox_d, bscore, bdist, cnt):
    f32 = jnp.float32
    pid = pl.program_id(0)
    last = pl.num_programs(0) - 1
    tn = vox_ref.shape[0]

    @pl.when(pid == 0)
    def _():
        bbox_s[...] = jnp.zeros_like(bbox_s)
        bbox_d[...] = jnp.zeros_like(bbox_d)
        bscore[...] = jnp.full_like(bscore, -jnp.inf)
        bdist[...] = jnp.full_like(bdist, jnp.inf)
        cnt[...] = jnp.zeros_like(cnt)

    # ---- MeanVFE folded into the backbone matmul (MXU, bf16 operands) -----
    x = vox_ref[...]                                                   # (tn, P*Cin) bf16
    feat = jnp.dot(x, wbb_ref[...], preferred_element_type=jnp.float32)
    feat = feat / jnp.maximum(npts_ref[...], 1.0) + bbb_ref[...]
    feat = jnp.maximum(feat, 0.0)                                      # relu

    # ---- merged dense head: columns [box(16, zero-padded) | heatmap] ------
    head = jnp.dot(feat.astype(jnp.bfloat16), whd_ref[...],
                   preferred_element_type=jnp.float32) + bhd_ref[...]
    box16 = head[:, 0:_BOX_PAD]                                        # (tn, 16)
    hm = head[:, _BOX_PAD:_BOX_PAD + n_cls]
    # sigmoid(max(hm)) == max(sigmoid(hm))  (monotonic) -> one EUP exp / row
    score = jax.nn.sigmoid(jnp.max(hm, axis=-1, keepdims=True))        # (tn, 1)

    # ---- voxel -> image projection + voxel -> world (VPU MACs, K=4) -------
    ch = ch_ref[...]                                                   # (tn, 4)
    pw = (ch[:, 0:1] * pw_ref[0:1, :] + ch[:, 1:2] * pw_ref[1:2, :]
          + ch[:, 2:3] * pw_ref[2:3, :] + ch[:, 3:4] * pw_ref[3:4, :])  # (tn, 20)
    d = pw[:, 2:3]
    d_safe = jnp.where(d >= 0.0, jnp.maximum(d, 1e-6), jnp.minimum(d, -1e-6))
    uv = pw[:, 0:2] / d_safe                                           # (tn, 2)
    box16_w = box16 + pw[:, 4:20]          # add world center to box regression

    # ---- in-kernel mask lookup (one-hot matmul gather, depth>0 gated) -----
    pxf = jnp.clip(uv[:, 0:1], -1e6, 1e6)
    pyf = jnp.clip(uv[:, 1:2], -1e6, 1e6)
    pxi = jnp.floor(pxf).astype(jnp.int32)
    pyi = jnp.floor(pyf).astype(jnp.int32)
    row_oh = (jax.lax.broadcasted_iota(jnp.int32, (tn, h), 1) == pyi).astype(f32)
    mask_rows = jnp.dot(row_oh, mask_ref[...],
                        preferred_element_type=jnp.float32)            # (tn, W)
    col_oh = (jax.lax.broadcasted_iota(jnp.int32, (tn, w), 1) == pxi).astype(f32)
    inb = ((pxi >= 0) & (pyi >= 0) & (pxi < w) & (pyi < h)
           & (d > 1e-6)).astype(f32)
    mval = jnp.sum(mask_rows * col_oh, axis=-1, keepdims=True) * inb   # (tn, 1)

    # ---- generate_3D_box selection math + running reductions --------------
    valid = valid_ref[...]
    extra = (score > q).astype(f32) * valid        # pred_scores > quality_score
    sel = mval * extra                              # selected_voxels *= mask_extra
    msc = jnp.where(sel > 0, score, -jnp.inf)
    dist = jnp.sum((uv - center_ref[...]) ** 2, axis=-1, keepdims=True)
    mdist = jnp.where(extra > 0, dist, jnp.inf)

    riota = jax.lax.broadcasted_iota(jnp.int32, (tn, 1), 0)

    blk_best = jnp.max(msc, axis=0, keepdims=True)                     # (1, 1)
    idx_s = jnp.min(jnp.where(msc >= blk_best, riota, tn), axis=0, keepdims=True)
    oh_s = (riota == idx_s).astype(f32)
    box_s = jnp.sum(box16_w * oh_s, axis=0, keepdims=True)             # (1, 16)

    blk_mind = jnp.min(mdist, axis=0, keepdims=True)
    idx_d = jnp.min(jnp.where(mdist <= blk_mind, riota, tn), axis=0, keepdims=True)
    oh_d = (riota == idx_d).astype(f32)
    box_d = jnp.sum(box16_w * oh_d, axis=0, keepdims=True)             # (1, 16)

    bbox_s[...] = jnp.where(blk_best > bscore[...], box_s, bbox_s[...])
    bscore[...] = jnp.maximum(blk_best, bscore[...])
    bbox_d[...] = jnp.where(blk_mind < bdist[...], box_d, bbox_d[...])
    bdist[...] = jnp.minimum(blk_mind, bdist[...])
    cnt[...] += jnp.concatenate(
        [jnp.sum(sel, axis=0, keepdims=True),
         jnp.sum(extra, axis=0, keepdims=True)], axis=1)               # (1, 2)

    @pl.when(pid == last)
    def _():
        out_ref[...] = jnp.zeros_like(out_ref)
        out_ref[:, 0:16] = bbox_s[...]
        out_ref[:, 16:32] = bbox_d[...]
        out_ref[:, 32:34] = cnt[...]
        out_ref[:, 34:35] = bscore[...]
        out_ref[:, 35:36] = bdist[...]


def voxelnext_sam_fused(vox_flat, npts, coords_h, valid,
                        w_bb_t, b_bb, w_head, b_head,
                        pw_mat, mask_f, center,
                        *, n_cls, quality_score, tn):
    n_pad, kdim = vox_flat.shape
    c_feat = w_bb_t.shape[1]
    head_w = w_head.shape[1]
    hw_h, hw_w = mask_f.shape
    nblk = n_pad // tn

    kern = functools.partial(_fused_kernel, n_cls, float(quality_score),
                             hw_h, hw_w)
    return pl.pallas_call(
        kern,
        out_shape=jax.ShapeDtypeStruct((1, 128), jnp.float32),
        grid=(nblk,),
        in_specs=[
            pl.BlockSpec((tn, kdim), lambda i: (i, 0)),
            pl.BlockSpec((tn, 1), lambda i: (i, 0)),
            pl.BlockSpec((tn, 4), lambda i: (i, 0)),
            pl.BlockSpec((tn, 1), lambda i: (i, 0)),
            pl.BlockSpec((kdim, c_feat), lambda i: (0, 0)),
            pl.BlockSpec((1, c_feat), lambda i: (0, 0)),
            pl.BlockSpec((c_feat, head_w), lambda i: (0, 0)),
            pl.BlockSpec((1, head_w), lambda i: (0, 0)),
            pl.BlockSpec((4, 20), lambda i: (0, 0)),
            pl.BlockSpec((hw_h, hw_w), lambda i: (0, 0)),
            pl.BlockSpec((1, 2), lambda i: (0, 0)),
        ],
        out_specs=pl.BlockSpec((1, 128), lambda i: (0, 0)),
        scratch_shapes=[
            pltpu.VMEM((1, _BOX_PAD), jnp.float32),   # best box (mask branch)
            pltpu.VMEM((1, _BOX_PAD), jnp.float32),   # best box (dist branch)
            pltpu.VMEM((1, 1), jnp.float32),          # best score
            pltpu.VMEM((1, 1), jnp.float32),          # best dist
            pltpu.VMEM((1, 2), jnp.float32),          # [sel_total, extra_total]
        ],
        compiler_params=pltpu.CompilerParams(
            dimension_semantics=("arbitrary",)),      # accumulators across grid
    )(vox_flat, npts, coords_h, valid, w_bb_t, b_bb, w_head, b_head,
      pw_mat, mask_f, center)


# ---------------------------------------------------------------------------
# Model wrapper (parameter setup + cheap XLA glue)
# ---------------------------------------------------------------------------
class PallasVoxelNeXtSAM:
    def __init__(self, key, c_in=5, c_feat=128, n_classes=10, box_dim=9):
        assert box_dim <= _BOX_PAD
        k0, k1, k2 = jax.random.split(key, 3)
        self.c_in = c_in
        self.c_feat = c_feat
        self.n_classes = n_classes
        self.box_dim = box_dim
        # deterministic synthetic parameters (no checkpoint loading)
        self.w_bb = 0.1 * jax.random.normal(k0, (c_in, c_feat), jnp.float32)
        self.b_bb = jnp.zeros((1, c_feat), jnp.float32)
        w_hm = 0.1 * jax.random.normal(k1, (c_feat, n_classes), jnp.float32)
        w_box = 0.1 * jax.random.normal(k2, (c_feat, box_dim), jnp.float32)
        # merged head weights: [box | pad-to-16 | heatmap], bf16 for the MXU
        self.w_head = jnp.concatenate(
            [w_box, jnp.zeros((c_feat, _BOX_PAD - box_dim), jnp.float32), w_hm],
            axis=1).astype(jnp.bfloat16)
        self.b_head = jnp.zeros((1, _BOX_PAD + n_classes), jnp.float32)

    def forward(self, voxels, voxel_num_points, voxel_coords, mask,
                lidar2img_rt, quality_score=0.1, tn=1024):
        n, p, c_in = voxels.shape
        h, w = mask.shape
        bd = self.box_dim

        tn_eff = min(tn, _round_up(n, 8))
        n_pad = _round_up(n, tn_eff)
        pad = n_pad - n

        # point features flattened to (N, P*Cin); MeanVFE divisor as a column
        vox_flat = voxels.reshape(n, p * c_in)
        vox_flat = jnp.pad(vox_flat, ((0, pad), (0, 0))).astype(jnp.bfloat16)
        npts = jnp.pad(voxel_num_points.reshape(n, 1).astype(jnp.float32),
                       ((0, pad), (0, 0)), constant_values=1.0)
        valid = jnp.pad(jnp.ones((n, 1), jnp.float32), ((0, pad), (0, 0)))

        # MeanVFE fold: backbone weight tiled P times along the input axis
        w_bb_t = jnp.tile(self.w_bb, (p, 1)).astype(jnp.bfloat16)

        # out_voxels * feature_map_stride -> homogeneous coords
        coords = voxel_coords.astype(jnp.float32) * FEATURE_MAP_STRIDE   # [z,y,x]
        coords_h = jnp.concatenate([coords, jnp.ones((n, 1), jnp.float32)], axis=1)
        coords_h = jnp.pad(coords_h, ((0, pad), (0, 0)))

        # voxel -> world affine and voxel -> image projection matrix
        vs = jnp.asarray(VOXEL_SIZE, jnp.float32)
        pc = jnp.asarray(PC_RANGE[:3], jnp.float32)
        s_aff = jnp.zeros((4, 4), jnp.float32)
        s_aff = s_aff.at[2, 0].set(vs[0]).at[1, 1].set(vs[1]).at[0, 2].set(vs[2])
        s_aff = s_aff.at[3, 0].set(pc[0] + 0.5 * vs[0])
        s_aff = s_aff.at[3, 1].set(pc[1] + 0.5 * vs[1])
        s_aff = s_aff.at[3, 2].set(pc[2] + 0.5 * vs[2])
        s_aff = s_aff.at[3, 3].set(1.0)
        t_mat = s_aff @ lidar2img_rt.T                                   # (4, 4)
        # pw_mat columns: [proj u*d, v*d, d, . | world x,y,z | zero pad] -> (4,20)
        pw_mat = jnp.concatenate(
            [t_mat, s_aff[:, 0:3], jnp.zeros((4, 13), jnp.float32)], axis=1)

        # mask as f32 (VMEM resident in kernel) + centroid (fallback branch)
        maskf = mask.astype(jnp.float32)
        tot = jnp.maximum(maskf.sum(), 1.0)
        mean_row = (maskf * jnp.arange(h, dtype=jnp.float32)[:, None]).sum() / tot
        mean_col = (maskf * jnp.arange(w, dtype=jnp.float32)[None, :]).sum() / tot
        center = jnp.stack([mean_col, mean_row]).reshape(1, 2)

        out = voxelnext_sam_fused(
            vox_flat, npts, coords_h, valid,
            w_bb_t, self.b_bb, self.w_head, self.b_head,
            pw_mat, maskf, center,
            n_cls=self.n_classes, quality_score=quality_score, tn=tn_eff)

        row = out[0]
        box_sel = row[0:bd]              # best box among mask-selected voxels
        box_dist = row[16:16 + bd]       # best box by distance to mask centroid
        sel_total = row[32]
        extra_total = row[33]
        box3d = jnp.where(sel_total > 0, box_sel, box_dist)
        # PyTorch returns None when no box clears quality_score; signal with NaN
        box3d = jnp.where(extra_total > 0, box3d, jnp.full_like(box3d, jnp.nan))
        return mask, box3d, extra_total


if __name__ == "__main__":
    key = jax.random.PRNGKey(0)
    N, P, C_IN = 256, 8, 5
    H, W = 64, 64
    k1, k2, k3, k4, k5, kp = jax.random.split(key, 6)

    voxels = jax.random.normal(k1, (N, P, C_IN), jnp.float32)
    voxel_num_points = jax.random.randint(k2, (N,), 1, P + 1).astype(jnp.float32)
    voxel_coords = jnp.stack(
        [
            jax.random.randint(k3, (N,), 0, 5),      # z
            jax.random.randint(k4, (N,), 0, 180),    # y
            jax.random.randint(k5, (N,), 0, 180),    # x
        ],
        axis=1,
    ).astype(jnp.float32)

    # segmentation mask stand-in for SamPredictor.predict output
    mask = jnp.zeros((H, W), dtype=bool).at[16:48, 16:48].set(True)

    # simple pinhole lidar->image matrix (camera looking along +x)
    fpx, cx, cy = 32.0, 32.0, 32.0
    lidar2img_rt = jnp.array(
        [[cx, -fpx, 0.0, 0.0],
         [cy, 0.0, -fpx, 0.0],
         [1.0, 0.0, 0.0, 0.0],
         [0.0, 0.0, 0.0, 1.0]], jnp.float32)

    model = PallasVoxelNeXtSAM(kp, c_in=C_IN)
    mask_out, box3d, n_extra = model.forward(
        voxels, voxel_num_points, voxel_coords, mask, lidar2img_rt,
        quality_score=0.1)
    jax.block_until_ready((mask_out, box3d, n_extra))
    if float(n_extra) == 0.0:
        print("no high quality 3D box related.")
    print("KERNEL_OK")
</pallas_src>

<mosaic_0001>
module attributes {stable_mosaic.version = 11 : i64} {
  func.func @_fused_kernel(%arg0: i32, %arg1: memref<256x40xbf16, #tpu.memory_space<vmem>>, %arg2: memref<256x1xf32, #tpu.memory_space<vmem>>, %arg3: memref<256x4xf32, #tpu.memory_space<vmem>>, %arg4: memref<256x1xf32, #tpu.memory_space<vmem>>, %arg5: memref<40x128xbf16, #tpu.memory_space<vmem>>, %arg6: memref<1x128xf32, #tpu.memory_space<vmem>>, %arg7: memref<128x26xbf16, #tpu.memory_space<vmem>>, %arg8: memref<1x26xf32, #tpu.memory_space<vmem>>, %arg9: memref<4x20xf32, #tpu.memory_space<vmem>>, %arg10: memref<64x64xf32, #tpu.memory_space<vmem>>, %arg11: memref<1x2xf32, #tpu.memory_space<vmem>>, %arg12: memref<1x128xf32, #tpu.memory_space<vmem>>, %arg13: memref<1x16xf32, #tpu.memory_space<vmem>>, %arg14: memref<1x16xf32, #tpu.memory_space<vmem>>, %arg15: memref<1x1xf32, #tpu.memory_space<vmem>>, %arg16: memref<1x1xf32, #tpu.memory_space<vmem>>, %arg17: memref<1x2xf32, #tpu.memory_space<vmem>>) attributes {dimension_semantics = [#tpu.dimension_semantics<arbitrary>], iteration_bounds = array<i64: 1>, scalar_prefetch = 0 : i64, scratch_operands = 5 : i64, tpu.core_type = #tpu.core_type<tc>, window_params = [{transform_indices = @transform_0, window_bounds = array<i64: 256, 40>}, {transform_indices = @transform_1, window_bounds = array<i64: 256, 1>}, {transform_indices = @transform_2, window_bounds = array<i64: 256, 4>}, {transform_indices = @transform_3, window_bounds = array<i64: 256, 1>}, {pipeline_mode = #tpu.pipeline_mode<synchronous>, transform_indices = @transform_4, window_bounds = array<i64: 40, 128>}, {pipeline_mode = #tpu.pipeline_mode<synchronous>, transform_indices = @transform_5, window_bounds = array<i64: 1, 128>}, {pipeline_mode = #tpu.pipeline_mode<synchronous>, transform_indices = @transform_6, window_bounds = array<i64: 128, 26>}, {pipeline_mode = #tpu.pipeline_mode<synchronous>, transform_indices = @transform_7, window_bounds = array<i64: 1, 26>}, {pipeline_mode = #tpu.pipeline_mode<synchronous>, transform_indices = @transform_8, window_bounds = array<i64: 4, 20>}, {pipeline_mode = #tpu.pipeline_mode<synchronous>, transform_indices = @transform_9, window_bounds = array<i64: 64, 64>}, {pipeline_mode = #tpu.pipeline_mode<synchronous>, transform_indices = @transform_10, window_bounds = array<i64: 1, 2>}, {pipeline_mode = #tpu.pipeline_mode<synchronous>, transform_indices = @transform_11, window_bounds = array<i64: 1, 128>}]} {
    %c0_i32 = arith.constant 0 : i32
    %0 = arith.cmpi eq, %arg0, %c0_i32 : i32
    %1 = arith.extui %0 : i1 to i32
    %c0_i32_0 = arith.constant 0 : i32
    %2 = arith.cmpi ne, %1, %c0_i32_0 : i32
    scf.if %2 {
      %cst_84 = arith.constant 0.000000e+00 : f32
      %199 = vector.broadcast %cst_84 : f32 to vector<1x16xf32>
      %c0_85 = arith.constant 0 : index
      %c0_86 = arith.constant 0 : index
      %200 = vector.load %arg13[%c0_85, %c0_86] : memref<1x16xf32, #tpu.memory_space<vmem>>, vector<1x16xf32>
      tpu.vector_store %arg13[%c0_85, %c0_86], %199 {strides = array<i32>} : memref<1x16xf32, #tpu.memory_space<vmem>>, vector<1x16xf32>,
      %cst_87 = arith.constant 0.000000e+00 : f32
      %201 = vector.broadcast %cst_87 : f32 to vector<1x16xf32>
      %c0_88 = arith.constant 0 : index
      %c0_89 = arith.constant 0 : index
      %202 = vector.load %arg14[%c0_88, %c0_89] : memref<1x16xf32, #tpu.memory_space<vmem>>, vector<1x16xf32>
      tpu.vector_store %arg14[%c0_88, %c0_89], %201 {strides = array<i32>} : memref<1x16xf32, #tpu.memory_space<vmem>>, vector<1x16xf32>,
      %cst_90 = arith.constant 0xFF800000 : f32
      %203 = vector.broadcast %cst_90 : f32 to vector<1x1xf32>
      %c0_91 = arith.constant 0 : index
      %c0_92 = arith.constant 0 : index
      %204 = vector.load %arg15[%c0_91, %c0_92] : memref<1x1xf32, #tpu.memory_space<vmem>>, vector<1x1xf32>
      tpu.vector_store %arg15[%c0_91, %c0_92], %203 {strides = array<i32>} : memref<1x1xf32, #tpu.memory_space<vmem>>, vector<1x1xf32>,
      %cst_93 = arith.constant 0x7F800000 : f32
      %205 = vector.broadcast %cst_93 : f32 to vector<1x1xf32>
      %c0_94 = arith.constant 0 : index
      %c0_95 = arith.constant 0 : index
      %206 = vector.load %arg16[%c0_94, %c0_95] : memref<1x1xf32, #tpu.memory_space<vmem>>, vector<1x1xf32>
      tpu.vector_store %arg16[%c0_94, %c0_95], %205 {strides = array<i32>} : memref<1x1xf32, #tpu.memory_space<vmem>>, vector<1x1xf32>,
      %cst_96 = arith.constant 0.000000e+00 : f32
      %207 = vector.broadcast %cst_96 : f32 to vector<1x2xf32>
      %c0_97 = arith.constant 0 : index
      %c0_98 = arith.constant 0 : index
      %208 = vector.load %arg17[%c0_97, %c0_98] : memref<1x2xf32, #tpu.memory_space<vmem>>, vector<1x2xf32>
      tpu.vector_store %arg17[%c0_97, %c0_98], %207 {strides = array<i32>} : memref<1x2xf32, #tpu.memory_space<vmem>>, vector<1x2xf32>,
    } else {
    }
    %c0 = arith.constant 0 : index
    %c0_1 = arith.constant 0 : index
    %3 = vector.load %arg1[%c0, %c0_1] : memref<256x40xbf16, #tpu.memory_space<vmem>>, vector<256x40xbf16>
    %c0_2 = arith.constant 0 : index
    %c0_3 = arith.constant 0 : index
    %4 = vector.load %arg5[%c0_2, %c0_3] : memref<40x128xbf16, #tpu.memory_space<vmem>>, vector<40x128xbf16>
    %cst = arith.constant dense<0.000000e+00> : vector<256x128xf32>
    %5 = tpu.matmul %3, %4, %cst {dimension_numbers = #tpu.dot_dimension_numbers<[1], [0], [0], [1], [0, 0, 1, 1], [], []>} : vector<256x40xbf16>, vector<40x128xbf16>, vector<256x128xf32> -> vector<256x128xf32>
    %c0_4 = arith.constant 0 : index
    %c0_5 = arith.constant 0 : index
    %6 = vector.load %arg2[%c0_4, %c0_5] : memref<256x1xf32, #tpu.memory_space<vmem>>, vector<256x1xf32>
    %cst_6 = arith.constant 1.000000e+00 : f32
    %7 = vector.broadcast %cst_6 : f32 to vector<256x1xf32>
    %8 = arith.maximumf %6, %7 : vector<256x1xf32>
    %9 = vector.broadcast %8 : vector<256x1xf32> to vector<256x128xf32>
    %10 = arith.divf %5, %9 : vector<256x128xf32>
    %c0_7 = arith.constant 0 : index
    %c0_8 = arith.constant 0 : index
    %11 = vector.load %arg6[%c0_7, %c0_8] : memref<1x128xf32, #tpu.memory_space<vmem>>, vector<1x128xf32>
    %12 = vector.broadcast %11 : vector<1x128xf32> to vector<256x128xf32>
    %13 = arith.addf %10, %12 : vector<256x128xf32>
    %cst_9 = arith.constant 0.000000e+00 : f32
    %14 = vector.broadcast %cst_9 : f32 to vector<256x128xf32>
    %15 = arith.maximumf %13, %14 : vector<256x128xf32>
    %16 = arith.truncf %15 : vector<256x128xf32> to vector<256x128xbf16>
    %c0_10 = arith.constant 0 : index
    %c0_11 = arith.constant 0 : index
    %17 = vector.load %arg7[%c0_10, %c0_11] : memref<128x26xbf16, #tpu.memory_space<vmem>>, vector<128x26xbf16>
    %cst_12 = arith.constant dense<0.000000e+00> : vector<256x26xf32>
    %18 = tpu.matmul %16, %17, %cst_12 {dimension_numbers = #tpu.dot_dimension_numbers<[1], [0], [0], [1], [0, 0, 1, 1], [], []>} : vector<256x128xbf16>, vector<128x26xbf16>, vector<256x26xf32> -> vector<256x26xf32>
    %c0_13 = arith.constant 0 : index
    %c0_14 = arith.constant 0 : index
    %19 = vector.load %arg8[%c0_13, %c0_14] : memref<1x26xf32, #tpu.memory_space<vmem>>, vector<1x26xf32>
    %20 = vector.broadcast %19 : vector<1x26xf32> to vector<256x26xf32>
    %21 = arith.addf %18, %20 : vector<256x26xf32>
    %22 = vector.extract_strided_slice %21 {offsets = [0, 0], sizes = [256, 16], strides = [1, 1]} : vector<256x26xf32> to vector<256x16xf32>
    %23 = vector.extract_strided_slice %21 {offsets = [0, 16], sizes = [256, 10], strides = [1, 1]} : vector<256x26xf32> to vector<256x10xf32>
    %cst_15 = arith.constant dense<0xFF800000> : vector<256xf32>
    %24 = vector.multi_reduction <maximumf>, %23, %cst_15 [1] : vector<256x10xf32> to vector<256xf32>
    %25 = vector.shape_cast %24 : vector<256xf32> to vector<256x1xf32>
    %26 = arith.negf %25 : vector<256x1xf32>
    %27 = math.exp %26 : vector<256x1xf32>
    %cst_16 = arith.constant 1.000000e+00 : f32
    %28 = vector.broadcast %cst_16 : f32 to vector<256x1xf32>
    %29 = arith.addf %28, %27 : vector<256x1xf32>
    %30 = arith.divf %28, %29 : vector<256x1xf32>
    %c0_17 = arith.constant 0 : index
    %c0_18 = arith.constant 0 : index
    %31 = vector.load %arg3[%c0_17, %c0_18] : memref<256x4xf32, #tpu.memory_space<vmem>>, vector<256x4xf32>
    %32 = vector.extract_strided_slice %31 {offsets = [0, 0], sizes = [256, 1], strides = [1, 1]} : vector<256x4xf32> to vector<256x1xf32>
    %c0_19 = arith.constant 0 : index
    %c0_20 = arith.constant 0 : index
    %33 = vector.load %arg9[%c0_19, %c0_20] : memref<4x20xf32, #tpu.memory_space<vmem>>, vector<1x20xf32>
    %34 = vector.broadcast %32 : vector<256x1xf32> to vector<256x20xf32>
    %35 = vector.broadcast %33 : vector<1x20xf32> to vector<256x20xf32>
    %36 = arith.mulf %34, %35 : vector<256x20xf32>
    %37 = vector.extract_strided_slice %31 {offsets = [0, 1], sizes = [256, 1], strides = [1, 1]} : vector<256x4xf32> to vector<256x1xf32>
    %c1 = arith.constant 1 : index
    %c0_21 = arith.constant 0 : index
    %38 = vector.load %arg9[%c1, %c0_21] : memref<4x20xf32, #tpu.memory_space<vmem>>, vector<1x20xf32>
    %39 = vector.broadcast %37 : vector<256x1xf32> to vector<256x20xf32>
    %40 = vector.broadcast %38 : vector<1x20xf32> to vector<256x20xf32>
    %41 = arith.mulf %39, %40 : vector<256x20xf32>
    %42 = arith.addf %36, %41 : vector<256x20xf32>
    %43 = vector.extract_strided_slice %31 {offsets = [0, 2], sizes = [256, 1], strides = [1, 1]} : vector<256x4xf32> to vector<256x1xf32>
    %c2 = arith.constant 2 : index
    %c0_22 = arith.constant 0 : index
    %44 = vector.load %arg9[%c2, %c0_22] : memref<4x20xf32, #tpu.memory_space<vmem>>, vector<1x20xf32>
    %45 = vector.broadcast %43 : vector<256x1xf32> to vector<256x20xf32>
    %46 = vector.broadcast %44 : vector<1x20xf32> to vector<256x20xf32>
    %47 = arith.mulf %45, %46 : vector<256x20xf32>
    %48 = arith.addf %42, %47 : vector<256x20xf32>
    %49 = vector.extract_strided_slice %31 {offsets = [0, 3], sizes = [256, 1], strides = [1, 1]} : vector<256x4xf32> to vector<256x1xf32>
    %c3 = arith.constant 3 : index
    %c0_23 = arith.constant 0 : index
    %50 = vector.load %arg9[%c3, %c0_23] : memref<4x20xf32, #tpu.memory_space<vmem>>, vector<1x20xf32>
    %51 = vector.broadcast %49 : vector<256x1xf32> to vector<256x20xf32>
    %52 = vector.broadcast %50 : vector<1x20xf32> to vector<256x20xf32>
    %53 = arith.mulf %51, %52 : vector<256x20xf32>
    %54 = arith.addf %48, %53 : vector<256x20xf32>
    %55 = vector.extract_strided_slice %54 {offsets = [0, 2], sizes = [256, 1], strides = [1, 1]} : vector<256x20xf32> to vector<256x1xf32>
    %cst_24 = arith.constant 0.000000e+00 : f32
    %56 = vector.broadcast %cst_24 : f32 to vector<256x1xf32>
    %57 = arith.cmpf oge, %55, %56 : vector<256x1xf32>
    %cst_25 = arith.constant 9.99999997E-7 : f32
    %58 = vector.broadcast %cst_25 : f32 to vector<256x1xf32>
    %59 = arith.maximumf %55, %58 : vector<256x1xf32>
    %cst_26 = arith.constant -9.99999997E-7 : f32
    %60 = vector.broadcast %cst_26 : f32 to vector<256x1xf32>
    %61 = arith.minimumf %55, %60 : vector<256x1xf32>
    %62 = arith.select %57, %59, %61 : vector<256x1xi1>, vector<256x1xf32>
    %63 = vector.extract_strided_slice %54 {offsets = [0, 0], sizes = [256, 2], strides = [1, 1]} : vector<256x20xf32> to vector<256x2xf32>
    %64 = vector.broadcast %62 : vector<256x1xf32> to vector<256x2xf32>
    %65 = arith.divf %63, %64 : vector<256x2xf32>
    %66 = vector.extract_strided_slice %54 {offsets = [0, 4], sizes = [256, 16], strides = [1, 1]} : vector<256x20xf32> to vector<256x16xf32>
    %67 = arith.addf %22, %66 : vector<256x16xf32>
    %68 = vector.extract_strided_slice %65 {offsets = [0, 0], sizes = [256, 1], strides = [1, 1]} : vector<256x2xf32> to vector<256x1xf32>
    %cst_27 = arith.constant -1.000000e+06 : f32
    %cst_28 = arith.constant 1.000000e+06 : f32
    %69 = vector.broadcast %cst_27 : f32 to vector<256x1xf32>
    %70 = arith.maximumf %69, %68 : vector<256x1xf32>
    %71 = vector.broadcast %cst_28 : f32 to vector<256x1xf32>
    %72 = arith.minimumf %71, %70 : vector<256x1xf32>
    %73 = vector.extract_strided_slice %65 {offsets = [0, 1], sizes = [256, 1], strides = [1, 1]} : vector<256x2xf32> to vector<256x1xf32>
    %cst_29 = arith.constant -1.000000e+06 : f32
    %cst_30 = arith.constant 1.000000e+06 : f32
    %74 = vector.broadcast %cst_29 : f32 to vector<256x1xf32>
    %75 = arith.maximumf %74, %73 : vector<256x1xf32>
    %76 = vector.broadcast %cst_30 : f32 to vector<256x1xf32>
    %77 = arith.minimumf %76, %75 : vector<256x1xf32>
    %78 = math.floor %72 : vector<256x1xf32>
    %79 = arith.fptosi %78 : vector<256x1xf32> to vector<256x1xi32>
    %80 = math.floor %77 : vector<256x1xf32>
    %81 = arith.fptosi %80 : vector<256x1xf32> to vector<256x1xi32>
    %82 = tpu.iota {dimensions = array<i32: 1>} : vector<256x64xi32>
    %83 = vector.broadcast %81 : vector<256x1xi32> to vector<256x64xi32>
    %84 = arith.cmpi eq, %82, %83 : vector<256x64xi32>
    %85 = arith.extui %84 : vector<256x64xi1> to vector<256x64xi32>
    %86 = arith.sitofp %85 : vector<256x64xi32> to vector<256x64xf32>
    %c0_31 = arith.constant 0 : index
    %c0_32 = arith.constant 0 : index
    %87 = vector.load %arg10[%c0_31, %c0_32] : memref<64x64xf32, #tpu.memory_space<vmem>>, vector<64x64xf32>
    %cst_33 = arith.constant dense<0.000000e+00> : vector<256x64xf32>
    %88 = tpu.matmul %86, %87, %cst_33 {dimension_numbers = #tpu.dot_dimension_numbers<[1], [0], [0], [1], [0, 0, 1, 1], [], []>} : vector<256x64xf32>, vector<64x64xf32>, vector<256x64xf32> -> vector<256x64xf32>
    %89 = tpu.iota {dimensions = array<i32: 1>} : vector<256x64xi32>
    %90 = vector.broadcast %79 : vector<256x1xi32> to vector<256x64xi32>
    %91 = arith.cmpi eq, %89, %90 : vector<256x64xi32>
    %92 = arith.extui %91 : vector<256x64xi1> to vector<256x64xi32>
    %93 = arith.sitofp %92 : vector<256x64xi32> to vector<256x64xf32>
    %c0_i32_34 = arith.constant 0 : i32
    %94 = vector.broadcast %c0_i32_34 : i32 to vector<256x1xi32>
    %95 = arith.cmpi sge, %79, %94 : vector<256x1xi32>
    %c0_i32_35 = arith.constant 0 : i32
    %96 = vector.broadcast %c0_i32_35 : i32 to vector<256x1xi32>
    %97 = arith.cmpi sge, %81, %96 : vector<256x1xi32>
    %98 = arith.andi %95, %97 : vector<256x1xi1>
    %c64_i32 = arith.constant 64 : i32
    %99 = vector.broadcast %c64_i32 : i32 to vector<256x1xi32>
    %100 = arith.cmpi slt, %79, %99 : vector<256x1xi32>
    %101 = arith.andi %98, %100 : vector<256x1xi1>
    %c64_i32_36 = arith.constant 64 : i32
    %102 = vector.broadcast %c64_i32_36 : i32 to vector<256x1xi32>
    %103 = arith.cmpi slt, %81, %102 : vector<256x1xi32>
    %104 = arith.andi %101, %103 : vector<256x1xi1>
    %cst_37 = arith.constant 9.99999997E-7 : f32
    %105 = vector.broadcast %cst_37 : f32 to vector<256x1xf32>
    %106 = arith.cmpf ogt, %55, %105 : vector<256x1xf32>
    %107 = arith.andi %104, %106 : vector<256x1xi1>
    %108 = arith.extui %107 : vector<256x1xi1> to vector<256x1xi32>
    %109 = arith.sitofp %108 : vector<256x1xi32> to vector<256x1xf32>
    %110 = arith.mulf %88, %93 : vector<256x64xf32>
    %cst_38 = arith.constant dense<0.000000e+00> : vector<256xf32>
    %111 = vector.multi_reduction <add>, %110, %cst_38 [1] : vector<256x64xf32> to vector<256xf32>
    %112 = vector.shape_cast %111 : vector<256xf32> to vector<256x1xf32>
    %113 = arith.mulf %112, %109 : vector<256x1xf32>
    %c0_39 = arith.constant 0 : index
    %c0_40 = arith.constant 0 : index
    %114 = vector.load %arg4[%c0_39, %c0_40] : memref<256x1xf32, #tpu.memory_space<vmem>>, vector<256x1xf32>
    %cst_41 = arith.constant 1.000000e-01 : f32
    %115 = vector.broadcast %cst_41 : f32 to vector<256x1xf32>
    %116 = arith.cmpf ogt, %30, %115 : vector<256x1xf32>
    %117 = arith.extui %116 : vector<256x1xi1> to vector<256x1xi32>
    %118 = arith.sitofp %117 : vector<256x1xi32> to vector<256x1xf32>
    %119 = arith.mulf %118, %114 : vector<256x1xf32>
    %120 = arith.mulf %113, %119 : vector<256x1xf32>
    %cst_42 = arith.constant 0.000000e+00 : f32
    %121 = vector.broadcast %cst_42 : f32 to vector<256x1xf32>
    %122 = arith.cmpf ogt, %120, %121 : vector<256x1xf32>
    %cst_43 = arith.constant 0xFF800000 : f32
    %123 = vector.broadcast %cst_43 : f32 to vector<256x1xf32>
    %124 = arith.select %122, %30, %123 : vector<256x1xi1>, vector<256x1xf32>
    %c0_44 = arith.constant 0 : index
    %c0_45 = arith.constant 0 : index
    %125 = vector.load %arg11[%c0_44, %c0_45] : memref<1x2xf32, #tpu.memory_space<vmem>>, vector<1x2xf32>
    %126 = vector.broadcast %125 : vector<1x2xf32> to vector<256x2xf32>
    %127 = arith.subf %65, %126 : vector<256x2xf32>
    %128 = arith.mulf %127, %127 : vector<256x2xf32>
    %cst_46 = arith.constant dense<0.000000e+00> : vector<256xf32>
    %129 = vector.multi_reduction <add>, %128, %cst_46 [1] : vector<256x2xf32> to vector<256xf32>
    %130 = vector.shape_cast %129 : vector<256xf32> to vector<256x1xf32>
    %cst_47 = arith.constant 0.000000e+00 : f32
    %131 = vector.broadcast %cst_47 : f32 to vector<256x1xf32>
    %132 = arith.cmpf ogt, %119, %131 : vector<256x1xf32>
    %cst_48 = arith.constant 0x7F800000 : f32
    %133 = vector.broadcast %cst_48 : f32 to vector<256x1xf32>
    %134 = arith.select %132, %130, %133 : vector<256x1xi1>, vector<256x1xf32>
    %135 = tpu.iota {dimensions = array<i32: 0>} : vector<256x1xi32>
    %cst_49 = arith.constant dense<0xFF800000> : vector<1xf32>
    %136 = vector.multi_reduction <maximumf>, %124, %cst_49 [0] : vector<256x1xf32> to vector<1xf32>
    %137 = vector.shape_cast %136 : vector<1xf32> to vector<1x1xf32>
    %138 = vector.broadcast %137 : vector<1x1xf32> to vector<256x1xf32>
    %139 = arith.cmpf oge, %124, %138 : vector<256x1xf32>
    %c256_i32 = arith.constant 256 : i32
    %140 = vector.broadcast %c256_i32 : i32 to vector<256x1xi32>
    %141 = arith.select %139, %135, %140 : vector<256x1xi1>, vector<256x1xi32>
    %cst_50 = arith.constant dense<2147483647> : vector<1xi32>
    %142 = vector.multi_reduction <minsi>, %141, %cst_50 [0] : vector<256x1xi32> to vector<1xi32>
    %143 = vector.shape_cast %142 : vector<1xi32> to vector<1x1xi32>
    %144 = vector.broadcast %143 : vector<1x1xi32> to vector<256x1xi32>
    %145 = arith.cmpi eq, %135, %144 : vector<256x1xi32>
    %146 = arith.extui %145 : vector<256x1xi1> to vector<256x1xi32>
    %147 = arith.sitofp %146 : vector<256x1xi32> to vector<256x1xf32>
    %148 = vector.broadcast %147 : vector<256x1xf32> to vector<256x16xf32>
    %149 = arith.mulf %67, %148 : vector<256x16xf32>
    %cst_51 = arith.constant dense<0.000000e+00> : vector<16xf32>
    %150 = vector.multi_reduction <add>, %149, %cst_51 [0] : vector<256x16xf32> to vector<16xf32>
    %151 = vector.shape_cast %150 : vector<16xf32> to vector<1x16xf32>
    %cst_52 = arith.constant dense<0x7F800000> : vector<1xf32>
    %152 = vector.multi_reduction <minimumf>, %134, %cst_52 [0] : vector<256x1xf32> to vector<1xf32>
    %153 = vector.shape_cast %152 : vector<1xf32> to vector<1x1xf32>
    %154 = vector.broadcast %153 : vector<1x1xf32> to vector<256x1xf32>
    %155 = arith.cmpf ole, %134, %154 : vector<256x1xf32>
    %c256_i32_53 = arith.constant 256 : i32
    %156 = vector.broadcast %c256_i32_53 : i32 to vector<256x1xi32>
    %157 = arith.select %155, %135, %156 : vector<256x1xi1>, vector<256x1xi32>
    %cst_54 = arith.constant dense<2147483647> : vector<1xi32>
    %158 = vector.multi_reduction <minsi>, %157, %cst_54 [0] : vector<256x1xi32> to vector<1xi32>
    %159 = vector.shape_cast %158 : vector<1xi32> to vector<1x1xi32>
    %160 = vector.broadcast %159 : vector<1x1xi32> to vector<256x1xi32>
    %161 = arith.cmpi eq, %135, %160 : vector<256x1xi32>
    %162 = arith.extui %161 : vector<256x1xi1> to vector<256x1xi32>
    %163 = arith.sitofp %162 : vector<256x1xi32> to vector<256x1xf32>
    %164 = vector.broadcast %163 : vector<256x1xf32> to vector<256x16xf32>
    %165 = arith.mulf %67, %164 : vector<256x16xf32>
    %cst_55 = arith.constant dense<0.000000e+00> : vector<16xf32>
    %166 = vector.multi_reduction <add>, %165, %cst_55 [0] : vector<256x16xf32> to vector<16xf32>
    %167 = vector.shape_cast %166 : vector<16xf32> to vector<1x16xf32>
    %c0_56 = arith.constant 0 : index
    %c0_57 = arith.constant 0 : index
    %168 = vector.load %arg15[%c0_56, %c0_57] : memref<1x1xf32, #tpu.memory_space<vmem>>, vector<1x1xf32>
    %169 = arith.cmpf ogt, %137, %168 : vector<1x1xf32>
    %c0_58 = arith.constant 0 : index
    %c0_59 = arith.constant 0 : index
    %170 = vector.load %arg13[%c0_58, %c0_59] : memref<1x16xf32, #tpu.memory_space<vmem>>, vector<1x16xf32>
    %171 = vector.shape_cast %169 : vector<1x1xi1> to vector<1x1xi1>
    %172 = vector.broadcast %171 : vector<1x1xi1> to vector<1x16xi1>
    %173 = arith.select %172, %151, %170 : vector<1x16xi1>, vector<1x16xf32>
    %c0_60 = arith.constant 0 : index
    %c0_61 = arith.constant 0 : index
    %174 = vector.load %arg13[%c0_60, %c0_61] : memref<1x16xf32, #tpu.memory_space<vmem>>, vector<1x16xf32>
    tpu.vector_store %arg13[%c0_60, %c0_61], %173 {strides = array<i32>} : memref<1x16xf32, #tpu.memory_space<vmem>>, vector<1x16xf32>,
    %c0_62 = arith.constant 0 : index
    %c0_63 = arith.constant 0 : index
    %175 = vector.load %arg15[%c0_62, %c0_63] : memref<1x1xf32, #tpu.memory_space<vmem>>, vector<1x1xf32>
    %176 = arith.maximumf %137, %175 : vector<1x1xf32>
    %c0_64 = arith.constant 0 : index
    %c0_65 = arith.constant 0 : index
    %177 = vector.load %arg15[%c0_64, %c0_65] : memref<1x1xf32, #tpu.memory_space<vmem>>, vector<1x1xf32>
    tpu.vector_store %arg15[%c0_64, %c0_65], %176 {strides = array<i32>} : memref<1x1xf32, #tpu.memory_space<vmem>>, vector<1x1xf32>,
    %c0_66 = arith.constant 0 : index
    %c0_67 = arith.constant 0 : index
    %178 = vector.load %arg16[%c0_66, %c0_67] : memref<1x1xf32, #tpu.memory_space<vmem>>, vector<1x1xf32>
    %179 = arith.cmpf olt, %153, %178 : vector<1x1xf32>
    %c0_68 = arith.constant 0 : index
    %c0_69 = arith.constant 0 : index
    %180 = vector.load %arg14[%c0_68, %c0_69] : memref<1x16xf32, #tpu.memory_space<vmem>>, vector<1x16xf32>
    %181 = vector.shape_cast %179 : vector<1x1xi1> to vector<1x1xi1>
    %182 = vector.broadcast %181 : vector<1x1xi1> to vector<1x16xi1>
    %183 = arith.select %182, %167, %180 : vector<1x16xi1>, vector<1x16xf32>
    %c0_70 = arith.constant 0 : index
    %c0_71 = arith.constant 0 : index
    %184 = vector.load %arg14[%c0_70, %c0_71] : memref<1x16xf32, #tpu.memory_space<vmem>>, vector<1x16xf32>
    tpu.vector_store %arg14[%c0_70, %c0_71], %183 {strides = array<i32>} : memref<1x16xf32, #tpu.memory_space<vmem>>, vector<1x16xf32>,
    %c0_72 = arith.constant 0 : index
    %c0_73 = arith.constant 0 : index
    %185 = vector.load %arg16[%c0_72, %c0_73] : memref<1x1xf32, #tpu.memory_space<vmem>>, vector<1x1xf32>
    %186 = arith.minimumf %153, %185 : vector<1x1xf32>
    %c0_74 = arith.constant 0 : index
    %c0_75 = arith.constant 0 : index
    %187 = vector.load %arg16[%c0_74, %c0_75] : memref<1x1xf32, #tpu.memory_space<vmem>>, vector<1x1xf32>
    tpu.vector_store %arg16[%c0_74, %c0_75], %186 {strides = array<i32>} : memref<1x1xf32, #tpu.memory_space<vmem>>, vector<1x1xf32>,
    %c0_76 = arith.constant 0 : index
    %c0_77 = arith.constant 0 : index
    %188 = vector.load %arg17[%c0_76, %c0_77] : memref<1x2xf32, #tpu.memory_space<vmem>>, vector<1x2xf32>
    %cst_78 = arith.constant dense<0.000000e+00> : vector<1xf32>
    %189 = vector.multi_reduction <add>, %120, %cst_78 [0] : vector<256x1xf32> to vector<1xf32>
    %190 = vector.shape_cast %189 : vector<1xf32> to vector<1x1xf32>
    %cst_79 = arith.constant dense<0.000000e+00> : vector<1xf32>
    %191 = vector.multi_reduction <add>, %119, %cst_79 [0] : vector<256x1xf32> to vector<1xf32>
    %192 = vector.shape_cast %191 : vector<1xf32> to vector<1x1xf32>
    %193 = tpu.concatenate %190, %192 in 1 : vector<1x1xf32>, vector<1x1xf32> -> vector<1x2xf32>
    %194 = arith.addf %188, %193 : vector<1x2xf32>
    %c0_80 = arith.constant 0 : index
    %c0_81 = arith.constant 0 : index
    %195 = vector.load %arg17[%c0_80, %c0_81] : memref<1x2xf32, #tpu.memory_space<vmem>>, vector<1x2xf32>
    tpu.vector_store %arg17[%c0_80, %c0_81], %194 {strides = array<i32>} : memref<1x2xf32, #tpu.memory_space<vmem>>, vector<1x2xf32>,
    %c0_i32_82 = arith.constant 0 : i32
    %196 = arith.cmpi eq, %arg0, %c0_i32_82 : i32
    %197 = arith.extui %196 : i1 to i32
    %c0_i32_83 = arith.constant 0 : i32
    %198 = arith.cmpi ne, %197, %c0_i32_83 : i32
    scf.if %198 {
      %cst_84 = arith.constant 0.000000e+00 : f32
      %199 = vector.broadcast %cst_84 : f32 to vector<1x128xf32>
      %c0_85 = arith.constant 0 : index
      %c0_86 = arith.constant 0 : index
      %200 = vector.load %arg12[%c0_85, %c0_86] : memref<1x128xf32, #tpu.memory_space<vmem>>, vector<1x128xf32>
      tpu.vector_store %arg12[%c0_85, %c0_86], %199 {strides = array<i32>} : memref<1x128xf32, #tpu.memory_space<vmem>>, vector<1x128xf32>,
      %c0_87 = arith.constant 0 : index
      %c0_88 = arith.constant 0 : index
      %201 = vector.load %arg13[%c0_87, %c0_88] : memref<1x16xf32, #tpu.memory_space<vmem>>, vector<1x16xf32>
      %c0_89 = arith.constant 0 : index
      %c0_90 = arith.constant 0 : index
      %202 = vector.load %arg12[%c0_89, %c0_90] : memref<1x128xf32, #tpu.memory_space<vmem>>, vector<1x16xf32>
      tpu.vector_store %arg12[%c0_89, %c0_90], %201 {strides = array<i32>} : memref<1x128xf32, #tpu.memory_space<vmem>>, vector<1x16xf32>,
      %c0_91 = arith.constant 0 : index
      %c0_92 = arith.constant 0 : index
      %203 = vector.load %arg14[%c0_91, %c0_92] : memref<1x16xf32, #tpu.memory_space<vmem>>, vector<1x16xf32>
      %c0_93 = arith.constant 0 : index
      %c16 = arith.constant 16 : index
      %204 = vector.load %arg12[%c0_93, %c16] : memref<1x128xf32, #tpu.memory_space<vmem>>, vector<1x16xf32>
      tpu.vector_store %arg12[%c0_93, %c16], %203 {strides = array<i32>} : memref<1x128xf32, #tpu.memory_space<vmem>>, vector<1x16xf32>,
      %c0_94 = arith.constant 0 : index
      %c0_95 = arith.constant 0 : index
      %205 = vector.load %arg17[%c0_94, %c0_95] : memref<1x2xf32, #tpu.memory_space<vmem>>, vector<1x2xf32>
      %c0_96 = arith.constant 0 : index
      %c32 = arith.constant 32 : index
      %206 = vector.load %arg12[%c0_96, %c32] : memref<1x128xf32, #tpu.memory_space<vmem>>, vector<1x2xf32>
      tpu.vector_store %arg12[%c0_96, %c32], %205 {strides = array<i32>} : memref<1x128xf32, #tpu.memory_space<vmem>>, vector<1x2xf32>,
      %c0_97 = arith.constant 0 : index
      %c0_98 = arith.constant 0 : index
      %207 = vector.load %arg15[%c0_97, %c0_98] : memref<1x1xf32, #tpu.memory_space<vmem>>, vector<1x1xf32>
      %c0_99 = arith.constant 0 : index
      %c34 = arith.constant 34 : index
      %208 = vector.load %arg12[%c0_99, %c34] : memref<1x128xf32, #tpu.memory_space<vmem>>, vector<1x1xf32>
      tpu.vector_store %arg12[%c0_99, %c34], %207 {strides = array<i32>} : memref<1x128xf32, #tpu.memory_space<vmem>>, vector<1x1xf32>,
      %c0_100 = arith.constant 0 : index
      %c0_101 = arith.constant 0 : index
      %209 = vector.load %arg16[%c0_100, %c0_101] : memref<1x1xf32, #tpu.memory_space<vmem>>, vector<1x1xf32>
      %c0_102 = arith.constant 0 : index
      %c35 = arith.constant 35 : index
      %210 = vector.load %arg12[%c0_102, %c35] : memref<1x128xf32, #tpu.memory_space<vmem>>, vector<1x1xf32>
      tpu.vector_store %arg12[%c0_102, %c35], %209 {strides = array<i32>} : memref<1x128xf32, #tpu.memory_space<vmem>>, vector<1x1xf32>,
    } else {
    }
    return
  }
  func.func @transform_0(%arg0: i32) -> (i32, i32) {
    %c0_i32 = arith.constant 0 : i32
    %c0_i32_0 = arith.constant 0 : i32
    return %arg0, %c0_i32 : i32, i32
  }
  func.func @transform_1(%arg0: i32) -> (i32, i32) {
    %c0_i32 = arith.constant 0 : i32
    %c0_i32_0 = arith.constant 0 : i32
    return %arg0, %c0_i32 : i32, i32
  }
  func.func @transform_2(%arg0: i32) -> (i32, i32) {
    %c0_i32 = arith.constant 0 : i32
    %c0_i32_0 = arith.constant 0 : i32
    return %arg0, %c0_i32 : i32, i32
  }
  func.func @transform_3(%arg0: i32) -> (i32, i32) {
    %c0_i32 = arith.constant 0 : i32
    %c0_i32_0 = arith.constant 0 : i32
    return %arg0, %c0_i32 : i32, i32
  }
  func.func @transform_4(%arg0: i32) -> (i32, i32) {
    %c0_i32 = arith.constant 0 : i32
    %c0_i32_0 = arith.constant 0 : i32
    %c0_i32_1 = arith.constant 0 : i32
    return %c0_i32, %c0_i32_0 : i32, i32
  }
  func.func @transform_5(%arg0: i32) -> (i32, i32) {
    %c0_i32 = arith.constant 0 : i32
    %c0_i32_0 = arith.constant 0 : i32
    %c0_i32_1 = arith.constant 0 : i32
    return %c0_i32, %c0_i32_0 : i32, i32
  }
  func.func @transform_6(%arg0: i32) -> (i32, i32) {
    %c0_i32 = arith.constant 0 : i32
    %c0_i32_0 = arith.constant 0 : i32
    %c0_i32_1 = arith.constant 0 : i32
    return %c0_i32, %c0_i32_0 : i32, i32
  }
  func.func @transform_7(%arg0: i32) -> (i32, i32) {
    %c0_i32 = arith.constant 0 : i32
    %c0_i32_0 = arith.constant 0 : i32
    %c0_i32_1 = arith.constant 0 : i32
    return %c0_i32, %c0_i32_0 : i32, i32
  }
  func.func @transform_8(%arg0: i32) -> (i32, i32) {
    %c0_i32 = arith.constant 0 : i32
    %c0_i32_0 = arith.constant 0 : i32
    %c0_i32_1 = arith.constant 0 : i32
    return %c0_i32, %c0_i32_0 : i32, i32
  }
  func.func @transform_9(%arg0: i32) -> (i32, i32) {
    %c0_i32 = arith.constant 0 : i32
    %c0_i32_0 = arith.constant 0 : i32
    %c0_i32_1 = arith.constant 0 : i32
    return %c0_i32, %c0_i32_0 : i32, i32
  }
  func.func @transform_10(%arg0: i32) -> (i32, i32) {
    %c0_i32 = arith.constant 0 : i32
    %c0_i32_0 = arith.constant 0 : i32
    %c0_i32_1 = arith.constant 0 : i32
    return %c0_i32, %c0_i32_0 : i32, i32
  }
  func.func @transform_11(%arg0: i32) -> (i32, i32) {
    %c0_i32 = arith.constant 0 : i32
    %c0_i32_0 = arith.constant 0 : i32
    %c0_i32_1 = arith.constant 0 : i32
    return %c0_i32, %c0_i32_0 : i32, i32
  }
}

</mosaic_0001>

<bundles_post_ra>
// kernel: tpu_custom_call.1
= control target key start
LH: loop header
LB: loop body
LE: loop exit
PB: predicated region body
PF: predicated region fallthrough
CT: control target
= control target key end

     0   :  { %v14085_v2 = vmov 0   ;;  %vm184_vm0 = vcmask 326656   ;;  %vm233_vm1 = vcmask 1043456   ;;  %s14073_s0 = inlined_call_operand.vmem [shape: bf16[256,40], index: 0, kind: input, shape index: {}]   ;;  %s14074_s1 = inlined_call_operand.vmem [shape: f32[256,1], index: 1, kind: input, shape index: {}]   ;;  %s14075_s2 = inlined_call_operand.vmem [shape: f32[256,4], index: 2, kind: input, shape index: {}]   ;;  %s14076_s3 = inlined_call_operand.vmem [shape: f32[256,1], index: 3, kind: input, shape index: {}]   ;;  %s14077_s4 = inlined_call_operand.vmem [shape: bf16[40,128], index: 4, kind: input, shape index: {}]   ;;  %s14078_s5 = inlined_call_operand.vmem [shape: f32[1,128], index: 5, kind: input, shape index: {}]   ;;  %s14079_s6 = inlined_call_operand.vmem [shape: bf16[128,26], index: 6, kind: input, shape index: {}]   ;;  %s14080_s7 = inlined_call_operand.vmem [shape: f32[1,26], index: 7, kind: input, shape index: {}]   ;;  %s14081_s8 = inlined_call_operand.vmem [shape: f32[4,20], index: 8, kind: input, shape index: {}]   ;;  %s14082_s9 = inlined_call_operand.vmem [shape: f32[64,64], index: 9, kind: input, shape index: {}]   ;;  %s14083_s10 = inlined_call_operand.vmem [shape: f32[1,2], index: 10, kind: input, shape index: {}]   ;;  %s14084_s11 = inlined_call_operand.hbm [shape: f32[1,128], index: 11, kind: output, shape index: {}]  }
   0x1   :  { %v400_v0 = vld [vmem:[%s14074_s1 + $0x10] sm:$0xff]  ;;  %v398_v1 = vld [vmem:[%s14074_s1] sm:$0xff]  ;;  %6930 = vset.pattern.permute.xlu1 %v14085_v2  ;;  %6929 = vset.pattern.permute.xlu0 %v14085_v2  ;;  %v401_v6 = vld [vmem:[%s14074_s1 + $0x18] sm:$0xff] }
   0x2   :  { %v432_v3 = vmax.f32 %v400_v0, 1.0  ;;  %v430_v4 = vmax.f32 %v398_v1, 1.0  ;;  %v6987_v5 = vld [vmem:[%s14077_s4] sm:$0xff]   ;;  %v399_v7 = vld [vmem:[%s14074_s1 + $0x8] sm:$0xff]  ;;  %v433_v8 = vmax.f32 %v401_v6, 1.0  ;;  %v405_v18 = vld [vmem:[%s14074_s1 + $0x38] sm:$0xff] }
   0x3   :  { %v431_v9 = vmax.f32 %v399_v7, 1.0  ;;  %v6988_v10 = vld [vmem:[%s14077_s4 + $0x8] sm:$0xff]   ;;  %6675 = vmatprep.subr.bf16.mxu0 %v6987_v5  ;;  %6841 = vmatprep.subr.bf16.mxu1 %v6987_v5  ;;  %v402_v12 = vld [vmem:[%s14074_s1 + $0x20] sm:$0xff]  ;;  %v6989_v13 = vld [vmem:[%s14077_s4 + $0x10] ss:$0 sps:$4 sm:$0xff]   ;;  %v437_v21 = vmax.f32 %v405_v18, 1.0 }
   0x4   :  { %474 = vperm.xlu1 %6930, %v432_v3   ;;  %464 = vperm.xlu0 %6929, %v430_v4   ;;  %v403_v11 = vld [vmem:[%s14074_s1 + $0x28] sm:$0xff]  ;;  %v6990_v14 = vld [vmem:[%s14073_s0] sm:$0xff]   ;;  %v434_v17 = vmax.f32 %v402_v12, 1.0  ;;  %v404_v19 = vld [vmem:[%s14074_s1 + $0x30] sm:$0xff]  ;;  %v235_v20 = vsel %vm233_vm1, %v6989_v13, 0 }
   0x5   :  { %6676 = vmatpush3.bf16.msra.mxu0 %v6987_v5  ;;  %6844 = vmatpush3.bf16.msra.mxu1 %v6987_v5  ;;  %v6991_v15 = vld [vmem:[%s14073_s0 + $0x40] sm:$0xff]   ;;  %v435_v16 = vmax.f32 %v403_v11, 1.0  ;;  %v6992_v22 = vld [vmem:[%s14073_s0 + $0x8] sm:$0xff]   ;;  %v436_v23 = vmax.f32 %v404_v19, 1.0  ;;  %v6994_v27 = vld [vmem:[%s14073_s0 + $0x10] sm:$0xff]  }
   0x6   :  { %6677 = vmatprep.subr.bf16.mxu0 %v6988_v10  ;;  %6842 = vmatprep.subr.bf16.mxu1 %v6988_v10  ;;  %v6993_v24 = vld [vmem:[%s14073_s0 + $0x48] sm:$0xff]   ;;  %v406_v26 = vld [vmem:[%s14074_s1 + $0x40] sm:$0xff]  ;;  %v6995_v28 = vld [vmem:[%s14073_s0 + $0x50] sm:$0xff]  }
   0x7   :  { %6681 = vmatprep.mubr.msk.bf16.mxu0 %vm184_vm0, %v6990_v14  ;;  %6697 = vmatprep.mubr.msk.bf16.mxu1 %vm184_vm0, %v6991_v15  ;;  %v407_v25 = vld [vmem:[%s14074_s1 + $0x48] sm:$0xff]  ;;  %v438_v30 = vmax.f32 %v406_v26, 1.0  ;;  %v409_v31 = vld [vmem:[%s14074_s1 + $0x58] sm:$0xff]  ;;  %v408_v32 = vld [vmem:[%s14074_s1 + $0x50] sm:$0xff] }
   0x8   :  { %479 = vperm.xlu1 %6930, %v433_v8   ;;  %469 = vperm.xlu0 %6929, %v431_v9   ;;  %v439_v29 = vmax.f32 %v407_v25, 1.0  ;;  %v441_v33 = vmax.f32 %v409_v31, 1.0  ;;  %v6996_v34 = vld [vmem:[%s14073_s0 + $0x18] sm:$0xff]   ;;  %v440_v36 = vmax.f32 %v408_v32, 1.0  ;;  %v411_v37 = vld [vmem:[%s14074_s1 + $0x68] sm:$0xff]  ;;  %v410_v38 = vld [vmem:[%s14074_s1 + $0x60] sm:$0xff] }
   0x9   :  { %6678 = vmatpush3.bf16.msra.mxu0 %v6988_v10  ;;  %6845 = vmatpush3.bf16.msra.mxu1 %v6988_v10  ;;  %v6997_v35 = vld [vmem:[%s14073_s0 + $0x58] sm:$0xff]   ;;  %v6998_v39 = vld [vmem:[%s14073_s0 + $0x20] sm:$0xff]   ;;  %v443_v41 = vmax.f32 %v411_v37, 1.0  ;;  %v442_v42 = vmax.f32 %v410_v38, 1.0  ;;  %v412_v44 = vld [vmem:[%s14074_s1 + $0x70] sm:$0xff] }
   0xa   :  { %6847 = vmatprep.subr.msk.bf16.mxu0 %vm233_vm1, %v6989_v13  ;;  %6848 = vmatprep.subr.msk.bf16.mxu1 %vm233_vm1, %v6989_v13  ;;  %v6999_v40 = vld [vmem:[%s14073_s0 + $0x60] sm:$0xff]   ;;  %v413_v43 = vld [vmem:[%s14074_s1 + $0x78] sm:$0xff]  ;;  %v444_v46 = vmax.f32 %v412_v44, 1.0  ;;  %v7000_v47 = vld [vmem:[%s14073_s0 + $0x28] sm:$0xff]  }
   0xb   :  { %v445_v45 = vmax.f32 %v413_v43, 1.0  ;;  %v7001_v48 = vld [vmem:[%s14073_s0 + $0x68] sm:$0xff]   ;;  %v414_v50 = vld [vmem:[%s14074_s1 + $0x80] sm:$0xff]  ;;  %v7002_v51 = vld [vmem:[%s14073_s0 + $0x30] sm:$0xff]  }
   0xc   :  { %489 = vperm.xlu1 %6930, %v435_v16   ;;  %484 = vperm.xlu0 %6929, %v434_v17   ;;  %v415_v49 = vld [vmem:[%s14074_s1 + $0x88] sm:$0xff]  ;;  %v7003_v52 = vld [vmem:[%s14073_s0 + $0x70] sm:$0xff]   ;;  %v446_v54 = vmax.f32 %v414_v50, 1.0  ;;  %v417_v55 = vld [vmem:[%s14074_s1 + $0x98] sm:$0xff] }
   0xd   :  { %6680 = vmatpush3.bf16.msra.mxu0 %v235_v20  ;;  %6846 = vmatpush3.bf16.msra.mxu1 %v235_v20  ;;  %v447_v53 = vmax.f32 %v415_v49, 1.0  ;;  %v416_v56 = vld [vmem:[%s14074_s1 + $0x90] sm:$0xff]  ;;  %v449_v57 = vmax.f32 %v417_v55, 1.0  ;;  %v7004_v59 = vld [vmem:[%s14073_s0 + $0x38] sm:$0xff]   ;;  %v419_v61 = vld [vmem:[%s14074_s1 + $0xa8] sm:$0xff] }
   0xe   :  { %v448_v58 = vmax.f32 %v416_v56, 1.0  ;;  %v7005_v60 = vld [vmem:[%s14073_s0 + $0x78] sm:$0xff]   ;;  %v418_v62 = vld [vmem:[%s14074_s1 + $0xa0] sm:$0xff]  ;;  %v420_v0 = vld [vmem:[%s14074_s1 + $0xb0] sm:$0xff]  ;;  %v451_v1 = vmax.f32 %v419_v61, 1.0 }
   0xf   :  { %v421_v63 = vld [vmem:[%s14074_s1 + $0xb8] sm:$0xff]  ;;  %v450_v3 = vmax.f32 %v418_v62, 1.0  ;;  %v452_v5 = vmax.f32 %v420_v0, 1.0  ;;  %v423_v6 = vld [vmem:[%s14074_s1 + $0xc8] sm:$0xff]  ;;  %v422_v7 = vld [vmem:[%s14074_s1 + $0xc0] sm:$0xff] }
  0x10   :  { %499 = vperm.xlu1 %6930, %v437_v21   ;;  %494 = vperm.xlu0 %6929, %v436_v23   ;;  %v453_v4 = vmax.f32 %v421_v63, 1.0  ;;  %v455_v8 = vmax.f32 %v423_v6, 1.0  ;;  %v454_v9 = vmax.f32 %v422_v7, 1.0 }
  0x11   :  { %6682 = vmatmul.mubr.msk.bf16.vlgmr.msra.gmra.mrb[0].mxu0 %vm184_vm0, %v6992_v22  ;;  %6698 = vmatmul.mubr.msk.bf16.vlgmr.msra.gmra.mrb[0].mxu1 %vm184_vm0, %v6993_v24 }
  0x12   :  { %6685 = vmatprep.mubr.msk.bf16.mxu0 %vm184_vm0, %v6994_v27  ;;  %6701 = vmatprep.mubr.msk.bf16.mxu1 %vm184_vm0, %v6995_v28 }
  0x14   :  { %509 = vperm.xlu1 %6930, %v439_v29   ;;  %504 = vperm.xlu0 %6929, %v438_v30  }
  0x18   :  { %519 = vperm.xlu1 %6930, %v441_v33   ;;  %514 = vperm.xlu0 %6929, %v440_v36  }
  0x19   :  { %6686 = vmatmul.mubr.msk.bf16.gmra.mrb[4].mxu0 %vm184_vm0, %v6996_v34  ;;  %6702 = vmatmul.mubr.msk.bf16.gmra.mrb[4].mxu1 %vm184_vm0, %v6997_v35 }
  0x1a   :  { %6689 = vmatprep.mubr.msk.bf16.mxu0 %vm184_vm0, %v6998_v39  ;;  %6705 = vmatprep.mubr.msk.bf16.mxu1 %vm184_vm0, %v6999_v40 }
  0x1c   :  { %529 = vperm.xlu1 %6930, %v443_v41   ;;  %524 = vperm.xlu0 %6929, %v442_v42  }
  0x20   :  { %539 = vperm.xlu1 %6930, %v445_v45   ;;  %534 = vperm.xlu0 %6929, %v444_v46  }
  0x21   :  { %6690 = vmatmul.mubr.msk.bf16.gmra.mrb[8].mxu0 %vm184_vm0, %v7000_v47  ;;  %6706 = vmatmul.mubr.msk.bf16.gmra.mrb[8].mxu1 %vm184_vm0, %v7001_v48 }
  0x22   :  { %6693 = vmatprep.mubr.msk.bf16.mxu0 %vm184_vm0, %v7002_v51  ;;  %6709 = vmatprep.mubr.msk.bf16.mxu1 %vm184_vm0, %v7003_v52 }
  0x24   :  { %549 = vperm.xlu1 %6930, %v447_v53   ;;  %544 = vperm.xlu0 %6929, %v446_v54  }
  0x28   :  { %559 = vperm.xlu1 %6930, %v449_v57   ;;  %554 = vperm.xlu0 %6929, %v448_v58  }
  0x29   :  { %6694 = vmatmul.mubr.msk.bf16.gmra.mrb[12].mxu0 %vm184_vm0, %v7004_v59  ;;  %6710 = vmatmul.mubr.msk.bf16.gmra.mrb[12].mxu1 %vm184_vm0, %v7005_v60 }
  0x2c   :  { %569 = vperm.xlu1 %6930, %v451_v1   ;;  %564 = vperm.xlu0 %6929, %v450_v3  }
  0x30   :  { %579 = vperm.xlu1 %6930, %v453_v4   ;;  %574 = vperm.xlu0 %6929, %v452_v5  }
  0x31   :  { %16 = vsyncpa [#allocation8], 0  ;;  %v425_v10 = vld [vmem:[%s14074_s1 + $0xd8] sm:$0xff]  ;;  %v424_v11 = vld [vmem:[%s14074_s1 + $0xd0] sm:$0xff]  ;;  %v14087_v61 = vmov 1   ;;  %v14097_v2 = vmov 3  }
  0x32   :  { %v457_v12 = vmax.f32 %v425_v10, 1.0  ;;  %v456_v13 = vmax.f32 %v424_v11, 1.0  ;;  %v427_v14 = vld [vmem:[%s14074_s1 + $0xe8] sm:$0xff]  ;;  %v426_v15 = vld [vmem:[%s14074_s1 + $0xe0] sm:$0xff]  ;;  %v429_v18 = vld [vmem:[%s14074_s1 + $0xf8] sm:$0xff]  ;;  %s7303_s4 = smov 124  }
  0x33   :  { %v459_v16 = vmax.f32 %v427_v14, 1.0  ;;  %v458_v17 = vmax.f32 %v426_v15, 1.0  ;;  %v428_v19 = vld [vmem:[%s14074_s1 + $0xf0] sm:$0xff]  ;;  %v461_v20 = vmax.f32 %v429_v18, 1.0  ;;  %v7549_v22 = vld [vmem:[%s14075_s2] sm:$0xff]  ;;  %v7554_v23 = vld [vmem:[%s14075_s2 + $0x8] sm:$0xff] }
  0x34   :  { %589 = vperm.xlu1 %6930, %v455_v8   ;;  %584 = vperm.xlu0 %6929, %v454_v9   ;;  %v460_v21 = vmax.f32 %v428_v19, 1.0  ;;  %v7561_v24 = vld [vmem:[%s14075_s2 + $0x10] sm:$0xff]  ;;  %v7566_v25 = vld [vmem:[%s14075_s2 + $0x20] sm:$0xff]  ;;  %v7573_v26 = vld [vmem:[%s14075_s2 + $0x18] sm:$0xff]  ;;  %s7310_s23 = smov 32   ;;  %s7311_s24 = smov 35  }
  0x35   :  { %v7578_v27 = vld [vmem:[%s14075_s2 + $0x30] sm:$0xff]  ;;  %v7585_v28 = vld [vmem:[%s14075_s2 + $0x28] sm:$0xff]  ;;  %v7590_v29 = vld [vmem:[%s14075_s2 + $0x40] sm:$0xff]  ;;  %s7312_s25 = smov 16   ;;  %s7314_s26 = smov [#allocation7]  }
  0x36   :  { %v7006_v30 = vld [vmem:[%s14079_s6] sm:$0xff]   ;;  %v7600_v31 = vld [vmem:[%s14075_s2 + $0x38] sm:$0xff]  ;;  %v7605_v32 = vld [vmem:[%s14075_s2 + $0x50] sm:$0xff]  ;;  %s6242_s27 = sshll.u32 %s7314_s26, 4  ;;  %s6243_s27 = int_to_ptr.vmem [resolvable:$true] %s6242_s27 }
  0x37   :  { %6713 = vmatprep.subr.bf16.mxu1 %v7006_v30  ;;  %v7007_v33 = vld [vmem:[%s14079_s6 + $0x8] sm:$0xff]   ;;  %v7620_v35 = vld [vmem:[%s14075_s2 + $0x60] sm:$0xff]  ;;  %v7008_v36 = vld [vmem:[%s14079_s6 + $0x10] sm:$0xff]   ;;  %s7275_s28 = scalar_lea.vmem %s6243_s27, 16  ;;  %s7279_s29 = scalar_lea.vmem %s6243_s27, 32 }
  0x38   :  { %599 = vperm.xlu1 %6930, %v457_v12   ;;  %594 = vperm.xlu0 %6929, %v456_v13   ;;  %v7615_v34 = vld [vmem:[%s14075_s2 + $0x48] sm:$0xff]  ;;  %v7630_v37 = vld [vmem:[%s14075_s2 + $0x58] sm:$0xff]  ;;  %v7635_v38 = vld [vmem:[%s14075_s2 + $0x70] sm:$0xff]  ;;  %p7276_p0 = scmp.ne.s32.totalorder %s6243_s27, %s7275_s28  ;;  %p7280_p1 = scmp.lt.s32.totalorder %s6243_s27, %s6243_s27 }
  0x39   :  { %6714 = vmatpush3.bf16.msra.mxu1 %v7006_v30  ;;  %v7009_v39 = vld [vmem:[%s14079_s6 + $0x18] sm:$0xff]   ;;  %v7645_v40 = vld [vmem:[%s14075_s2 + $0x68] sm:$0xff]  ;;  %v7650_v41 = vld [vmem:[%s14075_s2 + $0x80] sm:$0xff]  ;;  %p7281_p2 = scmp.lt.s32.totalorder %s7279_s29, %s7275_s28 }
  0x3a   :  { %6715 = vmatprep.subr.bf16.mxu1 %v7007_v33  ;;  %v7010_v42 = vld [vmem:[%s14079_s6 + $0x20] sm:$0xff]   ;;  %v7660_v43 = vld [vmem:[%s14075_s2 + $0x78] sm:$0xff]  ;;  %v7665_v44 = vld [vmem:[%s14075_s2 + $0x90] sm:$0xff] }
  0x3b   :  { %14591 = vst [vmem:[#allocation10_spill] sm:$0xff] %v7665_v44  ;;  %v7011_v45 = vld [vmem:[%s14079_s6 + $0x28] sm:$0xff]   ;;  %v7680_v47 = vld [vmem:[%s14075_s2 + $0xa0] sm:$0xff]  ;;  %v7012_v48 = vld [vmem:[%s14079_s6 + $0x30] sm:$0xff]   ;;  %p7282_p3 = por %p7281_p2, %p7280_p1 }
  0x3c   :  { %609 = vperm.xlu1 %6930, %v459_v16   ;;  %604 = vperm.xlu0 %6929, %v458_v17   ;;  %v7675_v46 = vld [vmem:[%s14075_s2 + $0x88] sm:$0xff]  ;;  %14592 = vst [vmem:[#allocation11_spill] sm:$0xff] %v7680_v47  ;;  %v7690_v49 = vld [vmem:[%s14075_s2 + $0x98] sm:$0xff]  ;;  %v7695_v50 = vld [vmem:[%s14075_s2 + $0xb0] sm:$0xff] }
  0x3d   :  { %6716 = vmatpush3.bf16.msra.mxu1 %v7007_v33  ;;  %14593 = vst [vmem:[#allocation12_spill] sm:$0xff] %v7695_v50  ;;  %v7013_v51 = vld [vmem:[%s14079_s6 + $0x38] sm:$0xff]   ;;  %v7705_v52 = vld [vmem:[%s14075_s2 + $0xa8] sm:$0xff]  ;;  %v7710_v53 = vld [vmem:[%s14075_s2 + $0xc0] sm:$0xff]  ;;  %p7283_p4 = pnand %p7282_p3, %p7276_p0 }
  0x3e   :  { %6717 = vmatprep.subr.bf16.mxu1 %v7008_v36  ;;  %14594 = vst [vmem:[#allocation13_spill] sm:$0xff] %v7710_v53  ;;  %v7717_v54 = vld [vmem:[%s14075_s2 + $0xb8] sm:$0xff]  ;;  %v7722_v55 = vld [vmem:[%s14075_s2 + $0xd0] sm:$0xff]  ;;  %v7729_v56 = vld [vmem:[%s14075_s2 + $0xc8] sm:$0xff] }
  0x3f   :  { %14595 = vst [vmem:[#allocation14_spill] sm:$0xff] %v7722_v55  ;;  %v7734_v57 = vld [vmem:[%s14075_s2 + $0xe0] sm:$0xff]  ;;  %v7741_v58 = vld [vmem:[%s14075_s2 + $0xd8] sm:$0xff]  ;;  %v7746_v59 = vld [vmem:[%s14075_s2 + $0xf0] sm:$0xff] }
  0x40   :  { %619 = vperm.xlu1 %6930, %v461_v20   ;;  %614 = vperm.xlu0 %6929, %v460_v21   ;;  %14596 = vst [vmem:[#allocation15_spill] sm:$0xff] %v7734_v57  ;;  %v7753_v60 = vld [vmem:[%s14075_s2 + $0xe8] sm:$0xff]  ;;  %v7761_v62 = vld [vmem:[%s14075_s2 + $0xf8] sm:$0xff] }
  0x41   :  { %6718 = vmatpush3.bf16.msra.mxu1 %v7008_v36 }
  0x42   :  { %6719 = vmatprep.subr.bf16.mxu1 %v7009_v39 }
  0x44   :  { %1329 = vperm.xlu1 %6930, %v7549_v22   ;;  %1334 = vperm.xlu0 %6929, %v7554_v23  }
  0x45   :  { %6720 = vmatpush3.bf16.msra.mxu1 %v7009_v39 }
  0x46   :  { %6721 = vmatprep.subr.bf16.mxu1 %v7010_v42 }
  0x48   :  { %1339 = vperm.xlu1 %6930, %v7561_v24   ;;  %1349 = vperm.xlu0 %6929, %v7566_v25  }
  0x49   :  { %6722 = vmatpush3.bf16.msra.mxu1 %v7010_v42 }
  0x4a   :  { %6723 = vmatprep.subr.bf16.mxu1 %v7011_v45 }
  0x4c   :  { %1344 = vperm.xlu1 %6930, %v7573_v26   ;;  %1359 = vperm.xlu0 %6929, %v7578_v27  }
  0x4d   :  { %6724 = vmatpush3.bf16.msra.mxu1 %v7011_v45 }
  0x4e   :  { %6725 = vmatprep.subr.bf16.mxu1 %v7012_v48 }
  0x50   :  { %1354 = vperm.xlu1 %6930, %v7585_v28   ;;  %1369 = vperm.xlu0 %6929, %v7590_v29  }
  0x51   :  { %6726 = vmatpush3.bf16.msra.mxu1 %v7012_v48 }
  0x52   :  { %6727 = vmatprep.subr.bf16.mxu1 %v7013_v51 }
  0x54   :  { %1364 = vperm.xlu1 %6930, %v7600_v31   ;;  %1379 = vperm.xlu0 %6929, %v7605_v32  }
  0x55   :  { %6728 = vmatpush3.bf16.msra.mxu1 %v7013_v51 }
  0x58   :  { %1374 = vperm.xlu1 %6930, %v7615_v34   ;;  %1389 = vperm.xlu0 %6929, %v7620_v35  }
  0x5c   :  { %1384 = vperm.xlu1 %6930, %v7630_v37   ;;  %1399 = vperm.xlu0 %6929, %v7635_v38  }
  0x60   :  { %1394 = vperm.xlu1 %6930, %v7645_v40   ;;  %1409 = vperm.xlu0 %6929, %v7650_v41  }
  0x64   :  { %1404 = vperm.xlu1 %6930, %v7660_v43   ;;  %1419 = vperm.xlu0 %6929, %v7665_v44  }
  0x68   :  { %1414 = vperm.xlu1 %6930, %v7675_v46   ;;  %1429 = vperm.xlu0 %6929, %v7680_v47  }
  0x6c   :  { %1424 = vperm.xlu1 %6930, %v7690_v49   ;;  %1439 = vperm.xlu0 %6929, %v7695_v50  }
  0x70   :  { %1434 = vperm.xlu1 %6930, %v7705_v52   ;;  %1449 = vperm.xlu0 %6929, %v7710_v53  }
  0x74   :  { %1444 = vperm.xlu1 %6930, %v7717_v54   ;;  %1459 = vperm.xlu0 %6929, %v7722_v55  }
  0x78   :  { %1454 = vperm.xlu1 %6930, %v7729_v56   ;;  %1469 = vperm.xlu0 %6929, %v7734_v57  }
  0x7c   :  { %1464 = vperm.xlu1 %6930, %v7741_v58   ;;  %1479 = vperm.xlu0 %6929, %v7746_v59  }
  0x80   :  { %1474 = vperm.xlu1 %6930, %v7753_v60   ;;  %6931 = vset.pattern.permute.xlu0 %v14087_v61 }
  0x81   :  { %1525 = vperm.xlu0 %6931, %v7549_v22  }
  0x83   :  { %v7763_v63 = vpop.permute.xlu1 %474  ;;  %v7765_v0 = vpop.permute.xlu0 %464 }
  0x84   :  { %1484 = vperm.xlu1 %6930, %v7761_v62   ;;  %7014 = vrcp.f32 %v7763_v63 }
  0x85   :  { %1537 = vperm.xlu0 %6931, %v7573_v26   ;;  %7016 = vrcp.f32 %v7765_v0 }
  0x87   :  { %v7769_v1 = vpop.permute.xlu1 %479  ;;  %v7771_v3 = vpop.permute.xlu0 %469 }
  0x88   :  { %6932 = vset.pattern.permute.xlu1 %v14087_v61  ;;  %7018 = vrcp.f32 %v7769_v1 }
  0x89   :  { %1529 = vperm.xlu1 %6932, %v7554_v23   ;;  %1545 = vperm.xlu0 %6931, %v7585_v28   ;;  %7020 = vrcp.f32 %v7771_v3 }
  0x8b   :  { %v7776_v4 = vpop.permute.xlu1 %489  ;;  %v7778_v5 = vpop.permute.xlu0 %484 }
  0x8c   :  { %7022 = vrcp.f32 %v7776_v4 }
  0x8d   :  { %1533 = vperm.xlu1 %6932, %v7561_v24   ;;  %1553 = vperm.xlu0 %6931, %v7600_v31  }
  0x8e   :  { %v7015_v63 = vpop.eup %7014 }
  0x8f   :  { %v7782_v6 = vpop.permute.xlu1 %499  ;;  %v7784_v7 = vpop.permute.xlu0 %494 }
  0x90   :  { %v7017_v1 = vpop.eup %7016 }
  0x91   :  { %1541 = vperm.xlu1 %6932, %v7566_v25   ;;  %1561 = vperm.xlu0 %6931, %v7615_v34  }
  0x92   :  { %v7019_v3 = vpop.eup %7018 }
  0x93   :  { %v7788_v8 = vpop.permute.xlu1 %509  ;;  %v7790_v9 = vpop.permute.xlu0 %504 }
  0x94   :  { %v7021_v4 = vpop.eup %7020 }
  0x95   :  { %1549 = vperm.xlu1 %6932, %v7578_v27   ;;  %1569 = vperm.xlu0 %6931, %v7630_v37  }
  0x97   :  { %v7794_v10 = vpop.permute.xlu1 %519  ;;  %v7796_v11 = vpop.permute.xlu0 %514 }
  0x99   :  { %1557 = vperm.xlu1 %6932, %v7590_v29   ;;  %1577 = vperm.xlu0 %6931, %v7645_v40  }
  0x9b   :  { %v7800_v12 = vpop.permute.xlu1 %529  ;;  %v7802_v13 = vpop.permute.xlu0 %524 }
  0x9d   :  { %1565 = vperm.xlu1 %6932, %v7605_v32   ;;  %1585 = vperm.xlu0 %6931, %v7660_v43  }
  0x9f   :  { %v7806_v14 = vpop.permute.xlu1 %539  ;;  %v7808_v15 = vpop.permute.xlu0 %534 }
  0xa1   :  { %1573 = vperm.xlu1 %6932, %v7620_v35   ;;  %1593 = vperm.xlu0 %6931, %v7675_v46  }
  0xa3   :  { %v7812_v16 = vpop.permute.xlu1 %549  ;;  %v7814_v17 = vpop.permute.xlu0 %544 }
  0xa5   :  { %1581 = vperm.xlu1 %6932, %v7635_v38   ;;  %1601 = vperm.xlu0 %6931, %v7690_v49  }
  0xa7   :  { %v7818_v18 = vpop.permute.xlu1 %559  ;;  %v555_v19 = vpop.permute.xlu0 %554 }
  0xa8   :  { %7024 = vrcp.f32 %v555_v19 }
  0xa9   :  { %1589 = vperm.xlu1 %6932, %v7650_v41   ;;  %1609 = vperm.xlu0 %6931, %v7705_v52   ;;  %7026 = vrcp.f32 %v7814_v17 }
  0xaa   :  { %7028 = vrcp.f32 %v7818_v18 }
  0xab   :  { %v7822_v20 = vpop.permute.xlu1 %569  ;;  %v7824_v21 = vpop.permute.xlu0 %564  ;;  %7030 = vrcp.f32 %v7812_v16 }
  0xac   :  { %7032 = vrcp.f32 %v7778_v5 }
  0xad   :  { %1597 = vperm.xlu1 %6932, %v7665_v44   ;;  %1617 = vperm.xlu0 %6931, %v7717_v54   ;;  %v14102_v44 = vmov 2   ;;  %7034 = vrcp.f32 %v7782_v6 }
  0xae   :  { %7036 = vrcp.f32 %v7784_v7 }
  0xaf   :  { %v7828_v30 = vpop.permute.xlu1 %579  ;;  %v7830_v33 = vpop.permute.xlu0 %574  ;;  %7038 = vrcp.f32 %v7788_v8  ;;  %v7932_v8 = vld [vmem:[%s14078_s5] ss:$0 sm:$0xff] }
  0xb0   :  { %7040 = vrcp.f32 %v7790_v9 }
  0xb1   :  { %1605 = vperm.xlu1 %6932, %v7680_v47   ;;  %1625 = vperm.xlu0 %6931, %v7729_v56   ;;  %7042 = vrcp.f32 %v7794_v10 }
  0xb2   :  { %7044 = vrcp.f32 %v7824_v21 }
  0xb3   :  { %v7834_v36 = vpop.permute.xlu1 %589  ;;  %v7836_v39 = vpop.permute.xlu0 %584  ;;  %7046 = vrcp.f32 %v7822_v20 }
  0xb4   :  { %7048 = vrcp.f32 %v7828_v30 }
  0xb5   :  { %1613 = vperm.xlu1 %6932, %v7695_v50   ;;  %1633 = vperm.xlu0 %6931, %v7741_v58   ;;  %7050 = vrcp.f32 %v7830_v33 }
  0xb6   :  { %7052 = vrcp.f32 %v7796_v11 }
  0xb7   :  { %v7840_v42 = vpop.permute.xlu1 %599  ;;  %v7842_v45 = vpop.permute.xlu0 %594 }
  0xb9   :  { %1621 = vperm.xlu1 %6932, %v7710_v53   ;;  %1641 = vperm.xlu0 %6931, %v7753_v60  }
  0xbb   :  { %v7846_v48 = vpop.permute.xlu1 %609  ;;  %v7848_v51 = vpop.permute.xlu0 %604 }
  0xbd   :  { %1629 = vperm.xlu1 %6932, %v7722_v55   ;;  %6934 = vset.pattern.permute.xlu0 %v14097_v2 }
  0xbe   :  { %1919 = vperm.xlu0 %6934, %v7549_v22  }
  0xbf   :  { %v7853_v61 = vpop.permute.xlu1 %619  ;;  %v7855_v50 = vpop.permute.xlu0 %614 }
  0xc1   :  { %1637 = vperm.xlu1 %6932, %v7734_v57  }
  0xc2   :  { %1931 = vperm.xlu0 %6934, %v7573_v26  }
  0xc3   :  { %v7859_v53 = vpop.permute.xlu1 %1329  ;;  %v7861_v47 = vpop.permute.xlu0 %1334 }
  0xc4   :  { %14597 = vst [vmem:[#allocation16_spill] sm:$0xff] %v7859_v53  ;;  %14598 = vst [vmem:[#allocation17_spill] sm:$0xff] %v7861_v47 }
  0xc5   :  { %1645 = vperm.xlu1 %6932, %v7746_v59  }
  0xc6   :  { %1939 = vperm.xlu0 %6934, %v7585_v28  }
  0xc7   :  { %v7865_v55 = vpop.permute.xlu1 %1339  ;;  %v7867_v2 = vpop.permute.xlu0 %1349 }
  0xc8   :  { %14599 = vst [vmem:[#allocation18_spill] sm:$0xff] %v7865_v55 }
  0xc9   :  { %6933 = vset.pattern.permute.xlu1 %v14102_v44 }
  0xca   :  { %1722 = vperm.xlu1 %6933, %v7549_v22   ;;  %1947 = vperm.xlu0 %6934, %v7600_v31  }
  0xcb   :  { %v7872_v57 = vpop.permute.xlu1 %1344  ;;  %v7874_v53 = vpop.permute.xlu0 %1359 }
  0xce   :  { %1730 = vperm.xlu1 %6933, %v7561_v24   ;;  %1955 = vperm.xlu0 %6934, %v7615_v34  }
  0xcf   :  { %v7878_v47 = vpop.permute.xlu1 %1354  ;;  %v7880_v55 = vpop.permute.xlu0 %1369 }
  0xd0   :  { %14600 = vst [vmem:[#allocation19_spill] sm:$0xff] %v7878_v47  ;;  %14601 = vst [vmem:[#allocation20_spill] sm:$0xff] %v7880_v55 }
  0xd2   :  { %1734 = vperm.xlu1 %6933, %v7573_v26   ;;  %1963 = vperm.xlu0 %6934, %v7630_v37  }
  0xd3   :  { %v7884_v44 = vpop.permute.xlu1 %1364  ;;  %v7886_v22 = vpop.permute.xlu0 %1379 }
  0xd6   :  { %1742 = vperm.xlu1 %6933, %v7585_v28   ;;  %1971 = vperm.xlu0 %6934, %v7645_v40  }
  0xd7   :  { %v7893_v47 = vpop.permute.xlu1 %1374  ;;  %v7895_v55 = vpop.permute.xlu0 %1389 }
  0xd8   :  { %14602 = vst [vmem:[#allocation21_spill] sm:$0xff] %v7895_v55 }
  0xda   :  { %1750 = vperm.xlu1 %6933, %v7600_v31   ;;  %1979 = vperm.xlu0 %6934, %v7660_v43  }
  0xdb   :  { %v7902_v26 = vpop.permute.xlu1 %1384  ;;  %v7904_v28 = vpop.permute.xlu0 %1399 }
  0xdc   :  { %14603 = vst [vmem:[#allocation22_spill] sm:$0xff] %v7902_v26  ;;  %14604 = vst [vmem:[#allocation23_spill] sm:$0xff] %v7904_v28 }
  0xde   :  { %1758 = vperm.xlu1 %6933, %v7615_v34   ;;  %1987 = vperm.xlu0 %6934, %v7675_v46   ;;  %v7921_v34 = vpop.eup %7022  ;;  %7054 = vrcp.f32 %v7802_v13 }
  0xdf   :  { %v7912_v31 = vpop.permute.xlu1 %1394  ;;  %v7914_v0 = vpop.permute.xlu0 %1409 }
  0xe0   :  { %14605 = vst [vmem:[#allocation24_spill] sm:$0xff] %v7912_v31  ;;  %14606 = vst [vmem:[#allocation25_spill] sm:$0xff] %v7914_v0  ;;  %v7025_v16 = vpop.eup %7024  ;;  %7056 = vrcp.f32 %v7836_v39 }
  0xe1   :  { %v7027_v9 = vpop.eup %7026  ;;  %7058 = vrcp.f32 %v7840_v42 }
  0xe2   :  { %1766 = vperm.xlu1 %6933, %v7630_v37   ;;  %1995 = vperm.xlu0 %6934, %v7690_v49  }
  0xe3   :  { %v7924_v5 = vpop.permute.xlu1 %1404  ;;  %v7926_v6 = vpop.permute.xlu0 %1419 }
  0xe4   :  { %14607 = vst [vmem:[#allocation26_spill] sm:$0xff] %v7924_v5  ;;  %14608 = vst [vmem:[#allocation27_spill] sm:$0xff] %v7926_v6  ;;  %v6683_v7 = vpop.f32.mrb[0].mxu0  ;;  %v6699_v37 = vpop.f32.mrb[0].mxu1 }
  0xe5   :  { %v627_v17 = vmul.f32 %v7015_v63, %v6683_v7  ;;  %v659_v18 = vmul.f32 %v7025_v16, %v6699_v37  ;;  %v271_v10 = vpop.f32.mrb[1].mxu0  ;;  %v335_v19 = vpop.f32.mrb[1].mxu1 }
  0xe6   :  { %v7029_v5 = vpop.eup %7028  ;;  %v623_v6 = vmul.f32 %v7017_v1, %v271_v10  ;;  %v655_v0 = vmul.f32 %v7027_v9, %v335_v19  ;;  %v6684_v21 = vpop.f32.mrb[2].mxu0  ;;  %1774 = vperm.xlu1 %6933, %v7645_v40   ;;  %2003 = vperm.xlu0 %6934, %v7705_v52   ;;  %7060 = vrcp.f32 %v7842_v45 }
  0xe7   :  { %v6700_v31 = vpop.f32.mrb[2].mxu1  ;;  %v7031_v28 = vpop.eup %7030  ;;  %v695_v26 = vadd.f32 %v7932_v8, %v627_v17  ;;  %v711_v20 = vadd.f32 %v7932_v8, %v659_v18  ;;  %v629_v63 = vmul.f32 %v7019_v3, %v6684_v21  ;;  %7062 = vrcp.f32 %v7834_v36 }
  0xe8   :  { %v661_v16 = vmul.f32 %v7029_v5, %v6700_v31  ;;  %v274_v7 = vpop.f32.mrb[3].mxu0  ;;  %v338_v37 = vpop.f32.mrb[3].mxu1  ;;  %v693_v30 = vadd.f32 %v7932_v8, %v623_v6  ;;  %v709_v17 = vadd.f32 %v7932_v8, %v655_v0 }
  0xe9   :  { %v7033_v55 = vpop.eup %7032  ;;  %v625_v1 = vmul.f32 %v7021_v4, %v274_v7  ;;  %v657_v9 = vmul.f32 %v7031_v28, %v338_v37  ;;  %v7942_v10 = vpop.permute.xlu1 %1414  ;;  %v696_v31 = vadd.f32 %v7932_v8, %v629_v63  ;;  %v727_v11 = vmax.f32 %v695_v26, 0.0 }
  0xea   :  { %v7944_v40 = vpop.permute.xlu0 %1429  ;;  %v7035_v19 = vpop.eup %7034  ;;  %v712_v3 = vadd.f32 %v7932_v8, %v661_v16  ;;  %1782 = vperm.xlu1 %6933, %v7660_v43   ;;  %2011 = vperm.xlu0 %6934, %v7717_v54   ;;  %v743_v6 = vmax.f32 %v711_v20, 0.0  ;;  %v725_v63 = vmax.f32 %v693_v30, 0.0  ;;  %7064 = vrcp.f32 %v7806_v14 }
  0xeb   :  { %v7037_v5 = vpop.eup %7036  ;;  %v694_v33 = vadd.f32 %v7932_v8, %v625_v1  ;;  %v710_v28 = vadd.f32 %v7932_v8, %v657_v9  ;;  %v728_v0 = vmax.f32 %v696_v31, 0.0  ;;  %v741_v1 = vmax.f32 %v709_v17, 0.0 }
  0xec   :  { %v7955_v4 = vpop.eup %7038  ;;  %v744_v18 = vmax.f32 %v712_v3, 0.0  ;;  %v6687_v20 = vpop.f32.mrb[4].mxu0  ;;  %7066 = vrcp.f32 %v7808_v15 }
  0xed   :  { %v7957_v21 = vpop.eup %7040  ;;  %v726_v13 = vmax.f32 %v694_v33, 0.0  ;;  %v742_v16 = vmax.f32 %v710_v28, 0.0  ;;  %v7960_v7 = vpop.permute.xlu1 %1424  ;;  %v758_v26 = vpack.c.bf16 %v728_v0, %v727_v11  ;;  %v635_v39 = vmul.f32 %v7037_v5, %v6687_v20 }
  0xee   :  { %v7962_v37 = vpop.permute.xlu0 %1439  ;;  %v7964_v43 = vpop.eup %7042  ;;  %v7967_v31 = vpack.c.bf16 %v744_v18, %v743_v6  ;;  %1790 = vperm.xlu1 %6933, %v7675_v46   ;;  %2019 = vperm.xlu0 %6934, %v7729_v56   ;;  %7068 = vrcp.f32 %v7855_v50 }
  0xef   :  { %14609 = vst [vmem:[#allocation28_spill] sm:$0xff] %v7962_v37  ;;  %v6703_v9 = vpop.f32.mrb[4].mxu1  ;;  %v7045_v3 = vpop.eup %7044  ;;  %v757_v28 = vpack.c.bf16 %v726_v13, %v725_v63  ;;  %v7973_v6 = vpack.c.bf16 %v742_v16, %v741_v1  ;;  %v699_v45 = vadd.f32 %v7932_v8, %v635_v39  ;;  %7070 = vrcp.f32 %v7848_v51 }
  0xf0   :  { %v287_v30 = vpop.f32.mrb[5].mxu0  ;;  %v351_v33 = vpop.f32.mrb[5].mxu1  ;;  %7072 = vrcp.f32 %v7853_v61 }
  0xf1   :  { %v7047_v37 = vpop.eup %7046  ;;  %v631_v42 = vmul.f32 %v7033_v55, %v287_v30  ;;  %v663_v17 = vmul.f32 %v7045_v3, %v351_v33  ;;  %v6688_v11 = vpop.f32.mrb[6].mxu0  ;;  %6729 = vmatprep.mubr.bf16.mxu1 %v757_v28  ;;  %v731_v50 = vmax.f32 %v699_v45, 0.0  ;;  %7074 = vrcp.f32 %v7800_v12 }
  0xf2   :  { %v6704_v0 = vpop.f32.mrb[6].mxu1  ;;  %v7049_v18 = vpop.eup %7048  ;;  %v637_v5 = vmul.f32 %v7035_v19, %v6688_v11  ;;  %6730 = vmatmul.mubr.bf16.vlgmr.msra.gmra.mrb[16].mxu1 %v758_v26  ;;  %1798 = vperm.xlu1 %6933, %v7690_v49   ;;  %7076 = vrcp.f32 %v7846_v48 }
  0xf3   :  { %v290_v20 = vpop.f32.mrb[7].mxu0  ;;  %v354_v46 = vpop.f32.mrb[7].mxu1  ;;  %v669_v63 = vmul.f32 %v7049_v18, %v6704_v0  ;;  %v697_v14 = vadd.f32 %v7932_v8, %v631_v42  ;;  %v713_v19 = vadd.f32 %v7932_v8, %v663_v17  ;;  %2027 = vperm.xlu0 %6934, %v7741_v58  }
  0xf4   :  { %v633_v36 = vmul.f32 %v7921_v34, %v290_v20  ;;  %v665_v55 = vmul.f32 %v7047_v37, %v354_v46  ;;  %v7979_v13 = vpop.permute.xlu1 %1434  ;;  %v7981_v3 = vpop.permute.xlu0 %1449  ;;  %v700_v1 = vadd.f32 %v7932_v8, %v637_v5 }
  0xf5   :  { %v7051_v16 = vpop.eup %7050  ;;  %v6691_v33 = vpop.f32.mrb[8].mxu0  ;;  %v716_v49 = vadd.f32 %v7932_v8, %v669_v63  ;;  %v729_v18 = vmax.f32 %v697_v14, 0.0  ;;  %v745_v5 = vmax.f32 %v713_v19, 0.0 }
  0xf6   :  { %v7053_v15 = vpop.eup %7052  ;;  %v667_v34 = vmul.f32 %v7051_v16, %v6703_v9  ;;  %v698_v37 = vadd.f32 %v7932_v8, %v633_v36  ;;  %v714_v26 = vadd.f32 %v7932_v8, %v665_v55  ;;  %v732_v30 = vmax.f32 %v700_v1, 0.0  ;;  %v6707_v28 = vpop.f32.mrb[8].mxu1  ;;  %1806 = vperm.xlu1 %6933, %v7705_v52  }
  0xf7   :  { %v7992_v39 = vpop.eup %7054  ;;  %v643_v9 = vmul.f32 %v7053_v15, %v6691_v33  ;;  %v303_v20 = vpop.f32.mrb[9].mxu0  ;;  %2035 = vperm.xlu0 %6934, %v7753_v60  }
  0xf8   :  { %v730_v42 = vmax.f32 %v698_v37, 0.0  ;;  %v746_v17 = vmax.f32 %v714_v26, 0.0  ;;  %v7996_v11 = vpop.permute.xlu1 %1444  ;;  %v7998_v51 = vpop.permute.xlu0 %1459  ;;  %v760_v45 = vpack.c.bf16 %v732_v30, %v731_v50  ;;  %v715_v63 = vadd.f32 %v7932_v8, %v667_v34 }
  0xf9   :  { %14610 = vst [vmem:[#allocation29_spill] sm:$0xff] %v7998_v51  ;;  %v7057_v0 = vpop.eup %7056  ;;  %v367_v61 = vpop.f32.mrb[9].mxu1  ;;  %v639_v36 = vmul.f32 %v7957_v21, %v303_v20  ;;  %v748_v50 = vmax.f32 %v716_v49, 0.0  ;;  %v703_v30 = vadd.f32 %v7932_v8, %v643_v9 }
  0xfa   :  { %v7059_v46 = vpop.eup %7058  ;;  %v6692_v55 = vpop.f32.mrb[10].mxu0  ;;  %v759_v37 = vpack.c.bf16 %v730_v42, %v729_v18  ;;  %v8007_v52 = vpack.c.bf16 %v746_v17, %v745_v5  ;;  %v671_v33 = vmul.f32 %v7057_v0, %v367_v61  ;;  %v747_v18 = vmax.f32 %v715_v63, 0.0  ;;  %1814 = vperm.xlu1 %6933, %v7717_v54  }
  0xfb   :  { %v6708_v16 = vpop.f32.mrb[10].mxu1  ;;  %v7061_v1 = vpop.eup %7060  ;;  %v645_v12 = vmul.f32 %v7964_v43, %v6692_v55  ;;  %v701_v51 = vadd.f32 %v7932_v8, %v639_v36  ;;  %2043 = vperm.xlu0 %6934, %v7761_v62  }
  0xfc   :  { %v677_v14 = vmul.f32 %v7059_v46, %v6708_v16  ;;  %v306_v19 = vpop.f32.mrb[11].mxu0  ;;  %v370_v15 = vpop.f32.mrb[11].mxu1  ;;  %v675_v48 = vmul.f32 %v7061_v1, %v6707_v28  ;;  %6733 = vmatprep.mubr.bf16.mxu1 %v759_v37  ;;  %v8029_v54 = vpack.c.bf16 %v748_v50, %v747_v18 }
  0xfd   :  { %v7063_v26 = vpop.eup %7062  ;;  %v8010_v34 = vpop.permute.xlu1 %1454  ;;  %v704_v43 = vadd.f32 %v7932_v8, %v645_v12  ;;  %v641_v46 = vmul.f32 %v7955_v4, %v306_v19  ;;  %6734 = vmatmul.mubr.bf16.gmra.mrb[20].mxu1 %v760_v45  ;;  %v733_v19 = vmax.f32 %v701_v51, 0.0 }
  0xfe   :  { %v8012_v21 = vpop.permute.xlu0 %1469  ;;  %v7065_v20 = vpop.eup %7064  ;;  %v673_v42 = vmul.f32 %v7063_v26, %v370_v15  ;;  %v8018_v49 = vadd.f32 %v7932_v8, %v677_v14  ;;  %v719_v55 = vadd.f32 %v7932_v8, %v675_v48  ;;  %v735_v14 = vmax.f32 %v703_v30, 0.0  ;;  %1822 = vperm.xlu1 %6933, %v7729_v56  }
  0xff   :  { %14611 = vst [vmem:[#allocation30_spill] sm:$0xff] %v8012_v21  ;;  %v7067_v17 = vpop.eup %7066  ;;  %v736_v9 = vmax.f32 %v704_v43, 0.0  ;;  %v702_v0 = vadd.f32 %v7932_v8, %v641_v46  ;;  %v6695_v61 = vpop.f32.mrb[12].mxu0  ;;  %v717_v15 = vadd.f32 %v7932_v8, %v671_v33  ;;  %v14614_v30 = vmov 2  }
 0x100   :  { %v7069_v28 = vpop.eup %7068  ;;  %v718_v5 = vadd.f32 %v7932_v8, %v673_v42  ;;  %v6711_v4 = vpop.f32.mrb[12].mxu1  ;;  %v651_v45 = vmul.f32 %v7067_v17, %v6695_v61  ;;  %v752_v46 = vmax.f32 %v8018_v49, 0.0  ;;  %6936 = vset.pattern.permute.xlu0 %v14614_v30 }
 0x101   :  { %v7071_v36 = vpop.eup %7070  ;;  %v8025_v63 = vpop.permute.xlu1 %1464  ;;  %v683_v1 = vmul.f32 %v7069_v28, %v6711_v4  ;;  %v734_v37 = vmax.f32 %v702_v0, 0.0  ;;  %v762_v0 = vpack.c.bf16 %v736_v9, %v735_v14  ;;  %1726 = vperm.xlu0 %6936, %v7554_v23  }
 0x102   :  { %14612 = vst [vmem:[#allocation31_spill] sm:$0xff] %v8025_v63  ;;  %v8027_v16 = vpop.permute.xlu0 %1479  ;;  %v7073_v12 = vpop.eup %7072  ;;  %v750_v42 = vmax.f32 %v718_v5, 0.0  ;;  %v707_v49 = vadd.f32 %v7932_v8, %v651_v45  ;;  %v751_v45 = vmax.f32 %v719_v55, 0.0  ;;  %1830 = vperm.xlu1 %6933, %v7741_v58  }
 0x103   :  { %14613 = vst [vmem:[#allocation32_spill] sm:$0xff] %v8027_v16  ;;  %v319_v26 = vpop.f32.mrb[13].mxu0  ;;  %v383_v43 = vpop.f32.mrb[13].mxu1  ;;  %v761_v28 = vpack.c.bf16 %v734_v37, %v733_v19  ;;  %v723_v5 = vadd.f32 %v7932_v8, %v683_v1 }
 0x104   :  { %v647_v48 = vmul.f32 %v7992_v39, %v319_v26  ;;  %v679_v63 = vmul.f32 %v7071_v36, %v383_v43  ;;  %v6696_v21 = vpop.f32.mrb[14].mxu0  ;;  %v6712_v16 = vpop.f32.mrb[14].mxu1  ;;  %v739_v37 = vmax.f32 %v707_v49, 0.0  ;;  %v770_v55 = vpack.c.bf16 %v752_v46, %v751_v45 }
 0x105   :  { %v7075_v50 = vpop.eup %7074  ;;  %v653_v17 = vmul.f32 %v7065_v20, %v6696_v21  ;;  %v685_v18 = vmul.f32 %v7073_v12, %v6712_v16  ;;  %v322_v51 = vpop.f32.mrb[15].mxu0  ;;  %6737 = vmatprep.mubr.bf16.mxu1 %v761_v28  ;;  %v749_v12 = vmax.f32 %v717_v15, 0.0  ;;  %v755_v26 = vmax.f32 %v723_v5, 0.0  ;;  %1738 = vperm.xlu0 %6936, %v7566_v25  }
 0x106   :  { %v386_v33 = vpop.f32.mrb[15].mxu1  ;;  %v7077_v61 = vpop.eup %7076  ;;  %v705_v39 = vadd.f32 %v7932_v8, %v647_v48  ;;  %v721_v4 = vadd.f32 %v7932_v8, %v679_v63  ;;  %v649_v9 = vmul.f32 %v7075_v50, %v322_v51  ;;  %6738 = vmatmul.mubr.bf16.gmra.mrb[24].mxu1 %v762_v0  ;;  %1838 = vperm.xlu1 %6933, %v7753_v60  }
 0x107   :  { %v8040_v36 = vpop.permute.xlu1 %1474  ;;  %v8043_v56 = vpop.permute.xlu0 %1525  ;;  %v708_v21 = vadd.f32 %v7932_v8, %v653_v17  ;;  %v724_v20 = vadd.f32 %v7932_v8, %v685_v18  ;;  %v681_v16 = vmul.f32 %v7077_v61, %v386_v33  ;;  %v769_v50 = vpack.c.bf16 %v750_v42, %v749_v12  ;;  %v14621_v12 = vld [vmem:[#allocation14_spill] sm:$0xff] }
 0x108   :  { %v706_v14 = vadd.f32 %v7932_v8, %v649_v9  ;;  %v737_v15 = vmax.f32 %v705_v39, 0.0  ;;  %v753_v17 = vmax.f32 %v721_v4, 0.0  ;;  %v14616_v42 = vmov 3  }
 0x109   :  { %v740_v1 = vmax.f32 %v708_v21, 0.0  ;;  %v756_v63 = vmax.f32 %v724_v20, 0.0  ;;  %v722_v19 = vadd.f32 %v7932_v8, %v681_v16  ;;  %1746 = vperm.xlu0 %6936, %v7578_v27   ;;  %v14619_v20 = vld [vmem:[#allocation12_spill] sm:$0xff]  ;;  %v14620_v16 = vld [vmem:[#allocation13_spill] sm:$0xff] }
 0x10a   :  { %v738_v18 = vmax.f32 %v706_v14, 0.0  ;;  %1846 = vperm.xlu1 %6933, %v7761_v62  }
 0x10b   :  { %v8050_v43 = vpop.permute.xlu1 %1484  ;;  %v8053_v48 = vpop.permute.xlu0 %1537  ;;  %v754_v58 = vmax.f32 %v722_v19, 0.0  ;;  %v764_v51 = vpack.c.bf16 %v740_v1, %v739_v37  ;;  %v772_v33 = vpack.c.bf16 %v756_v63, %v755_v26  ;;  %v14622_v63 = vld [vmem:[#allocation15_spill] sm:$0xff] }
 0x10c   :  { %14615 = vst [vmem:[#allocation33_spill] sm:$0xff] %v8050_v43  ;;  %v763_v28 = vpack.c.bf16 %v738_v18, %v737_v15  ;;  %v8149_v15 = vld [vmem:[%s14081_s8 + $0x1] ss:$0 sm:$0xff] }
 0x10d   :  { %v771_v8 = vpack.c.bf16 %v754_v58, %v753_v17  ;;  %1754 = vperm.xlu0 %6936, %v7590_v29   ;;  %v8155_v17 = vld [vmem:[%s14081_s8] ss:$0 sm:$0xff] }
 0x10e   :  { %6741 = vmatprep.mubr.bf16.mxu1 %v763_v28  ;;  %6935 = vset.pattern.permute.xlu1 %v14616_v42  ;;  %v8171_v28 = vld [vmem:[%s14081_s8 + $0x2] ss:$0 sm:$0xff] }
 0x10f   :  { %v8057_v0 = vpop.permute.xlu1 %1529  ;;  %v8059_v61 = vpop.permute.xlu0 %1545  ;;  %6742 = vmatmul.mubr.bf16.gmra.mrb[28].mxu1 %v764_v51  ;;  %1923 = vperm.xlu1 %6935, %v7554_v23   ;;  %v1656_v51 = vmul.f32 %v8149_v15, %v8043_v56 }
 0x110   :  { %6745 = vmatprep.mubr.bf16.mxu1 %v7973_v6 }
 0x111   :  { %1762 = vperm.xlu0 %6936, %v7605_v32  }
 0x113   :  { %v8064_v46 = vpop.permute.xlu1 %1533  ;;  %v8066_v60 = vpop.permute.xlu0 %1553  ;;  %1927 = vperm.xlu1 %6935, %v7561_v24  }
 0x115   :  { %1770 = vperm.xlu0 %6936, %v7620_v35  }
 0x117   :  { %v8071_v49 = vpop.permute.xlu1 %1541  ;;  %v8073_v5 = vpop.permute.xlu0 %1561  ;;  %6746 = vmatmul.mubr.bf16.gmra.mrb[32].mxu1 %v7967_v31  ;;  %1935 = vperm.xlu1 %6935, %v7566_v25   ;;  %v14617_v25 = vld [vmem:[#allocation10_spill] sm:$0xff] }
 0x118   :  { %6749 = vmatprep.mubr.bf16.mxu1 %v8007_v52 }
 0x119   :  { %1778 = vperm.xlu0 %6936, %v7635_v38  }
 0x11b   :  { %v8079_v62 = vpop.permute.xlu1 %1549  ;;  %v8081_v6 = vpop.permute.xlu0 %1569  ;;  %1943 = vperm.xlu1 %6935, %v7578_v27  }
 0x11d   :  { %1786 = vperm.xlu0 %6936, %v7650_v41  }
 0x11f   :  { %v8085_v23 = vpop.permute.xlu1 %1557  ;;  %v8087_v39 = vpop.permute.xlu0 %1577  ;;  %6750 = vmatmul.mubr.bf16.gmra.mrb[36].mxu1 %v8029_v54  ;;  %1951 = vperm.xlu1 %6935, %v7590_v29   ;;  %v14618_v54 = vld [vmem:[#allocation11_spill] sm:$0xff] }
 0x120   :  { %6753 = vmatprep.mubr.bf16.mxu1 %v769_v50 }
 0x121   :  { %1794 = vperm.xlu0 %6936, %v14617_v25  }
 0x123   :  { %v8092_v24 = vpop.permute.xlu1 %1565  ;;  %v8094_v31 = vpop.permute.xlu0 %1585  ;;  %1959 = vperm.xlu1 %6935, %v7605_v32  }
 0x125   :  { %1802 = vperm.xlu0 %6936, %v14618_v54  }
 0x127   :  { %v8098_v52 = vpop.permute.xlu1 %1573  ;;  %v8100_v4 = vpop.permute.xlu0 %1593  ;;  %6754 = vmatmul.mubr.bf16.gmra.mrb[40].mxu1 %v770_v55  ;;  %1967 = vperm.xlu1 %6935, %v7620_v35  }
 0x128   :  { %6757 = vmatprep.mubr.bf16.mxu1 %v771_v8  ;;  %v14629_v8 = vld [vmem:[#allocation16_spill] sm:$0xff] }
 0x129   :  { %1810 = vperm.xlu0 %6936, %v14619_v20   ;;  %v1491_v42 = vmul.f32 %v8155_v17, %v14629_v8 }
 0x12b   :  { %v8104_v27 = vpop.permute.xlu1 %1581  ;;  %v8106_v21 = vpop.permute.xlu0 %1601  ;;  %1975 = vperm.xlu1 %6935, %v7635_v38  }
 0x12d   :  { %1818 = vperm.xlu0 %6936, %v14620_v16  }
 0x12f   :  { %v8110_v29 = vpop.permute.xlu1 %1589  ;;  %v8112_v9 = vpop.permute.xlu0 %1609  ;;  %6758 = vmatmul.mubr.bf16.gmra.mrb[44].mxu1 %v772_v33  ;;  %1983 = vperm.xlu1 %6935, %v7650_v41   ;;  %v8166_v33 = vld [vmem:[%s14081_s8 + $0x3] ss:$0 sm:$0xff] }
 0x130   :  { %14628 = vst [vmem:[#allocation15_spill] sm:$0xff] %v8166_v33 }
 0x131   :  { %1826 = vperm.xlu0 %6936, %v14621_v12  }
 0x133   :  { %v8116_v32 = vpop.permute.xlu1 %1597  ;;  %v8118_v45 = vpop.permute.xlu0 %1617  ;;  %1991 = vperm.xlu1 %6935, %v14617_v25  }
 0x135   :  { %1834 = vperm.xlu0 %6936, %v14622_v63  }
 0x137   :  { %v8122_v35 = vpop.permute.xlu1 %1605  ;;  %v8124_v1 = vpop.permute.xlu0 %1625  ;;  %1999 = vperm.xlu1 %6935, %v14618_v54  }
 0x139   :  { %1842 = vperm.xlu0 %6936, %v7746_v59  }
 0x13b   :  { %v8128_v14 = vpop.permute.xlu1 %1613  ;;  %v8130_v38 = vpop.permute.xlu0 %1633  ;;  %2007 = vperm.xlu1 %6935, %v14619_v20   ;;  %v1688_v20 = vadd.f32 %v1656_v51, %v1491_v42 }
 0x13f   :  { %v8134_v19 = vpop.permute.xlu1 %1621  ;;  %v8136_v41 = vpop.permute.xlu0 %1641  ;;  %2015 = vperm.xlu1 %6935, %v14620_v16  }
 0x143   :  { %v8139_v37 = vpop.permute.xlu1 %1629  ;;  %v1920_v26 = vpop.permute.xlu0 %1919  ;;  %2023 = vperm.xlu1 %6935, %v14621_v12  }
 0x144   :  { %14623 = vst [vmem:[#allocation10_spill] sm:$0xff] %v8139_v37  ;;  %v2050_v56 = vmul.f32 %v8166_v33, %v1920_v26  ;;  %v14663_v33 = vld [vmem:[#allocation25_spill] sm:$0xff] }
 0x147   :  { %v8142_v50 = vpop.permute.xlu1 %1637  ;;  %v8144_v55 = vpop.permute.xlu0 %1931  ;;  %2031 = vperm.xlu1 %6935, %v14622_v63  }
 0x148   :  { %14624 = vst [vmem:[#allocation11_spill] sm:$0xff] %v8142_v50  ;;  %14625 = vst [vmem:[#allocation12_spill] sm:$0xff] %v8144_v55  ;;  %v14662_v55 = vld [vmem:[#allocation24_spill] sm:$0xff] }
 0x14b   :  { %v8157_v18 = vpop.permute.xlu1 %1645  ;;  %v8159_v58 = vpop.permute.xlu0 %1939  ;;  %2039 = vperm.xlu1 %6935, %v7746_v59  }
 0x14c   :  { %14626 = vst [vmem:[#allocation13_spill] sm:$0xff] %v8157_v18  ;;  %14627 = vst [vmem:[#allocation14_spill] sm:$0xff] %v8159_v58  ;;  %v14661_v58 = vld [vmem:[#allocation23_spill] sm:$0xff] }
 0x14f   :  { %v1723_v25 = vpop.permute.xlu1 %1722  ;;  %v8176_v54 = vpop.permute.xlu0 %1947  ;;  %6937 = vset.pattern.permute.xlu1 %v14614_v30 }
 0x150   :  { %14630 = vst [vmem:[#allocation16_spill] sm:$0xff] %v8176_v54  ;;  %v1853_v16 = vmul.f32 %v8171_v28, %v1723_v25  ;;  %v14660_v54 = vld [vmem:[#allocation22_spill] sm:$0xff] }
 0x152   :  { %v1885_v12 = vadd.f32 %v1853_v16, %v1688_v20 }
 0x153   :  { %v8181_v43 = vpop.permute.xlu1 %1730  ;;  %v8183_v18 = vpop.permute.xlu0 %1955 }
 0x154   :  { %14631 = vst [vmem:[#allocation34_spill] sm:$0xff] %v8181_v43  ;;  %14632 = vst [vmem:[#allocation35_spill] sm:$0xff] %v8183_v18  ;;  %v8185_v50 = vadd.f32 %v2050_v56, %v1885_v12 }
 0x156   :  { %14633 = vst [vmem:[#allocation36_spill] sm:$0xff] %v8185_v50  ;;  %vm2114_vm2 = vcmp.ge.f32.partialorder %v8185_v50, 0.0  ;;  %v2146_v63 = vmax.f32 %v8185_v50, 1e-06  ;;  %v2178_v51 = vmin.f32 %v8185_v50, -1e-06 }
 0x157   :  { %v8191_v26 = vpop.permute.xlu1 %1734  ;;  %v8193_v8 = vpop.permute.xlu0 %1963 }
 0x158   :  { %14634 = vst [vmem:[#allocation37_spill] sm:$0xff] %v8193_v8  ;;  %v2210_v42 = vsel %vm2114_vm2, %v2146_v63, %v2178_v51  ;;  %v14659_v8 = vld [vmem:[#allocation21_spill] sm:$0xff] }
 0x159   :  { %2244 = vperm.xlu1 %6937, %v2210_v42  }
 0x15b   :  { %v8195_v59 = vpop.permute.xlu1 %1742  ;;  %v8197_v25 = vpop.permute.xlu0 %1971 }
 0x15c   :  { %14635 = vst [vmem:[#allocation38_spill] sm:$0xff] %v8195_v59  ;;  %14636 = vst [vmem:[#allocation39_spill] sm:$0xff] %v8197_v25  ;;  %v14666_v59 = vld [vmem:[#allocation27_spill] sm:$0xff] }
 0x15f   :  { %v8199_v20 = vpop.permute.xlu1 %1750  ;;  %v8201_v56 = vpop.permute.xlu0 %1979 }
 0x160   :  { %14637 = vst [vmem:[#allocation40_spill] sm:$0xff] %v8199_v20  ;;  %14638 = vst [vmem:[#allocation41_spill] sm:$0xff] %v8201_v56 }
 0x163   :  { %v8203_v30 = vpop.permute.xlu1 %1758  ;;  %v8205_v16 = vpop.permute.xlu0 %1987 }
 0x164   :  { %14639 = vst [vmem:[#allocation42_spill] sm:$0xff] %v8203_v30  ;;  %14640 = vst [vmem:[#allocation43_spill] sm:$0xff] %v8205_v16 }
 0x167   :  { %v8207_v12 = vpop.permute.xlu1 %1766  ;;  %v8209_v50 = vpop.permute.xlu0 %1995 }
 0x168   :  { %14641 = vst [vmem:[#allocation44_spill] sm:$0xff] %v8207_v12  ;;  %14642 = vst [vmem:[#allocation45_spill] sm:$0xff] %v8209_v50 }
 0x16b   :  { %v8211_v18 = vpop.permute.xlu1 %1774  ;;  %v8213_v63 = vpop.permute.xlu0 %2003 }
 0x16c   :  { %14643 = vst [vmem:[#allocation46_spill] sm:$0xff] %v8211_v18  ;;  %14644 = vst [vmem:[#allocation47_spill] sm:$0xff] %v8213_v63  ;;  %v14654_v18 = vld [vmem:[#allocation17_spill] sm:$0xff] }
 0x16d   :  { %v1492_v63 = vmul.f32 %v8155_v17, %v14654_v18 }
 0x16f   :  { %v8215_v51 = vpop.permute.xlu1 %1782  ;;  %v8217_v42 = vpop.permute.xlu0 %2011 }
 0x170   :  { %14645 = vst [vmem:[#allocation48_spill] sm:$0xff] %v8215_v51  ;;  %14646 = vst [vmem:[#allocation49_spill] sm:$0xff] %v8217_v42  ;;  %v14655_v51 = vld [vmem:[#allocation18_spill] sm:$0xff] }
 0x171   :  { %v1493_v42 = vmul.f32 %v8155_v17, %v14655_v51  ;;  %v1498_v51 = vmul.f32 %v8155_v17, %v7884_v44  ;;  %v8265_v44 = vmul.f32 %v8155_v17, %v14663_v33  ;;  %v14668_v33 = vld [vmem:[#allocation28_spill] sm:$0xff] }
 0x172   :  { %v8285_v37 = vmul.f32 %v8155_v17, %v14668_v33  ;;  %v8305_v33 = vmul.f32 %v8155_v17, %v8010_v34 }
 0x173   :  { %v8219_v25 = vpop.permute.xlu1 %1790  ;;  %v8221_v20 = vpop.permute.xlu0 %2019 }
 0x174   :  { %14647 = vst [vmem:[#allocation50_spill] sm:$0xff] %v8219_v25  ;;  %14648 = vst [vmem:[#allocation51_spill] sm:$0xff] %v8221_v20  ;;  %v1495_v25 = vmul.f32 %v8155_v17, %v7867_v2  ;;  %v1494_v20 = vmul.f32 %v8155_v17, %v7872_v57  ;;  %v1501_v2 = vmul.f32 %v8155_v17, %v7886_v22  ;;  %v14664_v22 = vld [vmem:[#allocation26_spill] sm:$0xff] }
 0x175   :  { %v1500_v57 = vmul.f32 %v8155_v17, %v7893_v47  ;;  %v1506_v43 = vmul.f32 %v8155_v17, %v14664_v22  ;;  %v1512_v22 = vmul.f32 %v8155_v17, %v7979_v13  ;;  %v1657_v13 = vmul.f32 %v8149_v15, %v8057_v0 }
 0x176   :  { %v8327_v0 = vmul.f32 %v8155_v17, %v8040_v36  ;;  %v1667_v36 = vmul.f32 %v8149_v15, %v8081_v6  ;;  %v1673_v6 = vmul.f32 %v8149_v15, %v8100_v4 }
 0x177   :  { %v8223_v56 = vpop.permute.xlu1 %1798  ;;  %v8225_v30 = vpop.permute.xlu0 %2027 }
 0x178   :  { %14649 = vst [vmem:[#allocation52_spill] sm:$0xff] %v8223_v56  ;;  %14650 = vst [vmem:[#allocation53_spill] sm:$0xff] %v8225_v30  ;;  %v1497_v30 = vmul.f32 %v8155_v17, %v7874_v53  ;;  %v1502_v53 = vmul.f32 %v8155_v17, %v14660_v54  ;;  %v1508_v54 = vmul.f32 %v8155_v17, %v7942_v10 }
 0x179   :  { %v1659_v10 = vmul.f32 %v8149_v15, %v8053_v48  ;;  %v14675_v48 = vld [vmem:[#allocation31_spill] sm:$0xff] }
 0x17b   :  { %v8227_v16 = vpop.permute.xlu1 %1806  ;;  %v8229_v12 = vpop.permute.xlu0 %2035 }
 0x17c   :  { %14651 = vst [vmem:[#allocation54_spill] sm:$0xff] %v8227_v16  ;;  %14652 = vst [vmem:[#allocation55_spill] sm:$0xff] %v8229_v12  ;;  %v14657_v12 = vld [vmem:[#allocation19_spill] sm:$0xff]  ;;  %v14658_v16 = vld [vmem:[#allocation20_spill] sm:$0xff] }
 0x17d   :  { %v1499_v18 = vmul.f32 %v8155_v17, %v14658_v16  ;;  %v1504_v16 = vmul.f32 %v8155_v17, %v14662_v55  ;;  %v1510_v55 = vmul.f32 %v8155_v17, %v7960_v7  ;;  %14669 = vst [vmem:[#allocation20_spill] sm:$0xff] %v8285_v37  ;;  %v14672_v7 = vld [vmem:[#allocation29_spill] sm:$0xff]  ;;  %v8315_v37 = vmul.f32 %v8155_v17, %v14675_v48 }
 0x17e   :  { %v1663_v48 = vmul.f32 %v8149_v15, %v8066_v60  ;;  %v1669_v60 = vmul.f32 %v8149_v15, %v8087_v39  ;;  %v1670_v39 = vmul.f32 %v8149_v15, %v8104_v27  ;;  %v1672_v27 = vmul.f32 %v8149_v15, %v8110_v29 }
 0x17f   :  { %v8231_v50 = vpop.permute.xlu1 %1814  ;;  %v8241_v56 = vpop.permute.xlu0 %2043 }
 0x180   :  { %14653 = vst [vmem:[#allocation56_spill] sm:$0xff] %v8231_v50  ;;  %14656 = vst [vmem:[#allocation17_spill] sm:$0xff] %v8241_v56  ;;  %v1496_v50 = vmul.f32 %v8155_v17, %v14657_v12  ;;  %v1503_v56 = vmul.f32 %v8155_v17, %v14659_v8  ;;  %v1505_v12 = vmul.f32 %v8155_v17, %v14661_v58 }
 0x181   :  { %v8273_v8 = vmul.f32 %v8155_v17, %v14666_v59  ;;  %v8279_v58 = vmul.f32 %v8155_v17, %v7944_v40  ;;  %v8291_v59 = vmul.f32 %v8155_v17, %v7981_v3  ;;  %v8297_v40 = vmul.f32 %v8155_v17, %v7996_v11  ;;  %v14673_v3 = vld [vmem:[#allocation30_spill] sm:$0xff]  ;;  %v14676_v11 = vld [vmem:[#allocation32_spill] sm:$0xff] }
 0x183   :  { %v8269_v47 = vpop.permute.xlu1 %1822  ;;  %14667 = vst [vmem:[#allocation19_spill] sm:$0xff] %v8279_v58  ;;  %14670 = vst [vmem:[#allocation21_spill] sm:$0xff] %v8291_v59  ;;  %v8301_v58 = vmul.f32 %v8155_v17, %v14672_v7  ;;  %v8311_v59 = vmul.f32 %v8155_v17, %v14673_v3  ;;  %v1661_v7 = vmul.f32 %v8149_v15, %v8059_v61 }
 0x184   :  { %14665 = vst [vmem:[#allocation18_spill] sm:$0xff] %v8269_v47  ;;  %v1727_v47 = vpop.permute.xlu0 %1726  ;;  %14671 = vst [vmem:[#allocation22_spill] sm:$0xff] %v8297_v40  ;;  %v8319_v40 = vmul.f32 %v8155_v17, %v14676_v11  ;;  %v1658_v3 = vmul.f32 %v8149_v15, %v8064_v46  ;;  %v1691_v11 = vadd.f32 %v1659_v10, %v1494_v20 }
 0x185   :  { %14674 = vst [vmem:[#allocation23_spill] sm:$0xff] %v8311_v59  ;;  %v1660_v59 = vmul.f32 %v8149_v15, %v8071_v49  ;;  %v1662_v61 = vmul.f32 %v8149_v15, %v8079_v62  ;;  %v1664_v46 = vmul.f32 %v8149_v15, %v8085_v23  ;;  %v1666_v49 = vmul.f32 %v8149_v15, %v8092_v24 }
 0x186   :  { %14677 = vst [vmem:[#allocation24_spill] sm:$0xff] %v8319_v40  ;;  %v1665_v40 = vmul.f32 %v8149_v15, %v8073_v5  ;;  %v1693_v20 = vadd.f32 %v1661_v7, %v1496_v50  ;;  %v1671_v5 = vmul.f32 %v8149_v15, %v8094_v31  ;;  %v1668_v62 = vmul.f32 %v8149_v15, %v8098_v52 }
 0x187   :  { %v8323_v34 = vpop.permute.xlu1 %1830  ;;  %v1690_v10 = vadd.f32 %v1658_v3, %v1493_v42  ;;  %v8357_v23 = vadd.f32 %v1663_v48, %v1498_v51  ;;  %v8365_v50 = vadd.f32 %v1662_v61, %v1497_v30  ;;  %v8367_v31 = vadd.f32 %v1667_v36, %v1502_v53 }
 0x188   :  { %14678 = vst [vmem:[#allocation25_spill] sm:$0xff] %v8323_v34  ;;  %v8341_v17 = vpop.permute.xlu0 %1738  ;;  %v1689_v34 = vadd.f32 %v1657_v13, %v1492_v63  ;;  %v8359_v13 = vadd.f32 %v1660_v59, %v1495_v25  ;;  %v8363_v24 = vadd.f32 %v1665_v40, %v1500_v57  ;;  %v1675_v52 = vmul.f32 %v8149_v15, %v8106_v21  ;;  %v14680_v40 = vld [vmem:[#allocation38_spill] sm:$0xff] }
 0x189   :  { %v8373_v7 = vadd.f32 %v1664_v46, %v1499_v18  ;;  %v8375_v42 = vadd.f32 %v1669_v60, %v1504_v16  ;;  %v8377_v25 = vadd.f32 %v1666_v49, %v1501_v2  ;;  %v8381_v51 = vadd.f32 %v1671_v5, %v1506_v43  ;;  %v14684_v49 = vld [vmem:[#allocation15_spill] sm:$0xff] }
 0x18a   :  { %v8383_v30 = vadd.f32 %v1668_v62, %v1503_v56  ;;  %v8385_v57 = vadd.f32 %v1673_v6, %v1508_v54  ;;  %v1677_v21 = vmul.f32 %v8149_v15, %v8112_v9  ;;  %v8391_v18 = vadd.f32 %v1670_v39, %v1505_v12  ;;  %v14683_v36 = vld [vmem:[#allocation19_spill] sm:$0xff] }
 0x18b   :  { %v8355_v63 = vpop.permute.xlu1 %1838  ;;  %v1674_v2 = vmul.f32 %v8149_v15, %v8116_v32  ;;  %v1679_v16 = vmul.f32 %v8149_v15, %v8118_v45  ;;  %v1856_v43 = vmul.f32 %v8171_v28, %v8191_v26  ;;  %v8399_v29 = vadd.f32 %v1675_v52, %v1510_v55  ;;  %v14686_v52 = vld [vmem:[#allocation21_spill] sm:$0xff] }
 0x18c   :  { %v8371_v4 = vpop.permute.xlu0 %1746  ;;  %v1676_v56 = vmul.f32 %v8149_v15, %v8122_v35  ;;  %v1681_v9 = vmul.f32 %v8149_v15, %v8124_v1  ;;  %v1854_v12 = vmul.f32 %v8171_v28, %v1727_v47  ;;  %v8409_v32 = vadd.f32 %v1672_v27, %v8265_v44  ;;  %v14679_v47 = vld [vmem:[#allocation10_spill] sm:$0xff]  ;;  %v14687_v27 = vld [vmem:[#allocation12_spill] sm:$0xff] }
 0x18d   :  { %v1678_v45 = vmul.f32 %v8149_v15, %v8128_v14  ;;  %v1683_v26 = vmul.f32 %v8149_v15, %v8130_v38  ;;  %v1680_v55 = vmul.f32 %v8149_v15, %v8134_v19  ;;  %v8417_v35 = vadd.f32 %v1677_v21, %v1512_v22  ;;  %v14681_v14 = vld [vmem:[#allocation22_spill] sm:$0xff] }
 0x18e   :  { %v1685_v1 = vmul.f32 %v8149_v15, %v8136_v41  ;;  %v1682_v59 = vmul.f32 %v8149_v15, %v14679_v47  ;;  %v1858_v44 = vmul.f32 %v8171_v28, %v14680_v40  ;;  %v8426_v3 = vadd.f32 %v1674_v2, %v8273_v8  ;;  %v14682_v38 = vld [vmem:[#allocation34_spill] sm:$0xff]  ;;  %v14685_v8 = vld [vmem:[#allocation20_spill] sm:$0xff] }
 0x18f   :  { %v8389_v53 = vpop.permute.xlu1 %1846  ;;  %v8429_v48 = vadd.f32 %v1679_v16, %v14681_v14  ;;  %v1855_v19 = vmul.f32 %v8171_v28, %v14682_v38  ;;  %v1888_v22 = vadd.f32 %v1856_v43, %v1691_v11  ;;  %v8434_v46 = vadd.f32 %v1676_v56, %v14683_v36  ;;  %v14689_v43 = vld [vmem:[#allocation14_spill] sm:$0xff]  ;;  %v14694_v40 = vld [vmem:[#allocation40_spill] sm:$0xff]  ;;  %v14698_v36 = vld [vmem:[#allocation39_spill] sm:$0xff] }
 0x190   :  { %v8406_v54 = vpop.permute.xlu0 %1754  ;;  %v8437_v41 = vadd.f32 %v1681_v9, %v8305_v33  ;;  %v1886_v60 = vadd.f32 %v1854_v12, %v1689_v34  ;;  %v8443_v6 = vadd.f32 %v1678_v45, %v14685_v8  ;;  %v8446_v39 = vadd.f32 %v1683_v26, %v8315_v37  ;;  %v14696_v38 = vld [vmem:[#allocation42_spill] sm:$0xff] }
 0x191   :  { %v8449_v11 = vadd.f32 %v1680_v55, %v14686_v52  ;;  %v2053_v21 = vmul.f32 %v14684_v49, %v14687_v27  ;;  %v8454_v33 = vadd.f32 %v1685_v1, %v8327_v0  ;;  %v8457_v34 = vadd.f32 %v1682_v59, %v8301_v58  ;;  %v14691_v55 = vld [vmem:[#allocation16_spill] sm:$0xff]  ;;  %v14693_v59 = vld [vmem:[#allocation37_spill] sm:$0xff] }
 0x192   :  { %v1890_v2 = vadd.f32 %v1858_v44, %v1693_v20  ;;  %v2055_v56 = vmul.f32 %v14684_v49, %v14689_v43  ;;  %v1887_v37 = vadd.f32 %v1855_v19, %v1690_v10  ;;  %v1857_v12 = vmul.f32 %v8171_v28, %v8341_v17  ;;  %v14692_v10 = vld [vmem:[#allocation35_spill] sm:$0xff] }
 0x193   :  { %v1924_v61 = vpop.permute.xlu1 %1923  ;;  %v8463_v9 = vadd.f32 %v2053_v21, %v1888_v22  ;;  %v2057_v1 = vmul.f32 %v14684_v49, %v14691_v55  ;;  %v2059_v47 = vmul.f32 %v14684_v49, %v14692_v10  ;;  %v8479_v17 = vmul.f32 %v14684_v49, %v14693_v59 }
 0x194   :  { %v2051_v5 = vmul.f32 %v14684_v49, %v1924_v61  ;;  %v8440_v62 = vpop.permute.xlu0 %1762  ;;  %v1860_v44 = vmul.f32 %v8171_v28, %v14694_v40  ;;  %v8483_v14 = vadd.f32 %v2055_v56, %v1890_v2  ;;  %v1862_v19 = vmul.f32 %v8171_v28, %v14696_v38 }
 0x195   :  { %14690 = vst [vmem:[#allocation27_spill] sm:$0xff] %v8463_v9  ;;  %v1859_v8 = vmul.f32 %v8171_v28, %v8371_v4  ;;  %vm2117_vm4 = vcmp.ge.f32.partialorder %v8463_v9, 0.0  ;;  %v2149_v4 = vmax.f32 %v8463_v9, 1e-06 }
 0x196   :  { %v8459_v16 = vadd.f32 %v2051_v5, %v1886_v60  ;;  %14695 = vst [vmem:[#allocation28_spill] sm:$0xff] %v8483_v14  ;;  %v8491_v60 = vmul.f32 %v14684_v49, %v14698_v36  ;;  %v1889_v5 = vadd.f32 %v1857_v12, %v8359_v13  ;;  %v1892_v56 = vadd.f32 %v1860_v44, %v8357_v23  ;;  %v14699_v13 = vld [vmem:[#allocation41_spill] sm:$0xff] }
 0x197   :  { %v1928_v45 = vpop.permute.xlu1 %1927  ;;  %v2181_v12 = vmin.f32 %v8463_v9, -1e-06  ;;  %vm2119_vm6 = vcmp.ge.f32.partialorder %v8483_v14, 0.0  ;;  %v1861_v23 = vmul.f32 %v8171_v28, %v8406_v54  ;;  %v2151_v10 = vmax.f32 %v8483_v14, 1e-06 }
 0x198   :  { %14688 = vst [vmem:[#allocation26_spill] sm:$0xff] %v8459_v16  ;;  %v2052_v26 = vmul.f32 %v14684_v49, %v1928_v45  ;;  %v8468_v0 = vpop.permute.xlu0 %1770  ;;  %vm2115_vm3 = vcmp.ge.f32.partialorder %v8459_v16, 0.0  ;;  %v2147_v58 = vmax.f32 %v8459_v16, 1e-06  ;;  %v2179_v20 = vmin.f32 %v8459_v16, -1e-06 }
 0x199   :  { %v1894_v45 = vadd.f32 %v1862_v19, %v8363_v24  ;;  %v2183_v59 = vmin.f32 %v8483_v14, -1e-06  ;;  %v14702_v19 = vld [vmem:[#allocation43_spill] sm:$0xff] }
 0x19a   :  { %v8487_v22 = vadd.f32 %v2052_v26, %v1887_v37  ;;  %v2211_v61 = vsel %vm2115_vm3, %v2147_v58, %v2179_v20  ;;  %v8506_v37 = vmul.f32 %v14684_v49, %v14699_v13  ;;  %v1891_v20 = vadd.f32 %v1859_v8, %v8365_v50 }
 0x19b   :  { %v1936_v52 = vpop.permute.xlu1 %1935  ;;  %2249 = vperm.xlu0 %6936, %v2211_v61   ;;  %v8525_v50 = vadd.f32 %v2057_v1, %v1892_v56  ;;  %v8529_v54 = vmul.f32 %v14684_v49, %v14702_v19  ;;  %v14703_v61 = vld [vmem:[#allocation44_spill] sm:$0xff]  ;;  %v8535_v8 = vadd.f32 %v2059_v47, %v1894_v45  ;;  %v1893_v1 = vadd.f32 %v1861_v23, %v8373_v7 }
 0x19c   :  { %14697 = vst [vmem:[#allocation29_spill] sm:$0xff] %v8487_v22  ;;  %v2054_v27 = vmul.f32 %v14684_v49, %v1936_v52  ;;  %v8498_v21 = vpop.permute.xlu0 %1778  ;;  %vm2116_vm5 = vcmp.ge.f32.partialorder %v8487_v22, 0.0  ;;  %v2148_v2 = vmax.f32 %v8487_v22, 1e-06  ;;  %v2180_v43 = vmin.f32 %v8487_v22, -1e-06 }
 0x19d   :  { %14701 = vst [vmem:[#allocation31_spill] sm:$0xff] %v8525_v50  ;;  %v1864_v36 = vmul.f32 %v8171_v28, %v14703_v61  ;;  %14704 = vst [vmem:[#allocation32_spill] sm:$0xff] %v8535_v8  ;;  %v14705_v52 = vld [vmem:[#allocation46_spill] sm:$0xff]  ;;  %v1863_v56 = vmul.f32 %v8171_v28, %v8440_v62  ;;  %vm2121_vm9 = vcmp.ge.f32.partialorder %v8525_v50, 0.0  ;;  %v2153_v62 = vmax.f32 %v8525_v50, 1e-06 }
 0x19e   :  { %v8511_v26 = vadd.f32 %v2054_v27, %v1889_v5  ;;  %v2212_v58 = vsel %vm2116_vm5, %v2148_v2, %v2180_v43  ;;  %v2213_v5 = vsel %vm2117_vm4, %v2149_v4, %v2181_v12  ;;  %v1866_v27 = vmul.f32 %v8171_v28, %v14705_v52 }
 0x19f   :  { %v1944_v55 = vpop.permute.xlu1 %1943  ;;  %2254 = vperm.xlu1 %6937, %v2212_v58   ;;  %v2215_v58 = vsel %vm2119_vm6, %v2151_v10, %v2183_v59  ;;  %v1896_v7 = vadd.f32 %v1864_v36, %v8367_v31  ;;  %vm2123_vm10 = vcmp.ge.f32.partialorder %v8535_v8, 0.0  ;;  %v1895_v59 = vadd.f32 %v1863_v56, %v8377_v25  ;;  %v14708_v36 = vld [vmem:[#allocation45_spill] sm:$0xff] }
 0x1a0   :  { %14700 = vst [vmem:[#allocation30_spill] sm:$0xff] %v8511_v26  ;;  %v2056_v40 = vmul.f32 %v14684_v49, %v1944_v55  ;;  %v8520_v44 = vpop.permute.xlu0 %1786  ;;  %vm2118_vm7 = vcmp.ge.f32.partialorder %v8511_v26, 0.0  ;;  %v2150_v24 = vmax.f32 %v8511_v26, 1e-06  ;;  %v2182_v38 = vmin.f32 %v8511_v26, -1e-06 }
 0x1a1   :  { %v1898_v23 = vadd.f32 %v1866_v27, %v8375_v42  ;;  %v2155_v31 = vmax.f32 %v8535_v8, 1e-06  ;;  %v8570_v25 = vadd.f32 %v8479_v17, %v1896_v7 }
 0x1a2   :  { %v8539_v2 = vadd.f32 %v2056_v40, %v1891_v20  ;;  %v2214_v43 = vsel %vm2118_vm7, %v2150_v24, %v2182_v38  ;;  %v2185_v20 = vmin.f32 %v8525_v50, -1e-06  ;;  %v1865_v40 = vmul.f32 %v8171_v28, %v8468_v0 }
 0x1a3   :  { %v1952_v13 = vpop.permute.xlu1 %1951  ;;  %2259 = vperm.xlu1 %6937, %v2213_v5   ;;  %2264 = vperm.xlu0 %6936, %v2214_v43   ;;  %v2187_v38 = vmin.f32 %v8535_v8, -1e-06  ;;  %14707 = vst [vmem:[#allocation38_spill] sm:$0xff] %v8570_v25  ;;  %v8574_v0 = vmul.f32 %v14684_v49, %v14708_v36  ;;  %v14709_v5 = vld [vmem:[#allocation48_spill] sm:$0xff]  ;;  %v8581_v43 = vadd.f32 %v8491_v60, %v1898_v23  ;;  %vm2125_vm13 = vcmp.ge.f32.partialorder %v8570_v25, 0.0 }
 0x1a4   :  { %14706 = vst [vmem:[#allocation10_spill] sm:$0xff] %v8539_v2  ;;  %v2058_v47 = vmul.f32 %v14684_v49, %v1952_v13  ;;  %v8547_v4 = vpop.permute.xlu0 %1794  ;;  %vm2120_vm8 = vcmp.ge.f32.partialorder %v8539_v2, 0.0  ;;  %v2152_v12 = vmax.f32 %v8539_v2, 1e-06  ;;  %v2184_v45 = vmin.f32 %v8539_v2, -1e-06 }
 0x1a5   :  { %v1868_v52 = vmul.f32 %v8171_v28, %v14709_v5  ;;  %v2217_v27 = vsel %vm2121_vm9, %v2153_v62, %v2185_v20  ;;  %14710 = vst [vmem:[#allocation22_spill] sm:$0xff] %v8581_v43  ;;  %v2219_v7 = vsel %vm2123_vm10, %v2155_v31, %v2187_v38  ;;  %vm2127_vm14 = vcmp.ge.f32.partialorder %v8581_v43, 0.0 }
 0x1a6   :  { %v8557_v55 = vadd.f32 %v2058_v47, %v1893_v1  ;;  %v2216_v10 = vsel %vm2120_vm8, %v2152_v12, %v2184_v45  ;;  %v14711_v1 = vld [vmem:[#allocation50_spill] sm:$0xff]  ;;  %v1897_v47 = vadd.f32 %v1865_v40, %v8383_v30  ;;  %v1867_v12 = vmul.f32 %v8171_v28, %v8498_v21 }
 0x1a7   :  { %v1960_v24 = vpop.permute.xlu1 %1959  ;;  %2269 = vperm.xlu1 %6937, %v2215_v58   ;;  %2274 = vperm.xlu0 %6936, %v2216_v10   ;;  %v1870_v56 = vmul.f32 %v8171_v28, %v14711_v1  ;;  %v1900_v23 = vadd.f32 %v1868_v52, %v8381_v51  ;;  %v2157_v30 = vmax.f32 %v8570_v25, 1e-06  ;;  %v2189_v21 = vmin.f32 %v8570_v25, -1e-06  ;;  %v14714_v52 = vld [vmem:[#allocation52_spill] sm:$0xff] }
 0x1a8   :  { %v2060_v19 = vmul.f32 %v14684_v49, %v1960_v24  ;;  %vm2122_vm11 = vcmp.ge.f32.partialorder %v8557_v55, 0.0  ;;  %v2154_v42 = vmax.f32 %v8557_v55, 1e-06  ;;  %v2186_v61 = vmin.f32 %v8557_v55, -1e-06  ;;  %v1803_v17 = vpop.permute.xlu0 %1802 }
 0x1a9   :  { %v1902_v10 = vadd.f32 %v1870_v56, %v8385_v57  ;;  %v1899_v24 = vadd.f32 %v1867_v12, %v8391_v18  ;;  %v1869_v31 = vmul.f32 %v8171_v28, %v8520_v44  ;;  %v2159_v51 = vmax.f32 %v8581_v43, 1e-06  ;;  %v14712_v18 = vld [vmem:[#allocation47_spill] sm:$0xff] }
 0x1aa   :  { %v8585_v13 = vadd.f32 %v2060_v19, %v1895_v59  ;;  %v2218_v58 = vsel %vm2122_vm11, %v2154_v42, %v2186_v61  ;;  %v2191_v19 = vmin.f32 %v8581_v43, -1e-06  ;;  %v2071_v5 = vmul.f32 %v14684_v49, %v14712_v18  ;;  %v14718_v18 = vld [vmem:[#allocation49_spill] sm:$0xff] }
 0x1ab   :  { %v1968_v45 = vpop.permute.xlu1 %1967  ;;  %2279 = vperm.xlu1 %6937, %v2217_v27   ;;  %2284 = vperm.xlu0 %6936, %v2218_v58   ;;  %v8616_v44 = vadd.f32 %v8506_v37, %v1900_v23  ;;  %v1872_v27 = vmul.f32 %v8171_v28, %v14714_v52  ;;  %v2221_v1 = vsel %vm2125_vm13, %v2157_v30, %v2189_v21  ;;  %v14716_v58 = vld [vmem:[#allocation54_spill] sm:$0xff] }
 0x1ac   :  { %v2062_v60 = vmul.f32 %v14684_v49, %v1968_v45  ;;  %vm2124_vm12 = vcmp.ge.f32.partialorder %v8585_v13, 0.0  ;;  %v2156_v62 = vmax.f32 %v8585_v13, 1e-06  ;;  %v2188_v20 = vmin.f32 %v8585_v13, -1e-06  ;;  %v1811_v42 = vpop.permute.xlu0 %1810 }
 0x1ad   :  { %14713 = vst [vmem:[#allocation34_spill] sm:$0xff] %v8616_v44  ;;  %v8623_v56 = vadd.f32 %v8529_v54, %v1902_v10  ;;  %v1871_v37 = vmul.f32 %v8171_v28, %v8547_v4  ;;  %v1904_v30 = vadd.f32 %v1872_v27, %v8399_v29  ;;  %vm2129_vm1 = vcmp.ge.f32.partialorder %v8616_v44, 0.0  ;;  %v14720_v27 = vld [vmem:[#allocation56_spill] sm:$0xff] }
 0x1ae   :  { %v8601_v59 = vadd.f32 %v2062_v60, %v1897_v47  ;;  %v2220_v40 = vsel %vm2124_vm12, %v2156_v62, %v2188_v20  ;;  %v1874_v47 = vmul.f32 %v8171_v28, %v14716_v58  ;;  %v2223_v62 = vsel %vm2127_vm14, %v2159_v51, %v2191_v19 }
 0x1af   :  { %v1976_v38 = vpop.permute.xlu1 %1975  ;;  %2289 = vperm.xlu1 %6937, %v2219_v7   ;;  %2294 = vperm.xlu0 %6936, %v2220_v40   ;;  %14715 = vst [vmem:[#allocation19_spill] sm:$0xff] %v8623_v56  ;;  %v1901_v7 = vadd.f32 %v1869_v31, %v8409_v32  ;;  %v2161_v32 = vmax.f32 %v8616_v44, 1e-06  ;;  %v2193_v4 = vmin.f32 %v8616_v44, -1e-06  ;;  %vm2131_vm2 = vcmp.ge.f32.partialorder %v8623_v56, 0.0 }
 0x1b0   :  { %v2064_v57 = vmul.f32 %v14684_v49, %v1976_v38  ;;  %vm2126_vm15 = vcmp.ge.f32.partialorder %v8601_v59, 0.0  ;;  %v2158_v61 = vmax.f32 %v8601_v59, 1e-06  ;;  %v2190_v36 = vmin.f32 %v8601_v59, -1e-06  ;;  %v1819_v10 = vpop.permute.xlu0 %1818 }
 0x1b1   :  { %v1906_v21 = vadd.f32 %v1874_v47, %v8417_v35  ;;  %v1903_v31 = vadd.f32 %v1871_v37, %v8426_v3  ;;  %v1873_v38 = vmul.f32 %v8171_v28, %v1803_v17  ;;  %v2163_v29 = vmax.f32 %v8623_v56, 1e-06 }
 0x1b2   :  { %v8627_v12 = vadd.f32 %v2064_v57, %v1899_v24  ;;  %v2222_v45 = vsel %vm2126_vm15, %v2158_v61, %v2190_v36  ;;  %v2195_v19 = vmin.f32 %v8623_v56, -1e-06  ;;  %v14717_v36 = vld [vmem:[#allocation11_spill] sm:$0xff]  ;;  %v2073_v17 = vmul.f32 %v14684_v49, %v14718_v18  ;;  %v14726_v18 = vld [vmem:[#allocation25_spill] sm:$0xff] }
 0x1b3   :  { %v1984_v60 = vpop.permute.xlu1 %1983  ;;  %2299 = vperm.xlu1 %6937, %v2221_v1   ;;  %2304 = vperm.xlu0 %6936, %v2222_v45   ;;  %v1684_v3 = vmul.f32 %v8149_v15, %v14717_v36  ;;  %v8659_v52 = vadd.f32 %v8574_v0, %v1904_v30  ;;  %v1876_v1 = vmul.f32 %v8171_v28, %v14720_v27 }
 0x1b4   :  { %v2066_v54 = vmul.f32 %v14684_v49, %v1984_v60  ;;  %vm2128_vm0 = vcmp.ge.f32.partialorder %v8627_v12, 0.0  ;;  %v2160_v20 = vmax.f32 %v8627_v12, 1e-06  ;;  %v2192_v23 = vmin.f32 %v8627_v12, -1e-06 }
 0x1b5   :  { %14719 = vst [vmem:[#allocation15_spill] sm:$0xff] %v8659_v52  ;;  %v8663_v58 = vadd.f32 %v2071_v5, %v1906_v21  ;;  %v2225_v45 = vsel %vm2129_vm1, %v2161_v32, %v2193_v4  ;;  %v1905_v37 = vadd.f32 %v1873_v38, %v8434_v46  ;;  %v1875_v60 = vmul.f32 %v8171_v28, %v1811_v42  ;;  %v14722_v46 = vld [vmem:[#allocation18_spill] sm:$0xff] }
 0x1b6   :  { %v8643_v40 = vadd.f32 %v2066_v54, %v1901_v7  ;;  %v2224_v24 = vsel %vm2128_vm0, %v2160_v20, %v2192_v23  ;;  %v2227_v0 = vsel %vm2131_vm2, %v2163_v29, %v2195_v19  ;;  %v1827_v54 = vpop.permute.xlu0 %1826  ;;  %v1908_v30 = vadd.f32 %v1876_v1, %v8429_v48  ;;  %v14727_v1 = vld [vmem:[#allocation51_spill] sm:$0xff] }
 0x1b7   :  { %v1992_v51 = vpop.permute.xlu1 %1991  ;;  %2309 = vperm.xlu1 %6937, %v2223_v62   ;;  %2314 = vperm.xlu0 %6936, %v2224_v24   ;;  %14721 = vst [vmem:[#allocation20_spill] sm:$0xff] %v8663_v58  ;;  %v1878_v42 = vmul.f32 %v8171_v28, %v14722_v46  ;;  %vm2133_vm5 = vcmp.ge.f32.partialorder %v8659_v52, 0.0  ;;  %v2165_v32 = vmax.f32 %v8659_v52, 1e-06  ;;  %v2197_v24 = vmin.f32 %v8659_v52, -1e-06 }
 0x1b8   :  { %v2068_v57 = vmul.f32 %v14684_v49, %v1992_v51  ;;  %vm2130_vm3 = vcmp.ge.f32.partialorder %v8643_v40, 0.0  ;;  %v2162_v35 = vmax.f32 %v8643_v40, 1e-06  ;;  %v2194_v61 = vmin.f32 %v8643_v40, -1e-06 }
 0x1b9   :  { %vm2135_vm6 = vcmp.ge.f32.partialorder %v8663_v58, 0.0  ;;  %v1877_v38 = vmul.f32 %v8171_v28, %v1819_v10  ;;  %v2167_v48 = vmax.f32 %v8663_v58, 1e-06  ;;  %v2199_v29 = vmin.f32 %v8663_v58, -1e-06 }
 0x1ba   :  { %v8665_v47 = vadd.f32 %v2068_v57, %v1903_v31  ;;  %v2226_v7 = vsel %vm2130_vm3, %v2162_v35, %v2194_v61  ;;  %v1907_v31 = vadd.f32 %v1875_v60, %v8443_v6  ;;  %v14724_v61 = vld [vmem:[#allocation23_spill] sm:$0xff]  ;;  %v8695_v6 = vadd.f32 %v2073_v17, %v1908_v30 }
 0x1bb   :  { %v2000_v62 = vpop.permute.xlu1 %1999  ;;  %2319 = vperm.xlu1 %6937, %v2225_v45   ;;  %2324 = vperm.xlu0 %6936, %v2226_v7   ;;  %v1716_v36 = vadd.f32 %v1684_v3, %v14724_v61  ;;  %v1910_v10 = vadd.f32 %v1878_v42, %v8437_v41  ;;  %v1880_v27 = vmul.f32 %v8171_v28, %v14726_v18  ;;  %v1835_v7 = vpop.permute.xlu0 %1834  ;;  %vm1005_vm1 = vcmask 212096  }
 0x1bc   :  { %v2070_v5 = vmul.f32 %v14684_v49, %v2000_v62  ;;  %vm2132_vm4 = vcmp.ge.f32.partialorder %v8665_v47, 0.0  ;;  %v2164_v20 = vmax.f32 %v8665_v47, 1e-06  ;;  %v2196_v23 = vmin.f32 %v8665_v47, -1e-06  ;;  %14725 = vst [vmem:[#allocation12_spill] sm:$0xff] %v8695_v6 }
 0x1bd   :  { %v2075_v45 = vmul.f32 %v14684_v49, %v14727_v1  ;;  %v2229_v60 = vsel %vm2133_vm5, %v2165_v32, %v2197_v24  ;;  %v1879_v3 = vmul.f32 %v8171_v28, %v1827_v54  ;;  %v2231_v41 = vsel %vm2135_vm6, %v2167_v48, %v2199_v29  ;;  %v14731_v24 = vld [vmem:[#allocation53_spill] sm:$0xff] }
 0x1be   :  { %v8682_v4 = vadd.f32 %v2070_v5, %v1905_v37  ;;  %v2228_v21 = vsel %vm2132_vm4, %v2164_v20, %v2196_v23  ;;  %v2169_v54 = vmax.f32 %v8695_v6, 1e-06  ;;  %v2201_v46 = vmin.f32 %v8695_v6, -1e-06 }
 0x1bf   :  { %v2008_v51 = vpop.permute.xlu1 %2007  ;;  %2329 = vperm.xlu1 %6937, %v2227_v0   ;;  %2334 = vperm.xlu0 %6936, %v2228_v21   ;;  %v1909_v0 = vadd.f32 %v1877_v38, %v8449_v11  ;;  %v8714_v30 = vadd.f32 %v2075_v45, %v1910_v10  ;;  %v1912_v11 = vadd.f32 %v1880_v27, %v8446_v39  ;;  %vm2137_vm9 = vcmp.ge.f32.partialorder %v8695_v6, 0.0  ;;  %v1843_v48 = vpop.permute.xlu0 %1842 }
 0x1c0   :  { %14723 = vst [vmem:[#allocation21_spill] sm:$0xff] %v8682_v4  ;;  %v2072_v19 = vmul.f32 %v14684_v49, %v2008_v51  ;;  %vm2134_vm7 = vcmp.ge.f32.partialorder %v8682_v4, 0.0  ;;  %v2166_v57 = vmax.f32 %v8682_v4, 1e-06  ;;  %v2198_v35 = vmin.f32 %v8682_v4, -1e-06 }
 0x1c1   :  { %14729 = vst [vmem:[#allocation16_spill] sm:$0xff] %v8714_v30  ;;  %v1882_v42 = vmul.f32 %v8171_v28, %v8355_v63  ;;  %v1911_v38 = vadd.f32 %v1879_v3, %v8457_v34  ;;  %v1881_v51 = vmul.f32 %v8171_v28, %v1835_v7  ;;  %v2233_v18 = vsel %vm2137_vm9, %v2169_v54, %v2201_v46 }
 0x1c2   :  { %v8702_v37 = vadd.f32 %v2072_v19, %v1907_v31  ;;  %v2230_v62 = vsel %vm2134_vm7, %v2166_v57, %v2198_v35  ;;  %v2077_v31 = vmul.f32 %v14684_v49, %v14731_v24  ;;  %v14732_v35 = vld [vmem:[#allocation13_spill] sm:$0xff]  ;;  %v2171_v27 = vmax.f32 %v8714_v30, 1e-06 }
 0x1c3   :  { %v2016_v17 = vpop.permute.xlu1 %2015  ;;  %2339 = vperm.xlu1 %6937, %v2229_v60   ;;  %2344 = vperm.xlu0 %6936, %v2230_v62   ;;  %v1686_v61 = vmul.f32 %v8149_v15, %v14732_v35  ;;  %v1914_v1 = vadd.f32 %v1882_v42, %v8454_v33  ;;  %v2203_v62 = vmin.f32 %v8714_v30, -1e-06  ;;  %v1913_v3 = vadd.f32 %v1881_v51, %v1716_v36  ;;  %v14737_v36 = vld [vmem:[#allocation24_spill] sm:$0xff] }
 0x1c4   :  { %14728 = vst [vmem:[#allocation14_spill] sm:$0xff] %v8702_v37  ;;  %v2074_v5 = vmul.f32 %v14684_v49, %v2016_v17  ;;  %vm2136_vm8 = vcmp.ge.f32.partialorder %v8702_v37, 0.0  ;;  %v2168_v20 = vmax.f32 %v8702_v37, 1e-06  ;;  %v2200_v23 = vmin.f32 %v8702_v37, -1e-06 }
 0x1c5   :  { %v8729_v19 = vpop.f32.mrb[16].mxu1  ;;  %v8736_v34 = vadd.f32 %v2077_v31, %v1912_v11  ;;  %v1883_v17 = vmul.f32 %v8171_v28, %v1843_v48  ;;  %vm2139_vm11 = vcmp.ge.f32.partialorder %v8714_v30, 0.0  ;;  %v1718_v11 = vadd.f32 %v1686_v61, %v14737_v36 }
 0x1c6   :  { %v8721_v32 = vadd.f32 %v2074_v5, %v1909_v0  ;;  %v2232_v21 = vsel %vm2136_vm8, %v2168_v20, %v2200_v23  ;;  %v8738_v10 = vpop.f32.mrb[17].mxu1  ;;  %v14735_v0 = vld [vmem:[#allocation55_spill] sm:$0xff]  ;;  %v2235_v31 = vsel %vm2139_vm11, %v2171_v27, %v2203_v62  ;;  %vm2956_vm4 = vcmask 523264  }
 0x1c7   :  { %v2024_v39 = vpop.permute.xlu1 %2023  ;;  %2349 = vperm.xlu1 %6937, %v2231_v41   ;;  %2354 = vperm.xlu0 %6936, %v2232_v21   ;;  %14733 = vst [vmem:[#allocation37_spill] sm:$0xff] %v8736_v34  ;;  %v8746_v7 = vpop.f32.mrb[18].mxu1  ;;  %v2079_v15 = vmul.f32 %v14684_v49, %v14735_v0  ;;  %v8755_v41 = vld [vmem:[%s14080_s7] ss:$0 sm:$0xff]  ;;  %v2173_v46 = vmax.f32 %v8736_v34, 1e-06 }
 0x1c8   :  { %14730 = vst [vmem:[#allocation35_spill] sm:$0xff] %v8721_v32  ;;  %v2076_v29 = vmul.f32 %v14684_v49, %v2024_v39  ;;  %vm2138_vm10 = vcmp.ge.f32.partialorder %v8721_v32, 0.0  ;;  %v2170_v63 = vmax.f32 %v8721_v32, 1e-06  ;;  %v2202_v57 = vmin.f32 %v8721_v32, -1e-06 }
 0x1c9   :  { %v881_v33 = vpop.f32.mrb[19].mxu1  ;;  %v2205_v42 = vmin.f32 %v8736_v34, -1e-06  ;;  %v8768_v21 = vadd.f32 %v2079_v15, %v1914_v1  ;;  %vm2141_vm13 = vcmp.ge.f32.partialorder %v8736_v34, 0.0  ;;  %s7306_s7 = smov 126  }
 0x1ca   :  { %v8744_v45 = vadd.f32 %v2076_v29, %v1911_v38  ;;  %v2234_v60 = vsel %vm2138_vm10, %v2170_v63, %v2202_v57  ;;  %v8760_v23 = vadd.f32 %v8755_v41, %v881_v33  ;;  %v1915_v38 = vadd.f32 %v1883_v17, %v1718_v11 }
 0x1cb   :  { %v2032_v5 = vpop.permute.xlu1 %2031  ;;  %2359 = vperm.xlu1 %6937, %v2233_v18   ;;  %2364 = vperm.xlu0 %6936, %v2234_v60   ;;  %14738 = vst [vmem:[#allocation39_spill] sm:$0xff] %v8768_v21  ;;  %v2237_v57 = vsel %vm2141_vm13, %v2173_v46, %v2205_v42  ;;  %v2175_v27 = vmax.f32 %v8768_v21, 1e-06  ;;  %v2207_v1 = vmin.f32 %v8768_v21, -1e-06  ;;  %vm2143_vm15 = vcmp.ge.f32.partialorder %v8768_v21, 0.0 }
 0x1cc   :  { %14734 = vst [vmem:[#allocation40_spill] sm:$0xff] %v8744_v45  ;;  %v2078_v20 = vmul.f32 %v14684_v49, %v2032_v5  ;;  %14736 = vst [vmem:[#allocation42_spill] sm:$0xff] %v8760_v23  ;;  %vm2140_vm12 = vcmp.ge.f32.partialorder %v8744_v45, 0.0  ;;  %v2172_v28 = vmax.f32 %v8744_v45, 1e-06  ;;  %v14746_v42 = vmov 1  }
 0x1cd   :  { %v2204_v54 = vmin.f32 %v8744_v45, -1e-06  ;;  %v2239_v33 = vsel %vm2143_vm15, %v2175_v27, %v2207_v1 }
 0x1ce   :  { %v8770_v24 = vadd.f32 %v2078_v20, %v1913_v3 }
 0x1cf   :  { %v2040_v51 = vpop.permute.xlu1 %2039  ;;  %2369 = vperm.xlu1 %6937, %v2235_v31   ;;  %v2236_v39 = vsel %vm2140_vm12, %v2172_v28, %v2204_v54 }
 0x1d0   :  { %14739 = vst [vmem:[#allocation41_spill] sm:$0xff] %v8770_v24  ;;  %v2080_v48 = vmul.f32 %v14684_v49, %v2040_v51  ;;  %2374 = vperm.xlu0 %6936, %v2236_v39   ;;  %vm2142_vm14 = vcmp.ge.f32.partialorder %v8770_v24, 0.0  ;;  %v2174_v29 = vmax.f32 %v8770_v24, 1e-06  ;;  %v2206_v63 = vmin.f32 %v8770_v24, -1e-06 }
 0x1d1   :  { %v6735_v61 = vpop.f32.mrb[20].mxu1  ;;  %v7270_v51 = vld [vmem:[%s14075_s2 + $0xf8] sm:$0xff] }
 0x1d2   :  { %v8777_v35 = vadd.f32 %v2080_v48, %v1915_v38  ;;  %v2238_v18 = vsel %vm2142_vm14, %v2174_v29, %v2206_v63  ;;  %v8782_v60 = vadd.f32 %v6735_v61, %v8755_v41  ;;  %v894_v49 = vpop.f32.mrb[21].mxu1  ;;  %v14749_v48 = vld [vmem:[#allocation36_spill] sm:$0xff] }
 0x1d3   :  { %2379 = vperm.xlu1 %6937, %v2237_v57   ;;  %v8786_v62 = vadd.f32 %v8755_v41, %v894_v49  ;;  %v8788_v0 = vpop.f32.mrb[22].mxu1 }
 0x1d4   :  { %14740 = vst [vmem:[#allocation43_spill] sm:$0xff] %v8777_v35  ;;  %14741 = vst [vmem:[#allocation44_spill] sm:$0xff] %v8782_v60  ;;  %2384 = vperm.xlu0 %6936, %v2238_v18   ;;  %vm2144_vm0 = vcmp.ge.f32.partialorder %v8777_v35, 0.0  ;;  %v2176_v15 = vmax.f32 %v8777_v35, 1e-06  ;;  %v897_v17 = vpop.f32.mrb[23].mxu1 }
 0x1d5   :  { %14742 = vst [vmem:[#allocation46_spill] sm:$0xff] %v8786_v62  ;;  %v2208_v3 = vmin.f32 %v8777_v35, -1e-06  ;;  %v8794_v5 = vadd.f32 %v8755_v41, %v897_v17 }
 0x1d7   :  { %14743 = vst [vmem:[#allocation45_spill] sm:$0xff] %v8794_v5  ;;  %v2240_v20 = vsel %vm2144_vm0, %v2176_v15, %v2208_v3  ;;  %2389 = vperm.xlu1 %6937, %v2239_v33  }
 0x1d8   :  { %2394 = vperm.xlu0 %6936, %v2240_v20  }
 0x1d9   :  { %v6739_v28 = vpop.f32.mrb[24].mxu1 }
 0x1da   :  { %v8797_v36 = vadd.f32 %v6739_v28, %v8755_v41  ;;  %v910_v11 = vpop.f32.mrb[25].mxu1 }
 0x1db   :  { %v8800_v54 = vadd.f32 %v8755_v41, %v910_v11  ;;  %v6740_v46 = vpop.f32.mrb[26].mxu1 }
 0x1dc   :  { %14744 = vst [vmem:[#allocation48_spill] sm:$0xff] %v8797_v36  ;;  %6938 = vset.pattern.permute.xlu0 %v14746_v42  ;;  %v8804_v31 = vadd.f32 %v6740_v46, %v8755_v41  ;;  %v913_v38 = vpop.f32.mrb[27].mxu1 }
 0x1dd   :  { %14745 = vst [vmem:[#allocation50_spill] sm:$0xff] %v8800_v54  ;;  %1649 = vperm.xlu0 %6938, %v7270_v51   ;;  %v8810_v39 = vadd.f32 %v8755_v41, %v913_v38 }
 0x1de   :  { %14747 = vst [vmem:[#allocation47_spill] sm:$0xff] %v8804_v31 }
 0x1df   :  { %14748 = vst [vmem:[#allocation52_spill] sm:$0xff] %v8810_v39 }
 0x1e1   :  { %2498 = vrot.lane.b32.xlu0 %v14749_v48, %s7303_s4 }
 0x1e2   :  { %v6743_v29 = vpop.f32.mrb[28].mxu1 }
 0x1e3   :  { %v8815_v63 = vadd.f32 %v6743_v29, %v8755_v41  ;;  %v926_v57 = vpop.f32.mrb[29].mxu1 }
 0x1e4   :  { %v8818_v61 = vadd.f32 %v8755_v41, %v926_v57  ;;  %v6744_v18 = vpop.f32.mrb[30].mxu1 }
 0x1e5   :  { %14750 = vst [vmem:[#allocation54_spill] sm:$0xff] %v8815_v63  ;;  %v8821_v27 = vadd.f32 %v6744_v18, %v8755_v41  ;;  %v929_v1 = vpop.f32.mrb[31].mxu1  ;;  %2502 = vrot.lane.b32.xlu0 %v8487_v22, %s7303_s4 }
 0x1e6   :  { %14751 = vst [vmem:[#allocation11_spill] sm:$0xff] %v8818_v61  ;;  %v8826_v49 = vadd.f32 %v8755_v41, %v929_v1 }
 0x1e7   :  { %14752 = vst [vmem:[#allocation49_spill] sm:$0xff] %v8821_v27 }
 0x1e8   :  { %14753 = vst [vmem:[#allocation56_spill] sm:$0xff] %v8826_v49 }
 0x1e9   :  { %2506 = vrot.lane.b32.xlu0 %v8511_v26, %s7303_s4 }
 0x1ea   :  { %v6747_v15 = vpop.f32.mrb[32].mxu1 }
 0x1eb   :  { %v8831_v3 = vadd.f32 %v6747_v15, %v8755_v41  ;;  %v942_v17 = vpop.f32.mrb[33].mxu1 }
 0x1ec   :  { %v8834_v33 = vadd.f32 %v8755_v41, %v942_v17  ;;  %v6748_v20 = vpop.f32.mrb[34].mxu1 }
 0x1ed   :  { %14754 = vst [vmem:[#allocation18_spill] sm:$0xff] %v8831_v3  ;;  %v8837_v28 = vadd.f32 %v6748_v20, %v8755_v41  ;;  %v945_v11 = vpop.f32.mrb[35].mxu1 }
 0x1ee   :  { %14755 = vst [vmem:[#allocation23_spill] sm:$0xff] %v8834_v33  ;;  %v8840_v46 = vadd.f32 %v8755_v41, %v945_v11 }
 0x1ef   :  { %14756 = vst [vmem:[#allocation25_spill] sm:$0xff] %v8837_v28 }
 0x1f0   :  { %14757 = vst [vmem:[#allocation51_spill] sm:$0xff] %v8840_v46 }
 0x1f2   :  { %v6751_v38 = vpop.f32.mrb[36].mxu1 }
 0x1f3   :  { %v8843_v51 = vadd.f32 %v6751_v38, %v8755_v41  ;;  %v958_v29 = vpop.f32.mrb[37].mxu1 }
 0x1f4   :  { %v8846_v57 = vadd.f32 %v8755_v41, %v958_v29  ;;  %v6752_v18 = vpop.f32.mrb[38].mxu1 }
 0x1f5   :  { %14758 = vst [vmem:[#allocation53_spill] sm:$0xff] %v8843_v51  ;;  %v8849_v1 = vadd.f32 %v6752_v18, %v8755_v41  ;;  %v961_v15 = vpop.f32.mrb[39].mxu1 }
 0x1f6   :  { %14759 = vst [vmem:[#allocation13_spill] sm:$0xff] %v8846_v57  ;;  %v8852_v17 = vadd.f32 %v8755_v41, %v961_v15  ;;  %v8868_v15 = vadd.f32 %v8729_v19, %v8755_v41  ;;  %v8884_v19 = vadd.f32 %v8755_v41, %v8738_v10 }
 0x1f7   :  { %14760 = vst [vmem:[#allocation55_spill] sm:$0xff] %v8849_v1 }
 0x1f8   :  { %14761 = vst [vmem:[#allocation24_spill] sm:$0xff] %v8852_v17  ;;  %14766 = vst [vmem:[#allocation60_spill] sm:$0xff] %v8868_v15 }
 0x1f9   :  { %14771 = vst [vmem:[#allocation65_spill] sm:$0xff] %v8884_v19 }
 0x1fa   :  { %v6755_v20 = vpop.f32.mrb[40].mxu1 }
 0x1fb   :  { %v8855_v11 = vadd.f32 %v6755_v20, %v8755_v41  ;;  %v974_v22 = vpop.f32.mrb[41].mxu1 }
 0x1fc   :  { %v8858_v38 = vadd.f32 %v8755_v41, %v974_v22  ;;  %v6756_v26 = vpop.f32.mrb[42].mxu1 }
 0x1fd   :  { %14762 = vst [vmem:[#allocation36_spill] sm:$0xff] %v8855_v11  ;;  %v8861_v29 = vadd.f32 %v6756_v26, %v8755_v41  ;;  %v977_v21 = vpop.f32.mrb[43].mxu1 }
 0x1fe   :  { %14763 = vst [vmem:[#allocation57_spill] sm:$0xff] %v8858_v38  ;;  %v8864_v18 = vadd.f32 %v8755_v41, %v977_v21 }
 0x1ff   :  { %14764 = vst [vmem:[#allocation58_spill] sm:$0xff] %v8861_v29 }
 0x200   :  { %14765 = vst [vmem:[#allocation59_spill] sm:$0xff] %v8864_v18 }
 0x202   :  { %v6759_v34 = vpop.f32.mrb[44].mxu1 }
 0x203   :  { %v8871_v20 = vadd.f32 %v6759_v34, %v8755_v41  ;;  %v990_v30 = vpop.f32.mrb[45].mxu1  ;;  %v1012_v34 = vsel %vm1005_vm1, %v8868_v15, -inf }
 0x204   :  { %v8874_v22 = vadd.f32 %v8755_v41, %v990_v30  ;;  %v6760_v6 = vpop.f32.mrb[46].mxu1  ;;  %v8890_v30 = vadd.f32 %v8746_v7, %v8755_v41 }
 0x205   :  { %14767 = vst [vmem:[#allocation61_spill] sm:$0xff] %v8871_v20  ;;  %v8877_v26 = vadd.f32 %v6760_v6, %v8755_v41  ;;  %v993_v58 = vpop.f32.mrb[47].mxu1  ;;  %v1006_v6 = vsel %vm1005_vm1, %v8884_v19, -inf  ;;  %v14130_v19 = vmov 0.0  }
 0x206   :  { %14768 = vst [vmem:[#allocation62_spill] sm:$0xff] %v8874_v22  ;;  %v8880_v21 = vadd.f32 %v8755_v41, %v993_v58  ;;  %14772 = vst [vmem:[#allocation66_spill] sm:$0xff] %v8890_v30  ;;  %v1015_v58 = vsel %vm1005_vm1, %v8890_v30, -inf }
 0x207   :  { %14769 = vst [vmem:[#allocation63_spill] sm:$0xff] %v8877_v26  ;;  %6189 = vst [vmem:[#allocation7] sm:$0x1] %v14130_v19 }
 0x208   :  { %14770 = vst [vmem:[#allocation64_spill] sm:$0xff] %v8880_v21  ;;  %1013 = vmax.xlane.f32.xlu0 %v1012_v34 }
 0x20c   :  { %1007 = vmax.xlane.f32.xlu0 %v1006_v6 }
 0x210   :  { %1016 = vmax.xlane.f32.xlu0 %v1015_v58 }
 0x21a   :  { %v8896_v52 = vpop.permute.xlu0 %2249 }
 0x222   :  { %v8898_v10 = vpop.permute.xlu0 %2264 }
 0x226   :  { %2510 = vrot.lane.b32.xlu0 %v8539_v2, %s7303_s4  ;;  %v8902_v34 = vpop.permute.xlu0 %2274  ;;  %v8919_v2 = vadd.f32 %v8788_v0, %v8755_v41  ;;  %v1033_v0 = vsel %vm1005_vm1, %v8810_v39, -inf  ;;  %v14783_v39 = vld [vmem:[#allocation33_spill] sm:$0xff] }
 0x227   :  { %14773 = vst [vmem:[#allocation67_spill] sm:$0xff] %v8902_v34 }
 0x228   :  { %14778 = vst [vmem:[#allocation72_spill] sm:$0xff] %v8919_v2 }
 0x22a   :  { %v8904_v15 = vpop.permute.xlu0 %2284 }
 0x22e   :  { %v8906_v7 = vpop.permute.xlu0 %2294 }
 0x22f   :  { %14774 = vst [vmem:[#allocation68_spill] sm:$0xff] %v8906_v7  ;;  %v1027_v7 = vsel %vm1005_vm1, %v8919_v2, -inf }
 0x232   :  { %v8908_v22 = vpop.permute.xlu0 %2304 }
 0x233   :  { %14775 = vst [vmem:[#allocation69_spill] sm:$0xff] %v8908_v22 }
 0x236   :  { %v8910_v6 = vpop.permute.xlu0 %2314 }
 0x237   :  { %14776 = vst [vmem:[#allocation70_spill] sm:$0xff] %v8910_v6  ;;  %v1021_v6 = vsel %vm1005_vm1, %v8794_v5, -inf }
 0x23a   :  { %v8913_v58 = vpop.permute.xlu0 %2324 }
 0x23e   :  { %v8915_v30 = vpop.permute.xlu0 %2334 }
 0x23f   :  { %14777 = vst [vmem:[#allocation71_spill] sm:$0xff] %v8915_v30  ;;  %v1039_v30 = vsel %vm1005_vm1, %v8804_v31, -inf }
 0x242   :  { %v8921_v34 = vpop.permute.xlu0 %2344 }
 0x245   :  { %1028 = vmax.xlane.f32.xlu0 %v1027_v7  ;;  %v1051_v7 = vsel %vm1005_vm1, %v8821_v27, -inf }
 0x246   :  { %v8925_v22 = vpop.permute.xlu0 %2354 }
 0x249   :  { %1022 = vmax.xlane.f32.xlu0 %v1021_v6  ;;  %v1045_v6 = vsel %vm1005_vm1, %v8826_v49, -inf }
 0x24a   :  { %v8929_v19 = vpop.permute.xlu0 %2364 }
 0x24b   :  { %14779 = vst [vmem:[#allocation73_spill] sm:$0xff] %v8929_v19 }
 0x24d   :  { %1040 = vmax.xlane.f32.xlu0 %v1039_v30  ;;  %v1063_v30 = vsel %vm1005_vm1, %v8837_v28, -inf  ;;  %v1057_v28 = vsel %vm1005_vm1, %v8840_v46, -inf }
 0x24f   :  { %v8933_v41 = vpop.permute.xlu0 %2374 }
 0x250   :  { %14780 = vst [vmem:[#allocation74_spill] sm:$0xff] %v8933_v41 }
 0x251   :  { %1034 = vmax.xlane.f32.xlu0 %v1033_v0  ;;  %v7271_v0 = vld [vmem:[%s14081_s8] ss:$0 sm:$0xff] }
 0x253   :  { %v8937_v2 = vpop.permute.xlu0 %2384 }
 0x254   :  { %14781 = vst [vmem:[#allocation75_spill] sm:$0xff] %v8937_v2  ;;  %v1522_v2 = vmul.f32 %v7271_v0, %v14783_v39  ;;  %v7274_v39 = vld [vmem:[%s14081_s8 + $0x3] ss:$0 sm:$0xff] }
 0x255   :  { %1052 = vmax.xlane.f32.xlu0 %v1051_v7  ;;  %v7272_v7 = vld [vmem:[%s14081_s8 + $0x1] ss:$0 sm:$0xff] }
 0x256   :  { %v14784_v0 = vld [vmem:[#allocation17_spill] sm:$0xff] }
 0x257   :  { %v8941_v5 = vpop.permute.xlu0 %2394  ;;  %v2081_v41 = vmul.f32 %v7274_v39, %v14784_v0 }
 0x258   :  { %14782 = vst [vmem:[#allocation76_spill] sm:$0xff] %v8941_v5 }
 0x259   :  { %1046 = vmax.xlane.f32.xlu0 %v1045_v6  ;;  %v7273_v6 = vld [vmem:[%s14081_s8 + $0x2] ss:$0 sm:$0xff]  ;;  %s7313_s8 = smov 34  }
 0x25a   :  { %v1884_v49 = vmul.f32 %v7273_v6, %v8389_v53 }
 0x25c   :  { %v1650_v31 = vpop.permute.xlu0 %1649 }
 0x25d   :  { %v1687_v27 = vmul.f32 %v7272_v7, %v1650_v31  ;;  %1064 = vmax.xlane.f32.xlu0 %v1063_v30  ;;  %v1075_v30 = vsel %vm1005_vm1, %v8849_v1, -inf  ;;  %v1069_v7 = vsel %vm1005_vm1, %v8852_v17, -inf }
 0x25f   :  { %v1719_v5 = vadd.f32 %v1687_v27, %v1522_v2 }
 0x261   :  { %v1916_v19 = vadd.f32 %v1884_v49, %v1719_v5  ;;  %1058 = vmax.xlane.f32.xlu0 %v1057_v28  ;;  %v1087_v5 = vsel %vm1005_vm1, %v8861_v29, -inf  ;;  %v1081_v49 = vsel %vm1005_vm1, %v8864_v18, -inf  ;;  %v1099_v28 = vsel %vm1005_vm1, %v8877_v26, -inf }
 0x263   :  { %v8964_v31 = vadd.f32 %v2081_v41, %v1916_v19  ;;  %v1093_v19 = vsel %vm1005_vm1, %v8880_v21, -inf  ;;  %v2245_v41 = vpop.permute.xlu1 %2244 }
 0x264   :  { %7078 = vrcp.f32 %v2245_v41 }
 0x265   :  { %14785 = vst [vmem:[#allocation33_spill] sm:$0xff] %v8964_v31  ;;  %1076 = vmax.xlane.f32.xlu0 %v1075_v30  ;;  %vm2145_vm2 = vcmp.ge.f32.partialorder %v8964_v31, 0.0  ;;  %v2177_v53 = vmax.f32 %v8964_v31, 1e-06  ;;  %v2209_v2 = vmin.f32 %v8964_v31, -1e-06 }
 0x266   :  { %v1009_v30 = vsel %vm1005_vm1, %v8760_v23, -inf  ;;  %v14807_v23 = vld [vmem:[#allocation62_spill] sm:$0xff] }
 0x267   :  { %v2241_v27 = vsel %vm2145_vm2, %v2177_v53, %v2209_v2  ;;  %v1024_v2 = vsel %vm1005_vm1, %v8782_v60, -inf }
 0x268   :  { %2399 = vperm.xlu1 %6937, %v2241_v27  }
 0x269   :  { %1070 = vmax.xlane.f32.xlu0 %v1069_v7  ;;  %v1018_v7 = vsel %vm1005_vm1, %v8786_v62, -inf }
 0x26c   :  { %2500 = vrot.lane.b32.xlu1 %v8459_v16, %s7303_s4 }
 0x26d   :  { %1088 = vmax.xlane.f32.xlu0 %v1087_v5  ;;  %6939 = vset.pattern.permute.xlu1 %v14746_v42  ;;  %v8988_v42 = vpop.permute.xlu1 %2254  ;;  %v1036_v5 = vsel %vm1005_vm1, %v8797_v36, -inf }
 0x270   :  { %2504 = vrot.lane.b32.xlu1 %v8463_v9, %s7303_s4 }
 0x271   :  { %1082 = vmax.xlane.f32.xlu0 %v1081_v49  ;;  %v2260_v6 = vpop.permute.xlu1 %2259 }
 0x272   :  { %7080 = vrcp.f32 %v2260_v6  ;;  %v9018_v6 = vpop.permute.xlu0 %2498 }
 0x273   :  { %14786 = vst [vmem:[#allocation17_spill] sm:$0xff] %v9018_v6 }
 0x274   :  { %2508 = vrot.lane.b32.xlu1 %v8483_v14, %s7303_s4 }
 0x275   :  { %1100 = vmax.xlane.f32.xlu0 %v1099_v28  ;;  %v2270_v39 = vpop.permute.xlu1 %2269  ;;  %v1030_v28 = vsel %vm1005_vm1, %v8800_v54, -inf  ;;  %v1078_v54 = vsel %vm1005_vm1, %v8858_v38, -inf }
 0x276   :  { %7082 = vrcp.f32 %v2270_v39  ;;  %v1042_v39 = vsel %vm1005_vm1, %v8818_v61, -inf }
 0x279   :  { %1094 = vmax.xlane.f32.xlu0 %v1093_v19  ;;  %v2280_v0 = vpop.permute.xlu1 %2279  ;;  %v7079_v19 = vpop.eup %7078 }
 0x27a   :  { %7084 = vrcp.f32 %v2280_v0 }
 0x27d   :  { %v2290_v53 = vpop.permute.xlu1 %2289 }
 0x27e   :  { %7086 = vrcp.f32 %v2290_v53 }
 0x281   :  { %v2300_v27 = vpop.permute.xlu1 %2299 }
 0x282   :  { %7088 = vrcp.f32 %v2300_v27  ;;  %v1054_v27 = vsel %vm1005_vm1, %v8834_v33, -inf }
 0x285   :  { %v2310_v49 = vpop.permute.xlu1 %2309 }
 0x286   :  { %7090 = vrcp.f32 %v2310_v49 }
 0x289   :  { %v2320_v41 = vpop.permute.xlu1 %2319 }
 0x28a   :  { %7092 = vrcp.f32 %v2320_v41 }
 0x28f   :  { %2514 = vrot.lane.b32.xlu0 %v8557_v55, %s7303_s4 }
 0x293   :  { %2518 = vrot.lane.b32.xlu0 %v8585_v13, %s7303_s4 }
 0x297   :  { %2522 = vrot.lane.b32.xlu0 %v8601_v59, %s7303_s4 }
 0x298   :  { %1010 = vmax.xlane.f32.xlu1 %v1009_v30  ;;  %v1048_v30 = vsel %vm1005_vm1, %v8815_v63, -inf }
 0x29b   :  { %2526 = vrot.lane.b32.xlu0 %v8627_v12, %s7303_s4 }
 0x29c   :  { %1025 = vmax.xlane.f32.xlu1 %v1024_v2  ;;  %v9021_v2 = vmul.f32 %v7079_v19, %v14749_v48  ;;  %v1060_v19 = vsel %vm1005_vm1, %v8831_v3, -inf  ;;  %v1072_v3 = vsel %vm1005_vm1, %v8843_v51, -inf  ;;  %v1066_v51 = vsel %vm1005_vm1, %v8846_v57, -inf }
 0x29d   :  { %v1084_v57 = vsel %vm1005_vm1, %v8855_v11, -inf }
 0x29e   :  { %14787 = vst [vmem:[#allocation77_spill] sm:$0xff] %v9021_v2 }
 0x29f   :  { %2530 = vrot.lane.b32.xlu0 %v8643_v40, %s7303_s4 }
 0x2a0   :  { %1019 = vmax.xlane.f32.xlu1 %v1018_v7  ;;  %v7081_v7 = vpop.eup %7080 }
 0x2a1   :  { %v9029_v0 = vmul.f32 %v7081_v7, %v8463_v9  ;;  %v7083_v26 = vpop.eup %7082 }
 0x2a2   :  { %v7085_v29 = vpop.eup %7084 }
 0x2a3   :  { %2534 = vrot.lane.b32.xlu0 %v8665_v47, %s7303_s4  ;;  %14788 = vst [vmem:[#allocation78_spill] sm:$0xff] %v9029_v0  ;;  %v6334_v53 = vclamps-f32 %v9029_v0, 1000000.0  ;;  %v9049_v17 = vmul.f32 %v7085_v29, %v8525_v50 }
 0x2a4   :  { %1037 = vmax.xlane.f32.xlu1 %v1036_v5  ;;  %v6331_v5 = vclamps-f32 %v9021_v2, 1000000.0 }
 0x2a5   :  { %14792 = vst [vmem:[#allocation82_spill] sm:$0xff] %v9049_v17  ;;  %v6338_v29 = vclamps-f32 %v9049_v17, 1000000.0 }
 0x2a6   :  { %v2690_v21 = vfloor.f32 %v6331_v5 }
 0x2a7   :  { %2538 = vrot.lane.b32.xlu0 %v8682_v4, %s7303_s4 }
 0x2a8   :  { %1031 = vmax.xlane.f32.xlu1 %v1030_v28  ;;  %v2330_v28 = vpop.permute.xlu1 %2329  ;;  %v6849_v1 = vtrunc.f32 %v2690_v21 }
 0x2a9   :  { %7094 = vrcp.f32 %v2330_v28 }
 0x2aa   :  { %v9057_v49 = vcvt.f32.s32 %v6849_v1 }
 0x2ab   :  { %2542 = vrot.lane.b32.xlu0 %v8702_v37, %s7303_s4 }
 0x2ac   :  { %1049 = vmax.xlane.f32.xlu1 %v1048_v30  ;;  %v9031_v30 = vpop.permute.xlu0 %2502  ;;  %v2340_v7 = vpop.permute.xlu1 %2339  ;;  %14794 = vst [vmem:[#allocation84_spill] sm:$0xff] %v9057_v49  ;;  %vm3470_vm3 = vcmp.ge.s32.totalorder %v9057_v49, 0 }
 0x2ad   :  { %14789 = vst [vmem:[#allocation79_spill] sm:$0xff] %v9031_v30  ;;  %7096 = vrcp.f32 %v2340_v7 }
 0x2af   :  { %2546 = vrot.lane.b32.xlu0 %v8721_v32, %s7303_s4 }
 0x2b0   :  { %1043 = vmax.xlane.f32.xlu1 %v1042_v39  ;;  %v9039_v39 = vmul.f32 %v7083_v26, %v8483_v14  ;;  %v9045_v18 = vpop.permute.xlu0 %2506  ;;  %v7087_v26 = vpop.eup %7086 }
 0x2b1   :  { %14791 = vst [vmem:[#allocation81_spill] sm:$0xff] %v9045_v18  ;;  %v7089_v21 = vpop.eup %7088  ;;  %v9061_v63 = vmul.f32 %v7087_v26, %v8535_v8 }
 0x2b2   :  { %14790 = vst [vmem:[#allocation80_spill] sm:$0xff] %v9039_v39  ;;  %v6336_v5 = vclamps-f32 %v9039_v39, 1000000.0  ;;  %v7091_v61 = vpop.eup %7090 }
 0x2b3   :  { %2550 = vrot.lane.b32.xlu0 %v8744_v45, %s7303_s4  ;;  %14795 = vst [vmem:[#allocation85_spill] sm:$0xff] %v9061_v63 }
 0x2b4   :  { %1061 = vmax.xlane.f32.xlu1 %v1060_v19  ;;  %v2693_v19 = vfloor.f32 %v6334_v53  ;;  %v9055_v46 = vpop.xlane.xlu0 %1013  ;;  %v2350_v53 = vpop.permute.xlu1 %2349  ;;  %v2695_v33 = vfloor.f32 %v6336_v5  ;;  %v6340_v5 = vclamps-f32 %v9061_v63, 1000000.0 }
 0x2b5   :  { %14793 = vst [vmem:[#allocation83_spill] sm:$0xff] %v9055_v46  ;;  %7098 = vrcp.f32 %v2350_v53  ;;  %v1096_v53 = vsel %vm1005_vm1, %v8871_v20, -inf  ;;  %v1090_v20 = vsel %vm1005_vm1, %v14807_v23, -inf }
 0x2b6   :  { %v6859_v41 = vtrunc.f32 %v2695_v33  ;;  %v2699_v33 = vfloor.f32 %v6340_v5 }
 0x2b7   :  { %2554 = vrot.lane.b32.xlu0 %v8770_v24, %s7303_s4 }
 0x2b8   :  { %1055 = vmax.xlane.f32.xlu1 %v1054_v27  ;;  %v6855_v27 = vtrunc.f32 %v2693_v19  ;;  %v2697_v19 = vfloor.f32 %v6338_v29  ;;  %v9072_v36 = vpop.xlane.xlu0 %1007  ;;  %v2360_v26 = vpop.permute.xlu1 %2359  ;;  %v9078_v28 = vcvt.f32.s32 %v6859_v41  ;;  %v6867_v41 = vtrunc.f32 %v2699_v33 }
 0x2b9   :  { %14798 = vst [vmem:[#allocation88_spill] sm:$0xff] %v9072_v36  ;;  %v7093_v29 = vpop.eup %7092  ;;  %7100 = vrcp.f32 %v2360_v26 }
 0x2ba   :  { %v9069_v1 = vcvt.f32.s32 %v6855_v27  ;;  %14799 = vst [vmem:[#allocation89_spill] sm:$0xff] %v9078_v28  ;;  %v9081_v27 = vmul.f32 %v7091_v61, %v8581_v43  ;;  %v9092_v61 = vmul.f32 %v7093_v29, %v8616_v44  ;;  %v7095_v5 = vpop.eup %7094 }
 0x2bb   :  { %2558 = vrot.lane.b32.xlu0 %v8777_v35, %s7303_s4  ;;  %v9101_v33 = vmul.f32 %v7095_v5, %v8623_v56  ;;  %v7097_v18 = vpop.eup %7096  ;;  %v14809_v5 = vld [vmem:[#allocation15_spill] sm:$0xff] }
 0x2bc   :  { %1073 = vmax.xlane.f32.xlu1 %v1072_v3  ;;  %v9067_v3 = vmul.f32 %v7089_v21, %v8570_v25  ;;  %14797 = vst [vmem:[#allocation87_spill] sm:$0xff] %v9069_v1  ;;  %v6863_v21 = vtrunc.f32 %v2697_v19  ;;  %14800 = vst [vmem:[#allocation90_spill] sm:$0xff] %v9081_v27  ;;  %v9086_v60 = vpop.xlane.xlu0 %1016  ;;  %v2370_v7 = vpop.permute.xlu1 %2369  ;;  %v6344_v19 = vclamps-f32 %v9081_v27, 1000000.0  ;;  %v9112_v30 = vmul.f32 %v7097_v18, %v14809_v5  ;;  %v14821_v27 = vld [vmem:[#allocation16_spill] sm:$0xff] }
 0x2bd   :  { %14801 = vst [vmem:[#allocation91_spill] sm:$0xff] %v9086_v60  ;;  %14803 = vst [vmem:[#allocation93_spill] sm:$0xff] %v9092_v61  ;;  %7102 = vrcp.f32 %v2370_v7 }
 0x2be   :  { %14796 = vst [vmem:[#allocation86_spill] sm:$0xff] %v9067_v3  ;;  %v9088_v11 = vcvt.f32.s32 %v6863_v21  ;;  %v6346_v21 = vclamps-f32 %v9092_v61, 1000000.0  ;;  %14805 = vst [vmem:[#allocation95_spill] sm:$0xff] %v9101_v33 }
 0x2bf   :  { %2757 = vperm.xlu0 %6938, %v9057_v49   ;;  %14810 = vst [vmem:[#allocation98_spill] sm:$0xff] %v9112_v30 }
 0x2c0   :  { %1067 = vmax.xlane.f32.xlu1 %v1066_v51  ;;  %v6342_v51 = vclamps-f32 %v9067_v3, 1000000.0  ;;  %14802 = vst [vmem:[#allocation92_spill] sm:$0xff] %v9088_v11  ;;  %v9103_v29 = vpop.permute.xlu0 %2510  ;;  %v2380_v62 = vpop.permute.xlu1 %2379 }
 0x2c1   :  { %14806 = vst [vmem:[#allocation96_spill] sm:$0xff] %v9103_v29  ;;  %7104 = vrcp.f32 %v2380_v62  ;;  %v14812_v29 = vld [vmem:[#allocation20_spill] sm:$0xff] }
 0x2c3   :  { %2766 = vperm.xlu0 %6938, %v9069_v1  }
 0x2c4   :  { %1085 = vmax.xlane.f32.xlu1 %v1084_v57  ;;  %v2701_v57 = vfloor.f32 %v6342_v51  ;;  %v2703_v51 = vfloor.f32 %v6344_v19  ;;  %v2705_v19 = vfloor.f32 %v6346_v21  ;;  %v2390_v7 = vpop.permute.xlu1 %2389 }
 0x2c5   :  { %7106 = vrcp.f32 %v2390_v7 }
 0x2c6   :  { %v6871_v38 = vtrunc.f32 %v2701_v57  ;;  %v7099_v57 = vpop.eup %7098  ;;  %7108 = vrcp.f32 %v8896_v52 }
 0x2c7   :  { %2772 = vperm.xlu0 %6938, %v9078_v28   ;;  %v9118_v60 = vmul.f32 %v7099_v57, %v14812_v29  ;;  %v7101_v21 = vpop.eup %7100  ;;  %7110 = vrcp.f32 %v8898_v10 }
 0x2c8   :  { %1079 = vmax.xlane.f32.xlu1 %v1078_v54  ;;  %v9097_v54 = vcvt.f32.s32 %v6867_v41  ;;  %v9108_v26 = vcvt.f32.s32 %v6871_v38  ;;  %v6875_v41 = vtrunc.f32 %v2703_v51  ;;  %v6879_v38 = vtrunc.f32 %v2705_v19 }
 0x2c9   :  { %14813 = vst [vmem:[#allocation100_spill] sm:$0xff] %v9118_v60  ;;  %v6350_v51 = vclamps-f32 %v9112_v30, 1000000.0  ;;  %v6352_v18 = vclamps-f32 %v9118_v60, 1000000.0 }
 0x2ca   :  { %14804 = vst [vmem:[#allocation94_spill] sm:$0xff] %v9097_v54  ;;  %14808 = vst [vmem:[#allocation97_spill] sm:$0xff] %v9108_v26 }
 0x2cb   :  { %2778 = vperm.xlu0 %6938, %v9088_v11   ;;  %v2709_v57 = vfloor.f32 %v6350_v51 }
 0x2cc   :  { %1097 = vmax.xlane.f32.xlu1 %v1096_v53  ;;  %v6348_v53 = vclamps-f32 %v9101_v33, 1000000.0  ;;  %v14817_v33 = vld [vmem:[#allocation12_spill] sm:$0xff] }
 0x2cd   :  { %v9130_v61 = vmul.f32 %v7101_v21, %v14817_v33 }
 0x2ce   :  { %v2707_v23 = vfloor.f32 %v6348_v53  ;;  %v2711_v53 = vfloor.f32 %v6352_v18 }
 0x2cf   :  { %2784 = vperm.xlu0 %6938, %v9097_v54   ;;  %14818 = vst [vmem:[#allocation104_spill] sm:$0xff] %v9130_v61  ;;  %v6354_v7 = vclamps-f32 %v9130_v61, 1000000.0 }
 0x2d0   :  { %1091 = vmax.xlane.f32.xlu1 %v1090_v20  ;;  %v9120_v20 = vcvt.f32.s32 %v6875_v41  ;;  %v6883_v62 = vtrunc.f32 %v2707_v23  ;;  %v7103_v41 = vpop.eup %7102  ;;  %v6891_v51 = vtrunc.f32 %v2711_v53 }
 0x2d1   :  { %v9139_v60 = vmul.f32 %v7103_v41, %v14821_v27  ;;  %v2713_v18 = vfloor.f32 %v6354_v7 }
 0x2d2   :  { %v9114_v6 = vpop.xlane.xlu0 %1028  ;;  %14814 = vst [vmem:[#allocation101_spill] sm:$0xff] %v9120_v20  ;;  %v9135_v30 = vcvt.f32.s32 %v6883_v62 }
 0x2d3   :  { %14811 = vst [vmem:[#allocation99_spill] sm:$0xff] %v9114_v6  ;;  %2790 = vperm.xlu0 %6938, %v9108_v26   ;;  %v9127_v6 = vcvt.f32.s32 %v6879_v38  ;;  %14822 = vst [vmem:[#allocation107_spill] sm:$0xff] %v9139_v60  ;;  %v7105_v38 = vpop.eup %7104  ;;  %v6356_v62 = vclamps-f32 %v9139_v60, 1000000.0  ;;  %v14829_v60 = vld [vmem:[#allocation39_spill] sm:$0xff] }
 0x2d4   :  { %14820 = vst [vmem:[#allocation106_spill] sm:$0xff] %v9135_v30  ;;  %v7107_v61 = vpop.eup %7106 }
 0x2d5   :  { %14816 = vst [vmem:[#allocation103_spill] sm:$0xff] %v9127_v6  ;;  %v2715_v53 = vfloor.f32 %v6356_v62  ;;  %v9162_v46 = vmul.f32 %v7107_v61, %v14829_v60  ;;  %v14834_v61 = vld [vmem:[#allocation67_spill] sm:$0xff]  ;;  %v7109_v10 = vpop.eup %7108 }
 0x2d6   :  { %v9123_v36 = vpop.xlane.xlu0 %1022 }
 0x2d7   :  { %14815 = vst [vmem:[#allocation102_spill] sm:$0xff] %v9123_v36  ;;  %2796 = vperm.xlu0 %6938, %v9120_v20   ;;  %v6887_v36 = vtrunc.f32 %v2709_v57  ;;  %v14825_v57 = vld [vmem:[#allocation37_spill] sm:$0xff]  ;;  %14830 = vst [vmem:[#allocation113_spill] sm:$0xff] %v9162_v46 }
 0x2d9   :  { %v9146_v21 = vcvt.f32.s32 %v6887_v36  ;;  %v6895_v36 = vtrunc.f32 %v2713_v18  ;;  %v6899_v18 = vtrunc.f32 %v2715_v53  ;;  %v9186_v53 = vmul.f32 %v7109_v10, %v8459_v16  ;;  %v14842_v10 = vld [vmem:[#allocation30_spill] sm:$0xff] }
 0x2da   :  { %v9132_v19 = vpop.xlane.xlu0 %1040 }
 0x2db   :  { %14819 = vst [vmem:[#allocation105_spill] sm:$0xff] %v9132_v19  ;;  %2802 = vperm.xlu0 %6938, %v9127_v6   ;;  %14824 = vst [vmem:[#allocation109_spill] sm:$0xff] %v9146_v21  ;;  %v9150_v19 = vmul.f32 %v7105_v38, %v14825_v57 }
 0x2dc   :  { %14837 = vst [vmem:[#allocation118_spill] sm:$0xff] %v9186_v53 }
 0x2dd   :  { %14826 = vst [vmem:[#allocation110_spill] sm:$0xff] %v9150_v19  ;;  %v6358_v7 = vclamps-f32 %v9150_v19, 1000000.0  ;;  %v6360_v19 = vclamps-f32 %v9162_v46, 1000000.0 }
 0x2de   :  { %v9141_v23 = vpop.xlane.xlu0 %1034 }
 0x2df   :  { %14823 = vst [vmem:[#allocation108_spill] sm:$0xff] %v9141_v23  ;;  %2808 = vperm.xlu0 %6938, %v9135_v30   ;;  %v9156_v23 = vcvt.f32.s32 %v6891_v51  ;;  %v9170_v51 = vcvt.f32.s32 %v6895_v36  ;;  %v2717_v62 = vfloor.f32 %v6358_v7  ;;  %v2719_v3 = vfloor.f32 %v6360_v19  ;;  %v7111_v7 = vpop.eup %7110  ;;  %v14840_v19 = vld [vmem:[#allocation68_spill] sm:$0xff] }
 0x2e1   :  { %2512 = vrot.lane.b32.xlu1 %v8525_v50, %s7303_s4  ;;  %14828 = vst [vmem:[#allocation112_spill] sm:$0xff] %v9156_v23  ;;  %14832 = vst [vmem:[#allocation115_spill] sm:$0xff] %v9170_v51  ;;  %v6907_v46 = vtrunc.f32 %v2719_v3 }
 0x2e2   :  { %v9153_v41 = vpop.xlane.xlu0 %1052 }
 0x2e3   :  { %14827 = vst [vmem:[#allocation111_spill] sm:$0xff] %v9153_v41  ;;  %2814 = vperm.xlu0 %6938, %v9146_v21   ;;  %v9205_v3 = vcvt.f32.s32 %v6907_v46  ;;  %v2948_v46 = vld [vmem:[%s14082_s9] sm:$0xff] }
 0x2e5   :  { %2516 = vrot.lane.b32.xlu1 %v8535_v8, %s7303_s4  ;;  %14844 = vst [vmem:[#allocation121_spill] sm:$0xff] %v9205_v3 }
 0x2e6   :  { %v9164_v38 = vpop.xlane.xlu0 %1046 }
 0x2e7   :  { %14831 = vst [vmem:[#allocation114_spill] sm:$0xff] %v9164_v38  ;;  %v2400_v52 = vpop.permute.xlu1 %2399  ;;  %2820 = vperm.xlu0 %6938, %v9156_v23   ;;  %v6903_v38 = vtrunc.f32 %v2717_v62  ;;  %v6332_v62 = vclamps-f32 %v9186_v53, 1000000.0 }
 0x2e8   :  { %7112 = vrcp.f32 %v2400_v52  ;;  %v9179_v52 = vcvt.f32.s32 %v6899_v18 }
 0x2e9   :  { %2520 = vrot.lane.b32.xlu1 %v8570_v25, %s7303_s4  ;;  %7114 = vrcp.f32 %v14834_v61  ;;  %v9190_v61 = vcvt.f32.s32 %v6903_v38  ;;  %v2691_v17 = vfloor.f32 %v6332_v62 }
 0x2ea   :  { %v9173_v41 = vpop.xlane.xlu0 %1064  ;;  %14835 = vst [vmem:[#allocation67_spill] sm:$0xff] %v9179_v52  ;;  %7116 = vrcp.f32 %v8904_v15 }
 0x2eb   :  { %14833 = vst [vmem:[#allocation116_spill] sm:$0xff] %v9173_v41  ;;  %2826 = vperm.xlu0 %6938, %v9170_v51   ;;  %14838 = vst [vmem:[#allocation119_spill] sm:$0xff] %v9190_v61  ;;  %7118 = vrcp.f32 %v14840_v19  ;;  %v6851_v53 = vtrunc.f32 %v2691_v17  ;;  %v2950_v17 = vld [vmem:[%s14082_s9 + $0x10] sm:$0xff] }
 0x2ed   :  { %2524 = vrot.lane.b32.xlu1 %v8581_v43, %s7303_s4 }
 0x2ee   :  { %v9181_v36 = vpop.xlane.xlu0 %1058 }
 0x2ef   :  { %14836 = vst [vmem:[#allocation117_spill] sm:$0xff] %v9181_v36  ;;  %2832 = vperm.xlu0 %6938, %v9179_v52   ;;  %v9201_v36 = vmul.f32 %v7111_v7, %v14842_v10  ;;  %v14847_v7 = vld [vmem:[#allocation10_spill] sm:$0xff] }
 0x2f1   :  { %2528 = vrot.lane.b32.xlu1 %v8616_v44, %s7303_s4  ;;  %14843 = vst [vmem:[#allocation30_spill] sm:$0xff] %v9201_v36  ;;  %v6335_v39 = vclamps-f32 %v9201_v36, 1000000.0 }
 0x2f2   :  { %v7113_v18 = vpop.eup %7112  ;;  %v9192_v41 = vpop.xlane.xlu0 %1076 }
 0x2f3   :  { %14839 = vst [vmem:[#allocation120_spill] sm:$0xff] %v9192_v41  ;;  %2838 = vperm.xlu0 %6938, %v9190_v61   ;;  %v9197_v15 = vmul.f32 %v7113_v18, %v8964_v31  ;;  %v7115_v63 = vpop.eup %7114  ;;  %v14845_v41 = vld [vmem:[#allocation69_spill] sm:$0xff]  ;;  %v2694_v2 = vfloor.f32 %v6335_v39 }
 0x2f4   :  { %7120 = vrcp.f32 %v14845_v41  ;;  %v9214_v0 = vmul.f32 %v7115_v63, %v14847_v7  ;;  %v7117_v41 = vpop.eup %7116  ;;  %v14850_v63 = vld [vmem:[#allocation70_spill] sm:$0xff]  ;;  %v2951_v39 = vld [vmem:[%s14082_s9 + $0x18] sm:$0xff] }
 0x2f5   :  { %14841 = vst [vmem:[#allocation68_spill] sm:$0xff] %v9197_v15  ;;  %2532 = vrot.lane.b32.xlu1 %v8623_v56, %s7303_s4  ;;  %v6362_v38 = vclamps-f32 %v9197_v15, 1000000.0  ;;  %v2949_v15 = vld [vmem:[%s14082_s9 + $0x8] sm:$0xff]  ;;  %7122 = vrcp.f32 %v8988_v42  ;;  %v9232_v44 = vmul.f32 %v7117_v41, %v8557_v55 }
 0x2f6   :  { %v9209_v19 = vpop.xlane.xlu0 %1070  ;;  %14848 = vst [vmem:[#allocation10_spill] sm:$0xff] %v9214_v0  ;;  %7124 = vrcp.f32 %v14850_v63  ;;  %v6337_v56 = vclamps-f32 %v9214_v0, 1000000.0 }
 0x2f7   :  { %14846 = vst [vmem:[#allocation69_spill] sm:$0xff] %v9209_v19  ;;  %2844 = vperm.xlu0 %6938, %v9205_v3   ;;  %v2721_v18 = vfloor.f32 %v6362_v38  ;;  %v6825_v38 = vpack.c.bf16 %v2949_v15, %v2948_v46  ;;  %14852 = vst [vmem:[#allocation123_spill] sm:$0xff] %v9232_v44  ;;  %7126 = vrcp.f32 %v8913_v58  ;;  %v9246_v15 = vcvt.f32.s32 %v6851_v53  ;;  %v14858_v58 = vld [vmem:[#allocation71_spill] sm:$0xff] }
 0x2f8   :  { %v6857_v46 = vtrunc.f32 %v2694_v2  ;;  %v2696_v41 = vfloor.f32 %v6337_v56  ;;  %7128 = vrcp.f32 %v14858_v58 }
 0x2f9   :  { %2536 = vrot.lane.b32.xlu1 %v14809_v5, %s7303_s4  ;;  %v6911_v19 = vtrunc.f32 %v2721_v18  ;;  %6826 = vmatprep.subr.bf16.mxu0 %v6825_v38  ;;  %v7119_v5 = vpop.eup %7118  ;;  %14854 = vst [vmem:[#allocation125_spill] sm:$0xff] %v9246_v15  ;;  %7130 = vrcp.f32 %v8921_v34 }
 0x2fa   :  { %v9225_v62 = vpop.xlane.xlu0 %1088  ;;  %6828 = vmatpush3.bf16.msra.mxu0 %v6825_v38  ;;  %v6339_v38 = vclamps-f32 %v9232_v44, 1000000.0  ;;  %v9250_v63 = vmul.f32 %v7119_v5, %v8585_v13  ;;  %v9262_v53 = vcvt.f32.s32 %v6857_v46  ;;  %v6861_v5 = vtrunc.f32 %v2696_v41  ;;  %v14861_v41 = vld [vmem:[#allocation29_spill] sm:$0xff] }
 0x2fb   :  { %14849 = vst [vmem:[#allocation122_spill] sm:$0xff] %v9225_v62  ;;  %v9228_v36 = vcvt.f32.s32 %v6911_v19  ;;  %v6829_v19 = vpack.c.bf16 %v2951_v39, %v2950_v17  ;;  %7132 = vrcp.f32 %v8925_v22 }
 0x2fc   :  { %14855 = vst [vmem:[#allocation126_spill] sm:$0xff] %v9250_v63  ;;  %v2698_v17 = vfloor.f32 %v6339_v38  ;;  %v6341_v39 = vclamps-f32 %v9250_v63, 1000000.0  ;;  %v9281_v63 = vcvt.f32.s32 %v6861_v5  ;;  %vm3474_vm7 = vcmp.ge.s32.totalorder %v9262_v53, 0 }
 0x2fd   :  { %14851 = vst [vmem:[#allocation70_spill] sm:$0xff] %v9228_v36  ;;  %2850 = vperm.xlu0 %6938, %v9228_v36   ;;  %2540 = vrot.lane.b32.xlu1 %v14812_v29, %s7303_s4 }
 0x2fe   :  { %v9237_v42 = vpop.xlane.xlu0 %1082  ;;  %v7121_v18 = vpop.eup %7120  ;;  %6830 = vmatprep.subr.bf16.mxu0 %v6829_v19  ;;  %14863 = vst [vmem:[#allocation129_spill] sm:$0xff] %v9281_v63  ;;  %v6865_v0 = vtrunc.f32 %v2698_v17  ;;  %vm3476_vm8 = vcmp.ge.s32.totalorder %v9281_v63, 0 }
 0x2ff   :  { %14853 = vst [vmem:[#allocation124_spill] sm:$0xff] %v9237_v42  ;;  %v14856_v42 = vmov 0   ;;  %v9260_v2 = vmul.f32 %v7121_v18, %v8601_v59  ;;  %6832 = vmatpush3.bf16.msra.mxu0 %v6829_v19  ;;  %v7123_v56 = vpop.eup %7122  ;;  %v2952_v18 = vld [vmem:[%s14082_s9 + $0x20] sm:$0xff]  ;;  %v2953_v19 = vld [vmem:[%s14082_s9 + $0x28] sm:$0xff] }
 0x300   :  { %v7125_v44 = vpop.eup %7124  ;;  %v9279_v38 = vmul.f32 %v7123_v56, %v14861_v41  ;;  %v6833_v58 = vpack.c.bf16 %v2953_v19, %v2952_v18  ;;  %v9293_v17 = vcvt.f32.s32 %v6865_v0  ;;  %v2955_v0 = vld [vmem:[%s14082_s9 + $0x38] sm:$0xff] }
 0x301   :  { %6941 = vset.pattern.permute.xlu0 %v14856_v42  ;;  %2544 = vrot.lane.b32.xlu1 %v14817_v33, %s7303_s4  ;;  %14859 = vst [vmem:[#allocation71_spill] sm:$0xff] %v9260_v2  ;;  %v6343_v46 = vclamps-f32 %v9260_v2, 1000000.0  ;;  %v7127_v33 = vpop.eup %7126 }
 0x302   :  { %3282 = vperm.xlu0 %6941, %v9246_v15   ;;  %v9256_v62 = vpop.xlane.xlu0 %1100  ;;  %14862 = vst [vmem:[#allocation29_spill] sm:$0xff] %v9279_v38  ;;  %6834 = vmatprep.subr.bf16.mxu0 %v6833_v58  ;;  %v6333_v5 = vclamps-f32 %v9279_v38, 1000000.0  ;;  %14866 = vst [vmem:[#allocation132_spill] sm:$0xff] %v9293_v17  ;;  %v9297_v18 = vmul.f32 %v7127_v33, %v8643_v40  ;;  %v7129_v19 = vpop.eup %7128  ;;  %vm3478_vm9 = vcmp.ge.s32.totalorder %v9293_v17, 0 }
 0x303   :  { %14857 = vst [vmem:[#allocation127_spill] sm:$0xff] %v9256_v62  ;;  %6836 = vmatpush3.bf16.msra.mxu0 %v6833_v58  ;;  %v2702_v56 = vfloor.f32 %v6343_v46  ;;  %v2954_v46 = vld [vmem:[%s14082_s9 + $0x30] sm:$0xff]  ;;  %s7305_s9 = smov 127  }
 0x304   :  { %14867 = vst [vmem:[#allocation133_spill] sm:$0xff] %v9297_v18  ;;  %v2692_v58 = vfloor.f32 %v6333_v5  ;;  %v6347_v38 = vclamps-f32 %v9297_v18, 1000000.0  ;;  %v9329_v18 = vpop.permute.xlu1 %2500 }
 0x305   :  { %2548 = vrot.lane.b32.xlu1 %v14821_v27, %s7303_s4  ;;  %v9284_v27 = vmul.f32 %v7125_v44, %v8627_v12  ;;  %v6873_v33 = vtrunc.f32 %v2702_v56  ;;  %v14872_v56 = vld [vmem:[#allocation74_spill] sm:$0xff]  ;;  %14875 = vst [vmem:[#allocation137_spill] sm:$0xff] %v9329_v18 }
 0x306   :  { %3291 = vperm.xlu0 %6941, %v9262_v53   ;;  %v9268_v62 = vpop.xlane.xlu0 %1094 }
 0x307   :  { %14860 = vst [vmem:[#allocation128_spill] sm:$0xff] %v9268_v62  ;;  %v2700_v62 = vfloor.f32 %v6341_v39  ;;  %14864 = vst [vmem:[#allocation130_spill] sm:$0xff] %v9284_v27  ;;  %v6345_v44 = vclamps-f32 %v9284_v27, 1000000.0  ;;  %v9323_v5 = vcvt.f32.s32 %v6873_v33 }
 0x309   :  { %2552 = vrot.lane.b32.xlu1 %v14825_v57, %s7303_s4  ;;  %v6869_v39 = vtrunc.f32 %v2700_v62  ;;  %v14869_v62 = vld [vmem:[#allocation73_spill] sm:$0xff]  ;;  %v2704_v2 = vfloor.f32 %v6345_v44  ;;  %14873 = vst [vmem:[#allocation74_spill] sm:$0xff] %v9323_v5  ;;  %vm14423_vm11 = vcmp.ge.s32.totalorder %v9323_v5, 0 }
 0x30a   :  { %3297 = vperm.xlu0 %6941, %v9281_v63   ;;  %v9290_v34 = vpop.permute.xlu0 %2514  ;;  %7134 = vrcp.f32 %v14869_v62 }
 0x30b   :  { %14865 = vst [vmem:[#allocation131_spill] sm:$0xff] %v9290_v34  ;;  %v6837_v34 = vpack.c.bf16 %v2955_v0, %v2954_v46  ;;  %v9311_v27 = vcvt.f32.s32 %v6869_v39  ;;  %7136 = vrcp.f32 %v14872_v56  ;;  %v6853_v39 = vtrunc.f32 %v2692_v58  ;;  %v14877_v56 = vld [vmem:[#allocation75_spill] sm:$0xff] }
 0x30c   :  { %v6877_v46 = vtrunc.f32 %v2704_v2  ;;  %v2706_v0 = vfloor.f32 %v6347_v38  ;;  %7138 = vrcp.f32 %v14877_v56 }
 0x30d   :  { %2556 = vrot.lane.b32.xlu1 %v14829_v60, %s7303_s4  ;;  %v7131_v60 = vpop.eup %7130  ;;  %6838 = vmatprep.subr.bf16.mxu0 %v6837_v34  ;;  %v9336_v33 = vcvt.f32.s32 %v6853_v39  ;;  %v9349_v39 = vpop.permute.xlu1 %2504  ;;  %vm14424_vm10 = vcmp.ge.s32.totalorder %v9311_v27, 0 }
 0x30e   :  { %3303 = vperm.xlu0 %6941, %v9293_v17   ;;  %v9302_v22 = vpop.permute.xlu0 %2518  ;;  %6840 = vmatpush3.bf16.msra.mxu0 %v6837_v34  ;;  %v7133_v44 = vpop.eup %7132  ;;  %v9327_v62 = vmul.f32 %v7131_v60, %v8682_v4  ;;  %v9341_v38 = vcvt.f32.s32 %v6877_v46  ;;  %v6881_v58 = vtrunc.f32 %v2706_v0 }
 0x30f   :  { %14868 = vst [vmem:[#allocation134_spill] sm:$0xff] %v9302_v22  ;;  %v9315_v22 = vmul.f32 %v7129_v19, %v8665_v47  ;;  %14878 = vst [vmem:[#allocation75_spill] sm:$0xff] %v9336_v33  ;;  %v9339_v2 = vmul.f32 %v7133_v44, %v8702_v37  ;;  %vm3472_vm5 = vcmp.ge.s32.totalorder %v9336_v33, 0 }
 0x310   :  { %14874 = vst [vmem:[#allocation136_spill] sm:$0xff] %v9327_v62  ;;  %14880 = vst [vmem:[#allocation140_spill] sm:$0xff] %v9341_v38  ;;  %v9352_v56 = vcvt.f32.s32 %v6881_v58  ;;  %vm14422_vm12 = vcmp.ge.s32.totalorder %v9341_v38, 0 }
 0x311   :  { %14870 = vst [vmem:[#allocation73_spill] sm:$0xff] %v9315_v22  ;;  %2560 = vrot.lane.b32.xlu1 %v8964_v31, %s7303_s4  ;;  %v6349_v19 = vclamps-f32 %v9315_v22, 1000000.0  ;;  %14879 = vst [vmem:[#allocation139_spill] sm:$0xff] %v9339_v2  ;;  %v6353_v44 = vclamps-f32 %v9339_v2, 1000000.0 }
 0x312   :  { %3309 = vperm.xlu0 %6941, %v9311_v27   ;;  %v9320_v57 = vpop.permute.xlu0 %2522  ;;  %14884 = vst [vmem:[#allocation142_spill] sm:$0xff] %v9352_v56  ;;  %v3516_v50 = vsel %vm14422_vm12, 1, %v14856_v42  ;;  %vm14421_vm13 = vcmp.ge.s32.totalorder %v9352_v56, 0 }
 0x313   :  { %14871 = vst [vmem:[#allocation135_spill] sm:$0xff] %v9320_v57  ;;  %v2708_v60 = vfloor.f32 %v6349_v19  ;;  %v6351_v57 = vclamps-f32 %v9327_v62, 1000000.0  ;;  %v3518_v14 = vsel %vm14421_vm13, 1, %v14856_v42 }
 0x314   :  { %v7135_v18 = vpop.eup %7134 }
 0x315   :  { %2760 = vperm.xlu1 %6939, %v9246_v15   ;;  %v6885_v46 = vtrunc.f32 %v2708_v60  ;;  %v2710_v0 = vfloor.f32 %v6351_v57  ;;  %v9355_v19 = vmul.f32 %v7135_v18, %v8721_v32  ;;  %v7137_v62 = vpop.eup %7136  ;;  %v9367_v60 = vpop.permute.xlu1 %2508 }
 0x316   :  { %3315 = vperm.xlu0 %6941, %v9323_v5   ;;  %v9333_v34 = vpop.permute.xlu0 %2526  ;;  %v9365_v58 = vmul.f32 %v7137_v62, %v8744_v45  ;;  %v7139_v57 = vpop.eup %7138  ;;  %14889 = vst [vmem:[#allocation147_spill] sm:$0xff] %v9367_v60 }
 0x317   :  { %14876 = vst [vmem:[#allocation138_spill] sm:$0xff] %v9333_v34  ;;  %v14882_v34 = vld [vmem:[#allocation76_spill] sm:$0xff]  ;;  %14885 = vst [vmem:[#allocation143_spill] sm:$0xff] %v9355_v19  ;;  %v6355_v2 = vclamps-f32 %v9355_v19, 1000000.0 }
 0x318   :  { %7140 = vrcp.f32 %v14882_v34  ;;  %14883 = vst [vmem:[#allocation76_spill] sm:$0xff] %v9349_v39  ;;  %v9361_v34 = vcvt.f32.s32 %v6885_v46  ;;  %v6889_v39 = vtrunc.f32 %v2710_v0  ;;  %14888 = vst [vmem:[#allocation146_spill] sm:$0xff] %v9365_v58  ;;  %v6357_v46 = vclamps-f32 %v9365_v58, 1000000.0 }
 0x319   :  { %2763 = vperm.xlu1 %6939, %v9336_v33   ;;  %v9377_v0 = vmul.f32 %v7139_v57, %v8770_v24 }
 0x31a   :  { %3321 = vperm.xlu0 %6941, %v9341_v38   ;;  %v9346_v22 = vpop.permute.xlu0 %2530  ;;  %14887 = vst [vmem:[#allocation145_spill] sm:$0xff] %v9361_v34  ;;  %vm14234_vm14 = vcmp.ge.s32.totalorder %v9361_v34, 0 }
 0x31b   :  { %14881 = vst [vmem:[#allocation141_spill] sm:$0xff] %v9346_v22  ;;  %v2712_v22 = vfloor.f32 %v6353_v44  ;;  %v2714_v44 = vfloor.f32 %v6355_v2  ;;  %14892 = vst [vmem:[#allocation150_spill] sm:$0xff] %v9377_v0  ;;  %v6359_v2 = vclamps-f32 %v9377_v0, 1000000.0  ;;  %v3520_v9 = vsel %vm14234_vm14, 1, %v14856_v42 }
 0x31d   :  { %2769 = vperm.xlu1 %6939, %v9262_v53   ;;  %v6893_v29 = vtrunc.f32 %v2712_v22  ;;  %v6897_v22 = vtrunc.f32 %v2714_v44 }
 0x31e   :  { %3327 = vperm.xlu0 %6941, %v9352_v56   ;;  %v9359_v31 = vpop.permute.xlu0 %2534 }
 0x31f   :  { %14886 = vst [vmem:[#allocation144_spill] sm:$0xff] %v9359_v31  ;;  %v9373_v31 = vcvt.f32.s32 %v6889_v39  ;;  %v9385_v43 = vcvt.f32.s32 %v6893_v29  ;;  %v2716_v39 = vfloor.f32 %v6357_v46  ;;  %v2718_v29 = vfloor.f32 %v6359_v2 }
 0x321   :  { %2775 = vperm.xlu1 %6939, %v9281_v63   ;;  %14891 = vst [vmem:[#allocation149_spill] sm:$0xff] %v9373_v31  ;;  %14895 = vst [vmem:[#allocation153_spill] sm:$0xff] %v9385_v43  ;;  %vm14224_vm15 = vcmp.ge.s32.totalorder %v9373_v31, 0  ;;  %vm14221_vm0 = vcmp.ge.s32.totalorder %v9385_v43, 0 }
 0x322   :  { %3333 = vperm.xlu0 %6941, %v9361_v34   ;;  %v9371_v18 = vpop.permute.xlu0 %2538  ;;  %v7141_v62 = vpop.eup %7140  ;;  %v3522_v16 = vsel %vm14224_vm15, 1, %v14856_v42  ;;  %vm14228_vm15 = vcmp.lt.s32.totalorder %v9293_v17, 64 }
 0x323   :  { %14890 = vst [vmem:[#allocation148_spill] sm:$0xff] %v9371_v18  ;;  %v9389_v18 = vmul.f32 %v7141_v62, %v8777_v35  ;;  %v3524_v35 = vsel %vm14221_vm0, 1, %v14856_v42  ;;  %vm14225_vm0 = vcmp.lt.s32.totalorder %v9281_v63, 64 }
 0x325   :  { %v9379_v19 = vpop.xlane.xlu1 %1010  ;;  %2781 = vperm.xlu1 %6939, %v9293_v17   ;;  %14896 = vst [vmem:[#allocation154_spill] sm:$0xff] %v9389_v18  ;;  %v6361_v44 = vclamps-f32 %v9389_v18, 1000000.0  ;;  %v3508_v18 = vsel %vm3476_vm8, 1, %v14856_v42 }
 0x326   :  { %14893 = vst [vmem:[#allocation151_spill] sm:$0xff] %v9379_v19  ;;  %3339 = vperm.xlu0 %6941, %v9373_v31   ;;  %v9383_v60 = vpop.permute.xlu0 %2542  ;;  %v9397_v19 = vcvt.f32.s32 %v6897_v22 }
 0x327   :  { %14894 = vst [vmem:[#allocation152_spill] sm:$0xff] %v9383_v60  ;;  %v6901_v60 = vtrunc.f32 %v2716_v39  ;;  %v2720_v25 = vfloor.f32 %v6361_v44 }
 0x328   :  { %14899 = vst [vmem:[#allocation157_spill] sm:$0xff] %v9397_v19  ;;  %vm14218_vm1 = vcmp.ge.s32.totalorder %v9397_v19, 0 }
 0x329   :  { %v9391_v57 = vpop.xlane.xlu1 %1025  ;;  %2787 = vperm.xlu1 %6939, %v9311_v27   ;;  %v9406_v0 = vcvt.f32.s32 %v6901_v60  ;;  %v6909_v2 = vtrunc.f32 %v2720_v25  ;;  %v14203_v60 = vlaneseq  ;;  %v3526_v24 = vsel %vm14218_vm1, 1, %v14856_v42 }
 0x32a   :  { %14897 = vst [vmem:[#allocation155_spill] sm:$0xff] %v9391_v57  ;;  %3345 = vperm.xlu0 %6941, %v9385_v43   ;;  %v9395_v58 = vpop.permute.xlu0 %2546  ;;  %v6905_v57 = vtrunc.f32 %v2718_v29  ;;  %vm14231_vm1 = vcmp.lt.s32.totalorder %v9262_v53, 64 }
 0x32b   :  { %14898 = vst [vmem:[#allocation156_spill] sm:$0xff] %v9395_v58  ;;  %14902 = vst [vmem:[#allocation160_spill] sm:$0xff] %v9406_v0  ;;  %v9420_v29 = vcvt.f32.s32 %v6909_v2  ;;  %v9430_v25 = vand.u32 127, %v14203_v60  ;;  %v3502_v2 = vsel %vm3470_vm3, 1, %v14856_v42  ;;  %vm14213_vm2 = vcmp.ge.s32.totalorder %v9406_v0, 0 }
 0x32c   :  { %v9414_v39 = vcvt.f32.s32 %v6905_v57  ;;  %v3528_v45 = vsel %vm14213_vm2, 1, %v14856_v42 }
 0x32d   :  { %v9400_v46 = vpop.xlane.xlu1 %1019  ;;  %2793 = vperm.xlu1 %6939, %v9323_v5   ;;  %14907 = vst [vmem:[#allocation165_spill] sm:$0xff] %v9420_v29  ;;  %vm14217_vm2 = vcmp.ge.s32.totalorder %v9420_v29, 0 }
 0x32e   :  { %14900 = vst [vmem:[#allocation158_spill] sm:$0xff] %v9400_v46  ;;  %3351 = vperm.xlu0 %6941, %v9397_v19   ;;  %v9404_v62 = vpop.permute.xlu0 %2550  ;;  %14905 = vst [vmem:[#allocation163_spill] sm:$0xff] %v9414_v39  ;;  %v3514_v46 = vsel %vm14423_vm11, 1, %v14856_v42 }
 0x32f   :  { %14901 = vst [vmem:[#allocation159_spill] sm:$0xff] %v9404_v62 }
 0x331   :  { %v9408_v8 = vpop.xlane.xlu1 %1037  ;;  %2799 = vperm.xlu1 %6939, %v9341_v38  }
 0x332   :  { %14903 = vst [vmem:[#allocation161_spill] sm:$0xff] %v9408_v8  ;;  %3357 = vperm.xlu0 %6941, %v9406_v0   ;;  %v9412_v22 = vpop.permute.xlu0 %2554  ;;  %v3510_v8 = vsel %vm3478_vm9, 1, %v14856_v42 }
 0x333   :  { %14904 = vst [vmem:[#allocation162_spill] sm:$0xff] %v9412_v22 }
 0x335   :  { %v9416_v58 = vpop.xlane.xlu1 %1031  ;;  %2805 = vperm.xlu1 %6939, %v9352_v56  }
 0x336   :  { %14906 = vst [vmem:[#allocation164_spill] sm:$0xff] %v9416_v58  ;;  %3363 = vperm.xlu0 %6941, %v9414_v39   ;;  %v9425_v62 = vpop.permute.xlu0 %2558  ;;  %v3512_v58 = vsel %vm14424_vm10, 1, %v14856_v42 }
 0x337   :  { %14909 = vst [vmem:[#allocation167_spill] sm:$0xff] %v9425_v62  ;;  %v14911_v62 = vmov 0.0  }
 0x339   :  { %v9422_v44 = vpop.xlane.xlu1 %1049  ;;  %2811 = vperm.xlu1 %6939, %v9361_v34  }
 0x33a   :  { %14908 = vst [vmem:[#allocation166_spill] sm:$0xff] %v9422_v44  ;;  %3369 = vperm.xlu0 %6941, %v9420_v29  }
 0x33d   :  { %2817 = vperm.xlu1 %6939, %v9373_v31   ;;  %v9433_v57 = vpop.xlane.xlu1 %1043 }
 0x33e   :  { %14910 = vst [vmem:[#allocation168_spill] sm:$0xff] %v9433_v57  ;;  %3534 = vrot.lane.b32.xlu0 %v3502_v2, %s7305_s9  ;;  %v2758_v22 = vpop.permute.xlu0 %2757  ;;  %v3504_v57 = vsel %vm3472_vm5, 1, %v14856_v42 }
 0x33f   :  { %vm2852_vm6 = vcmp.eq.s32.totalorder %v9430_v25, %v2758_v22 }
 0x340   :  { %v6363_v60 = vsel %vm2852_vm6, 1.0, %v14911_v62  ;;  %vm14215_vm6 = vcmp.ge.s32.totalorder %v9414_v39, 0 }
 0x341   :  { %2823 = vperm.xlu1 %6939, %v9385_v43   ;;  %v9443_v44 = vpop.xlane.xlu1 %1061  ;;  %6777 = vmatprep.mubr.msk.f32.mxu0 %vm2956_vm4, %v6363_v60  ;;  %v3530_v32 = vsel %vm14215_vm6, 1, %v14856_v42  ;;  %vm14236_vm6 = vcmp.lt.s32.totalorder %v9057_v49, 64 }
 0x342   :  { %14912 = vst [vmem:[#allocation169_spill] sm:$0xff] %v9443_v44  ;;  %3538 = vrot.lane.b32.xlu0 %v3504_v57, %s7305_s9  ;;  %v9450_v2 = vpop.permute.xlu0 %2766  ;;  %v3506_v44 = vsel %vm3474_vm7, 1, %v14856_v42 }
 0x343   :  { %vm2855_vm14 = vcmp.eq.s32.totalorder %v9430_v25, %v9450_v2 }
 0x345   :  { %2829 = vperm.xlu1 %6939, %v9397_v19   ;;  %v9454_v22 = vpop.xlane.xlu1 %1055 }
 0x346   :  { %14913 = vst [vmem:[#allocation170_spill] sm:$0xff] %v9454_v22  ;;  %3542 = vrot.lane.b32.xlu0 %v3506_v44, %s7305_s9  ;;  %v9460_v60 = vpop.permute.xlu0 %2772 }
 0x349   :  { %2835 = vperm.xlu1 %6939, %v9406_v0   ;;  %v9464_v57 = vpop.xlane.xlu1 %1073 }
 0x34a   :  { %14914 = vst [vmem:[#allocation171_spill] sm:$0xff] %v9464_v57  ;;  %3546 = vrot.lane.b32.xlu0 %v3508_v18, %s7305_s9  ;;  %v9470_v22 = vpop.permute.xlu0 %2778 }
 0x34d   :  { %2841 = vperm.xlu1 %6939, %v9414_v39   ;;  %v9474_v44 = vpop.xlane.xlu1 %1067 }
 0x34e   :  { %14915 = vst [vmem:[#allocation172_spill] sm:$0xff] %v9474_v44  ;;  %3550 = vrot.lane.b32.xlu0 %v3510_v8, %s7305_s9  ;;  %v9480_v57 = vpop.permute.xlu0 %2784 }
 0x351   :  { %2847 = vperm.xlu1 %6939, %v9420_v29   ;;  %v9484_v18 = vpop.xlane.xlu1 %1085 }
 0x352   :  { %14916 = vst [vmem:[#allocation173_spill] sm:$0xff] %v9484_v18  ;;  %3554 = vrot.lane.b32.xlu0 %v3512_v58, %s7305_s9  ;;  %v9490_v44 = vpop.permute.xlu0 %2790 }
 0x355   :  { %6940 = vset.pattern.permute.xlu1 %v14856_v42  ;;  %v9494_v8 = vpop.xlane.xlu1 %1079 }
 0x356   :  { %14917 = vst [vmem:[#allocation174_spill] sm:$0xff] %v9494_v8  ;;  %3558 = vrot.lane.b32.xlu0 %v3514_v46, %s7305_s9  ;;  %v9500_v18 = vpop.permute.xlu0 %2796  ;;  %3279 = vperm.xlu1 %6940, %v9057_v49  }
 0x359   :  { %v9504_v58 = vpop.xlane.xlu1 %1097 }
 0x35a   :  { %14918 = vst [vmem:[#allocation175_spill] sm:$0xff] %v9504_v58  ;;  %3562 = vrot.lane.b32.xlu0 %v3516_v50, %s7305_s9  ;;  %v9510_v8 = vpop.permute.xlu0 %2802  ;;  %3285 = vperm.xlu1 %6940, %v9336_v33  }
 0x35d   :  { %v9514_v46 = vpop.xlane.xlu1 %1091 }
 0x35e   :  { %14919 = vst [vmem:[#allocation176_spill] sm:$0xff] %v9514_v46  ;;  %3566 = vrot.lane.b32.xlu0 %v3518_v14, %s7305_s9  ;;  %v9520_v58 = vpop.permute.xlu0 %2808  ;;  %3288 = vperm.xlu1 %6940, %v9069_v1  }
 0x361   :  { %v9524_v50 = vpop.permute.xlu1 %2512 }
 0x362   :  { %14920 = vst [vmem:[#allocation177_spill] sm:$0xff] %v9524_v50  ;;  %3570 = vrot.lane.b32.xlu0 %v3520_v9, %s7305_s9  ;;  %v9530_v46 = vpop.permute.xlu0 %2814  ;;  %3294 = vperm.xlu1 %6940, %v9078_v28  }
 0x365   :  { %v9534_v14 = vpop.permute.xlu1 %2516 }
 0x366   :  { %14921 = vst [vmem:[#allocation178_spill] sm:$0xff] %v9534_v14  ;;  %3574 = vrot.lane.b32.xlu0 %v3522_v16, %s7305_s9  ;;  %v9540_v50 = vpop.permute.xlu0 %2820  ;;  %3300 = vperm.xlu1 %6940, %v9088_v11  }
 0x369   :  { %v9544_v9 = vpop.permute.xlu1 %2520 }
 0x36a   :  { %14922 = vst [vmem:[#allocation179_spill] sm:$0xff] %v9544_v9  ;;  %3578 = vrot.lane.b32.xlu0 %v3524_v35, %s7305_s9  ;;  %v9550_v14 = vpop.permute.xlu0 %2826  ;;  %3306 = vperm.xlu1 %6940, %v9097_v54  }
 0x36d   :  { %v9554_v16 = vpop.permute.xlu1 %2524 }
 0x36e   :  { %14923 = vst [vmem:[#allocation180_spill] sm:$0xff] %v9554_v16  ;;  %3582 = vrot.lane.b32.xlu0 %v3526_v24, %s7305_s9  ;;  %v9560_v9 = vpop.permute.xlu0 %2832  ;;  %3312 = vperm.xlu1 %6940, %v9108_v26  }
 0x371   :  { %v9564_v35 = vpop.permute.xlu1 %2528 }
 0x372   :  { %14924 = vst [vmem:[#allocation181_spill] sm:$0xff] %v9564_v35  ;;  %3586 = vrot.lane.b32.xlu0 %v3528_v45, %s7305_s9  ;;  %3318 = vperm.xlu1 %6940, %v9120_v20   ;;  %v9572_v16 = vpop.permute.xlu0 %2838  ;;  %v3532_v45 = vsel %vm14217_vm2, 1, %v14856_v42  ;;  %vm14233_vm2 = vcmp.lt.s32.totalorder %v9336_v33, 64 }
 0x375   :  { %v9574_v24 = vpop.permute.xlu1 %2532 }
 0x376   :  { %14925 = vst [vmem:[#allocation182_spill] sm:$0xff] %v9574_v24  ;;  %3590 = vrot.lane.b32.xlu0 %v3530_v32, %s7305_s9  ;;  %3324 = vperm.xlu1 %6940, %v9127_v6   ;;  %v9587_v37 = vpop.permute.xlu0 %2844  ;;  %v3726_v32 = vsel %vm14236_vm6, 1, %v14856_v42  ;;  %vm14242_vm6 = vcmp.ge.s32.totalorder %v9069_v1, 0 }
 0x379   :  { %v9582_v35 = vpop.permute.xlu1 %2536 }
 0x37a   :  { %14926 = vst [vmem:[#allocation183_spill] sm:$0xff] %v9582_v35  ;;  %3594 = vrot.lane.b32.xlu0 %v3532_v45, %s7305_s9  ;;  %3330 = vperm.xlu1 %6940, %v9135_v30   ;;  %v3728_v45 = vsel %vm14233_vm2, 1, %v14856_v42  ;;  %vm14239_vm2 = vcmp.ge.s32.totalorder %v9246_v15, 0 }
 0x37c   :  { %v9597_v4 = vpop.permute.xlu0 %2850 }
 0x37d   :  { %v9592_v24 = vpop.permute.xlu1 %2540 }
 0x37e   :  { %14927 = vst [vmem:[#allocation184_spill] sm:$0xff] %v9592_v24  ;;  %3758 = vrot.lane.b32.xlu0 %v3726_v32, %s7305_s9  ;;  %3336 = vperm.xlu1 %6940, %v9146_v21   ;;  %v3730_v32 = vsel %vm14231_vm1, 1, %v14856_v42 }
 0x381   :  { %v9602_v35 = vpop.permute.xlu1 %2544  ;;  %v9610_v24 = vpop.permute.xlu0 %3282 }
 0x382   :  { %14928 = vst [vmem:[#allocation185_spill] sm:$0xff] %v9602_v35  ;;  %3762 = vrot.lane.b32.xlu0 %v3728_v45, %s7305_s9  ;;  %3342 = vperm.xlu1 %6940, %v9156_v23   ;;  %v3732_v45 = vsel %vm14225_vm0, 1, %v14856_v42  ;;  %vm14232_vm0 = vcmp.lt.s32.totalorder %v9311_v27, 64 }
 0x385   :  { %v9612_v49 = vpop.permute.xlu1 %2548  ;;  %v9625_v33 = vpop.permute.xlu0 %3291 }
 0x386   :  { %14929 = vst [vmem:[#allocation186_spill] sm:$0xff] %v9612_v49  ;;  %3766 = vrot.lane.b32.xlu0 %v3730_v32, %s7305_s9  ;;  %3348 = vperm.xlu1 %6940, %v9170_v51   ;;  %v3734_v32 = vsel %vm14228_vm15, 1, %v14856_v42  ;;  %vm14235_vm15 = vcmp.lt.s32.totalorder %v9323_v5, 64  ;;  %v15030_v5 = vld [vmem:[#allocation73_spill] sm:$0xff] }
 0x389   :  { %v9620_v35 = vpop.permute.xlu1 %2552 }
 0x38a   :  { %14930 = vst [vmem:[#allocation187_spill] sm:$0xff] %v9620_v35  ;;  %3770 = vrot.lane.b32.xlu0 %v3732_v45, %s7305_s9  ;;  %3354 = vperm.xlu1 %6940, %v9179_v52   ;;  %v9638_v35 = vpop.permute.xlu0 %3297  ;;  %v3736_v45 = vsel %vm14232_vm0, 1, %v14856_v42  ;;  %vm14240_vm0 = vcmp.lt.s32.totalorder %v9341_v38, 64 }
 0x38d   :  { %v9630_v49 = vpop.permute.xlu1 %2556 }
 0x38e   :  { %14931 = vst [vmem:[#allocation188_spill] sm:$0xff] %v9630_v49  ;;  %3774 = vrot.lane.b32.xlu0 %v3734_v32, %s7305_s9  ;;  %3360 = vperm.xlu1 %6940, %v9190_v61   ;;  %v3738_v32 = vsel %vm14235_vm15, 1, %v14856_v42  ;;  %v9651_v17 = vpop.permute.xlu0 %3303 }
 0x391   :  { %v9640_v63 = vpop.permute.xlu1 %2560 }
 0x392   :  { %14932 = vst [vmem:[#allocation189_spill] sm:$0xff] %v9640_v63  ;;  %3778 = vrot.lane.b32.xlu0 %v3736_v45, %s7305_s9  ;;  %3366 = vperm.xlu1 %6940, %v9205_v3   ;;  %v9675_v38 = vpop.permute.xlu0 %3309 }
 0x395   :  { %v2761_v49 = vpop.permute.xlu1 %2760 }
 0x396   :  { %vm2853_vm1 = vcmp.eq.s32.totalorder %v9430_v25, %v2761_v49  ;;  %3782 = vrot.lane.b32.xlu0 %v3738_v32, %s7305_s9  ;;  %3372 = vperm.xlu1 %6940, %v9228_v36   ;;  %v3740_v49 = vsel %vm14240_vm0, 1, %v14856_v42  ;;  %v3503_v32 = vsel %vm14239_vm2, 1, %v14856_v42  ;;  %vm2857_vm2 = vcmp.eq.s32.totalorder %v9430_v25, %v9460_v60 }
 0x397   :  { %v6364_v45 = vsel %vm2853_vm1, 1.0, %v14911_v62  ;;  %vm14241_vm1 = vcmp.lt.s32.totalorder %v9352_v56, 64  ;;  %vm14243_vm0 = vcmp.ge.s32.totalorder %v9078_v28, 0 }
 0x398   :  { %6778 = vmatmul.mubr.msk.f32.vlgmr.msra.gmra.mrb[16].mxu0 %vm2956_vm4, %v6364_v45  ;;  %v6366_v45 = vsel %vm2855_vm14, 1.0, %v14911_v62 }
 0x399   :  { %v2764_v63 = vpop.permute.xlu1 %2763 }
 0x39a   :  { %vm2854_vm15 = vcmp.eq.s32.totalorder %v9430_v25, %v2764_v63  ;;  %3786 = vrot.lane.b32.xlu0 %v3740_v49, %s7305_s9  ;;  %3536 = vrot.lane.b32.xlu1 %v3503_v32, %s7305_s9  ;;  %v3742_v49 = vsel %vm14241_vm1, 1, %v14856_v42  ;;  %v3505_v32 = vsel %vm14242_vm6, 1, %v14856_v42  ;;  %vm2859_vm1 = vcmp.eq.s32.totalorder %v9430_v25, %v9470_v22 }
 0x39b   :  { %v6365_v2 = vsel %vm2854_vm15, 1.0, %v14911_v62  ;;  %vm14244_vm15 = vcmp.lt.s32.totalorder %v9361_v34, 64  ;;  %vm14245_vm6 = vcmp.ge.s32.totalorder %v9088_v11, 0 }
 0x39c   :  { %6780 = vmatprep.mubr.msk.f32.mxu0 %vm2956_vm4, %v6365_v2  ;;  %v6368_v2 = vsel %vm2857_vm2, 1.0, %v14911_v62 }
 0x39d   :  { %v2770_v63 = vpop.permute.xlu1 %2769  ;;  %6781 = vmatmul.mubr.msk.f32.gmra.mrb[18].mxu0 %vm2956_vm4, %v6366_v45 }
 0x39e   :  { %vm2856_vm14 = vcmp.eq.s32.totalorder %v9430_v25, %v2770_v63  ;;  %3790 = vrot.lane.b32.xlu0 %v3742_v49, %s7305_s9  ;;  %3540 = vrot.lane.b32.xlu1 %v3505_v32, %s7305_s9  ;;  %v3744_v63 = vsel %vm14244_vm15, 1, %v14856_v42  ;;  %v3507_v49 = vsel %vm14243_vm0, 1, %v14856_v42  ;;  %v9704_v32 = vpop.permute.xlu0 %3315  ;;  %vm2861_vm0 = vcmp.eq.s32.totalorder %v9430_v25, %v9480_v57 }
 0x39f   :  { %v6367_v60 = vsel %vm2856_vm14, 1.0, %v14911_v62  ;;  %vm14246_vm14 = vcmp.lt.s32.totalorder %v9373_v31, 64  ;;  %vm14248_vm15 = vcmp.ge.s32.totalorder %v9097_v54, 0  ;;  %v15000_v31 = vld [vmem:[#allocation118_spill] sm:$0xff] }
 0x3a0   :  { %6783 = vmatprep.mubr.msk.f32.mxu0 %vm2956_vm4, %v6367_v60  ;;  %v6370_v60 = vsel %vm2859_vm1, 1.0, %v14911_v62  ;;  %vm14247_vm1 = vcmp.lt.s32.totalorder %v9385_v43, 64  ;;  %v14962_v43 = vld [vmem:[#allocation19_spill] sm:$0xff] }
 0x3a1   :  { %v2776_v45 = vpop.permute.xlu1 %2775  ;;  %6784 = vmatmul.mubr.msk.f32.gmra.mrb[20].mxu0 %vm2956_vm4, %v6368_v2 }
 0x3a2   :  { %vm2858_vm2 = vcmp.eq.s32.totalorder %v9430_v25, %v2776_v45  ;;  %3794 = vrot.lane.b32.xlu0 %v3744_v63, %s7305_s9  ;;  %3544 = vrot.lane.b32.xlu1 %v3507_v49, %s7305_s9  ;;  %v3746_v45 = vsel %vm14246_vm14, 1, %v14856_v42  ;;  %v3509_v63 = vsel %vm14245_vm6, 1, %v14856_v42  ;;  %v6372_v49 = vsel %vm2861_vm0, 1.0, %v14911_v62 }
 0x3a3   :  { %v6369_v22 = vsel %vm2858_vm2, 1.0, %v14911_v62  ;;  %vm2863_vm6 = vcmp.eq.s32.totalorder %v9430_v25, %v9490_v44  ;;  %vm14249_vm14 = vcmp.ge.s32.totalorder %v9108_v26, 0 }
 0x3a4   :  { %6786 = vmatprep.mubr.msk.f32.mxu0 %vm2956_vm4, %v6369_v22  ;;  %v9730_v22 = vpop.permute.xlu0 %3321 }
 0x3a5   :  { %v2782_v2 = vpop.permute.xlu1 %2781  ;;  %6787 = vmatmul.mubr.msk.f32.gmra.mrb[22].mxu0 %vm2956_vm4, %v6370_v60 }
 0x3a6   :  { %vm2860_vm2 = vcmp.eq.s32.totalorder %v9430_v25, %v2782_v2  ;;  %3798 = vrot.lane.b32.xlu0 %v3746_v45, %s7305_s9  ;;  %3548 = vrot.lane.b32.xlu1 %v3509_v63, %s7305_s9  ;;  %v3748_v2 = vsel %vm14247_vm1, 1, %v14856_v42  ;;  %v3511_v45 = vsel %vm14248_vm15, 1, %v14856_v42  ;;  %v6374_v63 = vsel %vm2863_vm6, 1.0, %v14911_v62 }
 0x3a7   :  { %v6371_v57 = vsel %vm2860_vm2, 1.0, %v14911_v62  ;;  %vm14250_vm2 = vcmp.lt.s32.totalorder %v9397_v19, 64  ;;  %vm2865_vm1 = vcmp.eq.s32.totalorder %v9430_v25, %v9500_v18  ;;  %vm14251_vm15 = vcmp.ge.s32.totalorder %v9120_v20, 0  ;;  %v14957_v19 = vld [vmem:[#allocation22_spill] sm:$0xff] }
 0x3a8   :  { %6789 = vmatprep.mubr.msk.f32.mxu0 %vm2956_vm4, %v6371_v57 }
 0x3a9   :  { %v2788_v60 = vpop.permute.xlu1 %2787  ;;  %6790 = vmatmul.mubr.msk.f32.gmra.mrb[24].mxu0 %vm2956_vm4, %v6372_v49  ;;  %v3750_v49 = vsel %vm14250_vm2, 1, %v14856_v42  ;;  %vm14254_vm2 = vcmp.ge.s32.totalorder %v9127_v6, 0 }
 0x3aa   :  { %vm2862_vm0 = vcmp.eq.s32.totalorder %v9430_v25, %v2788_v60  ;;  %3802 = vrot.lane.b32.xlu0 %v3748_v2, %s7305_s9  ;;  %3552 = vrot.lane.b32.xlu1 %v3511_v45, %s7305_s9  ;;  %v3513_v60 = vsel %vm14249_vm14, 1, %v14856_v42  ;;  %v9759_v2 = vpop.permute.xlu0 %3327  ;;  %v6376_v45 = vsel %vm2865_vm1, 1.0, %v14911_v62  ;;  %vm2867_vm14 = vcmp.eq.s32.totalorder %v9430_v25, %v9510_v8 }
 0x3ab   :  { %v6373_v44 = vsel %vm2862_vm0, 1.0, %v14911_v62  ;;  %vm14252_vm0 = vcmp.lt.s32.totalorder %v9406_v0, 64  ;;  %vm14253_vm1 = vcmp.lt.s32.totalorder %v9414_v39, 64  ;;  %v14949_v39 = vld [vmem:[#allocation31_spill] sm:$0xff]  ;;  %v14954_v0 = vld [vmem:[#allocation38_spill] sm:$0xff] }
 0x3ac   :  { %6792 = vmatprep.mubr.msk.f32.mxu0 %vm2956_vm4, %v6373_v44 }
 0x3ad   :  { %v2794_v57 = vpop.permute.xlu1 %2793  ;;  %6793 = vmatmul.mubr.msk.f32.gmra.mrb[26].mxu0 %vm2956_vm4, %v6374_v63  ;;  %v3752_v63 = vsel %vm14252_vm0, 1, %v14856_v42  ;;  %vm14255_vm0 = vcmp.ge.s32.totalorder %v9135_v30, 0 }
 0x3ae   :  { %vm2864_vm6 = vcmp.eq.s32.totalorder %v9430_v25, %v2794_v57  ;;  %3806 = vrot.lane.b32.xlu0 %v3750_v49, %s7305_s9  ;;  %3556 = vrot.lane.b32.xlu1 %v3513_v60, %s7305_s9  ;;  %v3515_v57 = vsel %vm14251_vm15, 1, %v14856_v42  ;;  %v6378_v49 = vsel %vm2867_vm14, 1.0, %v14911_v62  ;;  %v9785_v60 = vpop.permute.xlu0 %3333  ;;  %vm2869_vm15 = vcmp.eq.s32.totalorder %v9430_v25, %v9520_v58 }
 0x3af   :  { %v6375_v18 = vsel %vm2864_vm6, 1.0, %v14911_v62 }
 0x3b0   :  { %6795 = vmatprep.mubr.msk.f32.mxu0 %vm2956_vm4, %v6375_v18 }
 0x3b1   :  { %v2800_v44 = vpop.permute.xlu1 %2799  ;;  %6796 = vmatmul.mubr.msk.f32.gmra.mrb[28].mxu0 %vm2956_vm4, %v6376_v45  ;;  %v3754_v45 = vsel %vm14253_vm1, 1, %v14856_v42  ;;  %vm2871_vm1 = vcmp.eq.s32.totalorder %v9430_v25, %v9530_v46 }
 0x3b2   :  { %vm2866_vm6 = vcmp.eq.s32.totalorder %v9430_v25, %v2800_v44  ;;  %3810 = vrot.lane.b32.xlu0 %v3752_v63, %s7305_s9  ;;  %3560 = vrot.lane.b32.xlu1 %v3515_v57, %s7305_s9  ;;  %v3517_v44 = vsel %vm14254_vm2, 1, %v14856_v42  ;;  %v6380_v63 = vsel %vm2869_vm15, 1.0, %v14911_v62  ;;  %vm14257_vm2 = vcmp.ge.s32.totalorder %v9146_v21, 0 }
 0x3b3   :  { %v6377_v8 = vsel %vm2866_vm6, 1.0, %v14911_v62  ;;  %vm14256_vm6 = vcmp.lt.s32.totalorder %v9420_v29, 64 }
 0x3b4   :  { %6798 = vmatprep.mubr.msk.f32.mxu0 %vm2956_vm4, %v6377_v8  ;;  %v3756_v8 = vsel %vm14256_vm6, 1, %v14856_v42 }
 0x3b5   :  { %v2806_v18 = vpop.permute.xlu1 %2805  ;;  %6799 = vmatmul.mubr.msk.f32.gmra.mrb[30].mxu0 %vm2956_vm4, %v6378_v49  ;;  %v3519_v49 = vsel %vm14255_vm0, 1, %v14856_v42  ;;  %vm2873_vm0 = vcmp.eq.s32.totalorder %v9430_v25, %v9540_v50 }
 0x3b6   :  { %vm2868_vm14 = vcmp.eq.s32.totalorder %v9430_v25, %v2806_v18  ;;  %3814 = vrot.lane.b32.xlu0 %v3754_v45, %s7305_s9  ;;  %3564 = vrot.lane.b32.xlu1 %v3517_v44, %s7305_s9  ;;  %v9814_v18 = vpop.permute.xlu0 %3339  ;;  %v6382_v45 = vsel %vm2871_vm1, 1.0, %v14911_v62  ;;  %vm3888_vm1 = vcmp.gt.f32.partialorder %v14861_v41, 1e-06 }
 0x3b7   :  { %v6379_v58 = vsel %vm2868_vm14, 1.0, %v14911_v62  ;;  %vm3886_vm14 = vcmp.gt.f32.partialorder %v14749_v48, 1e-06  ;;  %v3521_v48 = vsel %vm14257_vm2, 1, %v14856_v42  ;;  %vm14259_vm2 = vcmp.ge.s32.totalorder %v9170_v51, 0 }
 0x3b8   :  { %6801 = vmatprep.mubr.msk.f32.mxu0 %vm2956_vm4, %v6379_v58  ;;  %v3918_v58 = vsel %vm3886_vm14, 1, %v14856_v42  ;;  %vm2875_vm14 = vcmp.eq.s32.totalorder %v9430_v25, %v9550_v14 }
 0x3b9   :  { %v2812_v57 = vpop.permute.xlu1 %2811  ;;  %6802 = vmatmul.mubr.msk.f32.gmra.mrb[32].mxu0 %vm2956_vm4, %v6380_v63  ;;  %v6384_v63 = vsel %vm2873_vm0, 1.0, %v14911_v62  ;;  %vm3890_vm0 = vcmp.gt.f32.partialorder %v14842_v10, 1e-06  ;;  %v3525_v10 = vsel %vm14259_vm2, 1, %v14856_v42 }
 0x3ba   :  { %vm2870_vm15 = vcmp.eq.s32.totalorder %v9430_v25, %v2812_v57  ;;  %3818 = vrot.lane.b32.xlu0 %v3756_v8, %s7305_s9  ;;  %3568 = vrot.lane.b32.xlu1 %v3519_v49, %s7305_s9  ;;  %v9838_v57 = vpop.permute.xlu0 %3345  ;;  %v3920_v49 = vsel %vm3888_vm1, 1, %v14856_v42  ;;  %vm2877_vm1 = vcmp.eq.s32.totalorder %v9430_v25, %v9560_v9 }
 0x3bb   :  { %v6381_v46 = vsel %vm2870_vm15, 1.0, %v14911_v62  ;;  %vm14258_vm15 = vcmp.ge.s32.totalorder %v9156_v23, 0 }
 0x3bc   :  { %6804 = vmatprep.mubr.msk.f32.mxu0 %vm2956_vm4, %v6381_v46  ;;  %v3523_v41 = vsel %vm14258_vm15, 1, %v14856_v42  ;;  %v6386_v46 = vsel %vm2875_vm14, 1.0, %v14911_v62  ;;  %vm3892_vm14 = vcmp.gt.f32.partialorder %v14847_v7, 1e-06  ;;  %vm14260_vm15 = vcmp.ge.s32.totalorder %v9179_v52, 0 }
 0x3bd   :  { %v2818_v44 = vpop.permute.xlu1 %2817  ;;  %6805 = vmatmul.mubr.msk.f32.gmra.mrb[34].mxu0 %vm2956_vm4, %v6382_v45  ;;  %v3527_v7 = vsel %vm14260_vm15, 1, %v14856_v42  ;;  %vm14263_vm15 = vcmp.ge.s32.totalorder %v9205_v3, 0 }
 0x3be   :  { %vm2872_vm6 = vcmp.eq.s32.totalorder %v9430_v25, %v2818_v44  ;;  %3950 = vrot.lane.b32.xlu0 %v3918_v58, %s7306_s7  ;;  %3572 = vrot.lane.b32.xlu1 %v3521_v48, %s7305_s9  ;;  %v3922_v44 = vsel %vm3890_vm0, 1, %v14856_v42  ;;  %v9863_v58 = vpop.permute.xlu0 %3351  ;;  %v6388_v48 = vsel %vm2877_vm1, 1.0, %v14911_v62  ;;  %vm2879_vm0 = vcmp.eq.s32.totalorder %v9430_v25, %v9572_v16 }
 0x3bf   :  { %v6383_v50 = vsel %vm2872_vm6, 1.0, %v14911_v62  ;;  %vm3894_vm1 = vcmp.gt.f32.partialorder %v8557_v55, 1e-06 }
 0x3c0   :  { %6807 = vmatprep.mubr.msk.f32.mxu0 %vm2956_vm4, %v6383_v50 }
 0x3c1   :  { %v2824_v8 = vpop.permute.xlu1 %2823  ;;  %6808 = vmatmul.mubr.msk.f32.gmra.mrb[36].mxu0 %vm2956_vm4, %v6384_v63  ;;  %v3924_v63 = vsel %vm3892_vm14, 1, %v14856_v42  ;;  %vm2881_vm14 = vcmp.eq.s32.totalorder %v9430_v25, %v9587_v37 }
 0x3c2   :  { %vm2874_vm6 = vcmp.eq.s32.totalorder %v9430_v25, %v2824_v8  ;;  %3954 = vrot.lane.b32.xlu0 %v3920_v49, %s7306_s7  ;;  %3576 = vrot.lane.b32.xlu1 %v3523_v41, %s7305_s9  ;;  %v6390_v8 = vsel %vm2879_vm0, 1.0, %v14911_v62  ;;  %v9887_v49 = vpop.permute.xlu0 %3357  ;;  %vm3896_vm0 = vcmp.gt.f32.partialorder %v8585_v13, 1e-06  ;;  %v3531_v13 = vsel %vm14263_vm15, 1, %v14856_v42 }
 0x3c3   :  { %v6385_v14 = vsel %vm2874_vm6, 1.0, %v14911_v62  ;;  %vm14265_vm15 = vcmp.lt.s32.totalorder %v9088_v11, 64  ;;  %v14941_v11 = vld [vmem:[#allocation26_spill] sm:$0xff] }
 0x3c4   :  { %6810 = vmatprep.mubr.msk.f32.mxu0 %vm2956_vm4, %v6385_v14  ;;  %v3926_v14 = vsel %vm3894_vm1, 1, %v14856_v42  ;;  %vm2883_vm1 = vcmp.eq.s32.totalorder %v9430_v25, %v9597_v4 }
 0x3c5   :  { %v2830_v45 = vpop.permute.xlu1 %2829  ;;  %6811 = vmatmul.mubr.msk.f32.gmra.mrb[38].mxu0 %vm2956_vm4, %v6386_v46  ;;  %v6392_v46 = vsel %vm2881_vm14, 1.0, %v14911_v62  ;;  %vm3898_vm14 = vcmp.gt.f32.partialorder %v8601_v59, 1e-06 }
 0x3c6   :  { %vm2876_vm6 = vcmp.eq.s32.totalorder %v9430_v25, %v2830_v45  ;;  %3958 = vrot.lane.b32.xlu0 %v3922_v44, %s7306_s7  ;;  %3580 = vrot.lane.b32.xlu1 %v3525_v10, %s7305_s9  ;;  %v3928_v44 = vsel %vm3896_vm0, 1, %v14856_v42  ;;  %v9912_v10 = vpop.permute.xlu0 %3363  ;;  %vm3900_vm0 = vcmp.gt.f32.partialorder %v8627_v12, 1e-06 }
 0x3c7   :  { %v6387_v9 = vsel %vm2876_vm6, 1.0, %v14911_v62  ;;  %vm14261_vm6 = vcmp.ge.s32.totalorder %v9190_v61, 0 }
 0x3c8   :  { %6813 = vmatprep.mubr.msk.f32.mxu0 %vm2956_vm4, %v6387_v9  ;;  %v3529_v55 = vsel %vm14261_vm6, 1, %v14856_v42  ;;  %vm14262_vm6 = vcmp.ge.s32.totalorder %v9228_v36, 0  ;;  %v6394_v9 = vsel %vm2883_vm1, 1.0, %v14911_v62  ;;  %vm14420_vm1 = vcmp.lt.s32.totalorder %v9246_v15, 64 }
 0x3c9   :  { %v2836_v50 = vpop.permute.xlu1 %2835  ;;  %6814 = vmatmul.mubr.msk.f32.gmra.mrb[40].mxu0 %vm2956_vm4, %v6388_v48 }
 0x3ca   :  { %vm2878_vm2 = vcmp.eq.s32.totalorder %v9430_v25, %v2836_v50  ;;  %3962 = vrot.lane.b32.xlu0 %v3924_v63, %s7306_s7  ;;  %3584 = vrot.lane.b32.xlu1 %v3527_v7, %s7305_s9  ;;  %v3930_v50 = vsel %vm3898_vm14, 1, %v14856_v42  ;;  %v3533_v63 = vsel %vm14262_vm6, 1, %v14856_v42  ;;  %v9933_v59 = vpop.permute.xlu0 %3369  ;;  %vm14352_vm14 = vcmp.lt.s32.totalorder %v9069_v1, 64 }
 0x3cb   :  { %v6389_v16 = vsel %vm2878_vm2, 1.0, %v14911_v62  ;;  %vm14264_vm6 = vcmp.lt.s32.totalorder %v9078_v28, 64 }
 0x3cc   :  { %6816 = vmatprep.mubr.msk.f32.mxu0 %vm2956_vm4, %v6389_v16  ;;  %v3932_v16 = vsel %vm3900_vm0, 1, %v14856_v42  ;;  %vm3904_vm0 = vcmp.gt.f32.partialorder %v8665_v47, 1e-06 }
 0x3cd   :  { %v2842_v41 = vpop.permute.xlu1 %2841  ;;  %6817 = vmatmul.mubr.msk.f32.gmra.mrb[42].mxu0 %vm2956_vm4, %v6390_v8  ;;  %v3727_v8 = vsel %vm14420_vm1, 1, %v14856_v42 }
 0x3ce   :  { %vm2880_vm2 = vcmp.eq.s32.totalorder %v9430_v25, %v2842_v41  ;;  %3966 = vrot.lane.b32.xlu0 %v3926_v14, %s7306_s7  ;;  %3588 = vrot.lane.b32.xlu1 %v3529_v55, %s7305_s9  ;;  %v3729_v14 = vsel %vm14352_vm14, 1, %v14856_v42  ;;  %v9951_v55 = vpop.permute.xlu0 %3534 }
 0x3cf   :  { %v6391_v37 = vsel %vm2880_vm2, 1.0, %v14911_v62 }
 0x3d0   :  { %6819 = vmatprep.mubr.msk.f32.mxu0 %vm2956_vm4, %v6391_v37  ;;  %v3936_v37 = vsel %vm3904_vm0, 1, %v14856_v42 }
 0x3d1   :  { %v2848_v45 = vpop.permute.xlu1 %2847  ;;  %6820 = vmatmul.mubr.msk.f32.gmra.mrb[44].mxu0 %vm2956_vm4, %v6392_v46  ;;  %v3731_v46 = vsel %vm14264_vm6, 1, %v14856_v42  ;;  %vm14266_vm6 = vcmp.lt.s32.totalorder %v9097_v54, 64 }
 0x3d2   :  { %vm2882_vm2 = vcmp.eq.s32.totalorder %v9430_v25, %v2848_v45  ;;  %3970 = vrot.lane.b32.xlu0 %v3928_v44, %s7306_s7  ;;  %3592 = vrot.lane.b32.xlu1 %v3531_v13, %s7305_s9  ;;  %v14933_v45 = vld [vmem:[#allocation21_spill] sm:$0xff]  ;;  %v9967_v44 = vpop.permute.xlu0 %3538 }
 0x3d3   :  { %v6393_v4 = vsel %vm2882_vm2, 1.0, %v14911_v62  ;;  %vm3902_vm2 = vcmp.gt.f32.partialorder %v8643_v40, 1e-06 }
 0x3d4   :  { %6822 = vmatprep.mubr.msk.f32.mxu0 %vm2956_vm4, %v6393_v4  ;;  %v3934_v41 = vsel %vm3902_vm2, 1, %v14856_v42  ;;  %vm3906_vm2 = vcmp.gt.f32.partialorder %v14933_v45, 1e-06  ;;  %v3733_v4 = vsel %vm14265_vm15, 1, %v14856_v42  ;;  %vm14267_vm15 = vcmp.lt.s32.totalorder %v9108_v26, 64  ;;  %v14936_v45 = vld [vmem:[#allocation40_spill] sm:$0xff] }
 0x3d5   :  { %v9922_v48 = vpop.permute.xlu1 %3279  ;;  %6823 = vmatmul.mubr.msk.f32.gmra.mrb[46].mxu0 %vm2956_vm4, %v6394_v9  ;;  %v3938_v13 = vsel %vm3906_vm2, 1, %v14856_v42  ;;  %v14934_v9 = vld [vmem:[#allocation14_spill] sm:$0xff] }
 0x3d6   :  { %3974 = vrot.lane.b32.xlu0 %v3930_v50, %s7306_s7  ;;  %3596 = vrot.lane.b32.xlu1 %v3533_v63, %s7305_s9  ;;  %vm3908_vm0 = vcmp.gt.f32.partialorder %v14934_v9, 1e-06 }
 0x3d7   :  { %v3940_v63 = vsel %vm3908_vm0, 1, %v14856_v42  ;;  %vm3912_vm0 = vcmp.gt.f32.partialorder %v14936_v45, 1e-06 }
 0x3d8   :  { %v3944_v9 = vsel %vm3912_vm0, 1, %v14856_v42 }
 0x3d9   :  { %v9935_v7 = vpop.permute.xlu1 %3285 }
 0x3da   :  { %3978 = vrot.lane.b32.xlu0 %v3932_v16, %s7306_s7  ;;  %3760 = vrot.lane.b32.xlu1 %v3727_v8, %s7305_s9  ;;  %v3735_v16 = vsel %vm14266_vm6, 1, %v14856_v42  ;;  %v9985_v8 = vpop.permute.xlu0 %3542  ;;  %vm14268_vm6 = vcmp.lt.s32.totalorder %v9120_v20, 64 }
 0x3db   :  { %vm3602_vm1 = vcmp.ne.s32.totalorder %v9985_v8, 0  ;;  %v4325_v8 = vld [vmem:[%s14076_s3 + $0xb8] sm:$0xff] }
 0x3dd   :  { %v9945_v12 = vpop.permute.xlu1 %3288 }
 0x3de   :  { %3982 = vrot.lane.b32.xlu0 %v3934_v41, %s7306_s7  ;;  %3764 = vrot.lane.b32.xlu1 %v3729_v14, %s7305_s9  ;;  %v14935_v41 = vld [vmem:[#allocation35_spill] sm:$0xff] }
 0x3df   :  { %vm3910_vm2 = vcmp.gt.f32.partialorder %v14935_v41, 1e-06 }
 0x3e1   :  { %v9957_v40 = vpop.permute.xlu1 %3294 }
 0x3e2   :  { %3986 = vrot.lane.b32.xlu0 %v3936_v37, %s7306_s7  ;;  %3768 = vrot.lane.b32.xlu1 %v3731_v46, %s7305_s9  ;;  %v3942_v37 = vsel %vm3910_vm2, 1, %v14856_v42  ;;  %v3737_v46 = vsel %vm14267_vm15, 1, %v14856_v42  ;;  %vm14349_vm15 = vcmp.lt.s32.totalorder %v9127_v6, 64  ;;  %vm3379_vm14 = vcmp.eq.s32.totalorder %v9430_v25, %v9957_v40 }
 0x3e5   :  { %v9969_v47 = vpop.permute.xlu1 %3300 }
 0x3e6   :  { %3990 = vrot.lane.b32.xlu0 %v3938_v13, %s7306_s7  ;;  %3772 = vrot.lane.b32.xlu1 %v3733_v4, %s7305_s9  ;;  %v10001_v13 = vpop.permute.xlu0 %3546 }
 0x3e9   :  { %v9979_v50 = vpop.permute.xlu1 %3306 }
 0x3ea   :  { %3994 = vrot.lane.b32.xlu0 %v3940_v63, %s7306_s7  ;;  %3776 = vrot.lane.b32.xlu1 %v3735_v16, %s7305_s9  ;;  %v3739_v63 = vsel %vm14268_vm6, 1, %v14856_v42  ;;  %v14937_v16 = vld [vmem:[#allocation41_spill] sm:$0xff]  ;;  %v10019_v45 = vpop.permute.xlu0 %3550  ;;  %vm14273_vm6 = vcmp.lt.s32.totalorder %v9135_v30, 64 }
 0x3eb   :  { %vm3914_vm2 = vcmp.gt.f32.partialorder %v14937_v16, 1e-06  ;;  %v3743_v20 = vsel %vm14273_vm6, 1, %v14856_v42  ;;  %vm14286_vm6 = vcmp.lt.s32.totalorder %v9170_v51, 64 }
 0x3ed   :  { %v9991_v14 = vpop.permute.xlu1 %3312 }
 0x3ee   :  { %3998 = vrot.lane.b32.xlu0 %v3942_v37, %s7306_s7  ;;  %3780 = vrot.lane.b32.xlu1 %v3737_v46, %s7305_s9  ;;  %v3946_v37 = vsel %vm3914_vm2, 1, %v14856_v42  ;;  %v3741_v46 = vsel %vm14349_vm15, 1, %v14856_v42  ;;  %vm14276_vm2 = vcmp.lt.s32.totalorder %v9146_v21, 64  ;;  %vm3377_vm15 = vcmp.eq.s32.totalorder %v9430_v25, %v9945_v12 }
 0x3f1   :  { %v10003_v4 = vpop.permute.xlu1 %3318 }
 0x3f2   :  { %4002 = vrot.lane.b32.xlu0 %v3944_v9, %s7306_s7  ;;  %3784 = vrot.lane.b32.xlu1 %v3739_v63, %s7305_s9  ;;  %v14938_v9 = vld [vmem:[#allocation43_spill] sm:$0xff] }
 0x3f3   :  { %vm3916_vm0 = vcmp.gt.f32.partialorder %v14938_v9, 1e-06  ;;  %v3745_v9 = vsel %vm14276_vm2, 1, %v14856_v42  ;;  %vm14289_vm2 = vcmp.lt.s32.totalorder %v9179_v52, 64 }
 0x3f4   :  { %v3948_v16 = vsel %vm3916_vm0, 1, %v14856_v42  ;;  %vm14281_vm0 = vcmp.lt.s32.totalorder %v9156_v23, 64 }
 0x3f5   :  { %v10013_v41 = vpop.permute.xlu1 %3324 }
 0x3f6   :  { %4006 = vrot.lane.b32.xlu0 %v3946_v37, %s7306_s7  ;;  %3788 = vrot.lane.b32.xlu1 %v3741_v46, %s7305_s9  ;;  %v10034_v37 = vpop.permute.xlu0 %3554 }
 0x3f9   :  { %v10025_v63 = vpop.permute.xlu1 %3330 }
 0x3fa   :  { %4010 = vrot.lane.b32.xlu0 %v3948_v16, %s7306_s7  ;;  %3792 = vrot.lane.b32.xlu1 %v3743_v20, %s7305_s9  ;;  %v3747_v20 = vsel %vm14281_vm0, 1, %v14856_v42  ;;  %v10048_v16 = vpop.permute.xlu0 %3558  ;;  %vm14296_vm0 = vcmp.lt.s32.totalorder %v9190_v61, 64 }
 0x3fd   :  { %v10036_v46 = vpop.permute.xlu1 %3336 }
 0x3fe   :  { %3796 = vrot.lane.b32.xlu1 %v3745_v9, %s7305_s9  ;;  %v3749_v9 = vsel %vm14286_vm6, 1, %v14856_v42  ;;  %v10059_v21 = vpop.permute.xlu0 %3562  ;;  %vm14303_vm6 = vcmp.lt.s32.totalorder %v9205_v3, 64 }
 0x401   :  { %v10043_v30 = vpop.permute.xlu1 %3342 }
 0x402   :  { %3800 = vrot.lane.b32.xlu1 %v3747_v20, %s7305_s9  ;;  %v3751_v20 = vsel %vm14289_vm2, 1, %v14856_v42  ;;  %v10073_v51 = vpop.permute.xlu0 %3566  ;;  %vm14310_vm2 = vcmp.lt.s32.totalorder %v9228_v36, 64  ;;  %v14946_v36 = vld [vmem:[#allocation28_spill] sm:$0xff] }
 0x403   :  { %14939 = vst [vmem:[#allocation21_spill] sm:$0xff] %v10073_v51  ;;  %v15031_v51 = vld [vmem:[#allocation99_spill] sm:$0xff] }
 0x405   :  { %v10052_v6 = vpop.permute.xlu1 %3348 }
 0x406   :  { %3804 = vrot.lane.b32.xlu1 %v3749_v9, %s7305_s9  ;;  %v3753_v9 = vsel %vm14296_vm0, 1, %v14856_v42  ;;  %v10084_v52 = vpop.permute.xlu0 %3570  ;;  %vm3887_vm0 = vcmp.gt.f32.partialorder %v14941_v11, 1e-06 }
 0x407   :  { %14940 = vst [vmem:[#allocation14_spill] sm:$0xff] %v10084_v52  ;;  %v3919_v3 = vsel %vm3887_vm0, 1, %v14856_v42  ;;  %vm3893_vm0 = vcmp.gt.f32.partialorder %v14949_v39, 1e-06 }
 0x409   :  { %v10061_v23 = vpop.permute.xlu1 %3354 }
 0x40a   :  { %3808 = vrot.lane.b32.xlu1 %v3751_v20, %s7305_s9  ;;  %v3755_v20 = vsel %vm14303_vm6, 1, %v14856_v42  ;;  %v10096_v1 = vpop.permute.xlu0 %3574 }
 0x40b   :  { %14943 = vst [vmem:[#allocation40_spill] sm:$0xff] %v10096_v1 }
 0x40d   :  { %v10068_v26 = vpop.permute.xlu1 %3360 }
 0x40e   :  { %3812 = vrot.lane.b32.xlu1 %v3753_v9, %s7305_s9  ;;  %v3757_v9 = vsel %vm14310_vm2, 1, %v14856_v42  ;;  %vm3891_vm2 = vcmp.gt.f32.partialorder %v14946_v36, 1e-06 }
 0x411   :  { %v10077_v54 = vpop.permute.xlu1 %3366 }
 0x412   :  { %3816 = vrot.lane.b32.xlu1 %v3755_v20, %s7305_s9  ;;  %v14944_v20 = vld [vmem:[#allocation27_spill] sm:$0xff] }
 0x413   :  { %vm3889_vm6 = vcmp.gt.f32.partialorder %v14944_v20, 1e-06  ;;  %v3925_v20 = vsel %vm3893_vm0, 1, %v14856_v42  ;;  %vm3899_vm0 = vcmp.gt.f32.partialorder %v14957_v19, 1e-06 }
 0x414   :  { %v3921_v29 = vsel %vm3889_vm6, 1, %v14856_v42 }
 0x415   :  { %v10086_v61 = vpop.permute.xlu1 %3372 }
 0x416   :  { %3820 = vrot.lane.b32.xlu1 %v3757_v9, %s7305_s9  ;;  %v10105_v9 = vpop.permute.xlu0 %3578 }
 0x417   :  { %14947 = vst [vmem:[#allocation43_spill] sm:$0xff] %v10105_v9 }
 0x419   :  { %v10093_v28 = vpop.permute.xlu1 %3536 }
 0x41a   :  { %14942 = vst [vmem:[#allocation35_spill] sm:$0xff] %v10093_v28  ;;  %3952 = vrot.lane.b32.xlu1 %v3919_v3, %s7306_s7  ;;  %v3923_v28 = vsel %vm3891_vm2, 1, %v14856_v42  ;;  %vm3897_vm2 = vcmp.gt.f32.partialorder %v14954_v0, 1e-06 }
 0x41d   :  { %v10100_v15 = vpop.permute.xlu1 %3540 }
 0x41e   :  { %14945 = vst [vmem:[#allocation41_spill] sm:$0xff] %v10100_v15  ;;  %3956 = vrot.lane.b32.xlu1 %v3921_v29, %s7306_s7  ;;  %v10115_v15 = vpop.permute.xlu0 %3582  ;;  %v14952_v29 = vld [vmem:[#allocation32_spill] sm:$0xff] }
 0x41f   :  { %14951 = vst [vmem:[#allocation28_spill] sm:$0xff] %v10115_v15  ;;  %vm3895_vm6 = vcmp.gt.f32.partialorder %v14952_v29, 1e-06  ;;  %v3931_v29 = vsel %vm3899_vm0, 1, %v14856_v42 }
 0x421   :  { %v10107_v11 = vpop.permute.xlu1 %3544 }
 0x422   :  { %14948 = vst [vmem:[#allocation26_spill] sm:$0xff] %v10107_v11  ;;  %3960 = vrot.lane.b32.xlu1 %v3923_v28, %s7306_s7  ;;  %v3927_v11 = vsel %vm3895_vm6, 1, %v14856_v42  ;;  %v10124_v28 = vpop.permute.xlu0 %3586 }
 0x423   :  { %14955 = vst [vmem:[#allocation32_spill] sm:$0xff] %v10124_v28 }
 0x425   :  { %v10112_v3 = vpop.permute.xlu1 %3548 }
 0x426   :  { %14950 = vst [vmem:[#allocation27_spill] sm:$0xff] %v10112_v3  ;;  %3964 = vrot.lane.b32.xlu1 %v3925_v20, %s7306_s7  ;;  %v3929_v3 = vsel %vm3897_vm2, 1, %v14856_v42  ;;  %vm3903_vm2 = vcmp.gt.f32.partialorder %v14962_v43, 1e-06 }
 0x429   :  { %v10119_v36 = vpop.permute.xlu1 %3552 }
 0x42a   :  { %14953 = vst [vmem:[#allocation31_spill] sm:$0xff] %v10119_v36  ;;  %3968 = vrot.lane.b32.xlu1 %v3927_v11, %s7306_s7  ;;  %v10134_v36 = vpop.permute.xlu0 %3590  ;;  %v14960_v11 = vld [vmem:[#allocation34_spill] sm:$0xff] }
 0x42b   :  { %14959 = vst [vmem:[#allocation190_spill] sm:$0xff] %v10134_v36  ;;  %vm3901_vm6 = vcmp.gt.f32.partialorder %v14960_v11, 1e-06  ;;  %v14965_v36 = vld [vmem:[#allocation15_spill] sm:$0xff] }
 0x42c   :  { %vm3905_vm0 = vcmp.gt.f32.partialorder %v14965_v36, 1e-06 }
 0x42d   :  { %v10126_v39 = vpop.permute.xlu1 %3556  ;;  %v3937_v11 = vsel %vm3905_vm0, 1, %v14856_v42 }
 0x42e   :  { %14956 = vst [vmem:[#allocation38_spill] sm:$0xff] %v10126_v39  ;;  %3972 = vrot.lane.b32.xlu1 %v3929_v3, %s7306_s7  ;;  %v3933_v39 = vsel %vm3901_vm6, 1, %v14856_v42  ;;  %v10143_v3 = vpop.permute.xlu0 %3594 }
 0x42f   :  { %14963 = vst [vmem:[#allocation19_spill] sm:$0xff] %v10143_v3  ;;  %v14970_v3 = vld [vmem:[#allocation12_spill] sm:$0xff] }
 0x431   :  { %v10131_v20 = vpop.permute.xlu1 %3560 }
 0x432   :  { %14958 = vst [vmem:[#allocation22_spill] sm:$0xff] %v10131_v20  ;;  %3976 = vrot.lane.b32.xlu1 %v3931_v29, %s7306_s7  ;;  %v3935_v20 = vsel %vm3903_vm2, 1, %v14856_v42  ;;  %vm3909_vm2 = vcmp.gt.f32.partialorder %v14970_v3, 1e-06 }
 0x435   :  { %v10138_v0 = vpop.permute.xlu1 %3564 }
 0x436   :  { %14961 = vst [vmem:[#allocation34_spill] sm:$0xff] %v10138_v0  ;;  %3980 = vrot.lane.b32.xlu1 %v3933_v39, %s7306_s7  ;;  %v10153_v0 = vpop.permute.xlu0 %3758  ;;  %v14968_v39 = vld [vmem:[#allocation20_spill] sm:$0xff] }
 0x437   :  { %14967 = vst [vmem:[#allocation192_spill] sm:$0xff] %v10153_v0  ;;  %vm3907_vm6 = vcmp.gt.f32.partialorder %v14968_v39, 1e-06  ;;  %v14973_v0 = vld [vmem:[#allocation16_spill] sm:$0xff] }
 0x438   :  { %vm3911_vm0 = vcmp.gt.f32.partialorder %v14973_v0, 1e-06 }
 0x439   :  { %v10145_v19 = vpop.permute.xlu1 %3568  ;;  %v3943_v39 = vsel %vm3911_vm0, 1, %v14856_v42 }
 0x43a   :  { %14964 = vst [vmem:[#allocation191_spill] sm:$0xff] %v10145_v19  ;;  %3984 = vrot.lane.b32.xlu1 %v3935_v20, %s7306_s7  ;;  %v3939_v19 = vsel %vm3907_vm6, 1, %v14856_v42  ;;  %v10162_v20 = vpop.permute.xlu0 %3762 }
 0x43b   :  { %14971 = vst [vmem:[#allocation12_spill] sm:$0xff] %v10162_v20  ;;  %v14978_v20 = vld [vmem:[#allocation39_spill] sm:$0xff] }
 0x43d   :  { %v10150_v29 = vpop.permute.xlu1 %3572 }
 0x43e   :  { %14966 = vst [vmem:[#allocation15_spill] sm:$0xff] %v10150_v29  ;;  %3988 = vrot.lane.b32.xlu1 %v3937_v11, %s7306_s7  ;;  %v3941_v29 = vsel %vm3909_vm2, 1, %v14856_v42  ;;  %vm3915_vm2 = vcmp.gt.f32.partialorder %v14978_v20, 1e-06 }
 0x441   :  { %v10157_v43 = vpop.permute.xlu1 %3576 }
 0x442   :  { %14969 = vst [vmem:[#allocation20_spill] sm:$0xff] %v10157_v43  ;;  %3992 = vrot.lane.b32.xlu1 %v3939_v19, %s7306_s7  ;;  %v10172_v43 = vpop.permute.xlu0 %3766  ;;  %v14976_v19 = vld [vmem:[#allocation37_spill] sm:$0xff] }
 0x443   :  { %14975 = vst [vmem:[#allocation194_spill] sm:$0xff] %v10172_v43  ;;  %vm3913_vm6 = vcmp.gt.f32.partialorder %v14976_v19, 1e-06  ;;  %v14981_v43 = vld [vmem:[#allocation33_spill] sm:$0xff] }
 0x444   :  { %vm3917_vm0 = vcmp.gt.f32.partialorder %v14981_v43, 1e-06 }
 0x445   :  { %v10164_v36 = vpop.permute.xlu1 %3580  ;;  %v3949_v19 = vsel %vm3917_vm0, 1, %v14856_v42  ;;  %vm3375_vm0 = vcmp.eq.s32.totalorder %v9430_v25, %v9610_v24  ;;  %v10236_v24 = vld [vmem:[%s14083_s10] ss:$0 sm:$0xff] }
 0x446   :  { %14972 = vst [vmem:[#allocation193_spill] sm:$0xff] %v10164_v36  ;;  %3996 = vrot.lane.b32.xlu1 %v3941_v29, %s7306_s7  ;;  %v3945_v36 = vsel %vm3913_vm6, 1, %v14856_v42  ;;  %v10181_v29 = vpop.permute.xlu0 %3770  ;;  %vm3374_vm6 = vcmp.eq.s32.totalorder %v9430_v25, %v9922_v48  ;;  %v4566_v15 = vsub.f32 %v15000_v31, %v10236_v24 }
 0x447   :  { %14979 = vst [vmem:[#allocation39_spill] sm:$0xff] %v10181_v29 }
 0x449   :  { %v10169_v11 = vpop.permute.xlu1 %3584 }
 0x44a   :  { %14974 = vst [vmem:[#allocation16_spill] sm:$0xff] %v10169_v11  ;;  %4000 = vrot.lane.b32.xlu1 %v3943_v39, %s7306_s7  ;;  %v3947_v11 = vsel %vm3915_vm2, 1, %v14856_v42  ;;  %vm3376_vm2 = vcmp.eq.s32.totalorder %v9430_v25, %v9935_v7 }
 0x44d   :  { %v10176_v3 = vpop.permute.xlu1 %3588 }
 0x44e   :  { %14977 = vst [vmem:[#allocation37_spill] sm:$0xff] %v10176_v3  ;;  %4004 = vrot.lane.b32.xlu1 %v3945_v36, %s7306_s7  ;;  %v10191_v3 = vpop.permute.xlu0 %3774 }
 0x44f   :  { %14983 = vst [vmem:[#allocation196_spill] sm:$0xff] %v10191_v3 }
 0x451   :  { %v10183_v0 = vpop.permute.xlu1 %3592 }
 0x452   :  { %14980 = vst [vmem:[#allocation195_spill] sm:$0xff] %v10183_v0  ;;  %4008 = vrot.lane.b32.xlu1 %v3947_v11, %s7306_s7  ;;  %v10196_v20 = vpop.permute.xlu0 %3778 }
 0x453   :  { %14985 = vst [vmem:[#allocation198_spill] sm:$0xff] %v10196_v20 }
 0x455   :  { %v10188_v39 = vpop.permute.xlu1 %3596 }
 0x456   :  { %14982 = vst [vmem:[#allocation33_spill] sm:$0xff] %v10188_v39  ;;  %4012 = vrot.lane.b32.xlu1 %v3949_v19, %s7306_s7  ;;  %v10202_v28 = vpop.permute.xlu0 %3782 }
 0x457   :  { %14988 = vst [vmem:[#allocation201_spill] sm:$0xff] %v10202_v28  ;;  %v6432_v28 = vsel %vm3379_vm14, 1.0, %v14911_v62  ;;  %vm4629_vm14 = vcmask 15360  }
 0x459   :  { %v10194_v36 = vpop.permute.xlu1 %3760 }
 0x45a   :  { %14984 = vst [vmem:[#allocation197_spill] sm:$0xff] %v10194_v36  ;;  %v10206_v43 = vpop.permute.xlu0 %3786  ;;  %v6427_v36 = vsel %vm3374_vm6, 1.0, %v14911_v62  ;;  %vm3378_vm6 = vcmp.eq.s32.totalorder %v9430_v25, %v9625_v33 }
 0x45b   :  { %14990 = vst [vmem:[#allocation203_spill] sm:$0xff] %v10206_v43  ;;  %v6431_v40 = vsel %vm3378_vm6, 1.0, %v14911_v62  ;;  %vm3383_vm6 = vcmp.eq.s32.totalorder %v9430_v25, %v9979_v50 }
 0x45d   :  { %v10198_v29 = vpop.permute.xlu1 %3764 }
 0x45e   :  { %14986 = vst [vmem:[#allocation199_spill] sm:$0xff] %v10198_v29  ;;  %v10215_v29 = vpop.permute.xlu0 %3790 }
 0x45f   :  { %14993 = vst [vmem:[#allocation206_spill] sm:$0xff] %v10215_v29  ;;  %v14997_v29 = vld [vmem:[#allocation77_spill] sm:$0xff] }
 0x460   :  { %v4565_v43 = vsub.f32 %v14997_v29, %v10236_v24 }
 0x461   :  { %v10200_v0 = vpop.permute.xlu1 %3768 }
 0x462   :  { %14987 = vst [vmem:[#allocation200_spill] sm:$0xff] %v10200_v0  ;;  %v10229_v7 = vpop.permute.xlu0 %3794  ;;  %v4597_v33 = vmul.f32 %v4565_v43, %v4565_v43 }
 0x463   :  { %14995 = vst [vmem:[#allocation208_spill] sm:$0xff] %v10229_v7 }
 0x465   :  { %v10204_v11 = vpop.permute.xlu1 %3772 }
 0x466   :  { %14989 = vst [vmem:[#allocation202_spill] sm:$0xff] %v10204_v11 }
 0x469   :  { %v10210_v42 = vpop.permute.xlu1 %3776 }
 0x46a   :  { %14991 = vst [vmem:[#allocation204_spill] sm:$0xff] %v10210_v42 }
 0x46b   :  { %v6779_v19 = vpop.f32.mrb[16].mxu0 }
 0x46c   :  { %v3119_v39 = vpop.f32.mrb[17].mxu0 }
 0x46d   :  { %v4142_v20 = vmul.f32 %v6427_v36, %v3119_v39  ;;  %v10213_v3 = vpop.permute.xlu1 %3780  ;;  %v6429_v36 = vsel %vm3376_vm2, 1.0, %v14911_v62  ;;  %vm3381_vm2 = vcmp.eq.s32.totalorder %v9430_v25, %v9969_v47 }
 0x46e   :  { %14992 = vst [vmem:[#allocation205_spill] sm:$0xff] %v10213_v3 }
 0x46f   :  { %v4174_v11 = vsel %vm2956_vm4, %v4142_v20, 0.0  ;;  %v6428_v20 = vsel %vm3375_vm0, 1.0, %v14911_v62  ;;  %vm3382_vm0 = vcmp.eq.s32.totalorder %v9430_v25, %v9651_v17  ;;  %v15006_v17 = vld [vmem:[#allocation30_spill] sm:$0xff] }
 0x470   :  { %4175 = vadd.xlane.f32.xlu0 %v4174_v11  ;;  %v6782_v0 = vpop.f32.mrb[18].mxu0  ;;  %v6430_v11 = vsel %vm3377_vm15, 1.0, %v14911_v62  ;;  %v4143_v12 = vmul.f32 %v6779_v19, %v6428_v20  ;;  %vm3380_vm15 = vcmp.eq.s32.totalorder %v9430_v25, %v9638_v35  ;;  %v10283_v35 = vsel %vm4629_vm14, %v4597_v33, 0.0 }
 0x471   :  { %v10224_v48 = vpop.permute.xlu1 %3784  ;;  %v3129_v39 = vpop.f32.mrb[19].mxu0 }
 0x472   :  { %14994 = vst [vmem:[#allocation207_spill] sm:$0xff] %v10224_v48  ;;  %v4144_v3 = vmul.f32 %v6429_v36, %v3129_v39  ;;  %v4145_v39 = vmul.f32 %v6782_v0, %v6430_v11  ;;  %v4177_v20 = vsel %vm2956_vm4, %v4143_v12, 0.0  ;;  %v10258_v11 = vpop.permute.xlu0 %3798 }
 0x473   :  { %14999 = vst [vmem:[#allocation210_spill] sm:$0xff] %v10258_v11 }
 0x474   :  { %v6785_v42 = vpop.f32.mrb[20].mxu0  ;;  %v4180_v48 = vsel %vm2956_vm4, %v4144_v3, 0.0  ;;  %v4183_v29 = vsel %vm2956_vm4, %v4145_v39, 0.0 }
 0x475   :  { %v10240_v36 = vpop.permute.xlu1 %3788  ;;  %4181 = vadd.xlane.f32.xlu0 %v4180_v48  ;;  %v3139_v7 = vpop.f32.mrb[21].mxu0  ;;  %v4147_v3 = vmul.f32 %v6785_v42, %v6432_v28  ;;  %v6434_v42 = vsel %vm3381_vm2, 1.0, %v14911_v62  ;;  %v6433_v28 = vsel %vm3380_vm15, 1.0, %v14911_v62  ;;  %vm3384_vm15 = vcmp.eq.s32.totalorder %v9430_v25, %v9675_v38  ;;  %v15012_v38 = vld [vmem:[#allocation123_spill] sm:$0xff] }
 0x476   :  { %14996 = vst [vmem:[#allocation209_spill] sm:$0xff] %v10240_v36  ;;  %v4146_v19 = vmul.f32 %v6431_v40, %v3139_v7  ;;  %vm3385_vm2 = vcmp.eq.s32.totalorder %v9430_v25, %v9991_v14  ;;  %v4573_v56 = vsub.f32 %v15012_v38, %v10236_v24 }
 0x477   :  { %v4189_v43 = vsel %vm2956_vm4, %v4147_v3, 0.0 }
 0x478   :  { %v6788_v0 = vpop.f32.mrb[22].mxu0  ;;  %v4186_v40 = vsel %vm2956_vm4, %v4146_v19, 0.0 }
 0x479   :  { %v10254_v48 = vpop.permute.xlu1 %3792  ;;  %4184 = vadd.xlane.f32.xlu0 %v4183_v29  ;;  %v3149_v36 = vpop.f32.mrb[23].mxu0  ;;  %v4149_v31 = vmul.f32 %v6788_v0, %v6434_v42  ;;  %v4598_v29 = vmul.f32 %v4566_v15, %v4566_v15  ;;  %v6436_v15 = vsel %vm3383_vm6, 1.0, %v14911_v62  ;;  %v6435_v0 = vsel %vm3382_vm0, 1.0, %v14911_v62 }
 0x47a   :  { %14998 = vst [vmem:[#allocation77_spill] sm:$0xff] %v10254_v48  ;;  %4178 = vadd.xlane.f32.xlu1 %v4177_v20  ;;  %v4148_v12 = vmul.f32 %v6433_v28, %v3149_v36  ;;  %v15001_v20 = vld [vmem:[#allocation78_spill] sm:$0xff]  ;;  %v15002_v48 = vld [vmem:[#allocation29_spill] sm:$0xff]  ;;  %v10289_v36 = vpop.permute.xlu0 %3802  ;;  %vm3386_vm0 = vcmp.eq.s32.totalorder %v9430_v25, %v9704_v32  ;;  %vm3387_vm6 = vcmp.eq.s32.totalorder %v9430_v25, %v10003_v4 }
 0x47b   :  { %v4568_v47 = vsub.f32 %v15001_v20, %v10236_v24  ;;  %v4567_v11 = vsub.f32 %v15002_v48, %v10236_v24  ;;  %15004 = vst [vmem:[#allocation78_spill] sm:$0xff] %v10289_v36  ;;  %v4195_v33 = vsel %vm2956_vm4, %v4149_v31, 0.0  ;;  %v15005_v20 = vld [vmem:[#allocation80_spill] sm:$0xff]  ;;  %v4569_v36 = vsub.f32 %v15006_v17, %v10236_v24  ;;  %v15008_v31 = vld [vmem:[#allocation10_spill] sm:$0xff] }
 0x47c   :  { %v6791_v7 = vpop.f32.mrb[24].mxu0  ;;  %v4192_v28 = vsel %vm2956_vm4, %v4148_v12, 0.0  ;;  %v15009_v12 = vld [vmem:[#allocation85_spill] sm:$0xff] }
 0x47d   :  { %v3159_v39 = vpop.f32.mrb[25].mxu0  ;;  %4190 = vadd.xlane.f32.xlu0 %v4189_v43  ;;  %v10280_v34 = vpop.permute.xlu1 %3796  ;;  %v4151_v19 = vmul.f32 %v6791_v7, %v6436_v15  ;;  %v10302_v43 = vsel %vm4629_vm14, %v4598_v29, 0.0  ;;  %v4600_v50 = vmul.f32 %v4568_v47, %v4568_v47  ;;  %v15007_v7 = vld [vmem:[#allocation82_spill] sm:$0xff]  ;;  %v4571_v15 = vsub.f32 %v15008_v31, %v10236_v24 }
 0x47e   :  { %4187 = vadd.xlane.f32.xlu1 %v4186_v40  ;;  %15003 = vst [vmem:[#allocation118_spill] sm:$0xff] %v10280_v34  ;;  %v4150_v48 = vmul.f32 %v6435_v0, %v3159_v39  ;;  %v4599_v40 = vmul.f32 %v4567_v11, %v4567_v11  ;;  %v4570_v34 = vsub.f32 %v15005_v20, %v10236_v24  ;;  %v6438_v11 = vsel %vm3385_vm2, 1.0, %v14911_v62 }
 0x47f   :  { %v4572_v39 = vsub.f32 %v15007_v7, %v10236_v24  ;;  %v4574_v0 = vsub.f32 %v15009_v12, %v10236_v24  ;;  %v6437_v29 = vsel %vm3384_vm15, 1.0, %v14911_v62  ;;  %v4201_v17 = vsel %vm2956_vm4, %v4151_v19, 0.0  ;;  %v10330_v12 = vpop.permute.xlu0 %3806 }
 0x480   :  { %v6794_v3 = vpop.f32.mrb[26].mxu0  ;;  %v4198_v31 = vsel %vm2956_vm4, %v4150_v48, 0.0  ;;  %15011 = vst [vmem:[#allocation80_spill] sm:$0xff] %v10330_v12  ;;  %v10333_v14 = vsel %vm4629_vm14, %v4600_v50, 0.0  ;;  %v4602_v9 = vmul.f32 %v4570_v34, %v4570_v34  ;;  %v4603_v19 = vmul.f32 %v4571_v15, %v4571_v15 }
 0x481   :  { %v3169_v42 = vpop.f32.mrb[27].mxu0  ;;  %4196 = vadd.xlane.f32.xlu0 %v4195_v33  ;;  %v4153_v33 = vmul.f32 %v6794_v3, %v6438_v11  ;;  %v15013_v3 = vld [vmem:[#allocation86_spill] sm:$0xff]  ;;  %vm3388_vm15 = vcmp.eq.s32.totalorder %v9430_v25, %v9730_v22  ;;  %vm3389_vm2 = vcmp.eq.s32.totalorder %v9430_v25, %v10013_v41  ;;  %v6440_v34 = vsel %vm3387_vm6, 1.0, %v14911_v62 }
 0x482   :  { %4193 = vadd.xlane.f32.xlu1 %v4192_v28  ;;  %v10326_v28 = vpop.permute.xlu1 %3800  ;;  %v4152_v20 = vmul.f32 %v6437_v29, %v3169_v42  ;;  %v4576_v11 = vsub.f32 %v15013_v3, %v10236_v24  ;;  %v4601_v42 = vmul.f32 %v4569_v36, %v4569_v36  ;;  %v4604_v29 = vmul.f32 %v4572_v39, %v4572_v39 }
 0x483   :  { %15010 = vst [vmem:[#allocation29_spill] sm:$0xff] %v10326_v28  ;;  %v15014_v28 = vld [vmem:[#allocation126_spill] sm:$0xff]  ;;  %v6439_v36 = vsel %vm3386_vm0, 1.0, %v14911_v62  ;;  %v10356_v38 = vsel %vm4629_vm14, %v4599_v40, 0.0  ;;  %v4606_v4 = vmul.f32 %v4574_v0, %v4574_v0  ;;  %v4605_v3 = vmul.f32 %v4573_v56, %v4573_v56  ;;  %v10373_v56 = vpop.permute.xlu0 %3810 }
 0x484   :  { %v6797_v47 = vpop.f32.mrb[28].mxu0  ;;  %v4575_v48 = vsub.f32 %v15014_v28, %v10236_v24  ;;  %v4207_v28 = vsel %vm2956_vm4, %v4153_v33, 0.0  ;;  %v4608_v12 = vmul.f32 %v4576_v11, %v4576_v11  ;;  %v10361_v32 = vsel %vm4629_vm14, %v4602_v9, 0.0  ;;  %15016 = vst [vmem:[#allocation82_spill] sm:$0xff] %v10373_v56  ;;  %v15024_v56 = vld [vmem:[#allocation130_spill] sm:$0xff] }
 0x485   :  { %v3179_v7 = vpop.f32.mrb[29].mxu0  ;;  %4202 = vadd.xlane.f32.xlu0 %v4201_v17  ;;  %v4155_v39 = vmul.f32 %v6797_v47, %v6440_v34  ;;  %v10364_v47 = vsel %vm4629_vm14, %v4601_v42, 0.0  ;;  %v10367_v33 = vsel %vm4629_vm14, %v4604_v29, 0.0  ;;  %vm3390_vm0 = vcmp.eq.s32.totalorder %v9430_v25, %v9759_v2 }
 0x486   :  { %4199 = vadd.xlane.f32.xlu1 %v4198_v31  ;;  %v4154_v15 = vmul.f32 %v6439_v36, %v3179_v7  ;;  %v4204_v31 = vsel %vm2956_vm4, %v4152_v20, 0.0  ;;  %v10358_v1 = vpop.permute.xlu1 %3804  ;;  %v4607_v20 = vmul.f32 %v4575_v48, %v4575_v48  ;;  %vm3391_vm6 = vcmp.eq.s32.totalorder %v9430_v25, %v10025_v63  ;;  %v15023_v63 = vld [vmem:[#allocation93_spill] sm:$0xff] }
 0x487   :  { %15015 = vst [vmem:[#allocation30_spill] sm:$0xff] %v10358_v1  ;;  %v6442_v9 = vsel %vm3389_vm2, 1.0, %v14911_v62  ;;  %v6441_v40 = vsel %vm3388_vm15, 1.0, %v14911_v62  ;;  %v4213_v42 = vsel %vm2956_vm4, %v4155_v39, 0.0  ;;  %v10386_v34 = vsel %vm4629_vm14, %v4603_v19, 0.0  ;;  %v15019_v19 = vld [vmem:[#allocation71_spill] sm:$0xff]  ;;  %v10422_v1 = vpop.permute.xlu0 %3814 }
 0x488   :  { %v6800_v50 = vpop.f32.mrb[30].mxu0  ;;  %v4210_v48 = vsel %vm2956_vm4, %v4154_v15, 0.0  ;;  %v10389_v41 = vsel %vm4629_vm14, %v4606_v4, 0.0  ;;  %v10392_v36 = vsel %vm4629_vm14, %v4605_v3, 0.0  ;;  %v10395_v22 = vsel %vm4629_vm14, %v4608_v12, 0.0  ;;  %v15018_v15 = vld [vmem:[#allocation90_spill] sm:$0xff] }
 0x489   :  { %v3189_v17 = vpop.f32.mrb[31].mxu0  ;;  %4208 = vadd.xlane.f32.xlu0 %v4207_v28  ;;  %v4157_v7 = vmul.f32 %v6800_v50, %v6442_v9  ;;  %v15017_v50 = vld [vmem:[#allocation83_spill] sm:$0xff]  ;;  %v10399_v39 = vsel %vm4629_vm14, %v4607_v20, 0.0  ;;  %vm3392_vm15 = vcmp.eq.s32.totalorder %v9430_v25, %v9785_v60  ;;  %vm3393_vm2 = vcmp.eq.s32.totalorder %v9430_v25, %v10036_v46  ;;  %15022 = vst [vmem:[#allocation85_spill] sm:$0xff] %v10422_v1  ;;  %v15029_v46 = vld [vmem:[#allocation98_spill] sm:$0xff] }
 0x48a   :  { %4205 = vadd.xlane.f32.xlu1 %v4204_v31  ;;  %v4156_v11 = vmul.f32 %v6441_v40, %v3189_v17  ;;  %v6297_v28 = vmul.f32 -1.442695, %v15017_v50  ;;  %v4578_v17 = vsub.f32 %v15018_v15, %v10236_v24  ;;  %v4577_v31 = vsub.f32 %v15019_v19, %v10236_v24  ;;  %v10417_v20 = vpop.permute.xlu1 %3808  ;;  %v15021_v15 = vld [vmem:[#allocation151_spill] sm:$0xff] }
 0x48b   :  { %v6444_v12 = vsel %vm3391_vm6, 1.0, %v14911_v62  ;;  %v6443_v4 = vsel %vm3390_vm0, 1.0, %v14911_v62  ;;  %15020 = vst [vmem:[#allocation10_spill] sm:$0xff] %v10417_v20  ;;  %v6296_v19 = vmul.f32 -1.442695, %v15021_v15  ;;  %v4580_v2 = vsub.f32 %v15023_v63, %v10236_v24 }
 0x48c   :  { %v6803_v0 = vpop.f32.mrb[32].mxu0  ;;  %v4216_v50 = vsel %vm2956_vm4, %v4156_v11, 0.0  ;;  %v4579_v52 = vsub.f32 %v15024_v56, %v10236_v24  ;;  %7142 = vpow2.f32 %v6297_v28  ;;  %v15027_v11 = vld [vmem:[#allocation133_spill] sm:$0xff]  ;;  %vm3394_vm0 = vcmp.eq.s32.totalorder %v9430_v25, %v9814_v18 }
 0x48d   :  { %v3199_v29 = vpop.f32.mrb[33].mxu0  ;;  %4214 = vadd.xlane.f32.xlu0 %v4213_v42  ;;  %v4159_v9 = vmul.f32 %v6803_v0, %v6444_v12  ;;  %v4219_v42 = vsel %vm2956_vm4, %v4157_v7, 0.0  ;;  %v15025_v0 = vld [vmem:[#allocation95_spill] sm:$0xff]  ;;  %v15026_v7 = vld [vmem:[#allocation88_spill] sm:$0xff]  ;;  %v4581_v15 = vsub.f32 %v15027_v11, %v10236_v24  ;;  %vm3395_vm6 = vcmp.eq.s32.totalorder %v9430_v25, %v10043_v30 }
 0x48e   :  { %4211 = vadd.xlane.f32.xlu1 %v4210_v48  ;;  %v4158_v40 = vmul.f32 %v6443_v4, %v3199_v29  ;;  %v4582_v29 = vsub.f32 %v15025_v0, %v10236_v24  ;;  %v6295_v12 = vmul.f32 -1.442695, %v15026_v7  ;;  %v4610_v4 = vmul.f32 %v4578_v17, %v4578_v17  ;;  %v15028_v11 = vld [vmem:[#allocation91_spill] sm:$0xff] }
 0x48f   :  { %v6446_v56 = vsel %vm3393_vm2, 1.0, %v14911_v62  ;;  %v6445_v28 = vsel %vm3392_vm15, 1.0, %v14911_v62  ;;  %v4225_v63 = vsel %vm2956_vm4, %v4159_v9, 0.0  ;;  %v6298_v20 = vmul.f32 -1.442695, %v15028_v11 }
 0x490   :  { %v6806_v3 = vpop.f32.mrb[34].mxu0  ;;  %v4222_v7 = vsel %vm2956_vm4, %v4158_v40, 0.0  ;;  %7144 = vpow2.f32 %v6296_v19  ;;  %v4584_v1 = vsub.f32 %v15029_v46, %v10236_v24  ;;  %v4583_v60 = vsub.f32 %v15030_v5, %v10236_v24  ;;  %v10459_v40 = vpop.permute.xlu0 %3818 }
 0x491   :  { %v3209_v48 = vpop.f32.mrb[35].mxu0  ;;  %4220 = vadd.xlane.f32.xlu0 %v4219_v42  ;;  %v4161_v42 = vmul.f32 %v6806_v3, %v6446_v56  ;;  %7146 = vpow2.f32 %v6295_v12  ;;  %v6302_v3 = vmul.f32 -1.442695, %v15031_v51  ;;  %v4609_v9 = vmul.f32 %v4577_v31, %v4577_v31  ;;  %15033 = vst [vmem:[#allocation86_spill] sm:$0xff] %v10459_v40 }
 0x492   :  { %4217 = vadd.xlane.f32.xlu1 %v4216_v50  ;;  %v4160_v50 = vmul.f32 %v6445_v28, %v3209_v48  ;;  %v10453_v48 = vpop.permute.xlu1 %3812  ;;  %v4612_v56 = vmul.f32 %v4580_v2, %v4580_v2  ;;  %vm3396_vm15 = vcmp.eq.s32.totalorder %v9430_v25, %v9838_v57  ;;  %vm3397_vm2 = vcmp.eq.s32.totalorder %v9430_v25, %v10052_v6 }
 0x493   :  { %15032 = vst [vmem:[#allocation123_spill] sm:$0xff] %v10453_v48  ;;  %v6448_v5 = vsel %vm3395_vm6, 1.0, %v14911_v62  ;;  %v6447_v51 = vsel %vm3394_vm0, 1.0, %v14911_v62  ;;  %v4231_v12 = vsel %vm2956_vm4, %v4161_v42, 0.0  ;;  %7148 = vpow2.f32 %v6298_v20  ;;  %v15035_v48 = vld [vmem:[#allocation105_spill] sm:$0xff] }
 0x494   :  { %v6809_v17 = vpop.f32.mrb[36].mxu0  ;;  %v4611_v30 = vmul.f32 %v4579_v52, %v4579_v52  ;;  %v4614_v46 = vmul.f32 %v4582_v29, %v4582_v29  ;;  %7150 = vpow2.f32 %v6302_v3  ;;  %v6306_v40 = vmul.f32 -1.442695, %v15035_v48 }
 0x495   :  { %v3219_v0 = vpop.f32.mrb[37].mxu0  ;;  %4226 = vadd.xlane.f32.xlu0 %v4225_v63  ;;  %v4163_v19 = vmul.f32 %v6809_v17, %v6448_v5  ;;  %v4228_v63 = vsel %vm2956_vm4, %v4160_v50, 0.0  ;;  %v10474_v18 = vsel %vm4629_vm14, %v4610_v4, 0.0  ;;  %v4613_v17 = vmul.f32 %v4581_v15, %v4581_v15  ;;  %v15037_v5 = vld [vmem:[#allocation158_spill] sm:$0xff] }
 0x496   :  { %4223 = vadd.xlane.f32.xlu1 %v4222_v7  ;;  %v4162_v2 = vmul.f32 %v6447_v51, %v3219_v0  ;;  %v15034_v7 = vld [vmem:[#allocation102_spill] sm:$0xff]  ;;  %vm3398_vm0 = vcmp.eq.s32.totalorder %v9430_v25, %v9863_v58  ;;  %vm3399_vm6 = vcmp.eq.s32.totalorder %v9430_v25, %v10061_v23  ;;  %v6450_v20 = vsel %vm3397_vm2, 1.0, %v14911_v62  ;;  %v7143_v4 = vpop.eup %7142  ;;  %v10488_v42 = vpop.permute.xlu1 %3816 }
 0x497   :  { %v6300_v11 = vmul.f32 -1.442695, %v15034_v7  ;;  %v6449_v52 = vsel %vm3396_vm15, 1.0, %v14911_v62  ;;  %15036 = vst [vmem:[#allocation126_spill] sm:$0xff] %v10488_v42  ;;  %v4237_v0 = vsel %vm2956_vm4, %v4163_v19, 0.0  ;;  %v10493_v51 = vpop.permute.xlu0 %3950  ;;  %v4616_v57 = vmul.f32 %v4584_v1, %v4584_v1 }
 0x498   :  { %v6812_v31 = vpop.f32.mrb[38].mxu0  ;;  %v4234_v48 = vsel %vm2956_vm4, %v4162_v2, 0.0  ;;  %v6299_v6 = vmul.f32 -1.442695, %v15037_v5  ;;  %15038 = vst [vmem:[#allocation83_spill] sm:$0xff] %v10493_v51  ;;  %v10500_v19 = vsel %vm4629_vm14, %v4612_v56, 0.0  ;;  %vm3400_vm15 = vcmp.eq.s32.totalorder %v9430_v25, %v9887_v49 }
 0x499   :  { %v3229_v28 = vpop.f32.mrb[39].mxu0  ;;  %4232 = vadd.xlane.f32.xlu0 %v4231_v12  ;;  %v4165_v15 = vmul.f32 %v6812_v31, %v6450_v20  ;;  %7152 = vpow2.f32 %v6300_v11  ;;  %v4615_v12 = vmul.f32 %v4583_v60, %v4583_v60  ;;  %v10497_v31 = vsel %vm4629_vm14, %v4609_v9, 0.0 }
 0x49a   :  { %4229 = vadd.xlane.f32.xlu1 %v4228_v63  ;;  %v4164_v50 = vmul.f32 %v6449_v52, %v3229_v28  ;;  %7154 = vpow2.f32 %v6306_v40  ;;  %v15039_v63 = vld [vmem:[#allocation108_spill] sm:$0xff]  ;;  %v7145_v28 = vpop.eup %7144  ;;  %vm3401_vm2 = vcmp.eq.s32.totalorder %v9430_v25, %v10068_v26  ;;  %v6452_v1 = vsel %vm3399_vm6, 1.0, %v14911_v62  ;;  %v10522_v5 = vpop.permute.xlu1 %3820 }
 0x49b   :  { %v6304_v7 = vmul.f32 -1.442695, %v15039_v63  ;;  %v6451_v60 = vsel %vm3398_vm0, 1.0, %v14911_v62  ;;  %v7147_v56 = vpop.eup %7146  ;;  %v4243_v11 = vsel %vm2956_vm4, %v4165_v15, 0.0  ;;  %7156 = vpow2.f32 %v6299_v6  ;;  %15040 = vst [vmem:[#allocation90_spill] sm:$0xff] %v10522_v5  ;;  %v15048_v5 = vld [vmem:[#allocation139_spill] sm:$0xff] }
 0x49c   :  { %v6815_v29 = vpop.f32.mrb[40].mxu0  ;;  %v4240_v52 = vsel %vm2956_vm4, %v4164_v50, 0.0  ;;  %v10517_v23 = vsel %vm4629_vm14, %v4611_v30, 0.0  ;;  %v1199_v58 = vadd.f32 1.0, %v7145_v28  ;;  %v10528_v15 = vsel %vm4629_vm14, %v4616_v57, 0.0  ;;  %v10534_v30 = vpop.permute.xlu0 %3954 }
 0x49d   :  { %v3239_v3 = vpop.f32.mrb[41].mxu0  ;;  %4238 = vadd.xlane.f32.xlu0 %v4237_v0  ;;  %v4167_v40 = vmul.f32 %v6815_v29, %v6452_v1  ;;  %v1200_v0 = vadd.f32 1.0, %v7143_v4  ;;  %7158 = vpow2.f32 %v6304_v7  ;;  %v10525_v29 = vsel %vm4629_vm14, %v4613_v17, 0.0  ;;  %v7149_v4 = vpop.eup %7148  ;;  %15041 = vst [vmem:[#allocation71_spill] sm:$0xff] %v10534_v30 }
 0x49e   :  { %4235 = vadd.xlane.f32.xlu1 %v4234_v48  ;;  %v4166_v2 = vmul.f32 %v6451_v60, %v3239_v3  ;;  %v10520_v48 = vsel %vm4629_vm14, %v4614_v46, 0.0  ;;  %vm3402_vm0 = vcmp.eq.s32.totalorder %v9430_v25, %v9912_v10  ;;  %vm3403_vm6 = vcmp.eq.s32.totalorder %v9430_v25, %v10077_v54  ;;  %v7151_v3 = vpop.eup %7150  ;;  %v15042_v60 = vld [vmem:[#allocation100_spill] sm:$0xff] }
 0x49f   :  { %v6454_v46 = vsel %vm3401_vm2, 1.0, %v14911_v62  ;;  %v6453_v17 = vsel %vm3400_vm15, 1.0, %v14911_v62  ;;  %v4249_v63 = vsel %vm2956_vm4, %v4167_v40, 0.0  ;;  %7160 = vrcp.f32 %v1200_v0  ;;  %v15047_v10 = vld [vmem:[#allocation104_spill] sm:$0xff] }
 0x4a0   :  { %v6818_v9 = vpop.f32.mrb[42].mxu0  ;;  %v4246_v28 = vsel %vm2956_vm4, %v4166_v2, 0.0  ;;  %v1198_v1 = vadd.f32 1.0, %v7147_v56  ;;  %v10547_v26 = vsel %vm4629_vm14, %v4615_v12, 0.0  ;;  %v4586_v49 = vsub.f32 %v15042_v60, %v10236_v24  ;;  %v10570_v54 = vpop.permute.xlu0 %3958 }
 0x4a1   :  { %v3249_v20 = vpop.f32.mrb[43].mxu0  ;;  %4244 = vadd.xlane.f32.xlu0 %v4243_v11  ;;  %v4169_v6 = vmul.f32 %v6818_v9, %v6454_v46  ;;  %v1201_v11 = vadd.f32 1.0, %v7149_v4  ;;  %7162 = vrcp.f32 %v1199_v58  ;;  %vm3404_vm15 = vcmp.eq.s32.totalorder %v9430_v25, %v9933_v59  ;;  %v10566_v58 = vpop.permute.xlu1 %3952  ;;  %15046 = vst [vmem:[#allocation93_spill] sm:$0xff] %v10570_v54  ;;  %v15055_v59 = vld [vmem:[#allocation110_spill] sm:$0xff] }
 0x4a2   :  { %4241 = vadd.xlane.f32.xlu1 %v4240_v52  ;;  %v4168_v57 = vmul.f32 %v6453_v17, %v3249_v20  ;;  %v15043_v52 = vld [vmem:[#allocation155_spill] sm:$0xff]  ;;  %v15044_v20 = vld [vmem:[#allocation136_spill] sm:$0xff]  ;;  %vm3405_vm2 = vcmp.eq.s32.totalorder %v9430_v25, %v10086_v61  ;;  %v6456_v12 = vsel %vm3403_vm6, 1.0, %v14911_v62  ;;  %v6455_v56 = vsel %vm3402_vm0, 1.0, %v14911_v62  ;;  %15045 = vst [vmem:[#allocation151_spill] sm:$0xff] %v10566_v58 }
 0x4a3   :  { %v6301_v9 = vmul.f32 -1.442695, %v15043_v52  ;;  %v4585_v40 = vsub.f32 %v15044_v20, %v10236_v24  ;;  %v7153_v46 = vpop.eup %7152  ;;  %7164 = vrcp.f32 %v1198_v1  ;;  %v1205_v52 = vadd.f32 1.0, %v7151_v3  ;;  %v15051_v1 = vld [vmem:[#allocation114_spill] sm:$0xff]  ;;  %v15053_v61 = vld [vmem:[#allocation143_spill] sm:$0xff] }
 0x4a4   :  { %v6821_v50 = vpop.f32.mrb[44].mxu0  ;;  %v7155_v0 = vpop.eup %7154  ;;  %v4252_v60 = vsel %vm2956_vm4, %v4168_v57, 0.0  ;;  %v4588_v20 = vsub.f32 %v15047_v10, %v10236_v24  ;;  %v4587_v42 = vsub.f32 %v15048_v5, %v10236_v24  ;;  %7166 = vrcp.f32 %v1201_v11 }
 0x4a5   :  { %v3259_v7 = vpop.f32.mrb[45].mxu0  ;;  %4250 = vadd.xlane.f32.xlu0 %v4249_v63  ;;  %v4171_v4 = vmul.f32 %v6821_v50, %v6456_v12  ;;  %v4255_v63 = vsel %vm2956_vm4, %v4169_v6, 0.0  ;;  %v1203_v50 = vadd.f32 1.0, %v7153_v46  ;;  %v15050_v6 = vld [vmem:[#allocation107_spill] sm:$0xff]  ;;  %v7157_v57 = vpop.eup %7156  ;;  %v6308_v3 = vmul.f32 -1.442695, %v15051_v1 }
 0x4a6   :  { %4247 = vadd.xlane.f32.xlu1 %v4246_v28  ;;  %v4170_v17 = vmul.f32 %v6455_v56, %v3259_v7  ;;  %v15049_v7 = vld [vmem:[#allocation111_spill] sm:$0xff]  ;;  %v4590_v56 = vsub.f32 %v15050_v6, %v10236_v24  ;;  %7168 = vpow2.f32 %v6301_v9  ;;  %v6457_v5 = vsel %vm3404_vm15, 1.0, %v14911_v62  ;;  %v15052_v6 = vld [vmem:[#allocation164_spill] sm:$0xff]  ;;  %v10593_v25 = vpop.permute.xlu1 %3956 }
 0x4a7   :  { %v6310_v12 = vmul.f32 -1.442695, %v15049_v7  ;;  %v7159_v11 = vpop.eup %7158  ;;  %v4261_v10 = vsel %vm2956_vm4, %v4171_v4, 0.0  ;;  %7170 = vrcp.f32 %v1205_v52  ;;  %v6303_v9 = vmul.f32 -1.442695, %v15052_v6  ;;  %15054 = vst [vmem:[#allocation130_spill] sm:$0xff] %v10593_v25 }
 0x4a8   :  { %v6824_v2 = vpop.f32.mrb[46].mxu0  ;;  %v4258_v7 = vsel %vm2956_vm4, %v4170_v17, 0.0  ;;  %v4618_v1 = vmul.f32 %v4586_v49, %v4586_v49  ;;  %v4589_v58 = vsub.f32 %v15053_v61, %v10236_v24  ;;  %v1202_v54 = vadd.f32 1.0, %v7157_v57  ;;  %v15056_v4 = vld [vmem:[#allocation146_spill] sm:$0xff] }
 0x4a9   :  { %v3269_v28 = vpop.f32.mrb[47].mxu0  ;;  %4256 = vadd.xlane.f32.xlu0 %v4255_v63  ;;  %v6458_v63 = vsel %vm3405_vm2, 1.0, %v14911_v62  ;;  %7172 = vpow2.f32 %v6310_v12  ;;  %v10599_v17 = vpop.eup %7160  ;;  %v1209_v52 = vadd.f32 1.0, %v7155_v0  ;;  %v4617_v49 = vmul.f32 %v4585_v40, %v4585_v40  ;;  %v15060_v12 = vld [vmem:[#allocation116_spill] sm:$0xff]  ;;  %v15061_v0 = vld [vmem:[#allocation117_spill] sm:$0xff] }
 0x4aa   :  { %4253 = vadd.xlane.f32.xlu1 %v4252_v60  ;;  %v4173_v46 = vmul.f32 %v6824_v2, %v6458_v63  ;;  %v4172_v60 = vmul.f32 %v6457_v5, %v3269_v28  ;;  %v4592_v2 = vsub.f32 %v15055_v59, %v10236_v24  ;;  %v4591_v28 = vsub.f32 %v15056_v4, %v10236_v24  ;;  %v10601_v63 = vpop.permute.xlu0 %3962 }
 0x4ab   :  { %15057 = vst [vmem:[#allocation95_spill] sm:$0xff] %v10599_v17  ;;  %7174 = vrcp.f32 %v1203_v50  ;;  %15058 = vst [vmem:[#allocation88_spill] sm:$0xff] %v10601_v63  ;;  %v4620_v5 = vmul.f32 %v4588_v20, %v4588_v20  ;;  %v6314_v57 = vmul.f32 -1.442695, %v15060_v12  ;;  %v1207_v61 = vadd.f32 1.0, %v7159_v11  ;;  %v15063_v12 = vld [vmem:[#allocation120_spill] sm:$0xff] }
 0x4ac   :  { %7176 = vpow2.f32 %v6308_v3  ;;  %v4264_v6 = vsel %vm2956_vm4, %v4172_v60, 0.0  ;;  %v4619_v59 = vmul.f32 %v4587_v42, %v4587_v42  ;;  %v4622_v50 = vmul.f32 %v4590_v56, %v4590_v56  ;;  %v15065_v42 = vld [vmem:[#allocation69_spill] sm:$0xff]  ;;  %v15084_v63 = vld [vmem:[#allocation168_spill] sm:$0xff] }
 0x4ad   :  { %4262 = vadd.xlane.f32.xlu0 %v4261_v10  ;;  %v10603_v10 = vpop.eup %7162  ;;  %7178 = vpow2.f32 %v6303_v9  ;;  %v6312_v4 = vmul.f32 -1.442695, %v15061_v0  ;;  %v10610_v40 = vsel %vm4629_vm14, %v4618_v1, 0.0  ;;  %v4621_v20 = vmul.f32 %v4589_v58, %v4589_v58  ;;  %v10620_v9 = vpop.permute.xlu1 %3960 }
 0x4ae   :  { %4259 = vadd.xlane.f32.xlu1 %v4258_v7  ;;  %15059 = vst [vmem:[#allocation133_spill] sm:$0xff] %v10603_v10  ;;  %v4267_v7 = vsel %vm2956_vm4, %v4173_v46, 0.0  ;;  %7180 = vrcp.f32 %v1202_v54  ;;  %v10612_v3 = vpop.eup %7164  ;;  %v6318_v46 = vmul.f32 -1.442695, %v15063_v12  ;;  %v4624_v25 = vmul.f32 %v4592_v2, %v4592_v2  ;;  %15066 = vst [vmem:[#allocation73_spill] sm:$0xff] %v10620_v9  ;;  %v10629_v2 = vpop.permute.xlu0 %3966  ;;  %v15072_v12 = vld [vmem:[#allocation113_spill] sm:$0xff] }
 0x4af   :  { %15062 = vst [vmem:[#allocation91_spill] sm:$0xff] %v10612_v3  ;;  %7182 = vrcp.f32 %v1209_v52  ;;  %v10615_v60 = vmul.f32 %v4591_v28, %v4591_v28  ;;  %v10617_v11 = vpop.eup %7166  ;;  %v6316_v56 = vmul.f32 -1.442695, %v15065_v42  ;;  %v10623_v54 = vsel %vm4629_vm14, %v4617_v49, 0.0  ;;  %v15067_v52 = vld [vmem:[#allocation122_spill] sm:$0xff]  ;;  %15068 = vst [vmem:[#allocation99_spill] sm:$0xff] %v10629_v2 }
 0x4b0   :  { %15064 = vst [vmem:[#allocation98_spill] sm:$0xff] %v10617_v11  ;;  %7184 = vpow2.f32 %v6314_v57  ;;  %v10626_v58 = vsel %vm4629_vm14, %v4620_v5, 0.0  ;;  %v7169_v1 = vpop.eup %7168  ;;  %v10634_v28 = vsel %vm4629_vm14, %v4619_v59, 0.0  ;;  %vm4335_vm4 = vcmp.gt.f32.partialorder %v10603_v10, 0.1  ;;  %v15069_v49 = vld [vmem:[#allocation124_spill] sm:$0xff] }
 0x4b1   :  { %4268 = vadd.xlane.f32.xlu0 %v4267_v7  ;;  %7186 = vrcp.f32 %v1207_v61  ;;  %v6322_v7 = vmul.f32 -1.442695, %v15067_v52  ;;  %v6320_v57 = vmul.f32 -1.442695, %v15069_v49  ;;  %v10639_v5 = vsel %vm4629_vm14, %v4622_v50, 0.0  ;;  %v15071_v61 = vld [vmem:[#allocation161_spill] sm:$0xff] }
 0x4b2   :  { %4265 = vadd.xlane.f32.xlu1 %v4264_v6  ;;  %7188 = vpow2.f32 %v6312_v4  ;;  %vm4334_vm0 = vcmp.gt.f32.partialorder %v10612_v3, 0.1  ;;  %v10642_v6 = vpop.eup %7170  ;;  %v10649_v59 = vsel %vm4629_vm14, %v4624_v25, 0.0  ;;  %v1204_v4 = vadd.f32 1.0, %v7169_v1  ;;  %v4303_v42 = vld [vmem:[%s14076_s3 + $0x8] sm:$0xff]  ;;  %v4302_v1 = vld [vmem:[%s14076_s3] sm:$0xff]  ;;  %v10677_v9 = vpop.permute.xlu0 %3970 }
 0x4b3   :  { %15070 = vst [vmem:[#allocation102_spill] sm:$0xff] %v10642_v6  ;;  %7190 = vpow2.f32 %v6318_v46  ;;  %v7173_v0 = vpop.eup %7172  ;;  %v4594_v50 = vsub.f32 %v15072_v12, %v10236_v24  ;;  %v6492_v46 = vsel %vm4335_vm4, 1.0, %v14911_v62  ;;  %v15075_v25 = vld [vmem:[#allocation150_spill] sm:$0xff]  ;;  %vm4336_vm6 = vcmp.gt.f32.partialorder %v10599_v17, 0.1  ;;  %15079 = vst [vmem:[#allocation108_spill] sm:$0xff] %v10677_v9 }
 0x4b4   :  { %7192 = vpow2.f32 %v6316_v56  ;;  %v4593_v56 = vsub.f32 %v15075_v25, %v10236_v24  ;;  %vm4337_vm15 = vcmp.gt.f32.partialorder %v10617_v11, 0.1  ;;  %v15078_v25 = vld [vmem:[#allocation128_spill] sm:$0xff]  ;;  %v10679_v2 = vmul.f32 %v6492_v46, %v4303_v42 }
 0x4b5   :  { %4634 = vadd.xlane.f32.xlu0 %v10302_v43  ;;  %v6305_v43 = vmul.f32 -1.442695, %v15071_v61  ;;  %v10657_v52 = vpop.eup %7174  ;;  %7194 = vpow2.f32 %v6322_v7  ;;  %v6491_v61 = vsel %vm4334_vm0, 1.0, %v14911_v62  ;;  %v10670_v7 = vpop.permute.xlu1 %3964  ;;  %v6324_v10 = vmul.f32 -1.442695, %v15078_v25 }
 0x4b6   :  { %4631 = vadd.xlane.f32.xlu1 %v10283_v35  ;;  %v10646_v35 = vsel %vm4629_vm14, %v4621_v20, 0.0  ;;  %15073 = vst [vmem:[#allocation105_spill] sm:$0xff] %v10657_v52  ;;  %v15074_v20 = vld [vmem:[#allocation127_spill] sm:$0xff]  ;;  %v7177_v12 = vpop.eup %7176  ;;  %7196 = vpow2.f32 %v6320_v57  ;;  %15076 = vst [vmem:[#allocation158_spill] sm:$0xff] %v10670_v7  ;;  %vm4341_vm2 = vcmp.gt.f32.partialorder %v10642_v6, 0.1  ;;  %v10684_v7 = vmul.f32 %v6491_v61, %v4302_v1 }
 0x4b7   :  { %v6326_v49 = vmul.f32 -1.442695, %v15074_v20  ;;  %v15077_v20 = vld [vmem:[#allocation154_spill] sm:$0xff]  ;;  %7198 = vpow2.f32 %v6305_v43  ;;  %15080 = vst [vmem:[#allocation100_spill] sm:$0xff] %v10679_v2  ;;  %v1213_v3 = vadd.f32 1.0, %v7173_v0  ;;  %vm14447_vm4 = vcmask 7168  }
 0x4b8   :  { %7200 = vrcp.f32 %v1204_v4  ;;  %15082 = vst [vmem:[#allocation136_spill] sm:$0xff] %v10684_v7  ;;  %v6307_v30 = vmul.f32 -1.442695, %v15084_v63  ;;  %v4304_v43 = vld [vmem:[%s14076_s3 + $0x10] sm:$0xff]  ;;  %v6493_v0 = vsel %vm4336_vm6, 1.0, %v14911_v62  ;;  %v4305_v4 = vld [vmem:[%s14076_s3 + $0x18] sm:$0xff]  ;;  %v4626_v46 = vmul.f32 %v4594_v50, %v4594_v50 }
 0x4b9   :  { %4640 = vadd.xlane.f32.xlu0 %v10333_v14  ;;  %v4595_v14 = vsub.f32 %v15077_v20, %v10236_v24  ;;  %7202 = vpow2.f32 %v6326_v49  ;;  %v6494_v63 = vsel %vm4337_vm15, 1.0, %v14911_v62  ;;  %v4309_v49 = vld [vmem:[%s14076_s3 + $0x38] sm:$0xff]  ;;  %v6498_v1 = vsel %vm4341_vm2, 1.0, %v14911_v62  ;;  %v10714_v50 = vpop.permute.xlu1 %3968 }
 0x4ba   :  { %4637 = vadd.xlane.f32.xlu1 %v10356_v38  ;;  %v7179_v38 = vpop.eup %7178  ;;  %7204 = vpow2.f32 %v6324_v10  ;;  %v6110_v11 = vsel %vm14447_vm4, %v10679_v2, 0.0  ;;  %v10718_v17 = vmul.f32 %v6493_v0, %v4304_v43  ;;  %v10720_v6 = vmul.f32 %v6494_v63, %v4305_v4  ;;  %v10722_v10 = vpop.permute.xlu0 %3974  ;;  %v4306_v0 = vld [vmem:[%s14076_s3 + $0x20] sm:$0xff] }
 0x4bb   :  { %v10682_v57 = vpop.eup %7180  ;;  %v4627_v25 = vmul.f32 %v4595_v14, %v4595_v14  ;;  %7206 = vrcp.f32 %v1213_v3  ;;  %v1211_v51 = vadd.f32 1.0, %v7177_v12  ;;  %vm4339_vm6 = vcmp.gt.f32.partialorder %v10657_v52, 0.1  ;;  %v15092_v52 = vld [vmem:[#allocation68_spill] sm:$0xff] }
 0x4bc   :  { %15081 = vst [vmem:[#allocation155_spill] sm:$0xff] %v10682_v57  ;;  %v10686_v20 = vpop.eup %7182  ;;  %vm4338_vm0 = vcmp.gt.f32.partialorder %v10682_v57, 0.1  ;;  %15086 = vst [vmem:[#allocation111_spill] sm:$0xff] %v10718_v17  ;;  %7208 = vpow2.f32 %v6307_v30  ;;  %v10727_v3 = vmul.f32 %v6498_v1, %v4309_v49  ;;  %v10740_v4 = vsel %vm4629_vm14, %v4626_v46, 0.0 }
 0x4bd   :  { %15083 = vst [vmem:[#allocation104_spill] sm:$0xff] %v10686_v20  ;;  %4646 = vadd.xlane.f32.xlu0 %v10361_v32  ;;  %v7185_v42 = vpop.eup %7184  ;;  %v1206_v32 = vadd.f32 1.0, %v7179_v38  ;;  %15087 = vst [vmem:[#allocation107_spill] sm:$0xff] %v10720_v6  ;;  %v6495_v30 = vsel %vm4338_vm0, 1.0, %v14911_v62  ;;  %v6112_v49 = vsel %vm14447_vm4, %v10718_v17, 0.0  ;;  %v6114_v1 = vsel %vm14447_vm4, %v10720_v6, 0.0 }
 0x4be   :  { %4643 = vadd.xlane.f32.xlu1 %v10364_v47  ;;  %v4625_v47 = vmul.f32 %v4593_v56, %v4593_v56  ;;  %v10709_v61 = vpop.eup %7186  ;;  %v6109_v56 = vsel %vm14447_vm4, %v10684_v7, 0.0  ;;  %15088 = vst [vmem:[#allocation114_spill] sm:$0xff] %v10727_v3  ;;  %v1217_v2 = vadd.f32 1.0, %v7185_v42  ;;  %v6496_v46 = vsel %vm4339_vm6, 1.0, %v14911_v62  ;;  %v10770_v6 = vpop.permute.xlu0 %3978  ;;  %v15142_v7 = vld [vmem:[#allocation21_spill] sm:$0xff] }
 0x4bf   :  { %15085 = vst [vmem:[#allocation139_spill] sm:$0xff] %v10709_v61  ;;  %v7189_v38 = vpop.eup %7188  ;;  %7210 = vrcp.f32 %v1206_v32  ;;  %v6111_v43 = vadd.f32 %v6110_v11, %v6109_v56  ;;  %v10746_v32 = vsel %vm4629_vm14, %v4627_v25, 0.0  ;;  %vm4345_vm15 = vcmp.gt.f32.partialorder %v10686_v20, 0.1 }
 0x4c0   :  { %v7191_v9 = vpop.eup %7190  ;;  %v10743_v63 = vsel %vm4629_vm14, %v4625_v47, 0.0  ;;  %7212 = vrcp.f32 %v1211_v51  ;;  %v10760_v47 = vmul.f32 %v6495_v30, %v4306_v0  ;;  %v10764_v51 = vpop.permute.xlu1 %3972  ;;  %v4596_v0 = vsub.f32 %v15092_v52, %v10236_v24 }
 0x4c1   :  { %4652 = vadd.xlane.f32.xlu0 %v10367_v33  ;;  %v7193_v14 = vpop.eup %7192  ;;  %v1215_v33 = vadd.f32 1.0, %v7189_v38  ;;  %v1221_v42 = vadd.f32 1.0, %v7191_v9  ;;  %v4307_v9 = vld [vmem:[%s14076_s3 + $0x28] sm:$0xff]  ;;  %7214 = vrcp.f32 %v1217_v2  ;;  %15091 = vst [vmem:[#allocation110_spill] sm:$0xff] %v10764_v51  ;;  %vm4343_vm2 = vcmp.gt.f32.partialorder %v10709_v61, 0.1 }
 0x4c2   :  { %4649 = vadd.xlane.f32.xlu1 %v10386_v34  ;;  %v7195_v12 = vpop.eup %7194  ;;  %v10737_v34 = vsel %vm4629_vm14, %v10615_v60, 0.0  ;;  %v1219_v60 = vadd.f32 1.0, %v7193_v14  ;;  %15089 = vst [vmem:[#allocation164_spill] sm:$0xff] %v10760_v47  ;;  %v6113_v14 = vadd.f32 %v6112_v49, %v6111_v43  ;;  %v10775_v30 = vmul.f32 %v6496_v46, %v4307_v9  ;;  %v4311_v46 = vld [vmem:[%s14076_s3 + $0x48] sm:$0xff]  ;;  %v10810_v61 = vpop.permute.xlu0 %3982 }
 0x4c3   :  { %v7197_v11 = vpop.eup %7196  ;;  %v1225_v56 = vadd.f32 1.0, %v7195_v12  ;;  %7216 = vrcp.f32 %v1215_v33  ;;  %v15094_v12 = vld [vmem:[#allocation166_spill] sm:$0xff]  ;;  %v6116_v33 = vsel %vm14447_vm4, %v10760_v47, 0.0  ;;  %v4628_v9 = vmul.f32 %v4596_v0, %v4596_v0 }
 0x4c4   :  { %v7199_v38 = vpop.eup %7198  ;;  %v1223_v57 = vadd.f32 1.0, %v7197_v11  ;;  %7218 = vrcp.f32 %v1221_v42  ;;  %15093 = vst [vmem:[#allocation146_spill] sm:$0xff] %v10775_v30  ;;  %v6309_v49 = vmul.f32 -1.442695, %v15094_v12  ;;  %v6115_v11 = vadd.f32 %v6114_v1, %v6113_v14  ;;  %v4313_v42 = vld [vmem:[%s14076_s3 + $0x58] sm:$0xff]  ;;  %v15150_v51 = vld [vmem:[#allocation14_spill] sm:$0xff] }
 0x4c5   :  { %4658 = vadd.xlane.f32.xlu0 %v10389_v41  ;;  %v10762_v25 = vpop.eup %7200  ;;  %v10768_v41 = vsel %vm14447_vm4, %v10727_v3, 0.0  ;;  %v1208_v2 = vadd.f32 1.0, %v7199_v38  ;;  %7220 = vrcp.f32 %v1219_v60  ;;  %v6500_v1 = vsel %vm4343_vm2, 1.0, %v14911_v62 }
 0x4c6   :  { %4655 = vadd.xlane.f32.xlu1 %v10392_v36  ;;  %15090 = vst [vmem:[#allocation143_spill] sm:$0xff] %v10762_v25  ;;  %v7203_v36 = vpop.eup %7202  ;;  %vm4340_vm0 = vcmp.gt.f32.partialorder %v10762_v25, 0.1  ;;  %7222 = vrcp.f32 %v1225_v56  ;;  %v6117_v12 = vadd.f32 %v6116_v33, %v6115_v11  ;;  %v6118_v11 = vsel %vm14447_vm4, %v10775_v30, 0.0 }
 0x4c7   :  { %v7205_v43 = vpop.eup %7204  ;;  %v1229_v52 = vadd.f32 1.0, %v7203_v36  ;;  %7224 = vrcp.f32 %v1223_v57  ;;  %v10801_v36 = vpop.permute.xlu1 %3976  ;;  %v4308_v57 = vld [vmem:[%s14076_s3 + $0x30] sm:$0xff]  ;;  %v6497_v0 = vsel %vm4340_vm0, 1.0, %v14911_v62  ;;  %v10820_v25 = vmul.f32 %v6500_v1, %v4311_v46 }
 0x4c8   :  { %v10784_v24 = vpop.eup %7206  ;;  %v1227_v14 = vadd.f32 1.0, %v7205_v43  ;;  %7226 = vrcp.f32 %v1208_v2  ;;  %15098 = vst [vmem:[#allocation120_spill] sm:$0xff] %v10801_v36  ;;  %v15101_v43 = vld [vmem:[#allocation171_spill] sm:$0xff]  ;;  %v10824_v3 = vmul.f32 %v6497_v0, %v4308_v57  ;;  %v15110_v0 = vld [vmem:[#allocation174_spill] sm:$0xff]  ;;  %vm3598_vm0 = vcmp.ne.s32.totalorder %v9951_v55, 0 }
 0x4c9   :  { %4664 = vadd.xlane.f32.xlu0 %v10395_v22  ;;  %15095 = vst [vmem:[#allocation116_spill] sm:$0xff] %v10784_v24  ;;  %v6502_v22 = vsel %vm4345_vm15, 1.0, %v14911_v62  ;;  %v7209_v38 = vpop.eup %7208  ;;  %7228 = vpow2.f32 %v6309_v49  ;;  %vm4349_vm6 = vcmp.gt.f32.partialorder %v10784_v24, 0.1  ;;  %v6317_v33 = vmul.f32 -1.442695, %v15101_v43  ;;  %vm10899_vm11 = vmand %vm3470_vm3, %vm3598_vm0 }
 0x4ca   :  { %4661 = vadd.xlane.f32.xlu1 %v10399_v39  ;;  %v15096_v39 = vld [vmem:[#allocation169_spill] sm:$0xff]  ;;  %v10799_v56 = vpop.eup %7210  ;;  %v10814_v2 = vmul.f32 %v6502_v22, %v4313_v42  ;;  %7230 = vrcp.f32 %v1229_v52  ;;  %15102 = vst [vmem:[#allocation122_spill] sm:$0xff] %v10820_v25  ;;  %15104 = vst [vmem:[#allocation161_spill] sm:$0xff] %v10824_v3  ;;  %v6119_v42 = vadd.f32 %v6118_v11, %v6117_v12  ;;  %v6506_v46 = vsel %vm4349_vm6, 1.0, %v14911_v62  ;;  %v15115_v24 = vld [vmem:[#allocation175_spill] sm:$0xff] }
 0x4cb   :  { %v6313_v60 = vmul.f32 -1.442695, %v15096_v39  ;;  %15097 = vst [vmem:[#allocation117_spill] sm:$0xff] %v10799_v56  ;;  %v15099_v39 = vld [vmem:[#allocation170_spill] sm:$0xff]  ;;  %v10822_v49 = vpop.eup %7212  ;;  %vm4342_vm15 = vcmp.gt.f32.partialorder %v10799_v56, 0.1  ;;  %v10849_v11 = vpop.permute.xlu1 %3980 }
 0x4cc   :  { %v6311_v20 = vmul.f32 -1.442695, %v15099_v39  ;;  %15100 = vst [vmem:[#allocation69_spill] sm:$0xff] %v10814_v2  ;;  %15103 = vst [vmem:[#allocation124_spill] sm:$0xff] %v10822_v49  ;;  %v1210_v39 = vadd.f32 1.0, %v7209_v38  ;;  %v4317_v22 = vld [vmem:[%s14076_s3 + $0x78] sm:$0xff] }
 0x4cd   :  { %4670 = vadd.xlane.f32.xlu0 %v10474_v18  ;;  %7232 = vpow2.f32 %v6313_v60  ;;  %v10827_v18 = vpop.eup %7214  ;;  %v15108_v38 = vld [vmem:[#allocation173_spill] sm:$0xff]  ;;  %v10844_v12 = vsel %vm14447_vm4, %v10814_v2, 0.0  ;;  %v6319_v43 = vmul.f32 -1.442695, %v15110_v0  ;;  %15111 = vst [vmem:[#allocation154_spill] sm:$0xff] %v10849_v11  ;;  %vm3600_vm6 = vcmp.ne.s32.totalorder %v9967_v44, 0 }
 0x4ce   :  { %4667 = vadd.xlane.f32.xlu1 %v10497_v31  ;;  %15105 = vst [vmem:[#allocation113_spill] sm:$0xff] %v10827_v18  ;;  %7234 = vrcp.f32 %v1227_v14  ;;  %v15106_v31 = vld [vmem:[#allocation172_spill] sm:$0xff]  ;;  %v10834_v1 = vpop.eup %7216  ;;  %v6321_v60 = vmul.f32 -1.442695, %v15108_v38  ;;  %v10840_v14 = vsel %vm4629_vm14, %v4628_v9, 0.0  ;;  %v10868_v38 = vmul.f32 %v6506_v46, %v4317_v22  ;;  %v15125_v55 = vld [vmem:[#allocation75_spill] sm:$0xff]  ;;  %vm10915_vm3 = vmand %vm3472_vm5, %vm3600_vm6 }
 0x4cf   :  { %v6315_v52 = vmul.f32 -1.442695, %v15106_v31  ;;  %15107 = vst [vmem:[#allocation127_spill] sm:$0xff] %v10834_v1  ;;  %7236 = vpow2.f32 %v6311_v20  ;;  %v10846_v57 = vpop.eup %7218  ;;  %v10853_v20 = vsel %vm14447_vm4, %v10820_v25, 0.0  ;;  %v6120_v31 = vsel %vm14447_vm4, %v10824_v3, 0.0  ;;  %v4321_v44 = vld [vmem:[%s14076_s3 + $0x98] sm:$0xff]  ;;  %vm10936_vm5 = vmand %vm3474_vm7, %vm3602_vm1 }
 0x4d0   :  { %15109 = vst [vmem:[#allocation150_spill] sm:$0xff] %v10846_v57  ;;  %7238 = vpow2.f32 %v6317_v33  ;;  %v10861_v9 = vpop.eup %7220  ;;  %v10863_v33 = vpop.permute.xlu0 %3986  ;;  %vm4347_vm14 = vcmp.gt.f32.partialorder %v10822_v49, 0.1  ;;  %15113 = vst [vmem:[#allocation168_spill] sm:$0xff] %v10868_v38  ;;  %v6325_v2 = vmul.f32 -1.442695, %v15115_v24  ;;  %v6121_v25 = vadd.f32 %v6120_v31, %v6119_v42 }
 0x4d1   :  { %4676 = vadd.xlane.f32.xlu0 %v10500_v19  ;;  %v4310_v19 = vld [vmem:[%s14076_s3 + $0x40] sm:$0xff]  ;;  %15112 = vst [vmem:[#allocation128_spill] sm:$0xff] %v10861_v9  ;;  %7240 = vrcp.f32 %v1210_v39  ;;  %v10870_v0 = vpop.eup %7222  ;;  %vm4353_vm2 = vcmp.gt.f32.partialorder %v10827_v18, 0.1  ;;  %v15117_v39 = vld [vmem:[#allocation176_spill] sm:$0xff]  ;;  %v6504_v24 = vsel %vm4347_vm14, 1.0, %v14911_v62 }
 0x4d2   :  { %4673 = vadd.xlane.f32.xlu1 %v10517_v23  ;;  %v6499_v23 = vsel %vm4342_vm15, 1.0, %v14911_v62  ;;  %15114 = vst [vmem:[#allocation68_spill] sm:$0xff] %v10870_v0  ;;  %7242 = vpow2.f32 %v6315_v52  ;;  %v10874_v56 = vpop.eup %7224  ;;  %v6323_v47 = vmul.f32 -1.442695, %v15117_v39  ;;  %vm4351_vm15 = vcmp.gt.f32.partialorder %v10834_v1, 0.1 }
 0x4d3   :  { %15116 = vst [vmem:[#allocation166_spill] sm:$0xff] %v10874_v56  ;;  %7244 = vpow2.f32 %v6321_v60  ;;  %v10880_v22 = vmul.f32 %v6499_v23, %v4310_v19  ;;  %v10882_v46 = vpop.eup %7226  ;;  %vm4355_vm13 = vcmp.gt.f32.partialorder %v10861_v9, 0.1  ;;  %vm4357_vm12 = vcmp.gt.f32.partialorder %v10846_v57, 0.1  ;;  %v15121_v42 = vld [vmem:[#allocation84_spill] sm:$0xff] }
 0x4d4   :  { %15119 = vst [vmem:[#allocation170_spill] sm:$0xff] %v10882_v46  ;;  %7246 = vpow2.f32 %v6319_v43  ;;  %v7229_v52 = vpop.eup %7228  ;;  %vm3604_vm14 = vcmp.ne.s32.totalorder %v10001_v13, 0  ;;  %v10904_v43 = vpop.permute.xlu1 %3984  ;;  %v6123_v19 = vadd.f32 %v10768_v41, %v6121_v25  ;;  %v4315_v23 = vld [vmem:[%s14076_s3 + $0x68] sm:$0xff]  ;;  %vm3606_vm0 = vcmp.ne.s32.totalorder %v10019_v45, 0  ;;  %v15131_v38 = vld [vmem:[#allocation129_spill] sm:$0xff]  ;;  %v15184_v60 = vld [vmem:[#allocation32_spill] sm:$0xff] }
 0x4d5   :  { %4682 = vadd.xlane.f32.xlu0 %v10520_v48  ;;  %15118 = vst [vmem:[#allocation169_spill] sm:$0xff] %v10880_v22  ;;  %v6510_v48 = vsel %vm4353_vm2, 1.0, %v14911_v62  ;;  %7248 = vpow2.f32 %v6325_v2  ;;  %15124 = vst [vmem:[#allocation172_spill] sm:$0xff] %v10904_v43  ;;  %vm4361_vm2 = vcmp.gt.f32.partialorder %v10870_v0, 0.1  ;;  %v10920_v39 = vpop.permute.xlu0 %3990  ;;  %v6124_v25 = vsel %vm14447_vm4, %v10880_v22, 0.0 }
 0x4d6   :  { %4679 = vadd.xlane.f32.xlu1 %v10525_v29  ;;  %v10893_v29 = vpop.eup %7230  ;;  %7250 = vpow2.f32 %v6323_v47  ;;  %vm4344_vm10 = vcmp.gt.f32.partialorder %v10882_v46, 0.1  ;;  %v1212_v41 = vadd.f32 1.0, %v7229_v52  ;;  %vm3608_vm6 = vcmp.ne.s32.totalorder %v10034_v37, 0  ;;  %vm10957_vm7 = vmand %vm3476_vm8, %vm3604_vm14  ;;  %v4323_v3 = vld [vmem:[%s14076_s3 + $0xa8] sm:$0xff]  ;;  %v4329_v13 = vld [vmem:[%s14076_s3 + $0xd8] sm:$0xff] }
 0x4d7   :  { %15120 = vst [vmem:[#allocation171_spill] sm:$0xff] %v10893_v29  ;;  %v7233_v2 = vpop.eup %7232  ;;  %v6508_v18 = vsel %vm4351_vm15, 1.0, %v14911_v62  ;;  %v6514_v52 = vsel %vm4357_vm12, 1.0, %v14911_v62  ;;  %vm3610_vm1 = vcmp.ne.s32.totalorder %v10048_v16, 0  ;;  %v10962_v1 = vmul.f32 %v6504_v24, %v4315_v23  ;;  %v15135_v24 = vld [vmem:[#allocation132_spill] sm:$0xff]  ;;  %vm10980_vm8 = vmand %vm3478_vm9, %vm3606_vm0  ;;  %v15146_v37 = vld [vmem:[#allocation74_spill] sm:$0xff] }
 0x4d8   :  { %v10930_v47 = vpop.eup %7234  ;;  %v6512_v57 = vsel %vm4355_vm13, 1.0, %v14911_v62  ;;  %v6518_v30 = vsel %vm4361_vm2, 1.0, %v14911_v62  ;;  %v1216_v43 = vadd.f32 1.0, %v7233_v2  ;;  %vm3612_vm12 = vcmp.ne.s32.totalorder %v10059_v21, 0  ;;  %v15160_v21 = vld [vmem:[#allocation142_spill] sm:$0xff] }
 0x4d9   :  { %4688 = vadd.xlane.f32.xlu0 %v10528_v15  ;;  %15128 = vst [vmem:[#allocation173_spill] sm:$0xff] %v10930_v47  ;;  %v7237_v49 = vpop.eup %7236  ;;  %15134 = vst [vmem:[#allocation174_spill] sm:$0xff] %v10962_v1  ;;  %v6125_v9 = vadd.f32 %v6124_v25, %v6123_v19  ;;  %v4312_v1 = vld [vmem:[%s14076_s3 + $0x50] sm:$0xff]  ;;  %v6501_v0 = vsel %vm4344_vm10, 1.0, %v14911_v62  ;;  %vm15139_vm9 = vcmp.ge.s32.totalorder %v9311_v27, 0  ;;  %vm3614_vm15 = vcmp.ne.s32.totalorder %v15142_v7, 0 }
 0x4da   :  { %4685 = vadd.xlane.f32.xlu1 %v10547_v26  ;;  %v4319_v26 = vld [vmem:[%s14076_s3 + $0x88] sm:$0xff]  ;;  %v7239_v17 = vpop.eup %7238  ;;  %vm10997_vm13 = vmand %vm15139_vm9, %vm3608_vm6  ;;  %v11006_v25 = vmul.f32 %v6510_v48, %v4321_v44  ;;  %v11008_v46 = vmul.f32 %v6514_v52, %v4325_v8  ;;  %7252 = vrcp.f32 %v1212_v41  ;;  %vm15147_vm10 = vcmp.ge.s32.totalorder %v15146_v37, 0  ;;  %v15154_v41 = vld [vmem:[#allocation140_spill] sm:$0xff]  ;;  %v11034_v8 = vpop.permute.xlu0 %3994 }
 0x4db   :  { %v10991_v2 = vpop.eup %7240  ;;  %v11004_v19 = vmul.f32 %v6508_v18, %v4319_v26  ;;  %vm11014_vm14 = vmand %vm15147_vm10, %vm3610_vm1  ;;  %vm3616_vm2 = vcmp.ne.s32.totalorder %v15150_v51, 0  ;;  %v11023_v18 = vmul.f32 %v6518_v30, %v4329_v13  ;;  %v1214_v44 = vadd.f32 1.0, %v7237_v49  ;;  %v15158_v26 = vld [vmem:[#allocation40_spill] sm:$0xff]  ;;  %v15168_v7 = vld [vmem:[#allocation145_spill] sm:$0xff] }
 0x4dc   :  { %15138 = vst [vmem:[#allocation175_spill] sm:$0xff] %v10991_v2  ;;  %15144 = vst [vmem:[#allocation84_spill] sm:$0xff] %v11006_v25  ;;  %v7243_v11 = vpop.eup %7242  ;;  %vm15155_vm0 = vcmp.ge.s32.totalorder %v15154_v41, 0  ;;  %v11036_v52 = vmul.f32 %v6501_v0, %v4312_v1  ;;  %7254 = vrcp.f32 %v1216_v43  ;;  %v1220_v30 = vadd.f32 1.0, %v7239_v17  ;;  %v15172_v13 = vld [vmem:[#allocation28_spill] sm:$0xff]  ;;  %v15196_v15 = vld [vmem:[#allocation153_spill] sm:$0xff] }
 0x4dd   :  { %4694 = vadd.xlane.f32.xlu0 %v10610_v40  ;;  %15143 = vst [vmem:[#allocation176_spill] sm:$0xff] %v11004_v19  ;;  %15145 = vst [vmem:[#allocation75_spill] sm:$0xff] %v11008_v46  ;;  %v11019_v40 = vpop.permute.xlu1 %3988  ;;  %v7245_v48 = vpop.eup %7244  ;;  %vm15161_vm10 = vcmp.ge.s32.totalorder %v15160_v21, 0  ;;  %v15166_v1 = vmov 0  ;;  %v6127_v17 = vadd.f32 %v10853_v20, %v6125_v9  ;;  %v1218_v0 = vadd.f32 1.0, %v7243_v11  ;;  %v15180_v9 = vld [vmem:[#allocation149_spill] sm:$0xff] }
 0x4de   :  { %4691 = vadd.xlane.f32.xlu1 %v10623_v54  ;;  %15151 = vst [vmem:[#allocation129_spill] sm:$0xff] %v11019_v40  ;;  %v11021_v54 = vmul.f32 %v6512_v57, %v4323_v3  ;;  %15153 = vst [vmem:[#allocation21_spill] sm:$0xff] %v11023_v18  ;;  %v7247_v3 = vpop.eup %7246  ;;  %v15164_v57 = vld [vmem:[#allocation43_spill] sm:$0xff]  ;;  %vm15173_vm9 = vcmp.lt.s32.totalorder %v15125_v55, 64  ;;  %v15177_v51 = vmov 0  ;;  %v1224_v20 = vadd.f32 1.0, %v7245_v48 }
 0x4df   :  { %vm11029_vm6 = vmand %vm15155_vm0, %vm3612_vm12  ;;  %15159 = vst [vmem:[#allocation74_spill] sm:$0xff] %v11036_v52  ;;  %vm15165_vm0 = vcmp.lt.s32.totalorder %v15121_v42, 64  ;;  %v7249_v11 = vpop.eup %7248  ;;  %7256 = vrcp.f32 %v1214_v44  ;;  %v1222_v31 = vadd.f32 1.0, %v7247_v3  ;;  %v15205_v45 = vmov 0  ;;  %v15223_v49 = vld [vmem:[#allocation160_spill] sm:$0xff]  ;;  %v15257_v36 = vld [vmem:[#allocation26_spill] sm:$0xff] }
 0x4e0   :  { %15152 = vst [vmem:[#allocation132_spill] sm:$0xff] %v11021_v54  ;;  %vm11043_vm4 = vmand %vm15161_vm10, %vm3614_vm15  ;;  %vm15169_vm15 = vcmp.ge.s32.totalorder %v15168_v7, 0  ;;  %v7251_v55 = vpop.eup %7250  ;;  %7258 = vrcp.f32 %v1220_v30  ;;  %v15214_v44 = vmov 0  ;;  %v15268_v18 = vld [vmem:[#allocation125_spill] sm:$0xff]  ;;  %v15297_v25 = vmov 0  ;;  %v15309_v19 = vld [vmem:[#allocation38_spill] sm:$0xff] }
 0x4e1   :  { %vm11052_vm1 = vmand %vm10899_vm11, %vm15165_vm0  ;;  %vm15176_vm0 = vcmp.lt.s32.totalorder %v9262_v53, 64  ;;  %4700 = vadd.xlane.f32.xlu0 %v10626_v58  ;;  %v11176_v16 = vpop.permute.xlu1 %3992  ;;  %7260 = vrcp.f32 %v1218_v0  ;;  %v11207_v0 = vpop.permute.xlu0 %3998  ;;  %v15237_v53 = vld [vmem:[#allocation192_spill] sm:$0xff]  ;;  %v15304_v58 = vld [vmem:[#allocation89_spill] sm:$0xff]  ;;  %v15339_v46 = vmov 0 }
 0x4e2   :  { %v15167_v1 = vsel %vm11052_vm1, 4294967295, %v15166_v1  ;;  %vm11061_vm10 = vmand %vm15169_vm15, %vm3616_vm2  ;;  %4697 = vadd.xlane.f32.xlu1 %v10634_v28  ;;  %vm15188_vm15 = vcmp.lt.s32.totalorder %v15135_v24, 64  ;;  %v15200_v24 = vld [vmem:[#allocation190_spill] sm:$0xff]  ;;  %15219 = vst [vmem:[#allocation14_spill] sm:$0xff] %v11176_v16  ;;  %7262 = vrcp.f32 %v1224_v20  ;;  %v15362_v42 = vld [vmem:[#allocation191_spill] sm:$0xff] }
 0x4e3   :  { %vm11070_vm11 = vmand %vm10915_vm3, %vm15173_vm9  ;;  %vm15179_vm3 = vcmp.ne.s32.totalorder %v15158_v26, 0  ;;  %vm15181_vm9 = vcmp.ge.s32.totalorder %v15180_v9, 0  ;;  %7264 = vrcp.f32 %v1222_v31  ;;  %v15243_v20 = vld [vmem:[#allocation194_spill] sm:$0xff]  ;;  %v15412_v16 = vld [vmem:[#allocation99_spill] sm:$0xff] }
 0x4e4   :  { %vm11078_vm1 = vmand %vm10936_vm5, %vm15176_vm0  ;;  %vm15185_vm0 = vcmp.lt.s32.totalorder %v15131_v38, 64  ;;  %v15192_v38 = vmov 0  ;;  %v15308_v28 = vld [vmem:[#allocation210_spill] sm:$0xff]  ;;  %v4320_v40 = vld [vmem:[%s14076_s3 + $0x90] sm:$0xff] }
 0x4e5   :  { %v15178_v51 = vsel %vm11078_vm1, 4294967295, %v15177_v51  ;;  %vm11090_vm12 = vmand %vm15181_vm9, %vm15179_vm3  ;;  %vm15191_vm3 = vcmp.lt.s32.totalorder %v9311_v27, 64  ;;  %4706 = vadd.xlane.f32.xlu0 %v10639_v5  ;;  %v15240_v5 = vmov 0  ;;  %v15250_v27 = vld [vmem:[#allocation165_spill] sm:$0xff]  ;;  %v15326_v23 = vld [vmem:[#allocation78_spill] sm:$0xff] }
 0x4e6   :  { %vm11099_vm1 = vmand %vm10957_vm7, %vm15185_vm0  ;;  %vm15194_vm0 = vcmp.gt.f32.partialorder %v10874_v56, 0.1  ;;  %4703 = vadd.xlane.f32.xlu1 %v10646_v35  ;;  %v15242_v35 = vld [vmem:[#allocation12_spill] sm:$0xff]  ;;  %v15263_v56 = vmov 0  ;;  %v15327_v31 = vld [vmem:[#allocation22_spill] sm:$0xff] }
 0x4e7   :  { %vm11107_vm2 = vmand %vm10980_vm8, %vm15188_vm15  ;;  %v11123_v22 = vsel %vm15194_vm0, 1.0, %v14911_v62  ;;  %vm15195_vm8 = vcmp.ne.s32.totalorder %v15164_v57, 0  ;;  %vm15197_vm15 = vcmp.ge.s32.totalorder %v15196_v15, 0  ;;  %vm15204_vm0 = vcmp.lt.s32.totalorder %v15154_v41, 64  ;;  %v15266_v57 = vld [vmem:[#allocation203_spill] sm:$0xff] }
 0x4e8   :  { %vm11115_vm9 = vmand %vm10997_vm13, %vm15191_vm3  ;;  %vm15201_vm3 = vcmp.lt.s32.totalorder %v15146_v37, 64  ;;  %v15209_v37 = vld [vmem:[#allocation157_spill] sm:$0xff]  ;;  %v15217_v41 = vmov 0 }
 0x4e9   :  { %v15193_v38 = vsel %vm11115_vm9, 4294967295, %v15192_v38  ;;  %vm11129_vm5 = vmand %vm15197_vm15, %vm15195_vm8  ;;  %vm15207_vm8 = vcmask 7168   ;;  %vm15208_vm15 = vcmp.ne.s32.totalorder %v15172_v13, 0  ;;  %vm15210_vm13 = vcmp.ge.s32.totalorder %v15209_v37, 0  ;;  %4712 = vadd.xlane.f32.xlu0 %v10649_v59 }
 0x4ea   :  { %vm11138_vm7 = vmand %vm11014_vm14, %vm15201_vm3  ;;  %v6128_v48 = vsel %vm15207_vm8, %v11036_v52, 0.0  ;;  %vm15213_vm3 = vcmp.lt.s32.totalorder %v15160_v21, 64  ;;  %v1228_v21 = vadd.f32 1.0, %v7249_v11  ;;  %v1226_v13 = vadd.f32 1.0, %v7251_v55  ;;  %v15233_v11 = vld [vmem:[#allocation163_spill] sm:$0xff]  ;;  %v15244_v55 = vld [vmem:[#allocation41_spill] sm:$0xff]  ;;  %4709 = vadd.xlane.f32.xlu1 %v10737_v34 }
 0x4eb   :  { %vm11146_vm9 = vmand %vm11029_vm6, %vm15204_vm0  ;;  %vm15216_vm0 = vcmp.lt.s32.totalorder %v15168_v7, 64  ;;  %v11178_v26 = vadd.f32 %v6128_v48, %v6127_v17  ;;  %v15227_v17 = vld [vmem:[#allocation19_spill] sm:$0xff]  ;;  %v15229_v7 = vmov 0  ;;  %v15284_v34 = vld [vmem:[#allocation206_spill] sm:$0xff] }
 0x4ec   :  { %v15206_v45 = vsel %vm11146_vm9, 4294967295, %v15205_v45  ;;  %vm11156_vm14 = vmand %vm15210_vm13, %vm15208_vm15  ;;  %vm15220_vm13 = vcmp.gt.f32.partialorder %v10930_v47, 0.1  ;;  %vm15224_vm15 = vcmp.ge.s32.totalorder %v15223_v49, 0  ;;  %vm15245_vm9 = vcmp.lt.s32.totalorder %v15209_v37, 64  ;;  %v15254_v48 = vld [vmem:[#allocation39_spill] sm:$0xff] }
 0x4ed   :  { %vm11164_vm6 = vmand %vm11043_vm4, %vm15213_vm3  ;;  %v11183_v3 = vsel %vm15220_vm13, 1.0, %v14911_v62  ;;  %vm15221_vm4 = vcmp.gt.f32.partialorder %v10893_v29, 0.1  ;;  %vm15228_vm13 = vcmp.lt.s32.totalorder %v15180_v9, 64  ;;  %v15255_v29 = vld [vmem:[#allocation196_spill] sm:$0xff]  ;;  %v15256_v37 = vld [vmem:[#allocation198_spill] sm:$0xff]  ;;  %7266 = vrcp.f32 %v1228_v21  ;;  %4718 = vadd.xlane.f32.xlu0 %v10740_v4 }
 0x4ee   :  { %v15215_v44 = vsel %vm11164_vm6, 4294967295, %v15214_v44  ;;  %vm11172_vm8 = vmand %vm11061_vm10, %vm15216_vm0  ;;  %v11188_v30 = vsel %vm15221_vm4, 1.0, %v14911_v62  ;;  %vm15222_vm10 = vcmp.ne.s32.totalorder %v15184_v60, 0  ;;  %vm15231_vm4 = vcmp.gt.f32.partialorder %v10991_v2, 0.1  ;;  %v15238_v60 = vld [vmem:[#allocation35_spill] sm:$0xff]  ;;  %4715 = vadd.xlane.f32.xlu1 %v10743_v63 }
 0x4ef   :  { %v15218_v41 = vsel %vm11172_vm8, 4294967295, %v15217_v41  ;;  %vm11194_vm3 = vmand %vm15224_vm15, %vm15222_vm10  ;;  %v6503_v43 = vsel %vm15231_vm4, 1.0, %v14911_v62  ;;  %vm15232_vm10 = vcmp.ne.s32.totalorder %v15200_v24, 0  ;;  %vm15234_vm15 = vcmp.ge.s32.totalorder %v15233_v11, 0  ;;  %v4314_v47 = vld [vmem:[%s14076_s3 + $0x60] sm:$0xff]  ;;  %v15272_v21 = vld [vmem:[#allocation27_spill] sm:$0xff] }
 0x4f0   :  { %vm11203_vm8 = vmand %vm11090_vm12, %vm15228_vm13  ;;  %v15246_v24 = vmov 0  ;;  %7268 = vrcp.f32 %v1226_v13  ;;  %v15286_v13 = vld [vmem:[#allocation87_spill] sm:$0xff]  ;;  %v15290_v9 = vld [vmem:[#allocation208_spill] sm:$0xff]  ;;  %v15315_v2 = vmov 0 }
 0x4f1   :  { %v15230_v7 = vsel %vm11203_vm8, 4294967295, %v15229_v7  ;;  %vm11218_vm12 = vmand %vm15234_vm15, %vm15232_vm10  ;;  %vm15239_vm8 = vcmp.lt.s32.totalorder %v15196_v15, 64  ;;  %v11243_v15 = vpop.eup %7252  ;;  %vm15269_vm10 = vcmp.ge.s32.totalorder %v15268_v18, 0  ;;  %v15357_v4 = vld [vmem:[#allocation97_spill] sm:$0xff]  ;;  %4724 = vadd.xlane.f32.xlu0 %v10840_v14  ;;  %v15576_v14 = vmov 0 }
 0x4f2   :  { %vm11228_vm6 = vmand %vm11129_vm5, %vm15239_vm8  ;;  %15248 = vst [vmem:[#allocation140_spill] sm:$0xff] %v11243_v15  ;;  %vm15249_vm5 = vcmp.ne.s32.totalorder %v15227_v17, 0  ;;  %vm15251_vm8 = vcmp.ge.s32.totalorder %v15250_v27, 0  ;;  %v15259_v17 = vmov 0  ;;  %v11303_v54 = vpop.eup %7254  ;;  %4721 = vadd.xlane.f32.xlu1 %v10746_v32  ;;  %v15425_v32 = vld [vmem:[#allocation109_spill] sm:$0xff] }
 0x4f3   :  { %v15241_v5 = vsel %vm11228_vm6, 4294967295, %v15240_v5  ;;  %vm11239_vm0 = vmand %vm11156_vm14, %vm15245_vm9  ;;  %vm15258_vm14 = vcmp.lt.s32.totalorder %v15223_v49, 64  ;;  %v15265_v49 = vld [vmem:[#allocation201_spill] sm:$0xff]  ;;  %vm15273_vm6 = vcmp.lt.s32.totalorder %v15233_v11, 64  ;;  %15276 = vst [vmem:[#allocation40_spill] sm:$0xff] %v11303_v54  ;;  %vm15287_vm9 = vcmp.ge.s32.totalorder %v15286_v13, 0 }
 0x4f4   :  { %v15247_v24 = vsel %vm11239_vm0, 4294967295, %v15246_v24  ;;  %vm11249_vm13 = vmand %vm15251_vm8, %vm15249_vm5  ;;  %vm15261_vm5 = vcmp.ne.s32.totalorder %v15237_v53, 0  ;;  %vm15262_vm8 = vnez %v15167_v1  ;;  %v4327_v53 = vld [vmem:[%s14076_s3 + $0xc8] sm:$0xff]  ;;  %v15429_v1 = vld [vmem:[#allocation197_spill] sm:$0xff] }
 0x4f5   :  { %vm11261_vm0 = vmand %vm11194_vm3, %vm15258_vm14  ;;  %vm15267_vm14 = vcmp.ne.s32.totalorder %v15238_v60, 0  ;;  %v4333_v60 = vld [vmem:[%s14076_s3 + $0xf8] sm:$0xff]  ;;  %vm15285_vm3 = vcmp.ne.s32.totalorder %v15244_v55, 0  ;;  %v15294_v55 = vmov 0 }
 0x4f6   :  { %v15260_v17 = vsel %vm11261_vm0, 4294967295, %v15259_v17  ;;  %vm11272_vm4 = vmand %vm15262_vm8, %vm15261_vm5  ;;  %vm15281_vm8 = vnez %v15178_v51  ;;  %v4331_v51 = vld [vmem:[%s14076_s3 + $0xe8] sm:$0xff] }
 0x4f7   :  { %v15264_v56 = vsel %vm11272_vm4, 4294967295, %v15263_v56  ;;  %vm11282_vm15 = vmand %vm15269_vm10, %vm15267_vm14  ;;  %vm15280_vm10 = vcmp.ne.s32.totalorder %v15243_v20, 0  ;;  %v11332_v20 = vpop.permute.xlu1 %3996 }
 0x4f8   :  { %vm11291_vm5 = vmand %vm11218_vm12, %vm15273_vm6  ;;  %vm15277_vm6 = vcmp.ne.s32.totalorder %v15242_v35, 0  ;;  %v15291_v35 = vld [vmem:[#allocation31_spill] sm:$0xff]  ;;  %15292 = vst [vmem:[#allocation142_spill] sm:$0xff] %v11332_v20  ;;  %v15411_v20 = vld [vmem:[#allocation88_spill] sm:$0xff] }
 0x4f9   :  { %vm11309_vm12 = vmand %vm11070_vm11, %vm15277_vm6  ;;  %vm15299_vm6 = vcmp.ne.s32.totalorder %v15256_v37, 0  ;;  %vm15300_vm11 = vnez %v15193_v38  ;;  %v15311_v38 = vmov 0  ;;  %v11379_v37 = vpop.permute.xlu0 %4002 }
 0x4fa   :  { %vm11317_vm14 = vmand %vm15281_vm8, %vm15280_vm10  ;;  %vm15293_vm10 = vcmp.ne.s32.totalorder %v15254_v48, 0  ;;  %v15301_v48 = vmov 0 }
 0x4fb   :  { %vm11326_vm4 = vmand %vm15287_vm9, %vm15285_vm3  ;;  %vm15296_vm9 = vcmp.ne.s32.totalorder %v15255_v29, 0  ;;  %v15377_v29 = vld [vmem:[#allocation83_spill] sm:$0xff] }
 0x4fc   :  { %vm11341_vm8 = vmand %vm11099_vm1, %vm15293_vm10  ;;  %vm15303_vm1 = vcmp.ne.s32.totalorder %v15257_v36, 0  ;;  %vm15305_vm10 = vcmp.ge.s32.totalorder %v15304_v58, 0  ;;  %v11381_v36 = vmul.f32 %v6503_v43, %v4314_v47  ;;  %v15322_v47 = vld [vmem:[#allocation92_spill] sm:$0xff]  ;;  %v15389_v43 = vld [vmem:[#allocation103_spill] sm:$0xff] }
 0x4fd   :  { %v15295_v55 = vsel %vm11341_vm8, 4294967295, %v15294_v55  ;;  %vm11349_vm3 = vmand %vm11107_vm2, %vm15296_vm9  ;;  %vm15317_vm9 = vcmp.ne.s32.totalorder %v15266_v57, 0  ;;  %vm15321_vm2 = vcmp.ne.s32.totalorder %v15272_v21, 0  ;;  %v11422_v57 = vmul.f32 %v11188_v30, %v4333_v60  ;;  %v11424_v21 = vpop.eup %7256  ;;  %v15406_v30 = vld [vmem:[#allocation106_spill] sm:$0xff] }
 0x4fe   :  { %v15298_v25 = vsel %vm11349_vm3, 4294967295, %v15297_v25  ;;  %vm11357_vm0 = vmand %vm15300_vm11, %vm15299_vm6  ;;  %vm15310_vm3 = vcmp.lt.s32.totalorder %v15250_v27, 64  ;;  %15313 = vst [vmem:[#allocation43_spill] sm:$0xff] %v11381_v36  ;;  %v15319_v27 = vmov 0  ;;  %vm15323_vm6 = vcmp.ge.s32.totalorder %v15322_v47, 0 }
 0x4ff   :  { %v15302_v48 = vsel %vm11357_vm0, 4294967295, %v15301_v48  ;;  %vm11365_vm8 = vmand %vm15305_vm10, %vm15303_vm1  ;;  %vm15314_vm1 = vcmp.ne.s32.totalorder %v15265_v49, 0  ;;  %v11419_v49 = vmul.f32 %v11123_v22, %v4327_v53  ;;  %15332 = vst [vmem:[#allocation28_spill] sm:$0xff] %v11422_v57  ;;  %v15342_v22 = vld [vmem:[#allocation94_spill] sm:$0xff]  ;;  %v11464_v60 = vmul.f32 %v11183_v3, %v4331_v51 }
 0x500   :  { %vm11375_vm11 = vmand %vm11249_vm13, %vm15310_vm3  ;;  %vm15318_vm13 = vnez %v15206_v45  ;;  %v15329_v45 = vmov 0  ;;  %v15347_v53 = vld [vmem:[#allocation34_spill] sm:$0xff]  ;;  %v15369_v51 = vmov 0 }
 0x501   :  { %v15312_v38 = vsel %vm11375_vm11, 4294967295, %v15311_v38  ;;  %vm11388_vm10 = vmand %vm11138_vm7, %vm15314_vm1  ;;  %15331 = vst [vmem:[#allocation145_spill] sm:$0xff] %v11419_v49  ;;  %vm15341_vm7 = vcmp.ne.s32.totalorder %v15291_v35, 0  ;;  %v15361_v3 = vld [vmem:[#allocation82_spill] sm:$0xff]  ;;  %vm15379_vm11 = vcmp.lt.s32.totalorder %v15322_v47, 64  ;;  %v15386_v47 = vmov 0 }
 0x502   :  { %v15316_v2 = vsel %vm11388_vm10, 4294967295, %v15315_v2  ;;  %vm11396_vm3 = vmand %vm15318_vm13, %vm15317_vm9  ;;  %vm15328_vm10 = vcmp.lt.s32.totalorder %v15268_v18, 64  ;;  %v15335_v18 = vmov 0  ;;  %15351 = vst [vmem:[#allocation149_spill] sm:$0xff] %v11464_v60  ;;  %v15393_v49 = vld [vmem:[#allocation86_spill] sm:$0xff]  ;;  %v15454_v60 = vmov 0 }
 0x503   :  { %v15320_v27 = vsel %vm11396_vm3, 4294967295, %v15319_v27  ;;  %vm11404_vm0 = vmand %vm15323_vm6, %vm15321_vm2  ;;  %vm15333_vm2 = vcmp.ne.s32.totalorder %v15284_v34, 0  ;;  %vm15334_vm6 = vnez %v15215_v44  ;;  %v15346_v44 = vld [vmem:[#allocation80_spill] sm:$0xff]  ;;  %v11466_v34 = vpop.eup %7258 }
 0x504   :  { %vm11414_vm9 = vmand %vm11282_vm15, %vm15328_vm10  ;;  %vm15337_vm15 = vcmp.ne.s32.totalorder %v15290_v9, 0  ;;  %vm15338_vm10 = vnez %v15218_v41  ;;  %v15349_v41 = vmov 0  ;;  %v11499_v35 = vpop.eup %7260 }
 0x505   :  { %v15330_v45 = vsel %vm11414_vm9, 4294967295, %v15329_v45  ;;  %vm11430_vm13 = vmand %vm15334_vm6, %vm15333_vm2  ;;  %vm15343_vm9 = vcmp.ge.s32.totalorder %v15342_v22, 0  ;;  %v11533_v57 = vpop.eup %7262 }
 0x506   :  { %v15336_v18 = vsel %vm11430_vm13, 4294967295, %v15335_v18  ;;  %vm11438_vm1 = vmand %vm15338_vm10, %vm15337_vm15  ;;  %vm15348_vm13 = vcmp.lt.s32.totalorder %v15286_v13, 64  ;;  %vm15353_vm10 = vnez %v15230_v7  ;;  %v15354_v13 = vmov 0  ;;  %15383 = vst [vmem:[#allocation32_spill] sm:$0xff] %v11533_v57  ;;  %v11567_v52 = vpop.eup %7264 }
 0x507   :  { %v15340_v46 = vsel %vm11438_vm1, 4294967295, %v15339_v46  ;;  %vm11446_vm3 = vmand %vm15343_vm9, %vm15341_vm7  ;;  %vm15352_vm9 = vcmp.ne.s32.totalorder %v15308_v28, 0  ;;  %v15364_v7 = vmov 0  ;;  %v15378_v28 = vld [vmem:[#allocation15_spill] sm:$0xff] }
 0x508   :  { %vm11456_vm15 = vmand %vm11326_vm4, %vm15348_vm13  ;;  %vm15356_vm4 = vcmp.ne.s32.totalorder %v15309_v19, 0  ;;  %vm15358_vm13 = vcmp.ge.s32.totalorder %v15357_v4, 0  ;;  %v6131_v19 = vadd.f32 %v10844_v12, %v11178_v26  ;;  %v15376_v26 = vld [vmem:[#allocation85_spill] sm:$0xff]  ;;  %v15452_v12 = vld [vmem:[#allocation112_spill] sm:$0xff] }
 0x509   :  { %v15350_v41 = vsel %vm11456_vm15, 4294967295, %v15349_v41  ;;  %vm11472_vm6 = vmand %vm15353_vm10, %vm15352_vm9  ;;  %vm15363_vm15 = vcmp.lt.s32.totalorder %v15304_v58, 64  ;;  %vm15366_vm10 = vcmp.gt.f32.partialorder %v11243_v15, 0.1  ;;  %v15372_v58 = vld [vmem:[#allocation101_spill] sm:$0xff]  ;;  %v15394_v15 = vld [vmem:[#allocation71_spill] sm:$0xff] }
 0x50a   :  { %v15355_v13 = vsel %vm11472_vm6, 4294967295, %v15354_v13  ;;  %vm11480_vm2 = vmand %vm15358_vm13, %vm15356_vm4  ;;  %v6505_v9 = vsel %vm15366_vm10, 1.0, %v14911_v62  ;;  %vm15367_vm4 = vcmp.ne.s32.totalorder %v15326_v23, 0  ;;  %vm15368_vm13 = vnez %v15241_v5 }
 0x50b   :  { %vm11490_vm9 = vmand %vm11365_vm8, %vm15363_vm15  ;;  %vm15371_vm8 = vcmp.ne.s32.totalorder %v15327_v31, 0  ;;  %vm15373_vm15 = vcmp.ge.s32.totalorder %v15372_v58, 0  ;;  %v15380_v5 = vmov 0  ;;  %v4316_v31 = vld [vmem:[%s14076_s3 + $0x70] sm:$0xff]  ;;  %vm15426_vm10 = vcmp.ge.s32.totalorder %v15425_v32, 0 }
 0x50c   :  { %v15365_v7 = vsel %vm11490_vm9, 4294967295, %v15364_v7  ;;  %vm11505_vm1 = vmand %vm15368_vm13, %vm15367_vm4  ;;  %vm15382_vm13 = vcmask 7168  }
 0x50d   :  { %v15370_v51 = vsel %vm11505_vm1, 4294967295, %v15369_v51  ;;  %vm11513_vm7 = vmand %vm15373_vm15, %vm15371_vm8  ;;  %v6132_v23 = vsel %vm15382_vm13, %v11381_v36, 0.0  ;;  %vm15384_vm8 = vcmp.ne.s32.totalorder %v15346_v44, 0  ;;  %vm15385_vm15 = vnez %v15247_v24  ;;  %v15395_v36 = vld [vmem:[#allocation93_spill] sm:$0xff]  ;;  %v11562_v44 = vpop.permute.xlu1 %4000 }
 0x50e   :  { %vm11524_vm4 = vmand %vm11404_vm0, %vm15379_vm11  ;;  %vm15388_vm0 = vcmp.ne.s32.totalorder %v15347_v53, 0  ;;  %vm15390_vm11 = vcmp.ge.s32.totalorder %v15389_v43, 0  ;;  %v15397_v24 = vmov 0  ;;  %15399 = vst [vmem:[#allocation153_spill] sm:$0xff] %v11562_v44  ;;  %v11670_v11 = vadd.f32 %v6132_v23, %v6131_v19  ;;  %v15510_v19 = vld [vmem:[#allocation205_spill] sm:$0xff] }
 0x50f   :  { %v15381_v5 = vsel %vm11524_vm4, 4294967295, %v15380_v5  ;;  %vm11539_vm9 = vmand %vm15385_vm15, %vm15384_vm8  ;;  %vm15396_vm4 = vcmp.lt.s32.totalorder %v15342_v22, 64  ;;  %vm15400_vm15 = vcmp.gt.f32.partialorder %v11303_v54, 0.1  ;;  %v15403_v22 = vmov 0  ;;  %v15410_v54 = vld [vmem:[#allocation20_spill] sm:$0xff] }
 0x510   :  { %v15387_v47 = vsel %vm11539_vm9, 4294967295, %v15386_v47  ;;  %vm11547_vm6 = vmand %vm15390_vm11, %vm15388_vm0  ;;  %v6509_v53 = vsel %vm15400_vm15, 1.0, %v14911_v62  ;;  %vm15401_vm0 = vcmp.ne.s32.totalorder %v15361_v3, 0  ;;  %vm15402_vm11 = vnez %v15260_v17  ;;  %v15413_v3 = vld [vmem:[#allocation108_spill] sm:$0xff]  ;;  %15445 = vst [vmem:[#allocation160_spill] sm:$0xff] %v11670_v11 }
 0x511   :  { %vm11558_vm8 = vmand %vm11446_vm3, %vm15396_vm4  ;;  %vm15405_vm3 = vcmp.ne.s32.totalorder %v15362_v42, 0  ;;  %vm15407_vm4 = vcmp.ge.s32.totalorder %v15406_v30, 0  ;;  %v11597_v42 = vpop.permute.xlu0 %4006  ;;  %vm15424_vm9 = vcmp.ne.s32.totalorder %v15378_v28, 0  ;;  %v15436_v28 = vmov 0 }
 0x512   :  { %v15398_v24 = vsel %vm11558_vm8, 4294967295, %v15397_v24  ;;  %vm11573_vm13 = vmand %vm15402_vm11, %vm15401_vm0  ;;  %vm15414_vm0 = vcmp.lt.s32.totalorder %v15357_v4, 64  ;;  %v15418_v4 = vmov 0  ;;  %v15528_v44 = vmov 0 }
 0x513   :  { %v15404_v22 = vsel %vm11573_vm13, 4294967295, %v15403_v22  ;;  %vm11581_vm1 = vmand %vm15407_vm4, %vm15405_vm3  ;;  %vm15417_vm3 = vcmp.ne.s32.totalorder %v15376_v26, 0  ;;  %vm15430_vm13 = vcmp.lt.s32.totalorder %v15372_v58, 64  ;;  %v11639_v26 = vmul.f32 %v6505_v9, %v4316_v31  ;;  %v15441_v9 = vld [vmem:[#allocation199_spill] sm:$0xff]  ;;  %v4322_v31 = vld [vmem:[%s14076_s3 + $0xa0] sm:$0xff] }
 0x514   :  { %vm11593_vm11 = vmand %vm11480_vm2, %vm15414_vm0  ;;  %vm15420_vm2 = vcmp.ne.s32.totalorder %v15377_v29, 0  ;;  %vm15421_vm0 = vnez %v15264_v56  ;;  %v11641_v29 = vpop.eup %7266  ;;  %v15439_v58 = vmov 0 }
 0x515   :  { %vm11608_vm4 = vmand %vm11291_vm5, %vm15417_vm3  ;;  %15433 = vst [vmem:[#allocation190_spill] sm:$0xff] %v11639_v26  ;;  %vm15442_vm5 = vcmp.lt.s32.totalorder %v15389_v43, 64  ;;  %v11672_v59 = vpop.eup %7268  ;;  %vm15451_vm3 = vcmp.ne.s32.totalorder %v15410_v54, 0  ;;  %v15462_v54 = vmov 0  ;;  %v4011_v23 = vpop.permute.xlu0 %4010  ;;  %v15524_v43 = vmov 0 }
 0x516   :  { %v15419_v4 = vsel %vm11608_vm4, 4294967295, %v15418_v4  ;;  %vm11616_vm8 = vmand %vm15421_vm0, %vm15420_vm2  ;;  %15434 = vst [vmem:[#allocation157_spill] sm:$0xff] %v11641_v29  ;;  %vm15438_vm0 = vcmp.ne.s32.totalorder %v15395_v36, 0  ;;  %vm15453_vm4 = vcmp.ge.s32.totalorder %v15452_v12, 0  ;;  %v15578_v36 = vld [vmem:[#allocation158_spill] sm:$0xff] }
 0x517   :  { %vm11624_vm15 = vmand %vm15426_vm10, %vm15424_vm9  ;;  %vm15435_vm9 = vcmp.ne.s32.totalorder %v15394_v15, 0  ;;  %15446 = vst [vmem:[#allocation19_spill] sm:$0xff] %v11672_v59  ;;  %v15563_v15 = vmov 0 }
 0x518   :  { %vm11635_vm2 = vmand %vm11513_vm7, %vm15430_vm13  ;;  %vm15457_vm13 = vnez %v15295_v55  ;;  %v15468_v55 = vld [vmem:[#allocation200_spill] sm:$0xff] }
 0x519   :  { %vm11647_vm10 = vmand %vm11309_vm12, %vm15435_vm9  ;;  %vm15448_vm9 = vnez %v15312_v38  ;;  %v15479_v38 = vmov 0 }
 0x51a   :  { %v15437_v28 = vsel %vm11647_vm10, 4294967295, %v15436_v28  ;;  %vm11655_vm7 = vmand %vm11317_vm14, %vm15438_vm0  ;;  %vm15447_vm14 = vcmp.ne.s32.totalorder %v15393_v49, 0  ;;  %v15458_v49 = vmov 0 }
 0x51b   :  { %v15440_v58 = vsel %vm11655_vm7, 4294967295, %v15439_v58  ;;  %vm11666_vm12 = vmand %vm11547_vm6, %vm15442_vm5  ;;  %vm15456_vm5 = vcmp.ne.s32.totalorder %v15411_v20, 0  ;;  %v15466_v20 = vmov 0 }
 0x51c   :  { %vm11678_vm0 = vmand %vm15448_vm9, %vm15447_vm14  ;;  %vm15460_vm14 = vcmp.ne.s32.totalorder %v15412_v16, 0  ;;  %vm15461_vm9 = vnez %v15298_v25  ;;  %v11725_v16 = vmul.f32 %v6509_v53, %v4320_v40  ;;  %v15491_v40 = vmov 0  ;;  %v15530_v53 = vld [vmem:[#allocation209_spill] sm:$0xff] }
 0x51d   :  { %vm11686_vm6 = vmand %vm15453_vm4, %vm15451_vm3  ;;  %vm15464_vm4 = vcmp.ne.s32.totalorder %v15413_v3, 0  ;;  %vm15465_vm3 = vnez %v15302_v48  ;;  %v15475_v48 = vmov 0 }
 0x51e   :  { %v15455_v60 = vsel %vm11686_vm6, 4294967295, %v15454_v60  ;;  %vm11694_vm7 = vmand %vm15457_vm13, %vm15456_vm5  ;;  %15472 = vst [vmem:[#allocation163_spill] sm:$0xff] %v11725_v16  ;;  %vm15477_vm5 = vcmp.ne.s32.totalorder %v10770_v6, 0  ;;  %vm15478_vm13 = vnez %v15320_v27  ;;  %v15487_v6 = vmov 0 }
 0x51f   :  { %v15459_v49 = vsel %vm11694_vm7, 4294967295, %v15458_v49  ;;  %vm11702_vm10 = vmand %vm15461_vm9, %vm15460_vm14  ;;  %vm15469_vm7 = vcmp.lt.s32.totalorder %v15406_v30, 64  ;;  %vm15482_vm9 = vnez %v15330_v45  ;;  %v15495_v27 = vmov 0  ;;  %v15501_v45 = vld [vmem:[#allocation204_spill] sm:$0xff] }
 0x520   :  { %v15463_v54 = vsel %vm11702_vm10, 4294967295, %v15462_v54  ;;  %vm11710_vm6 = vmand %vm15465_vm3, %vm15464_vm4  ;;  %vm15473_vm4 = vcmp.ne.s32.totalorder %v10722_v10, 0  ;;  %vm15474_vm3 = vnez %v15316_v2  ;;  %v15483_v10 = vmov 0  ;;  %v15485_v2 = vld [vmem:[#allocation202_spill] sm:$0xff] }
 0x521   :  { %v15467_v20 = vsel %vm11710_vm6, 4294967295, %v15466_v20  ;;  %vm11720_vm14 = vmand %vm11581_vm1, %vm15469_vm7  ;;  %vm15481_vm7 = vcmp.ne.s32.totalorder %v15429_v1, 0  ;;  %v15541_v1 = vld [vmem:[#allocation77_spill] sm:$0xff] }
 0x522   :  { %vm11731_vm6 = vmand %vm15474_vm3, %vm15473_vm4  ;;  %vm15493_vm3 = vcmp.ne.s32.totalorder %v15441_v9, 0  ;;  %vm15494_vm4 = vnez %v15350_v41  ;;  %v4318_v41 = vld [vmem:[%s14076_s3 + $0x80] sm:$0xff] }
 0x523   :  { %v15476_v48 = vsel %vm11731_vm6, 4294967295, %v15475_v48  ;;  %vm11739_vm1 = vmand %vm15478_vm13, %vm15477_vm5  ;;  %vm15486_vm6 = vcmp.lt.s32.totalorder %v15425_v32, 64  ;;  %vm15498_vm5 = vnez %v15340_v46  ;;  %v4330_v9 = vld [vmem:[%s14076_s3 + $0xe0] sm:$0xff] }
 0x524   :  { %v15480_v38 = vsel %vm11739_vm1, 4294967295, %v15479_v38  ;;  %vm11747_vm10 = vmand %vm15482_vm9, %vm15481_vm7  ;;  %vm15489_vm9 = vcmp.ne.s32.totalorder %v10810_v61, 0  ;;  %vm15490_vm7 = vnez %v15336_v18  ;;  %v15499_v61 = vmov 0  ;;  %v11789_v18 = vpop.permute.xlu1 %4004 }
 0x525   :  { %v15484_v10 = vsel %vm11747_vm10, 4294967295, %v15483_v10  ;;  %vm11757_vm13 = vmand %vm11624_vm15, %vm15486_vm6  ;;  %vm15497_vm6 = vcmp.ne.s32.totalorder %v10863_v33, 0  ;;  %v15504_v33 = vmov 0 }
 0x526   :  { %v15488_v6 = vsel %vm11757_vm13, 4294967295, %v15487_v6  ;;  %vm11767_vm10 = vmand %vm15490_vm7, %vm15489_vm9  ;;  %vm15506_vm7 = vcmp.ne.s32.totalorder %v10920_v39, 0  ;;  %vm15507_vm9 = vnez %v15355_v13  ;;  %v15517_v13 = vmov 0 }
 0x527   :  { %v15492_v40 = vsel %vm11767_vm10, 4294967295, %v15491_v40  ;;  %vm11775_vm15 = vmand %vm15494_vm4, %vm15493_vm3  ;;  %vm15502_vm10 = vcmp.ne.s32.totalorder %v15468_v55, 0  ;;  %vm15520_vm3 = vcmp.gt.f32.partialorder %v11424_v21, 0.1  ;;  %v15652_v55 = vld [vmem:[#allocation30_spill] sm:$0xff] }
 0x528   :  { %v15496_v27 = vsel %vm11775_vm15, 4294967295, %v15495_v27  ;;  %vm11783_vm1 = vmand %vm15498_vm5, %vm15497_vm6  ;;  %vm15503_vm5 = vnez %v15365_v7  ;;  %v15519_v7 = vld [vmem:[#allocation207_spill] sm:$0xff]  ;;  %v11938_v56 = vpop.permute.xlu1 %4008 }
 0x529   :  { %v15500_v61 = vsel %vm11783_vm1, 4294967295, %v15499_v61  ;;  %vm11800_vm6 = vmand %vm15503_vm5, %vm15502_vm10  ;;  %vm15511_vm5 = vcmp.ne.s32.totalorder %v15485_v2, 0  ;;  %vm15527_vm10 = vnez %v15387_v47  ;;  %v4328_v47 = vld [vmem:[%s14076_s3 + $0xd0] sm:$0xff] }
 0x52a   :  { %v15505_v33 = vsel %vm11800_vm6, 4294967295, %v15504_v33  ;;  %vm11808_vm1 = vmand %vm15507_vm9, %vm15506_vm7  ;;  %vm15512_vm6 = vnez %v15381_v5  ;;  %vm15515_vm9 = vcmp.ne.s32.totalorder %v11034_v8, 0  ;;  %vm15516_vm7 = vnez %v15370_v51  ;;  %v4324_v8 = vld [vmem:[%s14076_s3 + $0xb0] sm:$0xff] }
 0x52b   :  { %vm11820_vm13 = vmand %vm15512_vm6, %vm15511_vm5  ;;  %v6507_v5 = vsel %vm15520_vm3, 1.0, %v14911_v62  ;;  %vm15521_vm6 = vcmp.gt.f32.partialorder %v11466_v34, 0.1  ;;  %vm15522_vm5 = vcmp.ne.s32.totalorder %v15501_v45, 0  ;;  %vm15526_vm3 = vcmp.ne.s32.totalorder %v11207_v0, 0  ;;  %v15551_v45 = vld [vmem:[#allocation118_spill] sm:$0xff] }
 0x52c   :  { %vm11828_vm4 = vmand %vm15516_vm7, %vm15515_vm9  ;;  %v6513_v51 = vsel %vm15521_vm6, 1.0, %v14911_v62  ;;  %vm15523_vm9 = vnez %v15398_v24  ;;  %vm15531_vm6 = vcmp.gt.f32.partialorder %v11499_v35, 0.1  ;;  %v4326_v24 = vld [vmem:[%s14076_s3 + $0xc0] sm:$0xff]  ;;  %v11925_v11 = vmul.f32 %v6507_v5, %v4318_v41 }
 0x52d   :  { %v15518_v13 = vsel %vm11828_vm4, 4294967295, %v15517_v13  ;;  %vm11850_vm7 = vmand %vm15523_vm9, %vm15522_vm5  ;;  %v6511_v30 = vsel %vm15531_vm6, 1.0, %v14911_v62  ;;  %vm15532_vm5 = vcmp.gt.f32.partialorder %v11567_v52, 0.1  ;;  %vm15534_vm9 = vcmp.ne.s32.totalorder %v15510_v19, 0  ;;  %v15552_v19 = vld [vmem:[#allocation151_spill] sm:$0xff] }
 0x52e   :  { %v15525_v43 = vsel %vm11850_vm7, 4294967295, %v15524_v43  ;;  %vm11858_vm15 = vmand %vm15527_vm10, %vm15526_vm3  ;;  %v6515_v0 = vsel %vm15532_vm5, 1.0, %v14911_v62  ;;  %vm15533_vm10 = vcmp.gt.f32.partialorder %v11533_v57, 0.1  ;;  %vm15537_vm6 = vcmp.ne.s32.totalorder %v11379_v37, 0  ;;  %v4332_v37 = vld [vmem:[%s14076_s3 + $0xf0] sm:$0xff] }
 0x52f   :  { %v15529_v44 = vsel %vm11858_vm15, 4294967295, %v15528_v44  ;;  %v6517_v3 = vsel %vm15533_vm10, 1.0, %v14911_v62  ;;  %vm11882_vm3 = vmand %vm11593_vm11, %vm15534_vm9  ;;  %vm15538_vm5 = vnez %v15404_v22  ;;  %vm15542_vm11 = vcmp.gt.f32.partialorder %v11672_v59, 0.1  ;;  %15553 = vst [vmem:[#allocation192_spill] sm:$0xff] %v11925_v11  ;;  %v15565_v5 = vld [vmem:[#allocation73_spill] sm:$0xff] }
 0x530   :  { %vm11890_vm4 = vmand %vm15538_vm5, %vm15537_vm6  ;;  %v6519_v17 = vsel %vm15542_vm11, 1.0, %v14911_v62  ;;  %vm15543_vm10 = vcmp.gt.f32.partialorder %v11641_v29, 0.1  ;;  %vm15544_vm9 = vcmp.ne.s32.totalorder %v15519_v7, 0  ;;  %vm15547_vm5 = vcmp.ne.s32.totalorder %v11597_v42, 0  ;;  %v4176_v29 = vpop.xlane.xlu0 %4175  ;;  %v15632_v42 = vld [vmem:[#allocation14_spill] sm:$0xff] }
 0x531   :  { %v6521_v22 = vsel %vm15543_vm10, 1.0, %v14911_v62  ;;  %vm11911_vm6 = vmand %vm11635_vm2, %vm15544_vm9  ;;  %vm15548_vm11 = vnez %v15419_v4  ;;  %vm3841_vm7 = vcmp.ne.s32.totalorder %v15551_v45, 0  ;;  %v11927_v7 = vmul.f32 %v6513_v51, %v4324_v8  ;;  %v15558_v4 = vld [vmem:[#allocation130_spill] sm:$0xff]  ;;  %v15621_v45 = vld [vmem:[#allocation129_spill] sm:$0xff]  ;;  %s7309_s3 = smov 1  }
 0x532   :  { %vm11919_vm15 = vmand %vm15548_vm11, %vm15547_vm5  ;;  %vm15555_vm2 = vcmp.ne.s32.totalorder %v15530_v53, 0  ;;  %v11940_v59 = vmul.f32 %v6511_v30, %v4322_v31  ;;  %v11942_v57 = vmul.f32 %v6515_v0, %v4326_v24  ;;  %v11944_v41 = vmul.f32 %v6517_v3, %v4328_v47  ;;  %v15604_v24 = vld [vmem:[#allocation120_spill] sm:$0xff]  ;;  %v15610_v47 = vld [vmem:[#allocation154_spill] sm:$0xff] }
 0x533   :  { %15554 = vst [vmem:[#allocation35_spill] sm:$0xff] %v11927_v7  ;;  %vm11933_vm9 = vmand %vm11666_vm12, %vm15555_vm2  ;;  %vm15562_vm11 = vcmp.ne.s32.totalorder %v15541_v1, 0  ;;  %v6459_v8 = vsel %vm11616_vm8, 1.0, %v14911_v62  ;;  %v11958_v31 = vmul.f32 %v6519_v17, %v4330_v9  ;;  %vm15567_vm2 = vcmp.ne.s32.totalorder %v4011_v23, 0  ;;  %v15611_v3 = vld [vmem:[#allocation136_spill] sm:$0xff] }
 0x534   :  { %15559 = vst [vmem:[#allocation12_spill] sm:$0xff] %v11940_v59  ;;  %15560 = vst [vmem:[#allocation194_spill] sm:$0xff] %v11942_v57  ;;  %v11967_v25 = vmul.f32 %v6521_v22, %v4332_v37  ;;  %v15572_v53 = vmov 0  ;;  %vm15574_vm8 = vcmp.ne.s32.totalorder %v15552_v19, 0  ;;  %vm15575_vm12 = vnez %v15484_v10  ;;  %v15617_v17 = vld [vmem:[#allocation172_spill] sm:$0xff]  ;;  %v15618_v22 = vld [vmem:[#allocation29_spill] sm:$0xff] }
 0x535   :  { %15561 = vst [vmem:[#allocation41_spill] sm:$0xff] %v11944_v41  ;;  %vm11950_vm10 = vmand %vm11720_vm14, %vm15562_vm11  ;;  %vm15571_vm14 = vnez %v15488_v6  ;;  %v4270_v23 = vmul.f32 %v6459_v8, %v4176_v29  ;;  %v15583_v10 = vmov 0  ;;  %v12070_v39 = vsel %vm11808_vm1, 1.0, %v14911_v62  ;;  %v15625_v19 = vld [vmem:[#allocation111_spill] sm:$0xff]  ;;  %v15648_v0 = vld [vmem:[#allocation100_spill] sm:$0xff] }
 0x536   :  { %v15564_v15 = vsel %vm11950_vm10, 4294967295, %v15563_v15  ;;  %15566 = vst [vmem:[#allocation165_spill] sm:$0xff] %v11958_v31  ;;  %vm11963_vm5 = vmand %vm11678_vm0, %vm15567_vm2  ;;  %vm15579_vm2 = vnez %v15437_v28  ;;  %vm15586_vm0 = vnez %v15496_v27  ;;  %vm15613_vm1 = vnez %v15529_v44 }
 0x537   :  { %15570 = vst [vmem:[#allocation39_spill] sm:$0xff] %v11967_v25  ;;  %vm11973_vm11 = vmand %vm15571_vm14, %vm3841_vm7  ;;  %v6461_v30 = vsel %vm15579_vm2, 1.0, %v14911_v62  ;;  %vm15580_vm7 = vnez %v15440_v58  ;;  %vm15581_vm14 = vcmp.lt.s32.totalorder %v15452_v12, 64  ;;  %vm4023_vm2 = vcmp.ne.s32.totalorder %v10714_v50, 0 }
 0x538   :  { %v15573_v53 = vsel %vm11973_vm11, 4294967295, %v15572_v53  ;;  %vm11981_vm10 = vmand %vm15575_vm12, %vm15574_vm8  ;;  %v11992_v6 = vsel %vm15580_vm7, 1.0, %v14911_v62  ;;  %vm15582_vm11 = vnez %v15455_v60  ;;  %vm15585_vm8 = vcmp.ne.s32.totalorder %v15558_v4, 0  ;;  %v15596_v60 = vld [vmem:[#allocation110_spill] sm:$0xff] }
 0x539   :  { %v15577_v14 = vsel %vm11981_vm10, 4294967295, %v15576_v14  ;;  %vm11998_vm12 = vmand %vm15582_vm11, %vm15581_vm14  ;;  %vm15589_vm7 = vnez %v15459_v49  ;;  %vm15590_vm11 = vnez %v15463_v54  ;;  %vm15591_vm14 = vnez %v15467_v20 }
 0x53a   :  { %v15584_v10 = vsel %vm11998_vm12, 4294967295, %v15583_v10  ;;  %vm12006_vm10 = vmand %vm15586_vm0, %vm15585_vm8  ;;  %v12014_v28 = vsel %vm15589_vm7, 1.0, %v14911_v62  ;;  %v12019_v58 = vsel %vm15590_vm11, 1.0, %v14911_v62  ;;  %v12024_v12 = vsel %vm15591_vm14, 1.0, %v14911_v62 }
 0x53b   :  { %vm15592_vm0 = vcmp.ne.s32.totalorder %v15565_v5, 0  ;;  %vm15593_vm8 = vnez %v15505_v33  ;;  %v15594_v50 = vmov 0  ;;  %v15597_v49 = vlaneseq }
 0x53c   :  { %vm12030_vm12 = vmand %vm15593_vm8, %vm15592_vm0  ;;  %vm15599_vm11 = vnez %v15476_v48  ;;  %vm15600_vm14 = vnez %v15480_v38  ;;  %vm15601_vm0 = vcmp.ne.s32.totalorder %v15578_v36, 0  ;;  %vm4027_vm7 = vcmp.ne.s32.totalorder %v15604_v24, 0 }
 0x53d   :  { %v15595_v50 = vsel %vm12030_vm12, 4294967295, %v15594_v50  ;;  %v12036_v27 = vshrl.u32 %v15597_v49, 7  ;;  %v12041_v54 = vsel %vm15599_vm11, 1.0, %v14911_v62  ;;  %v12046_v20 = vsel %vm15600_vm14, 1.0, %v14911_v62  ;;  %vm12052_vm8 = vmand %vm11820_vm13, %vm15601_vm0 }
 0x53e   :  { %vm15605_vm12 = vnez %v15492_v40  ;;  %vm15606_vm11 = vnez %v15500_v61  ;;  %vm15607_vm13 = vnez %v15525_v43  ;;  %vm4029_vm0 = vcmp.ne.s32.totalorder %v15610_v47, 0  ;;  %v12079_v40 = vpop.permute.xlu1 %4012  ;;  %v4182_v61 = vpop.xlane.xlu0 %4181 }
 0x53f   :  { %15598 = vst [vmem:[#allocation196_spill] sm:$0xff] %v12036_v27  ;;  %v12060_v48 = vsel %vm15605_vm12, 1.0, %v14911_v62  ;;  %v12065_v38 = vsel %vm15606_vm11, 1.0, %v14911_v62  ;;  %vm12074_vm14 = vmand %vm15607_vm13, %vm4023_vm2  ;;  %v4462_v1 = vmul.f32 %v15611_v3, %v4270_v23  ;;  %vm15612_vm12 = vnez %v15518_v13 }
 0x540   :  { %v12085_v9 = vsel %vm15612_vm12, 1.0, %v14911_v62  ;;  %v12090_v46 = vsel %vm15613_vm1, 1.0, %v14911_v62  ;;  %vm15614_vm2 = vcmp.ne.s32.totalorder %v15596_v60, 0  ;;  %vm4031_vm13 = vcmp.ne.s32.totalorder %v15617_v17, 0 }
 0x541   :  { %vm12096_vm11 = vmand %vm11882_vm3, %vm15614_vm2  ;;  %v4272_v37 = vmul.f32 %v6461_v30, %v4182_v61  ;;  %v12104_v13 = vsel %vm11890_vm4, 1.0, %v14911_v62  ;;  %v12109_v44 = vsel %vm11919_vm15, 1.0, %v14911_v62  ;;  %vm3843_vm12 = vcmp.ne.s32.totalorder %v15618_v22, 0  ;;  %v15638_v61 = vld [vmem:[#allocation193_spill] sm:$0xff]  ;;  %v15644_v22 = vld [vmem:[#allocation91_spill] sm:$0xff] }
 0x542   :  { %vm12116_vm3 = vmand %vm11911_vm6, %vm4027_vm7  ;;  %vm4033_vm1 = vcmp.ne.s32.totalorder %v15621_v45, 0  ;;  %v12122_v63 = vadd.s32 16, %v12036_v27  ;;  %v12127_v2 = vsel %vm11963_vm5, 1.0, %v14911_v62  ;;  %v12139_v5 = vadd.s32 24, %v12036_v27  ;;  %v4185_v30 = vpop.xlane.xlu0 %4184  ;;  %v4179_v49 = vpop.xlane.xlu1 %4178  ;;  %v15647_v45 = vld [vmem:[#allocation107_spill] sm:$0xff] }
 0x543   :  { %vm12133_vm15 = vmand %vm11933_vm9, %vm4029_vm0  ;;  %v4464_v4 = vmul.f32 %v15625_v19, %v4272_v37  ;;  %v12142_v8 = vadd.s32 8, %v12036_v27  ;;  %v12145_v51 = vadd.s32 40, %v12036_v27  ;;  %vm15629_vm4 = vnez %v15564_v15 }
 0x544   :  { %15622 = vst [vmem:[#allocation198_spill] sm:$0xff] %v12122_v63  ;;  %15626 = vst [vmem:[#allocation26_spill] sm:$0xff] %v12139_v5  ;;  %vm4035_vm9 = vcmp.ne.s32.totalorder %v15632_v42, 0  ;;  %v6462_v23 = vsel %vm12006_vm10, 1.0, %v14911_v62  ;;  %vm15633_vm7 = vnez %v15577_v14  ;;  %vm15634_vm0 = vnez %v15573_v53  ;;  %v15640_v14 = vld [vmem:[#allocation95_spill] sm:$0xff]  ;;  %v15655_v63 = vld [vmem:[#allocation98_spill] sm:$0xff] }
 0x545   :  { %15627 = vst [vmem:[#allocation201_spill] sm:$0xff] %v12142_v8  ;;  %15628 = vst [vmem:[#allocation203_spill] sm:$0xff] %v12145_v51  ;;  %v6460_v60 = vsel %vm15633_vm7, 1.0, %v14911_v62  ;;  %v4273_v24 = vmul.f32 %v6462_v23, %v4185_v30  ;;  %vm15637_vm10 = vnez %v15595_v50  ;;  %vm15639_vm7 = vnez %v15584_v10 }
 0x546   :  { %vm12149_vm6 = vmand %vm15629_vm4, %vm4031_vm13  ;;  %vm4496_vm13 = vcmp.gt.f32.partialorder %v4464_v4, 0.0  ;;  %v4271_v47 = vmul.f32 %v6460_v60, %v4179_v49  ;;  %v6464_v29 = vsel %vm15637_vm10, 1.0, %v14911_v62  ;;  %vm3621_vm4 = vcmp.ne.s32.totalorder %v15638_v61, 0  ;;  %v4191_v42 = vpop.xlane.xlu0 %4190  ;;  %v4188_v49 = vpop.xlane.xlu1 %4187 }
 0x547   :  { %vm12164_vm2 = vmand %vm15634_vm0, %vm4033_vm1  ;;  %v12177_v53 = vsel %vm4496_vm13, %v15640_v14, -inf  ;;  %v6466_v17 = vsel %vm12052_vm8, 1.0, %v14911_v62  ;;  %v12185_v37 = vsel %vm12074_vm14, 1.0, %v14911_v62  ;;  %v12190_v50 = vsel %vm12096_vm11, 1.0, %v14911_v62 }
 0x548   :  { %vm3875_vm5 = vmand %vm15639_vm7, %vm3843_vm12  ;;  %15641 = vst [vmem:[#allocation125_spill] sm:$0xff] %v12177_v53  ;;  %vm15645_vm1 = vcmp.gt.f32.partialorder %v4462_v1, 0.0  ;;  %v4465_v23 = vmul.f32 %v15647_v45, %v4273_v24  ;;  %v4463_v30 = vmul.f32 %v15648_v0, %v4271_v47  ;;  %v12207_v43 = vsel %vm12116_vm3, 1.0, %v14911_v62  ;;  %v15659_v45 = vld [vmem:[#allocation142_spill] sm:$0xff]  ;;  %v15662_v0 = vld [vmem:[#allocation164_spill] sm:$0xff] }
 0x549   :  { %vm12194_vm12 = vmand %vm3875_vm5, %vm4035_vm9  ;;  %v12200_v33 = vsel %vm15645_vm1, %v15644_v22, -inf  ;;  %vm15649_vm8 = vcmask 7168   ;;  %v12213_v14 = vsel %vm12133_vm15, 1.0, %v14911_v62  ;;  %v12218_v24 = vsel %vm12149_vm6, 1.0, %v14911_v62 }
 0x54a   :  { %15646 = vst [vmem:[#allocation27_spill] sm:$0xff] %v12200_v33  ;;  %v6040_v60 = vsel %vm15649_vm8, %v4462_v1, 0.0  ;;  %v12223_v32 = vsel %vm12164_vm2, 1.0, %v14911_v62  ;;  %vm15650_vm14 = vmmov %vm15649_vm8  ;;  %vm4497_vm11 = vcmp.gt.f32.partialorder %v4465_v23, 0.0  ;;  %vm4495_vm3 = vcmp.gt.f32.partialorder %v4463_v30, 0.0  ;;  %v4194_v10 = vpop.xlane.xlu1 %4193 }
 0x54b   :  { %v4826_v1 = vsel %vm15650_vm14, %v12177_v53, -inf  ;;  %vm15651_vm9 = vmmov %vm15649_vm8  ;;  %vm3845_vm15 = vcmp.ne.s32.totalorder %v15652_v55, 0  ;;  %v4275_v51 = vmul.f32 %v6464_v29, %v4191_v42  ;;  %v12234_v15 = vsel %vm12194_vm12, 1.0, %v14911_v62  ;;  %v15657_v53 = vld [vmem:[#allocation133_spill] sm:$0xff]  ;;  %v15660_v29 = vld [vmem:[#allocation146_spill] sm:$0xff] }
 0x54c   :  { %v6041_v47 = vsel %vm15651_vm9, %v4463_v30, 0.0  ;;  %vm15653_vm5 = vmmov %vm15649_vm8  ;;  %v12238_v8 = vsel %vm4497_vm11, %v15655_v63, -inf  ;;  %v12241_v19 = vsel %vm4495_vm3, %v15657_v53, -inf  ;;  %v4274_v30 = vmul.f32 %v11992_v6, %v4188_v49 }
 0x54d   :  { %v4824_v22 = vsel %vm15653_vm5, %v12200_v33, -inf  ;;  %v6042_v36 = vadd.f32 %v6041_v47, %v6040_v60  ;;  %vm15654_vm6 = vmmov %vm15653_vm5  ;;  %15656 = vst [vmem:[#allocation206_spill] sm:$0xff] %v12238_v8  ;;  %vm4037_vm0 = vcmp.ne.s32.totalorder %v15659_v45, 0  ;;  %v4467_v42 = vmul.f32 %v15660_v29, %v4275_v51  ;;  %v4197_v47 = vpop.xlane.xlu0 %4196  ;;  %v15697_v45 = vld [vmem:[#allocation139_spill] sm:$0xff] }
 0x54e   :  { %v6043_v5 = vsel %vm15654_vm6, %v4464_v4, 0.0  ;;  %15658 = vst [vmem:[#allocation87_spill] sm:$0xff] %v12241_v19  ;;  %v4829_v33 = vmax.f32 %v4824_v22, %v4826_v1  ;;  %vm15661_vm2 = vmmov %vm15653_vm5  ;;  %v4466_v4 = vmul.f32 %v15662_v0, %v4274_v30  ;;  %v4277_v25 = vmul.f32 %v6466_v17, %v4197_v47  ;;  %v15672_v47 = vld [vmem:[#allocation161_spill] sm:$0xff] }
 0x54f   :  { %v6044_v60 = vadd.f32 %v6043_v5, %v6042_v36  ;;  %v6045_v3 = vsel %vm15661_vm2, %v4465_v23, 0.0  ;;  %v4276_v63 = vmul.f32 %v12014_v28, %v4194_v10  ;;  %vm15663_vm13 = vmmov %vm15661_vm2  ;;  %vm4499_vm7 = vcmp.gt.f32.partialorder %v4467_v42, 0.0  ;;  %v15665_v5 = vld [vmem:[#allocation105_spill] sm:$0xff]  ;;  %v15668_v23 = vld [vmem:[#allocation114_spill] sm:$0xff] }
 0x550   :  { %v4827_v53 = vsel %vm15663_vm13, %v12238_v8, -inf  ;;  %vm15664_vm10 = vmmov %vm15661_vm2  ;;  %v12254_v1 = vsel %vm4499_vm7, %v15665_v5, -inf  ;;  %vm4498_vm12 = vcmp.gt.f32.partialorder %v4466_v4, 0.0  ;;  %v4469_v22 = vmul.f32 %v15668_v23, %v4277_v25  ;;  %v15670_v28 = vld [vmem:[#allocation155_spill] sm:$0xff] }
 0x551   :  { %v4825_v6 = vsel %vm15664_vm10, %v12241_v19, -inf  ;;  %v6046_v49 = vadd.f32 %v6045_v3, %v6044_v60  ;;  %15666 = vst [vmem:[#allocation208_spill] sm:$0xff] %v12254_v1  ;;  %vm15667_vm1 = vmmov %vm15661_vm2  ;;  %v12261_v36 = vsel %vm4498_vm12, %v15670_v28, -inf  ;;  %v4468_v10 = vmul.f32 %v15672_v47, %v4276_v63  ;;  %v4203_v8 = vpop.xlane.xlu0 %4202  ;;  %v4200_v19 = vpop.xlane.xlu1 %4199  ;;  %v15673_v3 = vld [vmem:[#allocation115_spill] sm:$0xff]  ;;  %v15678_v28 = vld [vmem:[#allocation16_spill] sm:$0xff] }
 0x552   :  { %v6047_v51 = vsel %vm15667_vm1, %v4466_v4, 0.0  ;;  %vm15669_vm8 = vmmov %vm15667_vm1  ;;  %15671 = vst [vmem:[#allocation31_spill] sm:$0xff] %v12261_v36  ;;  %vm15674_vm14 = vcmp.ge.s32.totalorder %v15673_v3, 0  ;;  %v4835_v25 = vmax.f32 %v4827_v53, %v4829_v33  ;;  %vm4501_vm9 = vcmp.gt.f32.partialorder %v4469_v22, 0.0  ;;  %v15685_v53 = vld [vmem:[#allocation195_spill] sm:$0xff] }
 0x553   :  { %v4830_v17 = vsel %vm15669_vm8, %v12254_v1, -inf  ;;  %v6048_v30 = vadd.f32 %v6047_v51, %v6046_v49  ;;  %vm12268_vm11 = vmand %vm15674_vm14, %vm3621_vm4  ;;  %vm3623_vm5 = vcmp.ne.s32.totalorder %v15678_v28, 0  ;;  %v15680_v49 = vld [vmem:[#allocation102_spill] sm:$0xff]  ;;  %vm4500_vm2 = vcmp.gt.f32.partialorder %v4468_v10, 0.0  ;;  %v15682_v1 = vld [vmem:[#allocation37_spill] sm:$0xff] }
 0x554   :  { %v4831_v4 = vmax.f32 %v4825_v6, %v4830_v17  ;;  %vm15677_vm3 = vmmov %vm15667_vm1  ;;  %v12277_v51 = vsel %vm4501_vm9, %v15680_v49, -inf  ;;  %vm3625_vm4 = vcmp.ne.s32.totalorder %v15682_v1, 0  ;;  %vm3627_vm7 = vcmp.ne.s32.totalorder %v15685_v53, 0  ;;  %v15688_v17 = vld [vmem:[#allocation143_spill] sm:$0xff] }
 0x555   :  { %v6049_v5 = vsel %vm15677_vm3, %v4467_v42, 0.0  ;;  %vm15679_vm6 = vmmov %vm15667_vm1  ;;  %15681 = vst [vmem:[#allocation89_spill] sm:$0xff] %v12277_v51  ;;  %v4279_v42 = vmul.f32 %v12185_v37, %v4203_v8  ;;  %vm15686_vm12 = vcmp.lt.s32.totalorder %v15673_v3, 64  ;;  %v15690_v37 = vld [vmem:[#allocation122_spill] sm:$0xff] }
 0x556   :  { %v4828_v63 = vsel %vm15679_vm6, %v12261_v36, -inf  ;;  %v6050_v61 = vadd.f32 %v6049_v5, %v6048_v30  ;;  %v4833_v47 = vmax.f32 %v4831_v4, %v4835_v25  ;;  %vm15683_vm13 = vmmov %vm15667_vm1  ;;  %v12291_v30 = vsel %vm4500_vm2, %v15688_v17, -inf  ;;  %v4209_v4 = vpop.xlane.xlu0 %4208  ;;  %v15700_v17 = vld [vmem:[#allocation74_spill] sm:$0xff] }
 0x557   :  { %v6053_v23 = vsel %vm15683_vm13, %v4469_v22, 0.0  ;;  %vm15684_vm10 = vmmov %vm15667_vm1  ;;  %15689 = vst [vmem:[#allocation210_spill] sm:$0xff] %v12291_v30  ;;  %v4278_v22 = vmul.f32 %v12019_v58, %v4200_v19  ;;  %v4471_v3 = vmul.f32 %v15690_v37, %v4279_v42  ;;  %v4281_v60 = vmul.f32 %v12190_v50, %v4209_v4  ;;  %v15693_v58 = vld [vmem:[#allocation169_spill] sm:$0xff]  ;;  %v15701_v4 = vld [vmem:[#allocation123_spill] sm:$0xff] }
 0x558   :  { %v6051_v33 = vsel %vm15684_vm10, %v4468_v10, 0.0  ;;  %vm3717_vm1 = vmand %vm12268_vm11, %vm15686_vm12  ;;  %v4206_v10 = vpop.xlane.xlu1 %4205  ;;  %v4839_v8 = vmax.f32 %v4828_v63, %v4833_v47  ;;  %v15695_v47 = vld [vmem:[#allocation69_spill] sm:$0xff]  ;;  %v7307_v50 = vmov -inf   ;;  %vm3849_vm13 = vcmp.ne.s32.totalorder %v15701_v4, 0 }
 0x559   :  { %vm15687_vm8 = vmmov %vm15677_vm3  ;;  %v6052_v25 = vadd.f32 %v6051_v33, %v6050_v61  ;;  %v4280_v5 = vmul.f32 %v12024_v12, %v4206_v10  ;;  %v4470_v19 = vmul.f32 %v15693_v58, %v4278_v22  ;;  %vm14540_vm3 = vcmask 0   ;;  %v15696_v12 = vld [vmem:[#allocation10_spill] sm:$0xff]  ;;  %v15712_v58 = vld [vmem:[#allocation67_spill] sm:$0xff] }
 0x55a   :  { %v4834_v6 = vsel %vm15687_vm8, %v12277_v51, -inf  ;;  %vm3877_vm14 = vmand %vm3717_vm1, %vm3845_vm15  ;;  %vm4503_vm9 = vcmp.gt.f32.partialorder %v4471_v3, 0.0  ;;  %v4473_v63 = vmul.f32 %v15695_v47, %v4281_v60  ;;  %48 = vst.msk [vmem:[#allocation4] sm:$0x1] %vm14540_vm3, %v7307_v50 }
 0x55b   :  { %vm12301_vm11 = vmand %vm3877_vm14, %vm4037_vm0  ;;  %v6054_v61 = vadd.f32 %v6053_v23, %v6052_v25  ;;  %v4837_v33 = vmax.f32 %v4834_v6, %v4839_v8  ;;  %v12312_v42 = vsel %vm4503_vm9, %v15697_v45, -inf  ;;  %vm4502_vm0 = vcmp.gt.f32.partialorder %v4470_v19, 0.0  ;;  %v4215_v6 = vpop.xlane.xlu0 %4214  ;;  %v15702_v8 = vld [vmem:[#allocation117_spill] sm:$0xff]  ;;  %v15703_v45 = vld [vmem:[#allocation126_spill] sm:$0xff] }
 0x55c   :  { %vm15694_vm15 = vmmov %vm15679_vm6  ;;  %vm3847_vm6 = vcmp.ne.s32.totalorder %v15696_v12, 0  ;;  %15698 = vst [vmem:[#allocation38_spill] sm:$0xff] %v12312_v42  ;;  %v4472_v25 = vmul.f32 %v15700_v17, %v4280_v5  ;;  %v4212_v22 = vpop.xlane.xlu1 %4211  ;;  %v12318_v60 = vsel %vm4502_vm0, %v15702_v8, -inf  ;;  %v12323_v50 = vsel %vm12301_vm11, 1.0, %v14911_v62 }
 0x55d   :  { %v4832_v55 = vsel %vm15694_vm15, %v12291_v30, -inf  ;;  %vm15699_vm2 = vmmov %vm15687_vm8  ;;  %vm3851_vm10 = vcmp.ne.s32.totalorder %v15703_v45, 0  ;;  %vm4505_vm8 = vcmp.gt.f32.partialorder %v4473_v63, 0.0  ;;  %v15706_v30 = vld [vmem:[#allocation153_spill] sm:$0xff]  ;;  %vm15713_vm0 = vcmp.ge.s32.totalorder %v15712_v58, 0 }
 0x55e   :  { %v6055_v23 = vsel %vm15699_vm2, %v4470_v19, 0.0  ;;  %v4843_v10 = vmax.f32 %v4832_v55, %v4837_v33  ;;  %vm15704_vm12 = vmmov %vm15699_vm2  ;;  %vm4504_vm14 = vcmp.gt.f32.partialorder %v4472_v25, 0.0  ;;  %vm4039_vm15 = vcmp.ne.s32.totalorder %v15706_v30, 0  ;;  %v15707_v55 = vld [vmem:[#allocation104_spill] sm:$0xff] }
 0x55f   :  { %v6056_v51 = vadd.f32 %v6055_v23, %v6054_v61  ;;  %v4838_v19 = vsel %vm15704_vm12, %v12312_v42, -inf  ;;  %vm15705_vm1 = vmmov %vm15699_vm2  ;;  %v12331_v8 = vsel %vm4505_vm8, %v15707_v55, -inf  ;;  %v15710_v23 = vld [vmem:[#allocation170_spill] sm:$0xff]  ;;  %v4283_v42 = vmul.f32 %v12207_v43, %v4215_v6  ;;  %v15742_v43 = vld [vmem:[#allocation175_spill] sm:$0xff] }
 0x560   :  { %v6057_v5 = vsel %vm15705_vm1, %v4471_v3, 0.0  ;;  %v4841_v33 = vmax.f32 %v4838_v19, %v4843_v10  ;;  %15708 = vst [vmem:[#allocation92_spill] sm:$0xff] %v12331_v8  ;;  %vm15709_vm9 = vmmov %vm15705_vm1  ;;  %v12336_v36 = vsel %vm4504_vm14, %v15710_v23, -inf  ;;  %v4221_v3 = vpop.xlane.xlu0 %4220  ;;  %v4218_v47 = vpop.xlane.xlu1 %4217  ;;  %v15722_v23 = vld [vmem:[#allocation174_spill] sm:$0xff] }
 0x561   :  { %v6058_v61 = vadd.f32 %v6057_v5, %v6056_v51  ;;  %v4836_v49 = vsel %vm15709_vm9, %v12318_v60, -inf  ;;  %vm15711_vm11 = vmmov %vm15705_vm1  ;;  %v4282_v5 = vmul.f32 %v12041_v54, %v4212_v22  ;;  %v4285_v55 = vmul.f32 %v12213_v14, %v4221_v3  ;;  %v15723_v54 = vld [vmem:[#allocation121_spill] sm:$0xff]  ;;  %v15728_v3 = vld [vmem:[#allocation168_spill] sm:$0xff] }
 0x562   :  { %v6059_v17 = vsel %vm15711_vm11, %v4472_v25, 0.0  ;;  %vm12344_vm2 = vmand %vm15713_vm0, %vm3623_vm5  ;;  %v4847_v51 = vmax.f32 %v4836_v49, %v4841_v33  ;;  %v15716_v25 = vld [vmem:[#allocation119_spill] sm:$0xff]  ;;  %v4475_v33 = vmul.f32 %v15722_v23, %v4283_v42  ;;  %vm15724_vm14 = vcmp.ge.s32.totalorder %v15723_v54, 0  ;;  %v15841_v23 = vld [vmem:[#allocation74_spill] sm:$0xff] }
 0x563   :  { %v6060_v19 = vadd.f32 %v6059_v17, %v6058_v61  ;;  %vm15717_vm12 = vcmp.ge.s32.totalorder %v15716_v25, 0  ;;  %vm15720_vm8 = vmmov %vm15709_vm9  ;;  %v4284_v17 = vmul.f32 %v12046_v20, %v4218_v47  ;;  %v15727_v61 = vld [vmem:[#allocation43_spill] sm:$0xff]  ;;  %vm4041_vm0 = vcmp.ne.s32.totalorder %v11789_v18, 0  ;;  %v15763_v18 = vld [vmem:[#allocation33_spill] sm:$0xff] }
 0x564   :  { %vm12354_vm1 = vmand %vm15717_vm12, %vm3625_vm4  ;;  %v4842_v28 = vsel %vm15720_vm8, %v12331_v8, -inf  ;;  %v4474_v49 = vmul.f32 %v15727_v61, %v4282_v5  ;;  %v4477_v8 = vmul.f32 %v15728_v3, %v4285_v55  ;;  %vm15729_vm4 = vcmp.lt.s32.totalorder %v15712_v58, 64  ;;  %v4224_v42 = vpop.xlane.xlu1 %4223  ;;  %v15840_v61 = vld [vmem:[#allocation69_spill] sm:$0xff] }
 0x565   :  { %vm15721_vm5 = vmmov %vm15720_vm8  ;;  %v4845_v1 = vmax.f32 %v4842_v28, %v4847_v51  ;;  %vm4507_vm12 = vcmp.gt.f32.partialorder %v4475_v33, 0.0  ;;  %v4476_v47 = vmul.f32 %v11639_v26, %v4284_v17  ;;  %vm15733_vm8 = vcmp.lt.s32.totalorder %v15716_v25, 64  ;;  %v15736_v51 = vld [vmem:[#allocation124_spill] sm:$0xff] }
 0x566   :  { %v6061_v6 = vsel %vm15721_vm5, %v4473_v63, 0.0  ;;  %vm12367_vm9 = vmand %vm15724_vm14, %vm3627_vm7  ;;  %v4227_v63 = vpop.xlane.xlu0 %4226  ;;  %v12686_v26 = vadd.s32 168, %v12036_v27  ;;  %v12689_v3 = vadd.s32 160, %v12036_v27 }
 0x567   :  { %v6062_v22 = vadd.f32 %v6061_v6, %v6060_v19  ;;  %vm12377_vm11 = vmand %vm12344_vm2, %vm15729_vm4  ;;  %v12394_v19 = vsel %vm4507_vm12, %v15736_v51, -inf  ;;  %vm4506_vm2 = vcmp.gt.f32.partialorder %v4474_v49, 0.0  ;;  %vm15738_vm4 = vcmp.lt.s32.totalorder %v15723_v54, 64  ;;  %v15753_v51 = vld [vmem:[#allocation140_spill] sm:$0xff] }
 0x568   :  { %vm15732_vm7 = vmmov %vm15721_vm5  ;;  %v12408_v28 = vsel %vm4506_vm2, %v15742_v43, -inf  ;;  %vm4509_vm12 = vcmp.gt.f32.partialorder %v4477_v8, 0.0  ;;  %v4286_v43 = vmul.f32 %v12060_v48, %v4224_v42  ;;  %v15758_v48 = vld [vmem:[#allocation176_spill] sm:$0xff]  ;;  %15837 = vst [vmem:[#allocation103_spill] sm:$0xff] %v12686_v26  ;;  %v12703_v26 = vadd.s32 192, %v12036_v27 }
 0x569   :  { %v4840_v53 = vsel %vm15732_vm7, %v12336_v36, -inf  ;;  %vm12389_vm5 = vmand %vm12354_vm1, %vm15733_vm8  ;;  %v15771_v42 = vld [vmem:[#allocation40_spill] sm:$0xff]  ;;  %15838 = vst [vmem:[#allocation86_spill] sm:$0xff] %v12689_v3  ;;  %v12706_v3 = vadd.s32 216, %v12036_v27 }
 0x56a   :  { %v4851_v10 = vmax.f32 %v4840_v53, %v4845_v1  ;;  %vm15737_vm14 = vmmov %vm15732_vm7  ;;  %v15746_v1 = vld [vmem:[#allocation116_spill] sm:$0xff]  ;;  %v4478_v30 = vmul.f32 %v11925_v11, %v4286_v43  ;;  %v12674_v11 = vadd.s32 136, %v12036_v27  ;;  %15844 = vst [vmem:[#allocation20_spill] sm:$0xff] %v12703_v26 }
 0x56b   :  { %v6063_v5 = vsel %vm15737_vm14, %v4474_v49, 0.0  ;;  %vm12401_vm7 = vmand %vm12367_vm9, %vm15738_vm4  ;;  %vm4043_vm9 = vcmp.ne.s32.totalorder %v11938_v56, 0  ;;  %v12421_v49 = vsel %vm4509_vm12, %v15746_v1, -inf  ;;  %15845 = vst [vmem:[#allocation88_spill] sm:$0xff] %v12706_v3 }
 0x56c   :  { %vm15741_vm1 = vmmov %vm15737_vm14  ;;  %v6064_v6 = vadd.f32 %v6063_v5, %v6062_v22  ;;  %15833 = vst [vmem:[#allocation101_spill] sm:$0xff] %v12674_v11 }
 0x56d   :  { %v4846_v25 = vsel %vm15741_vm1, %v12394_v19, -inf  ;;  %vm12414_vm8 = vmand %vm12377_vm11, %vm3847_vm6  ;;  %vm4508_vm11 = vcmp.gt.f32.partialorder %v4476_v47, 0.0 }
 0x56e   :  { %v4849_v54 = vmax.f32 %v4846_v25, %v4851_v10  ;;  %vm15745_vm14 = vmmov %vm15741_vm1  ;;  %v4233_v10 = vpop.xlane.xlu0 %4232  ;;  %v12443_v5 = vsel %vm4508_vm11, %v15753_v51, -inf  ;;  %v4287_v25 = vmul.f32 %v12218_v24, %v4227_v63 }
 0x56f   :  { %v6065_v14 = vsel %vm15745_vm14, %v4475_v33, 0.0  ;;  %vm12427_vm2 = vmand %vm12389_vm5, %vm3849_vm13  ;;  %v4230_v33 = vpop.xlane.xlu1 %4229  ;;  %vm4510_vm14 = vcmp.gt.f32.partialorder %v4478_v30, 0.0 }
 0x570   :  { %vm15749_vm6 = vmmov %vm15741_vm1  ;;  %v6066_v20 = vadd.f32 %v6065_v14, %v6064_v6  ;;  %v4289_v6 = vmul.f32 %v12223_v32, %v4233_v10  ;;  %v4479_v63 = vmul.f32 %v15758_v48, %v4287_v25  ;;  %v15764_v10 = vld [vmem:[#allocation127_spill] sm:$0xff]  ;;  %v12683_v48 = vadd.s32 144, %v12036_v27 }
 0x571   :  { %v4844_v22 = vsel %vm15749_vm6, %v12408_v28, -inf  ;;  %vm15750_vm4 = vmmov %vm15741_vm1 }
 0x572   :  { %v6067_v53 = vsel %vm15750_vm4, %v4476_v47, 0.0  ;;  %vm12438_vm1 = vmand %vm12401_vm7, %vm3851_vm10  ;;  %v4855_v58 = vmax.f32 %v4844_v22, %v4849_v54  ;;  %v4288_v54 = vmul.f32 %v12065_v38, %v4230_v33  ;;  %v15762_v38 = vld [vmem:[#allocation84_spill] sm:$0xff]  ;;  %v4239_v22 = vpop.xlane.xlu0 %4238  ;;  %15836 = vst [vmem:[#allocation15_spill] sm:$0xff] %v12683_v48 }
 0x573   :  { %vm12451_vm13 = vmand %vm12414_vm8, %vm4039_vm15  ;;  %v6068_v55 = vadd.f32 %v6067_v53, %v6066_v20  ;;  %v4481_v1 = vmul.f32 %v15762_v38, %v4289_v6  ;;  %v4236_v20 = vpop.xlane.xlu1 %4235  ;;  %vm4511_vm8 = vcmp.gt.f32.partialorder %v4479_v63, 0.0 }
 0x574   :  { %vm15756_vm10 = vmmov %vm15750_vm4  ;;  %v6484_v53 = vsel %vm12451_vm13, 1.0, %v14911_v62  ;;  %v12483_v33 = vsel %vm4511_vm8, %v15764_v10, -inf  ;;  %v4290_v10 = vmul.f32 %v12070_v39, %v4236_v20 }
 0x575   :  { %v4850_v47 = vsel %vm15756_vm10, %v12421_v49, -inf  ;;  %vm15757_vm5 = vmmov %vm15750_vm4  ;;  %vm4513_vm6 = vcmp.gt.f32.partialorder %v4481_v1, 0.0 }
 0x576   :  { %v4853_v14 = vmax.f32 %v4850_v47, %v4855_v58  ;;  %v6069_v24 = vsel %vm15757_vm5, %v4477_v8, 0.0  ;;  %vm12466_vm15 = vmand %vm12427_vm2, %vm4041_vm0  ;;  %v4480_v8 = vmul.f32 %v11725_v16, %v4288_v54  ;;  %vm3629_vm0 = vcmp.ne.s32.totalorder %v15763_v18, 0  ;;  %v4245_v6 = vpop.xlane.xlu0 %4244  ;;  %v15774_v16 = vld [vmem:[#allocation132_spill] sm:$0xff] }
 0x577   :  { %vm15761_vm7 = vmmov %vm15750_vm4  ;;  %v6070_v17 = vadd.f32 %v6069_v24, %v6068_v55  ;;  %v12486_v58 = vsel %vm4510_vm14, %v11424_v21, -inf  ;;  %v6486_v25 = vsel %vm12466_vm15, 1.0, %v14911_v62  ;;  %v15768_v55 = vld [vmem:[#allocation113_spill] sm:$0xff]  ;;  %v4242_v54 = vpop.xlane.xlu1 %4241 }
 0x578   :  { %v4848_v32 = vsel %vm15761_vm7, %v12443_v5, -inf  ;;  %vm4075_vm12 = vmand %vm12438_vm1, %vm4043_vm9  ;;  %v12499_v21 = vsel %vm4513_vm6, %v15768_v55, -inf }
 0x579   :  { %v4859_v12 = vmax.f32 %v4848_v32, %v4853_v14  ;;  %vm15765_vm2 = vmmov %vm15750_vm4  ;;  %v12495_v43 = vsel %vm4075_vm12, 1.0, %v14911_v62  ;;  %vm4512_vm4 = vcmp.gt.f32.partialorder %v4480_v8, 0.0  ;;  %v15769_v14 = vld [vmem:[#allocation90_spill] sm:$0xff] }
 0x57a   :  { %v6071_v56 = vsel %vm15765_vm2, %v4478_v30, 0.0  ;;  %vm15766_vm9 = vmmov %vm15765_vm2  ;;  %vm3853_vm1 = vcmp.ne.s32.totalorder %v15769_v14, 0  ;;  %v12505_v32 = vsel %vm4512_vm4, %v15771_v42, -inf  ;;  %vm4045_vm4 = vcmp.ne.s32.totalorder %v12079_v40, 0  ;;  %v15796_v40 = vld [vmem:[#allocation68_spill] sm:$0xff] }
 0x57b   :  { %v4854_v4 = vsel %vm15766_vm9, %v12483_v33, -inf  ;;  %v6072_v51 = vadd.f32 %v6071_v56, %v6070_v17  ;;  %vm15767_vm11 = vmmov %vm15765_vm2  ;;  %v4291_v17 = vmul.f32 %v12234_v15, %v4239_v22  ;;  %v4293_v56 = vmul.f32 %v12323_v50, %v4245_v6  ;;  %v15776_v22 = vld [vmem:[#allocation75_spill] sm:$0xff] }
 0x57c   :  { %v4857_v45 = vmax.f32 %v4854_v4, %v4859_v12  ;;  %v6073_v47 = vsel %vm15767_vm11, %v4479_v63, 0.0  ;;  %vm15770_vm13 = vmmov %vm15765_vm2  ;;  %v4482_v15 = vmul.f32 %v11940_v59, %v4290_v10  ;;  %v12664_v59 = vadd.s32 120, %v12036_v27 }
 0x57d   :  { %v4852_v24 = vsel %vm15770_vm13, %v12486_v58, -inf  ;;  %v6074_v30 = vadd.f32 %v6073_v47, %v6072_v51  ;;  %vm15772_vm10 = vmmov %vm15765_vm2  ;;  %v4483_v38 = vmul.f32 %v15774_v16, %v4291_v17  ;;  %v4292_v51 = vmul.f32 %v12085_v9, %v4242_v54 }
 0x57e   :  { %v4863_v12 = vmax.f32 %v4852_v24, %v4857_v45  ;;  %v6075_v63 = vsel %vm15772_vm10, %v4480_v8, 0.0  ;;  %vm15773_vm5 = vmmov %vm15765_vm2  ;;  %v4485_v45 = vmul.f32 %v15776_v22, %v4293_v56  ;;  %v4251_v8 = vpop.xlane.xlu0 %4250  ;;  %v4248_v24 = vpop.xlane.xlu1 %4247  ;;  %vm4514_vm8 = vcmp.gt.f32.partialorder %v4482_v15, 0.0  ;;  %v15828_v22 = vld [vmem:[#allocation169_spill] sm:$0xff]  ;;  %15829 = vst [vmem:[#allocation97_spill] sm:$0xff] %v12664_v59 }
 0x57f   :  { %v4858_v4 = vsel %vm15773_vm5, %v12499_v21, -inf  ;;  %v6076_v55 = vadd.f32 %v6075_v63, %v6074_v30  ;;  %vm15775_vm15 = vmmov %vm15765_vm2  ;;  %vm4515_vm12 = vcmp.gt.f32.partialorder %v4483_v38, 0.0  ;;  %v4484_v20 = vmul.f32 %v11927_v7, %v4292_v51  ;;  %v15778_v30 = vld [vmem:[#allocation128_spill] sm:$0xff]  ;;  %v15780_v63 = vld [vmem:[#allocation70_spill] sm:$0xff] }
 0x580   :  { %v4861_v47 = vmax.f32 %v4858_v4, %v4863_v12  ;;  %v6077_v42 = vsel %vm15775_vm15, %v4481_v1, 0.0  ;;  %vm15777_vm7 = vmmov %vm15765_vm2  ;;  %v12522_v17 = vsel %vm4515_vm12, %v15778_v30, -inf  ;;  %v12528_v54 = vsel %vm4514_vm8, %v11499_v35, -inf }
 0x581   :  { %v4856_v39 = vsel %vm15777_vm7, %v12505_v32, -inf  ;;  %v6078_v50 = vadd.f32 %v6077_v42, %v6076_v55  ;;  %vm15779_vm14 = vmmov %vm15765_vm2  ;;  %v4862_v1 = vsel %vm15765_vm2, %v12522_v17, -inf  ;;  %vm4517_vm6 = vcmp.gt.f32.partialorder %v4485_v45, 0.0  ;;  %v15785_v55 = vld [vmem:[#allocation150_spill] sm:$0xff] }
 0x582   :  { %v4867_v6 = vmax.f32 %v4856_v39, %v4861_v47  ;;  %v6079_v9 = vsel %vm15779_vm14, %v4482_v15, 0.0  ;;  %vm15781_vm9 = vcmp.ge.s32.totalorder %v15780_v63, 0  ;;  %vm15784_vm13 = vmmov %vm15765_vm2  ;;  %v12541_v51 = vsel %vm4517_vm6, %v15785_v55, -inf  ;;  %v4257_v35 = vpop.xlane.xlu0 %4256  ;;  %v4254_v47 = vpop.xlane.xlu1 %4253  ;;  %v15793_v55 = vld [vmem:[#allocation166_spill] sm:$0xff] }
 0x583   :  { %v6080_v12 = vadd.f32 %v6079_v9, %v6078_v50  ;;  %vm12534_vm11 = vmand %vm15781_vm9, %vm3629_vm0  ;;  %v6081_v4 = vsel %vm15784_vm13, %v4483_v38, 0.0  ;;  %vm4516_vm5 = vcmp.gt.f32.partialorder %v4484_v20, 0.0  ;;  %v4295_v30 = vmul.f32 %v6484_v53, %v4251_v8  ;;  %v15791_v8 = vld [vmem:[#allocation145_spill] sm:$0xff] }
 0x584   :  { %v4865_v56 = vmax.f32 %v4862_v1, %v4867_v6  ;;  %vm15786_vm10 = vmmov %vm15765_vm2  ;;  %v12547_v50 = vsel %vm4516_vm5, %v11466_v34, -inf  ;;  %v4294_v6 = vmul.f32 %v12090_v46, %v4248_v24  ;;  %vm15788_vm0 = vcmp.lt.s32.totalorder %v15780_v63, 64 }
 0x585   :  { %v4860_v42 = vsel %vm15786_vm10, %v12528_v54, -inf  ;;  %v6082_v18 = vadd.f32 %v6081_v4, %v6080_v12  ;;  %vm15787_vm15 = vmmov %vm15765_vm2  ;;  %v4297_v1 = vmul.f32 %v6486_v25, %v4257_v35  ;;  %v4296_v12 = vmul.f32 %v12104_v13, %v4254_v47  ;;  %v15792_v4 = vld [vmem:[#allocation21_spill] sm:$0xff] }
 0x586   :  { %v6083_v15 = vsel %vm15787_vm15, %v4484_v20, 0.0  ;;  %v4871_v39 = vmax.f32 %v4860_v42, %v4865_v56  ;;  %vm3725_vm7 = vmand %vm12534_vm11, %vm15788_vm0  ;;  %v4487_v46 = vmul.f32 %v15791_v8, %v4295_v30  ;;  %v4486_v24 = vmul.f32 %v11942_v57, %v4294_v6  ;;  %v4263_v20 = vpop.xlane.xlu0 %4262  ;;  %v4260_v63 = vpop.xlane.xlu1 %4259 }
 0x587   :  { %vm15789_vm12 = vmmov %vm15765_vm2  ;;  %v6084_v9 = vadd.f32 %v6083_v15, %v6082_v18  ;;  %v4864_v10 = vsel %vm15765_vm2, %v12547_v50, -inf  ;;  %v4489_v25 = vmul.f32 %v15792_v4, %v4297_v1  ;;  %v4488_v13 = vmul.f32 %v11944_v41, %v4296_v12 }
 0x588   :  { %v4866_v38 = vsel %vm15789_vm12, %v12541_v51, -inf  ;;  %vm3885_vm8 = vmand %vm3725_vm7, %vm3853_vm1  ;;  %vm4519_vm6 = vcmp.gt.f32.partialorder %v4487_v46, 0.0  ;;  %vm4518_vm9 = vcmp.gt.f32.partialorder %v4486_v24, 0.0  ;;  %v12650_v41 = vadd.s32 80, %v12036_v27 }
 0x589   :  { %v4869_v34 = vmax.f32 %v4866_v38, %v4871_v39  ;;  %vm15790_vm14 = vmmov %vm15765_vm2  ;;  %v12570_v35 = vsel %vm4519_vm6, %v15793_v55, -inf  ;;  %v12573_v47 = vsel %vm4518_vm9, %v11567_v52, -inf  ;;  %vm4521_vm13 = vcmp.gt.f32.partialorder %v4489_v25, 0.0 }
 0x58a   :  { %v6085_v53 = vsel %vm15790_vm14, %v4485_v45, 0.0  ;;  %vm4077_vm1 = vmand %vm3885_vm8, %vm4045_vm4  ;;  %v4299_v45 = vmul.f32 %v12495_v43, %v4263_v20  ;;  %v12579_v39 = vsel %vm4521_vm13, %v15796_v40, -inf  ;;  %v4269_v6 = vpop.xlane.xlu0 %4268  ;;  %v4266_v43 = vpop.xlane.xlu1 %4265  ;;  %vm4520_vm15 = vcmp.gt.f32.partialorder %v4488_v13, 0.0  ;;  %15824 = vst [vmem:[#allocation94_spill] sm:$0xff] %v12650_v41 }
 0x58b   :  { %v6086_v56 = vadd.f32 %v6085_v53, %v6084_v9  ;;  %v4875_v14 = vmax.f32 %v4864_v10, %v4869_v34  ;;  %vm15794_vm11 = vmmov %vm15765_vm2  ;;  %v6490_v30 = vsel %vm4077_vm1, 1.0, %v14911_v62  ;;  %v15800_v34 = vld [vmem:[#allocation32_spill] sm:$0xff]  ;;  %v12656_v4 = vadd.s32 104, %v12036_v27 }
 0x58c   :  { %v6087_v42 = vsel %vm15794_vm11, %v4486_v24, 0.0  ;;  %vm15795_vm10 = vmmov %vm15765_vm2  ;;  %v12588_v53 = vsel %vm4520_vm15, %v15800_v34, -inf  ;;  %v15801_v24 = vld [vmem:[#allocation149_spill] sm:$0xff]  ;;  %v4301_v55 = vmul.f32 %v6490_v30, %v4269_v6  ;;  %v12659_v57 = vadd.s32 96, %v12036_v27 }
 0x58d   :  { %v4870_v18 = vsel %vm15795_vm10, %v12570_v35, -inf  ;;  %v6088_v15 = vadd.f32 %v6087_v42, %v6086_v56  ;;  %vm15797_vm4 = vmmov %vm15765_vm2  ;;  %v4491_v20 = vmul.f32 %v15801_v24, %v4299_v45  ;;  %v15804_v34 = vld [vmem:[#allocation173_spill] sm:$0xff]  ;;  %vm4731_vm10 = vcmp.gt.f32.partialorder %v15660_v29, 0.0  ;;  %v15821_v24 = vld [vmem:[#allocation114_spill] sm:$0xff]  ;;  %15825 = vst [vmem:[#allocation80_spill] sm:$0xff] %v12656_v4 }
 0x58e   :  { %v4873_v38 = vmax.f32 %v4870_v18, %v4875_v14  ;;  %v6089_v9 = vsel %vm15797_vm4, %v4487_v46, 0.0  ;;  %vm15798_vm5 = vmmov %vm15765_vm2  ;;  %v4298_v14 = vmul.f32 %v12109_v44, %v4260_v63  ;;  %v4300_v18 = vmul.f32 %v12127_v2, %v4266_v43  ;;  %v12595_v40 = vpop.xlane.xlu0 %4634  ;;  %v15807_v2 = vld [vmem:[#allocation39_spill] sm:$0xff]  ;;  %15826 = vst [vmem:[#allocation34_spill] sm:$0xff] %v12659_v57 }
 0x58f   :  { %v4868_v52 = vsel %vm15798_vm5, %v12573_v47, -inf  ;;  %vm15799_vm0 = vmmov %vm15765_vm2  ;;  %v6090_v12 = vadd.f32 %v6089_v9, %v6088_v15  ;;  %vm4523_vm8 = vcmp.gt.f32.partialorder %v4491_v20, 0.0  ;;  %v12597_v15 = vpop.xlane.xlu1 %4631  ;;  %v12605_v44 = vadd.s32 32, %v12036_v27 }
 0x590   :  { %v4874_v1 = vsel %vm15799_vm0, %v12579_v39, -inf  ;;  %v4879_v10 = vmax.f32 %v4868_v52, %v4873_v38  ;;  %vm15802_vm7 = vmmov %vm15799_vm0  ;;  %v12600_v62 = vsel %vm4523_vm8, %v15804_v34, -inf  ;;  %v4490_v45 = vmul.f32 %v11958_v31, %v4298_v14  ;;  %v15820_v31 = vld [vmem:[#allocation111_spill] sm:$0xff] }
 0x591   :  { %v6091_v56 = vsel %vm15802_vm7, %v4488_v13, 0.0  ;;  %vm15803_vm12 = vmmov %vm15799_vm0  ;;  %v15805_v13 = vld [vmem:[#allocation28_spill] sm:$0xff]  ;;  %v4492_v30 = vmul.f32 %v15807_v2, %v4300_v18  ;;  %v12612_v52 = vadd.s32 56, %v12036_v27  ;;  %v15813_v18 = vld [vmem:[#allocation171_spill] sm:$0xff]  ;;  %vm4730_vm4 = vcmp.gt.f32.partialorder %v15662_v0, 0.0 }
 0x592   :  { %v6093_v46 = vsel %vm15803_vm12, %v4489_v25, 0.0  ;;  %v6092_v42 = vadd.f32 %v6091_v56, %v6090_v12  ;;  %v4877_v9 = vmax.f32 %v4874_v1, %v4879_v10  ;;  %v4493_v38 = vmul.f32 %v15805_v13, %v4301_v55  ;;  %vm15806_vm14 = vmmov %vm15799_vm0  ;;  %v15811_v12 = vld [vmem:[#allocation19_spill] sm:$0xff]  ;;  %v4641_v14 = vpop.xlane.xlu0 %4640 }
 0x593   :  { %v4872_v63 = vsel %vm15806_vm14, %v12588_v53, -inf  ;;  %vm4522_vm2 = vcmp.gt.f32.partialorder %v4490_v45, 0.0  ;;  %vm15808_vm1 = vmmov %vm15799_vm0  ;;  %15809 = vst [vmem:[#allocation78_spill] sm:$0xff] %v12612_v52  ;;  %v4638_v55 = vpop.xlane.xlu1 %4637  ;;  %vm4524_vm13 = vcmp.gt.f32.partialorder %v4492_v30, 0.0  ;;  %v12626_v34 = vadd.s32 48, %v12036_v27  ;;  %v15819_v13 = vld [vmem:[#allocation107_spill] sm:$0xff] }
 0x594   :  { %v6094_v25 = vadd.f32 %v6093_v46, %v6092_v42  ;;  %v4884_v6 = vmax.f32 %v4877_v9, %v4872_v63  ;;  %v6095_v43 = vsel %vm15808_vm1, %v4490_v45, 0.0  ;;  %vm4525_vm6 = vcmp.gt.f32.partialorder %v4493_v38, 0.0  ;;  %vm15810_vm9 = vmmov %vm15799_vm0 }
 0x595   :  { %v4878_v1 = vsel %vm15810_vm9, %v12600_v62, -inf  ;;  %v12617_v10 = vsel %vm4522_vm2, %v15811_v12, -inf  ;;  %vm15812_vm11 = vmmov %vm15799_vm0  ;;  %v12621_v9 = vsel %vm4525_vm6, %v15813_v18, -inf  ;;  %v12629_v45 = vadd.s32 72, %v12036_v27  ;;  %v15817_v12 = vld [vmem:[#allocation157_spill] sm:$0xff] }
 0x596   :  { %v6096_v56 = vadd.f32 %v6095_v43, %v6094_v25  ;;  %v4883_v46 = vmax.f32 %v4878_v1, %v4884_v6  ;;  %v6097_v42 = vsel %vm15812_vm11, %v4491_v20, 0.0  ;;  %vm15814_vm5 = vmmov %vm15799_vm0  ;;  %v15815_v6 = vld [vmem:[#allocation100_spill] sm:$0xff]  ;;  %v12636_v43 = vadd.s32 64, %v12036_v27 }
 0x597   :  { %v4876_v63 = vsel %vm15814_vm5, %v12617_v10, -inf  ;;  %vm4727_vm15 = vcmp.gt.f32.partialorder %v15815_v6, 0.0  ;;  %v15816_v20 = vld [vmem:[#allocation136_spill] sm:$0xff]  ;;  %v12639_v18 = vsel %vm4524_vm13, %v15817_v12, -inf  ;;  %vm15818_vm7 = vmmov %vm15808_vm1  ;;  %vm4729_vm12 = vcmp.gt.f32.partialorder %v15819_v13, 0.0  ;;  %v4647_v12 = vpop.xlane.xlu0 %4646 }
 0x598   :  { %v6098_v25 = vadd.f32 %v6097_v42, %v6096_v56  ;;  %vm4726_vm0 = vcmp.gt.f32.partialorder %v15816_v20, 0.0  ;;  %v4881_v1 = vmax.f32 %v4876_v63, %v4883_v46  ;;  %v6099_v2 = vsel %vm15818_vm7, %v4492_v30, 0.0  ;;  %v15822_v56 = vld [vmem:[#allocation161_spill] sm:$0xff]  ;;  %v4644_v30 = vpop.xlane.xlu1 %4643  ;;  %vm15827_vm9 = vmmov %vm15808_vm1 }
 0x599   :  { %vm4728_vm8 = vcmp.gt.f32.partialorder %v15820_v31, 0.0  ;;  %vm4733_vm14 = vcmp.gt.f32.partialorder %v15821_v24, 0.0  ;;  %vm4732_vm2 = vcmp.gt.f32.partialorder %v15822_v56, 0.0  ;;  %v12647_v42 = vadd.s32 88, %v12036_v27  ;;  %vm15831_vm13 = vmmov %vm15808_vm1 }
 0x59a   :  { %v4882_v46 = vsel %vm15808_vm1, %v12621_v9, -inf  ;;  %v6100_v63 = vadd.f32 %v6099_v2, %v6098_v25  ;;  %vm4735_vm6 = vcmp.gt.f32.partialorder %v15690_v37, 0.0  ;;  %v6101_v7 = vsel %vm15827_vm9, %v4493_v38, 0.0 }
 0x59b   :  { %15823 = vst [vmem:[#allocation22_spill] sm:$0xff] %v12647_v42  ;;  %v4885_v8 = vmax.f32 %v4881_v1, %v4882_v46  ;;  %vm4734_vm11 = vcmp.gt.f32.partialorder %v15828_v22, 0.0  ;;  %v12667_v2 = vadd.s32 112, %v12036_v27  ;;  %v4880_v25 = vsel %vm15831_vm13, %v12639_v18, -inf }
 0x59c   :  { %v12671_v16 = vadd.f32 %v6101_v7, %v6100_v63  ;;  %v12677_v1 = vadd.s32 128, %v12036_v27  ;;  %v12680_v38 = vadd.s32 152, %v12036_v27  ;;  %v12692_v7 = vadd.s32 184, %v12036_v27  ;;  %v4653_v63 = vpop.xlane.xlu0 %4652 }
 0x59d   :  { %15830 = vst [vmem:[#allocation82_spill] sm:$0xff] %v12667_v2  ;;  %v4886_v46 = vmax.f32 %v4880_v25, %v4885_v8  ;;  %vm4737_vm5 = vcmp.gt.f32.partialorder %v15840_v61, 0.0  ;;  %vm4736_vm7 = vcmp.gt.f32.partialorder %v15841_v23, 0.0  ;;  %v12697_v8 = vadd.s32 176, %v12036_v27 }
 0x59e   :  { %15832 = vst [vmem:[#allocation191_spill] sm:$0xff] %v12671_v16  ;;  %15834 = vst [vmem:[#allocation85_spill] sm:$0xff] %v12677_v1  ;;  %v4650_v16 = vpop.xlane.xlu1 %4649  ;;  %v12700_v25 = vadd.s32 200, %v12036_v27  ;;  %v12713_v48 = vsel %vm4731_vm10, %v4647_v12, inf  ;;  %v12725_v26 = vsel %vm4727_vm15, %v12595_v40, inf  ;;  %v12730_v3 = vsel %vm4726_vm0, %v12597_v15, inf }
 0x59f   :  { %15835 = vst [vmem:[#allocation83_spill] sm:$0xff] %v12680_v38  ;;  %15839 = vst [vmem:[#allocation71_spill] sm:$0xff] %v12692_v7  ;;  %v4887_v38 = vrot.slane %v4886_v46, 4  ;;  %v12709_v7 = vadd.s32 208, %v12036_v27  ;;  %v12734_v29 = vsel %vm4729_vm12, %v4641_v14, inf  ;;  %v12738_v0 = vsel %vm4728_vm8, %v4638_v55, inf }
 0x5a0   :  { %15842 = vst [vmem:[#allocation93_spill] sm:$0xff] %v12697_v8  ;;  %15843 = vst [vmem:[#allocation106_spill] sm:$0xff] %v12700_v25  ;;  %v12717_v8 = vsel %vm4730_vm4, %v4644_v30, inf  ;;  %v12720_v25 = vadd.s32 232, %v12036_v27  ;;  %v12742_v12 = vsel %vm4733_vm14, %v4653_v63, inf  ;;  %v12746_v40 = vsel %vm4732_vm2, %v4650_v16, inf  ;;  %v4659_v6 = vpop.xlane.xlu0 %4658 }
 0x5a1   :  { %15846 = vst [vmem:[#allocation99_spill] sm:$0xff] %v12709_v7  ;;  %15847 = vst [vmem:[#allocation108_spill] sm:$0xff] %v12713_v48  ;;  %v4888_v11 = vmax.f32 %v4886_v46, %v4887_v38  ;;  %v12754_v31 = vsel %vm4735_vm6, %v4659_v6, inf  ;;  %v7308_v46 = vmov inf   ;;  %v12796_v61 = vadd.s32 240, %v12036_v27 }
 0x5a2   :  { %15848 = vst [vmem:[#allocation109_spill] sm:$0xff] %v12717_v8  ;;  %15849 = vst [vmem:[#allocation197_spill] sm:$0xff] %v12720_v25  ;;  %v4656_v20 = vpop.xlane.xlu1 %4655 }
 0x5a3   :  { %15850 = vst [vmem:[#allocation199_spill] sm:$0xff] %v12725_v26  ;;  %15851 = vst [vmem:[#allocation112_spill] sm:$0xff] %v12730_v3  ;;  %v4889_v15 = vrot.slane %v4888_v11, 2  ;;  %v12762_v55 = vsel %vm4734_vm11, %v4656_v20, inf }
 0x5a4   :  { %15852 = vst [vmem:[#allocation200_spill] sm:$0xff] %v12734_v29  ;;  %15853 = vst [vmem:[#allocation202_spill] sm:$0xff] %v12738_v0  ;;  %v4665_v20 = vpop.xlane.xlu0 %4664 }
 0x5a5   :  { %15854 = vst [vmem:[#allocation204_spill] sm:$0xff] %v12742_v12  ;;  %15855 = vst [vmem:[#allocation205_spill] sm:$0xff] %v12746_v40  ;;  %v4890_v56 = vmax.f32 %v4888_v11, %v4889_v15 }
 0x5a6   :  { %vm15856_vm10 = vmmov %vm15808_vm1  ;;  %15858 = vst [vmem:[#allocation207_spill] sm:$0xff] %v12754_v31  ;;  %v4662_v15 = vpop.xlane.xlu1 %4661 }
 0x5a7   :  { %v5424_v13 = vsel %vm15856_vm10, %v12713_v48, inf  ;;  %vm15857_vm4 = vmmov %vm15808_vm1  ;;  %15861 = vst [vmem:[#allocation209_spill] sm:$0xff] %v12762_v55  ;;  %v4891_v48 = vrot.slane %v4890_v56, 1 }
 0x5a8   :  { %v5422_v14 = vsel %vm15857_vm4, %v12717_v8, inf  ;;  %vm15859_vm15 = vmmov %vm15808_vm1  ;;  %49 = vst.msk [vmem:[#allocation5] sm:$0x1] %vm14540_vm3, %v7308_v46  ;;  %v12783_v46 = vsel %vm4736_vm7, %v4662_v15, inf  ;;  %v15878_v15 = vld [vmem:[#allocation27_spill] sm:$0xff] }
 0x5a9   :  { %v5419_v24 = vsel %vm15859_vm15, %v12725_v26, inf  ;;  %vm15860_vm0 = vmmov %vm15808_vm1  ;;  %15869 = vst [vmem:[#allocation118_spill] sm:$0xff] %v12783_v46  ;;  %v12798_v23 = vmax.f32 %v4890_v56, %v4891_v48  ;;  %v15881_v48 = vld [vmem:[#allocation206_spill] sm:$0xff] }
 0x5aa   :  { %v5418_v16 = vsel %vm15860_vm0, %v12730_v3, inf  ;;  %vm15862_vm12 = vmmov %vm15860_vm0  ;;  %v5425_v6 = vmin.f32 %v5419_v24, %v5424_v13  ;;  %15874 = vst [vmem:[#allocation73_spill] sm:$0xff] %v12796_v61  ;;  %v15884_v56 = vld [vmem:[#allocation210_spill] sm:$0xff] }
 0x5ab   :  { %v5421_v30 = vsel %vm15862_vm12, %v12734_v29, inf  ;;  %vm15863_vm8 = vmmov %vm15860_vm0  ;;  %v5423_v22 = vmin.f32 %v5418_v16, %v5422_v14  ;;  %v12790_v16 = vadd.s32 224, %v12036_v27  ;;  %15875 = vst [vmem:[#allocation158_spill] sm:$0xff] %v12798_v23  ;;  %vm4893_vm13 = vcmp.ge.f32.partialorder %v15878_v15, %v12798_v23  ;;  %v15890_v3 = vld [vmem:[#allocation26_spill] sm:$0xff] }
 0x5ac   :  { %v5428_v38 = vsel %vm15863_vm8, %v12742_v12, inf  ;;  %vm15864_vm14 = vmmov %vm15860_vm0  ;;  %vm4896_vm10 = vcmp.ge.f32.partialorder %v15881_v48, %v12798_v23  ;;  %vm4901_vm8 = vcmp.ge.f32.partialorder %v12318_v60, %v12798_v23  ;;  %vm4921_vm3 = vcmp.ge.f32.partialorder %v12617_v10, %v12798_v23 }
 0x5ad   :  { %v5426_v37 = vsel %vm15864_vm14, %v12746_v40, inf  ;;  %vm15865_vm2 = vmmov %vm15860_vm0  ;;  %v12779_v40 = vsel %vm4737_vm5, %v4665_v20, inf  ;;  %v5429_v8 = vmin.f32 %v5421_v30, %v5428_v38  ;;  %15872 = vst [vmem:[#allocation151_spill] sm:$0xff] %v12790_v16  ;;  %vm4924_vm14 = vcmp.ge.f32.partialorder %v12621_v9, %v12798_v23 }
 0x5ae   :  { %v5420_v63 = vsel %vm15865_vm2, %v12738_v0, inf  ;;  %vm15866_vm1 = vmmov %vm15860_vm0  ;;  %15868 = vst [vmem:[#allocation77_spill] sm:$0xff] %v12779_v40  ;;  %vm4922_vm2 = vcmp.ge.f32.partialorder %v12600_v62, %v12798_v23  ;;  %v15889_v0 = vld [vmem:[#allocation198_spill] sm:$0xff] }
 0x5af   :  { %v5432_v11 = vsel %vm15866_vm1, %v12754_v31, inf  ;;  %vm15867_vm6 = vmmov %vm15860_vm0  ;;  %v5427_v13 = vmin.f32 %v5420_v63, %v5426_v37  ;;  %v12793_v31 = vadd.s32 248, %v12036_v27  ;;  %v12808_v63 = vpop.xlane.xlu0 %4670  ;;  %vm4923_vm1 = vcmp.ge.f32.partialorder %v12639_v18, %v12798_v23 }
 0x5b0   :  { %v5430_v12 = vsel %vm15867_vm6, %v12762_v55, inf  ;;  %vm15870_vm9 = vmmov %vm15860_vm0  ;;  %v12800_v20 = vmin.f32 %v5425_v6, %v5432_v11  ;;  %v15885_v6 = vld [vmem:[#allocation89_spill] sm:$0xff]  ;;  %v15887_v11 = vld [vmem:[#allocation92_spill] sm:$0xff]  ;;  %vm4918_vm6 = vcmp.ge.f32.partialorder %v12570_v35, %v12798_v23  ;;  %v13026_v35 = vsel %vm4921_vm3, %v12790_v16, 256 }
 0x5b1   :  { %v5436_v14 = vsel %vm15870_vm9, %v12779_v40, inf  ;;  %vm15871_vm11 = vmmov %vm15860_vm0  ;;  %15873 = vst [vmem:[#allocation130_spill] sm:$0xff] %v12793_v31  ;;  %v12802_v30 = vmin.f32 %v5423_v22, %v5430_v12  ;;  %v15879_v40 = vld [vmem:[#allocation87_spill] sm:$0xff]  ;;  %vm4899_vm0 = vcmp.ge.f32.partialorder %v15884_v56, %v12798_v23  ;;  %vm4900_vm12 = vcmp.ge.f32.partialorder %v15885_v6, %v12798_v23  ;;  %v15886_v22 = vld [vmem:[#allocation38_spill] sm:$0xff] }
 0x5b2   :  { %v5434_v24 = vsel %vm15871_vm11, %v12783_v46, inf  ;;  %v12804_v38 = vmin.f32 %v5429_v8, %v5436_v14  ;;  %vm4894_vm5 = vcmp.ge.f32.partialorder %v15879_v40, %v12798_v23  ;;  %v15880_v46 = vld [vmem:[#allocation125_spill] sm:$0xff]  ;;  %v15882_v12 = vld [vmem:[#allocation31_spill] sm:$0xff]  ;;  %v15883_v8 = vld [vmem:[#allocation208_spill] sm:$0xff]  ;;  %vm4919_vm9 = vcmp.ge.f32.partialorder %v12588_v53, %v12798_v23 }
 0x5b3   :  { %v12806_v37 = vmin.f32 %v5427_v13, %v5434_v24  ;;  %vm4895_vm7 = vcmp.ge.f32.partialorder %v15880_v46, %v12798_v23  ;;  %vm4897_vm4 = vcmp.ge.f32.partialorder %v15882_v12, %v12798_v23  ;;  %vm4898_vm15 = vcmp.ge.f32.partialorder %v15883_v8, %v12798_v23  ;;  %v12834_v13 = vpop.xlane.xlu1 %4667  ;;  %v12852_v14 = vpop.xlane.xlu0 %4676  ;;  %v15888_v55 = vld [vmem:[#allocation201_spill] sm:$0xff] }
 0x5b4   :  { %15876 = vst [vmem:[#allocation110_spill] sm:$0xff] %v12804_v38  ;;  %vm4920_vm11 = vcmp.ge.f32.partialorder %v12579_v39, %v12798_v23  ;;  %v4925_v24 = vsel %vm4893_vm13, %v12036_v27, 256  ;;  %v4926_v29 = vsel %vm4894_vm5, %v15888_v55, 256  ;;  %v4927_v26 = vsel %vm4895_vm7, %v15889_v0, 256  ;;  %v15891_v27 = vld [vmem:[#allocation203_spill] sm:$0xff] }
 0x5b5   :  { %15877 = vst [vmem:[#allocation120_spill] sm:$0xff] %v12806_v37  ;;  %v4928_v37 = vsel %vm4896_vm10, %v15890_v3, 256  ;;  %v4929_v15 = vsel %vm4897_vm4, %v12605_v44, 256  ;;  %v4930_v40 = vsel %vm4898_vm15, %v15891_v27, 256  ;;  %v4931_v46 = vsel %vm4899_vm0, %v12626_v34, 256 }
 0x5b6   :  { %v4932_v48 = vsel %vm4900_vm12, %v12612_v52, 256  ;;  %v4933_v12 = vsel %vm4901_vm8, %v12636_v43, 256  ;;  %vm15892_vm13 = vcmp.ge.f32.partialorder %v15886_v22, %v12798_v23  ;;  %vm15893_vm5 = vcmp.ge.f32.partialorder %v12336_v36, %v12798_v23 }
 0x5b7   :  { %v12894_v38 = vpop.xlane.xlu1 %4673  ;;  %v4934_v8 = vsel %vm15892_vm13, %v12629_v45, 256  ;;  %v4935_v56 = vsel %vm15893_vm5, %v12650_v41, 256  ;;  %vm15894_vm7 = vcmp.ge.f32.partialorder %v15887_v11, %v12798_v23  ;;  %v12928_v52 = vpop.xlane.xlu0 %4682  ;;  %vm15895_vm10 = vcmp.ge.f32.partialorder %v12408_v28, %v12798_v23  ;;  %v15902_v41 = vld [vmem:[#allocation15_spill] sm:$0xff] }
 0x5b8   :  { %v4936_v6 = vsel %vm15894_vm7, %v12647_v42, 256  ;;  %v4937_v60 = vsel %vm15895_vm10, %v12659_v57, 256  ;;  %vm15896_vm4 = vcmp.ge.f32.partialorder %v12394_v19, %v12798_v23  ;;  %vm15897_vm15 = vcmp.ge.f32.partialorder %v12443_v5, %v12798_v23  ;;  %v15900_v42 = vld [vmem:[#allocation101_spill] sm:$0xff] }
 0x5b9   :  { %v4938_v22 = vsel %vm15896_vm4, %v12656_v4, 256  ;;  %v4939_v36 = vsel %vm15897_vm15, %v12667_v2, 256  ;;  %vm15898_vm0 = vcmp.ge.f32.partialorder %v12421_v49, %v12798_v23  ;;  %vm15899_vm12 = vcmp.ge.f32.partialorder %v12486_v58, %v12798_v23  ;;  %v15904_v49 = vld [vmem:[#allocation83_spill] sm:$0xff]  ;;  %v15906_v58 = vld [vmem:[#allocation86_spill] sm:$0xff] }
 0x5ba   :  { %v4940_v11 = vsel %vm15898_vm0, %v12664_v59, 256  ;;  %v12950_v28 = vsel %vm15899_vm12, %v12677_v1, 256  ;;  %vm15901_vm8 = vcmp.ge.f32.partialorder %v12483_v33, %v12798_v23  ;;  %vm15903_vm13 = vcmp.ge.f32.partialorder %v12505_v32, %v12798_v23  ;;  %v15908_v33 = vld [vmem:[#allocation103_spill] sm:$0xff]  ;;  %v15910_v32 = vld [vmem:[#allocation93_spill] sm:$0xff] }
 0x5bb   :  { %v12956_v19 = vsel %vm15901_vm8, %v15900_v42, 256  ;;  %v12962_v5 = vsel %vm15903_vm13, %v15902_v41, 256  ;;  %vm15905_vm5 = vcmp.ge.f32.partialorder %v12499_v21, %v12798_v23  ;;  %vm15907_vm7 = vcmp.ge.f32.partialorder %v12528_v54, %v12798_v23  ;;  %v15912_v21 = vld [vmem:[#allocation71_spill] sm:$0xff]  ;;  %v12994_v54 = vld [vmem:[#allocation4] sm:$0x1] }
 0x5bc   :  { %v12968_v59 = vsel %vm15905_vm5, %v15904_v49, 256  ;;  %v12974_v1 = vsel %vm15907_vm7, %v15906_v58, 256  ;;  %vm15909_vm10 = vcmp.ge.f32.partialorder %v12522_v17, %v12798_v23  ;;  %vm15911_vm4 = vcmp.ge.f32.partialorder %v12547_v50, %v12798_v23  ;;  %15914 = vst [vmem:[#allocation154_spill] sm:$0xff] %v12994_v54  ;;  %v15915_v58 = vld [vmem:[#allocation20_spill] sm:$0xff] }
 0x5bd   :  { %v12980_v42 = vsel %vm15909_vm10, %v15908_v33, 256  ;;  %v12986_v41 = vsel %vm15911_vm4, %v15910_v32, 256  ;;  %vm15913_vm15 = vcmp.ge.f32.partialorder %v12541_v51, %v12798_v23  ;;  %vm15916_vm0 = vcmp.ge.f32.partialorder %v12573_v47, %v12798_v23  ;;  %v15917_v33 = vld [vmem:[#allocation106_spill] sm:$0xff]  ;;  %v13020_v47 = vpop.xlane.xlu1 %4679 }
 0x5be   :  { %v12992_v49 = vsel %vm15913_vm15, %v15912_v21, 256  ;;  %v13000_v17 = vsel %vm15916_vm0, %v15915_v58, 256  ;;  %v13006_v50 = vsel %vm4918_vm6, %v15917_v33, 256  ;;  %v13012_v51 = vsel %vm4919_vm9, %v12709_v7, 256  ;;  %v15918_v21 = vld [vmem:[#allocation88_spill] sm:$0xff] }
 0x5bf   :  { %v13018_v32 = vsel %vm4920_vm11, %v15918_v21, 256  ;;  %v6022_v58 = vld [vmem:[#allocation4] sm:$0x1]  ;;  %v13032_v53 = vsel %vm4922_vm2, %v12720_v25, 256  ;;  %v13038_v39 = vsel %vm4923_vm1, %v12796_v61, 256  ;;  %v13044_v21 = vsel %vm4924_vm14, %v12793_v31, 256  ;;  %v13049_v25 = vpop.xlane.xlu0 %4688 }
 0x5c0   :  { %vm15919_vm3 = vcmask 7168   ;;  %v6023_v9 = vmax.f32 %v12798_v23, %v6022_v58  ;;  %vm15927_vm4 = vcmask 0  }
 0x5c1   :  { %v4957_v10 = vsel %vm15919_vm3, %v4925_v24, 2147483647  ;;  %vm15920_vm6 = vmmov %vm15919_vm3  ;;  %v13062_v33 = vpop.xlane.xlu1 %4685 }
 0x5c2   :  { %v4958_v16 = vsel %vm15920_vm6, %v4926_v29, 2147483647  ;;  %vm15921_vm9 = vmmov %vm15919_vm3  ;;  %6025 = vst.msk [vmem:[#allocation4] sm:$0x1] %vm15927_vm4, %v6023_v9 }
 0x5c3   :  { %v4959_v62 = vsel %vm15921_vm9, %v4927_v26, 2147483647  ;;  %vm15922_vm11 = vmmov %vm15919_vm3 }
 0x5c4   :  { %v4960_v18 = vsel %vm15922_vm11, %v4928_v37, 2147483647  ;;  %vm15923_vm1 = vmmov %vm15919_vm3 }
 0x5c5   :  { %v4961_v61 = vsel %vm15923_vm1, %v4929_v15, 2147483647  ;;  %vm15924_vm12 = vmmov %vm15923_vm1 }
 0x5c6   :  { %v4964_v7 = vsel %vm15924_vm12, %v4930_v40, 2147483647  ;;  %vm4962_vm14 = vcmp.lt.s32.totalorder %v4957_v10, %v4961_v61  ;;  %vm15925_vm13 = vmmov %vm15923_vm1 }
 0x5c7   :  { %vm4965_vm8 = vcmp.lt.s32.totalorder %v4958_v16, %v4964_v7  ;;  %v4967_v24 = vsel %vm15925_vm13, %v4931_v46, 2147483647  ;;  %vm15926_vm5 = vmmov %vm15923_vm1  ;;  %v4963_v26 = vsel %vm4962_vm14, %v4957_v10, %v4961_v61 }
 0x5c8   :  { %v4970_v29 = vsel %vm15926_vm5, %v4932_v48, 2147483647  ;;  %v4966_v31 = vsel %vm4965_vm8, %v4958_v16, %v4964_v7  ;;  %vm4968_vm7 = vcmp.lt.s32.totalorder %v4959_v62, %v4967_v24  ;;  %vm15928_vm15 = vmmov %vm15923_vm1  ;;  %v13066_v16 = vpop.xlane.xlu0 %4694 }
 0x5c9   :  { %vm4971_vm10 = vcmp.lt.s32.totalorder %v4960_v18, %v4970_v29  ;;  %v4969_v54 = vsel %vm4968_vm7, %v4959_v62, %v4967_v24  ;;  %v4973_v15 = vsel %vm15928_vm15, %v4933_v12, 2147483647  ;;  %vm15929_vm0 = vmmov %vm15923_vm1  ;;  %v13076_v24 = vpop.xlane.xlu1 %4691 }
 0x5ca   :  { %v4972_v37 = vsel %vm4971_vm10, %v4960_v18, %v4970_v29  ;;  %v4976_v40 = vsel %vm15929_vm0, %v4934_v8, 2147483647  ;;  %vm4974_vm3 = vcmp.lt.s32.totalorder %v4963_v26, %v4973_v15  ;;  %vm15930_vm9 = vmmov %vm15929_vm0 }
 0x5cb   :  { %vm4977_vm6 = vcmp.lt.s32.totalorder %v4966_v31, %v4976_v40  ;;  %v4979_v46 = vsel %vm15930_vm9, %v4935_v56, 2147483647  ;;  %vm15931_vm11 = vmmov %vm15929_vm0  ;;  %v4975_v61 = vsel %vm4974_vm3, %v4963_v26, %v4973_v15 }
 0x5cc   :  { %v4982_v48 = vsel %vm15931_vm11, %v4936_v6, 2147483647  ;;  %v4978_v7 = vsel %vm4977_vm6, %v4966_v31, %v4976_v40  ;;  %vm4980_vm1 = vcmp.lt.s32.totalorder %v4969_v54, %v4979_v46  ;;  %vm15932_vm14 = vmmov %vm15929_vm0  ;;  %v13082_v26 = vpop.xlane.xlu0 %4700  ;;  %v15941_v40 = vld [vmem:[#allocation174_spill] sm:$0xff] }
 0x5cd   :  { %vm4983_vm12 = vcmp.lt.s32.totalorder %v4972_v37, %v4982_v48  ;;  %v4981_v58 = vsel %vm4980_vm1, %v4969_v54, %v4979_v46  ;;  %v4985_v12 = vsel %vm15932_vm14, %v4937_v60, 2147483647  ;;  %vm15933_vm8 = vmmov %vm15929_vm0  ;;  %v4997_v54 = vsel %vm15929_vm0, %v12950_v28, 2147483647  ;;  %v15944_v46 = vld [vmem:[#allocation43_spill] sm:$0xff] }
 0x5ce   :  { %v4984_v10 = vsel %vm4983_vm12, %v4972_v37, %v4982_v48  ;;  %v4988_v8 = vsel %vm15933_vm8, %v4938_v22, 2147483647  ;;  %vm4986_vm13 = vcmp.lt.s32.totalorder %v4975_v61, %v4985_v12  ;;  %vm15934_vm7 = vmmov %vm15929_vm0 }
 0x5cf   :  { %vm4989_vm5 = vcmp.lt.s32.totalorder %v4978_v7, %v4988_v8  ;;  %v4991_v62 = vsel %vm15934_vm7, %v4939_v36, 2147483647  ;;  %vm15935_vm10 = vmmov %vm15929_vm0  ;;  %v4987_v18 = vsel %vm4986_vm13, %v4975_v61, %v4985_v12  ;;  %v13100_v12 = vpop.xlane.xlu1 %4697 }
 0x5d0   :  { %v4994_v56 = vsel %vm15935_vm10, %v4940_v11, 2147483647  ;;  %v4990_v6 = vsel %vm4989_vm5, %v4978_v7, %v4988_v8  ;;  %vm4992_vm4 = vcmp.lt.s32.totalorder %v4981_v58, %v4991_v62  ;;  %vm15936_vm3 = vmmov %vm15929_vm0  ;;  %vm4998_vm6 = vcmp.lt.s32.totalorder %v4987_v18, %v4997_v54 }
 0x5d1   :  { %vm4995_vm15 = vcmp.lt.s32.totalorder %v4984_v10, %v4994_v56  ;;  %v4993_v31 = vsel %vm4992_vm4, %v4981_v58, %v4991_v62  ;;  %v5000_v60 = vsel %vm15936_vm3, %v12956_v19, 2147483647  ;;  %vm15937_vm11 = vmmov %vm15929_vm0  ;;  %v4999_v11 = vsel %vm4998_vm6, %v4987_v18, %v4997_v54  ;;  %v15950_v62 = vld [vmem:[#allocation176_spill] sm:$0xff] }
 0x5d2   :  { %v4996_v9 = vsel %vm4995_vm15, %v4984_v10, %v4994_v56  ;;  %vm5001_vm9 = vcmp.lt.s32.totalorder %v4990_v6, %v5000_v60  ;;  %v5003_v22 = vsel %vm15937_vm11, %v12962_v5, 2147483647  ;;  %vm15938_vm1 = vmmov %vm15929_vm0  ;;  %vm4739_vm5 = vcmp.gt.f32.partialorder %v15941_v40, 0.0  ;;  %v15954_v54 = vld [vmem:[#allocation84_spill] sm:$0xff] }
 0x5d3   :  { %v5006_v36 = vsel %vm15938_vm1, %v12968_v59, 2147483647  ;;  %v5002_v29 = vsel %vm5001_vm9, %v4990_v6, %v5000_v60  ;;  %vm5004_vm12 = vcmp.lt.s32.totalorder %v4993_v31, %v5003_v22  ;;  %vm15939_vm8 = vmmov %vm15929_vm0  ;;  %v5024_v10 = vsel %vm15938_vm1, %v13006_v50, 2147483647  ;;  %v13108_v50 = vpop.xlane.xlu0 %4706 }
 0x5d4   :  { %vm5007_vm14 = vcmp.lt.s32.totalorder %v4996_v9, %v5006_v36  ;;  %v5005_v28 = vsel %vm5004_vm12, %v4993_v31, %v5003_v22  ;;  %v5009_v19 = vsel %vm15939_vm8, %v12974_v1, 2147483647  ;;  %vm15940_vm13 = vmmov %vm15929_vm0  ;;  %v15945_v1 = vld [vmem:[#allocation168_spill] sm:$0xff] }
 0x5d5   :  { %v5008_v37 = vsel %vm5007_vm14, %v4996_v9, %v5006_v36  ;;  %v5012_v15 = vsel %vm15940_vm13, %v12980_v42, 2147483647  ;;  %vm5010_vm7 = vcmp.lt.s32.totalorder %v4999_v11, %v5009_v19  ;;  %vm15942_vm4 = vmmov %vm15929_vm0  ;;  %vm4741_vm9 = vcmp.gt.f32.partialorder %v15945_v1, 0.0 }
 0x5d6   :  { %vm5013_vm10 = vcmp.lt.s32.totalorder %v5002_v29, %v5012_v15  ;;  %v5015_v59 = vsel %vm15942_vm4, %v12986_v41, 2147483647  ;;  %vm15943_vm15 = vmmov %vm15929_vm0  ;;  %vm4738_vm0 = vcmp.gt.f32.partialorder %v15944_v46, 0.0  ;;  %v5011_v48 = vsel %vm5010_vm7, %v4999_v11, %v5009_v19  ;;  %v15947_v41 = vld [vmem:[#allocation190_spill] sm:$0xff]  ;;  %v4704_v19 = vpop.xlane.xlu1 %4703 }
 0x5d7   :  { %v5018_v5 = vsel %vm15943_vm15, %v12992_v49, 2147483647  ;;  %v5014_v61 = vsel %vm5013_vm10, %v5002_v29, %v5012_v15  ;;  %vm5016_vm3 = vcmp.lt.s32.totalorder %v5005_v28, %v5015_v59  ;;  %vm15946_vm11 = vmmov %vm15938_vm1  ;;  %vm4740_vm12 = vcmp.gt.f32.partialorder %v15947_v41, 0.0 }
 0x5d8   :  { %vm5019_vm6 = vcmp.lt.s32.totalorder %v5008_v37, %v5018_v5  ;;  %v5017_v7 = vsel %vm5016_vm3, %v5005_v28, %v5015_v59  ;;  %v5021_v58 = vsel %vm15946_vm11, %v13000_v17, 2147483647  ;;  %vm5025_vm8 = vcmp.lt.s32.totalorder %v5014_v61, %v5024_v10  ;;  %vm15948_vm13 = vmmov %vm15938_vm1  ;;  %v15951_v17 = vld [vmem:[#allocation192_spill] sm:$0xff] }
 0x5d9   :  { %v5020_v42 = vsel %vm5019_vm6, %v5008_v37, %v5018_v5  ;;  %vm5022_vm14 = vcmp.lt.s32.totalorder %v5011_v48, %v5021_v58  ;;  %v5027_v49 = vsel %vm15948_vm13, %v13012_v51, 2147483647  ;;  %vm15949_vm7 = vmmov %vm15938_vm1  ;;  %vm4743_vm10 = vcmp.gt.f32.partialorder %v15950_v62, 0.0  ;;  %v15959_v37 = vld [vmem:[#allocation12_spill] sm:$0xff]  ;;  %v15962_v5 = vld [vmem:[#allocation35_spill] sm:$0xff] }
 0x5da   :  { %v5030_v8 = vsel %vm15949_vm7, %v13018_v32, 2147483647  ;;  %v5023_v56 = vsel %vm5022_vm14, %v5011_v48, %v5021_v58  ;;  %v5026_v18 = vsel %vm5025_vm8, %v5014_v61, %v5024_v10  ;;  %vm5028_vm4 = vcmp.lt.s32.totalorder %v5017_v7, %v5027_v49  ;;  %vm15952_vm6 = vmmov %vm15938_vm1  ;;  %v15955_v32 = vld [vmem:[#allocation163_spill] sm:$0xff]  ;;  %v15966_v10 = vld [vmem:[#allocation194_spill] sm:$0xff] }
 0x5db   :  { %vm5031_vm15 = vcmp.lt.s32.totalorder %v5020_v42, %v5030_v8  ;;  %vm4742_vm3 = vcmp.gt.f32.partialorder %v15951_v17, 0.0  ;;  %v5029_v6 = vsel %vm5028_vm4, %v5017_v7, %v5027_v49  ;;  %v5033_v9 = vsel %vm15952_vm6, %v13026_v35, 2147483647  ;;  %vm15953_vm11 = vmmov %vm15938_vm1  ;;  %v15958_v35 = vld [vmem:[#allocation132_spill] sm:$0xff] }
 0x5dc   :  { %v5032_v31 = vsel %vm5031_vm15, %v5020_v42, %v5030_v8  ;;  %v5036_v51 = vsel %vm15953_vm11, %v13032_v53, 2147483647  ;;  %vm4745_vm1 = vcmp.gt.f32.partialorder %v15954_v54, 0.0  ;;  %vm5034_vm14 = vcmp.lt.s32.totalorder %v5023_v56, %v5033_v9  ;;  %vm15956_vm7 = vmmov %vm15952_vm6  ;;  %v4713_v42 = vpop.xlane.xlu0 %4712  ;;  %v15967_v8 = vld [vmem:[#allocation110_spill] sm:$0xff] }
 0x5dd   :  { %vm5037_vm8 = vcmp.lt.s32.totalorder %v5026_v18, %v5036_v51  ;;  %v5039_v60 = vsel %vm15956_vm7, %v13038_v39, 2147483647  ;;  %vm15957_vm2 = vmmov %vm15952_vm6  ;;  %v5035_v36 = vsel %vm5034_vm14, %v5023_v56, %v5033_v9  ;;  %vm4747_vm6 = vcmp.gt.f32.partialorder %v15958_v35, 0.0  ;;  %v15960_v39 = vld [vmem:[#allocation75_spill] sm:$0xff] }
 0x5de   :  { %v5042_v22 = vsel %vm15957_vm2, %v13044_v21, 2147483647  ;;  %v5038_v11 = vsel %vm5037_vm8, %v5026_v18, %v5036_v51  ;;  %vm5040_vm4 = vcmp.lt.s32.totalorder %v5029_v6, %v5039_v60  ;;  %v13124_v28 = vsel %vm4739_vm5, %v12808_v63, inf  ;;  %v15969_v18 = vld [vmem:[#allocation21_spill] sm:$0xff] }
 0x5df   :  { %vm5043_vm15 = vcmp.lt.s32.totalorder %v5032_v31, %v5042_v22  ;;  %v5041_v29 = vsel %vm5040_vm4, %v5029_v6, %v5039_v60  ;;  %vm5045_vm11 = vcmp.lt.s32.totalorder %v5035_v36, %v5038_v11  ;;  %vm4746_vm13 = vcmp.gt.f32.partialorder %v15959_v37, 0.0  ;;  %v15972_v60 = vld [vmem:[#allocation41_spill] sm:$0xff] }
 0x5e0   :  { %v5044_v53 = vsel %vm5043_vm15, %v5032_v31, %v5042_v22  ;;  %vm4749_vm7 = vcmp.gt.f32.partialorder %v15960_v39, 0.0  ;;  %v5046_v21 = vsel %vm5045_vm11, %v5035_v36, %v5038_v11  ;;  %vm15961_vm14 = vcmask 7168  }
 0x5e1   :  { %vm5047_vm2 = vcmp.lt.s32.totalorder %v5041_v29, %v5044_v53  ;;  %v5440_v15 = vsel %vm15961_vm14, %v13124_v28, inf  ;;  %v13133_v59 = vsel %vm4738_vm0, %v12834_v13, inf  ;;  %vm4748_vm8 = vcmp.gt.f32.partialorder %v15962_v5, 0.0  ;;  %vm15963_vm5 = vmmov %vm15961_vm14 }
 0x5e2   :  { %v5048_v48 = vsel %vm5047_vm2, %v5041_v29, %v5044_v53  ;;  %v5441_v63 = vmin.f32 %v12800_v20, %v5440_v15  ;;  %v5438_v61 = vsel %vm15963_vm5, %v13133_v59, inf  ;;  %v13142_v7 = vsel %vm4741_vm9, %v12852_v14, inf  ;;  %vm15964_vm0 = vmmov %vm15963_vm5  ;;  %v15965_v20 = vld [vmem:[#allocation145_spill] sm:$0xff]  ;;  %v4710_v29 = vpop.xlane.xlu1 %4709 }
 0x5e3   :  { %vm5049_vm4 = vcmp.lt.s32.totalorder %v5046_v21, %v5048_v48  ;;  %v5439_v58 = vmin.f32 %v12802_v30, %v5438_v61  ;;  %v5444_v13 = vsel %vm15964_vm0, %v13142_v7, inf  ;;  %v13150_v46 = vsel %vm4740_vm12, %v12894_v38, inf  ;;  %vm15968_vm9 = vmmov %vm15964_vm0  ;;  %v15970_v38 = vld [vmem:[#allocation120_spill] sm:$0xff]  ;;  %v15975_v53 = vld [vmem:[#allocation149_spill] sm:$0xff] }
 0x5e4   :  { %vm4751_vm15 = vcmp.gt.f32.partialorder %v15965_v20, 0.0  ;;  %vm4750_vm11 = vcmp.gt.f32.partialorder %v15966_v10, 0.0  ;;  %v5050_v49 = vsel %vm5049_vm4, %v5046_v21, %v5048_v48  ;;  %v5445_v14 = vmin.f32 %v15967_v8, %v5444_v13  ;;  %vm15971_vm12 = vmmov %vm15964_vm0  ;;  %v15977_v48 = vld [vmem:[#allocation165_spill] sm:$0xff]  ;;  %v4719_v13 = vpop.xlane.xlu0 %4718  ;;  %v15978_v8 = vld [vmem:[#allocation28_spill] sm:$0xff] }
 0x5e5   :  { %v5442_v56 = vsel %vm15968_vm9, %v13150_v46, inf  ;;  %v13160_v30 = vsel %vm4743_vm10, %v12928_v52, inf  ;;  %vm4753_vm2 = vcmp.gt.f32.partialorder %v15969_v18, 0.0  ;;  %v5051_v6 = vrot.slane %v5050_v49, 4  ;;  %vm15973_vm5 = vmmov %vm15964_vm0 }
 0x5e6   :  { %v5443_v31 = vmin.f32 %v15970_v38, %v5442_v56  ;;  %v5448_v9 = vsel %vm15971_vm12, %v13160_v30, inf  ;;  %v13169_v51 = vsel %vm4742_vm3, %v13020_v47, inf  ;;  %vm4752_vm14 = vcmp.gt.f32.partialorder %v15972_v60, 0.0  ;;  %vm15976_vm9 = vmmov %vm15964_vm0 }
 0x5e7   :  { %v5449_v22 = vmin.f32 %v5441_v63, %v5448_v9  ;;  %v5446_v52 = vsel %vm15973_vm5, %v13169_v51, inf  ;;  %v13177_v36 = vsel %vm4745_vm1, %v13049_v25, inf  ;;  %vm15974_vm10 = vcmp.gt.f32.partialorder %v15955_v32, 0.0  ;;  %vm15979_vm5 = vmmov %vm15964_vm0 }
 0x5e8   :  { %v13182_v11 = vsel %vm15974_vm10, %v13062_v33, inf  ;;  %vm4755_vm3 = vcmp.gt.f32.partialorder %v15975_v53, 0.0  ;;  %vm5052_vm4 = vcmp.lt.s32.totalorder %v5050_v49, %v5051_v6  ;;  %v5447_v47 = vmin.f32 %v5439_v58, %v5446_v52  ;;  %vm15981_vm10 = vmmov %vm15964_vm0 }
 0x5e9   :  { %v5452_v21 = vsel %vm15964_vm0, %v13177_v36, inf  ;;  %v5450_v15 = vsel %vm15976_vm9, %v13182_v11, inf  ;;  %vm4754_vm12 = vcmp.gt.f32.partialorder %v15977_v48, 0.0  ;;  %v5053_v25 = vsel %vm5052_vm4, %v5050_v49, %v5051_v6  ;;  %vm15986_vm9 = vmmov %vm15964_vm0 }
 0x5ea   :  { %v5453_v63 = vmin.f32 %v5445_v14, %v5452_v21  ;;  %v5451_v61 = vmin.f32 %v5443_v31, %v5450_v15  ;;  %v13193_v33 = vsel %vm4747_vm6, %v13066_v16, inf  ;;  %vm4757_vm1 = vcmp.gt.f32.partialorder %v15978_v8, 0.0  ;;  %vm15980_vm6 = vmmov %vm15964_vm0 }
 0x5eb   :  { %v5054_v58 = vrot.slane %v5053_v25, 2  ;;  %v5456_v56 = vsel %vm15979_vm5, %v13193_v33, inf  ;;  %v13201_v38 = vsel %vm4746_vm13, %v13076_v24, inf  ;;  %v13206_v49 = vsel %vm4749_vm7, %v13082_v26, inf  ;;  %vm15982_vm13 = vmmov %vm15964_vm0 }
 0x5ec   :  { %v5457_v14 = vmin.f32 %v5449_v22, %v5456_v56  ;;  %v5454_v16 = vsel %vm15980_vm6, %v13201_v38, inf  ;;  %v5460_v6 = vsel %vm15981_vm10, %v13206_v49, inf  ;;  %v13215_v31 = vsel %vm4748_vm8, %v13100_v12, inf  ;;  %v4716_v56 = vpop.xlane.xlu1 %4715  ;;  %v15983_v12 = vld [vmem:[#allocation39_spill] sm:$0xff]  ;;  %vm15984_vm8 = vmmov %vm15964_vm0 }
 0x5ed   :  { %vm5055_vm4 = vcmp.lt.s32.totalorder %v5053_v25, %v5054_v58  ;;  %v5455_v24 = vmin.f32 %v5447_v47, %v5454_v16  ;;  %v5461_v9 = vmin.f32 %v5453_v63, %v5460_v6  ;;  %v5458_v52 = vsel %vm15982_vm13, %v13215_v31, inf  ;;  %v4725_v16 = vpop.xlane.xlu0 %4724  ;;  %vm15990_vm5 = vmmov %vm15964_vm0 }
 0x5ee   :  { %v5056_v26 = vsel %vm5055_vm4, %v5053_v25, %v5054_v58  ;;  %v5459_v21 = vmin.f32 %v5451_v61, %v5458_v52  ;;  %v13222_v22 = vsel %vm4751_vm15, %v13108_v50, inf  ;;  %v13226_v15 = vsel %vm4750_vm11, %v4704_v19, inf  ;;  %vm15985_vm15 = vmmov %vm15964_vm0 }
 0x5ef   :  { %vm4756_vm7 = vcmp.gt.f32.partialorder %v15983_v12, 0.0  ;;  %v5057_v23 = vrot.slane %v5056_v26, 1  ;;  %v5464_v47 = vsel %vm15984_vm8, %v13222_v22, inf  ;;  %v5462_v25 = vsel %vm15964_vm0, %v13226_v15, inf  ;;  %vm15993_vm13 = vmmov %vm15964_vm0 }
 0x5f0   :  { %v13235_v63 = vsel %vm4753_vm2, %v4713_v42, inf  ;;  %v5465_v50 = vmin.f32 %v5457_v14, %v5464_v47  ;;  %v5463_v61 = vmin.f32 %v5455_v24, %v5462_v25  ;;  %v13241_v58 = vsel %vm4752_vm14, %v4710_v29, inf  ;;  %vm15988_vm2 = vmmov %vm15964_vm0 }
 0x5f1   :  { %v5468_v19 = vsel %vm15985_vm15, %v13235_v63, inf  ;;  %vm5058_vm11 = vcmp.lt.s32.totalorder %v5056_v26, %v5057_v23  ;;  %v5466_v52 = vsel %vm15986_vm9, %v13241_v58, inf  ;;  %v13247_v18 = vsel %vm4755_vm3, %v4719_v13, inf  ;;  %vm15989_vm14 = vmmov %vm15964_vm0 }
 0x5f2   :  { %v5469_v6 = vmin.f32 %v5461_v9, %v5468_v19  ;;  %v13249_v42 = vsel %vm5058_vm11, %v5056_v26, %v5057_v23  ;;  %v5467_v14 = vmin.f32 %v5459_v21, %v5466_v52  ;;  %v5472_v24 = vsel %vm15988_vm2, %v13247_v18, inf  ;;  %v15992_v52 = vld [vmem:[#allocation196_spill] sm:$0xff]  ;;  %vm15994_vm9 = vmmov %vm15988_vm2 }
 0x5f3   :  { %15987 = vst [vmem:[#allocation172_spill] sm:$0xff] %v13249_v42  ;;  %v13255_v29 = vsel %vm4754_vm12, %v4716_v56, inf  ;;  %v5473_v47 = vmin.f32 %v5465_v50, %v5472_v24  ;;  %v13261_v25 = vsel %vm4757_vm1, %v4725_v16, inf  ;;  %vm5062_vm3 = vcmp.eq.s32.totalorder %v15889_v0, %v13249_v42  ;;  %v4722_v56 = vpop.xlane.xlu1 %4721 }
 0x5f4   :  { %v5470_v9 = vsel %vm15989_vm14, %v13255_v29, inf  ;;  %v5476_v13 = vsel %vm15990_vm5, %v13261_v25, inf  ;;  %vm5063_vm6 = vcmp.eq.s32.totalorder %v15890_v3, %v13249_v42  ;;  %v15991_v26 = vmov 0.0  }
 0x5f5   :  { %v5471_v23 = vmin.f32 %v5463_v61, %v5470_v9  ;;  %v6526_v21 = vsel %vm5062_vm3, 1.0, %v15991_v26  ;;  %v5477_v50 = vmin.f32 %v5469_v6, %v5476_v13  ;;  %v6527_v19 = vsel %vm5063_vm6, 1.0, %v15991_v26 }
 0x5f6   :  { %vm5060_vm12 = vcmp.eq.s32.totalorder %v15992_v52, %v13249_v42  ;;  %vm5061_vm1 = vcmp.eq.s32.totalorder %v15888_v55, %v13249_v42  ;;  %v6947_v61 = vpack.i.bf16 %v6527_v19, %v6526_v21  ;;  %v13279_v53 = vsel %vm4756_vm7, %v4722_v56, inf }
 0x5f7   :  { %v5478_v16 = vmin.f32 %v5471_v23, %v5473_v47  ;;  %v6524_v24 = vsel %vm5060_vm12, 1.0, %v15991_v26  ;;  %v6525_v9 = vsel %vm5061_vm1, 1.0, %v15991_v26  ;;  %vm5068_vm10 = vcmp.eq.s32.totalorder %v12636_v43, %v13249_v42  ;;  %vm16000_vm1 = vmmov %vm15990_vm5 }
 0x5f8   :  { %v6942_v8 = vpack.i.bf16 %v6525_v9, %v6524_v24  ;;  %vm5069_vm4 = vcmp.eq.s32.totalorder %v12629_v45, %v13249_v42  ;;  %6948 = vperm.xlu0 %6941, %v6947_v61   ;;  %v5474_v6 = vsel %vm15993_vm13, %v13279_v53, inf  ;;  %v6532_v47 = vsel %vm5068_vm10, 1.0, %v15991_v26  ;;  %vm16001_vm10 = vmmov %vm16000_vm1 }
 0x5f9   :  { %v6533_v23 = vsel %vm5069_vm4, 1.0, %v15991_v26  ;;  %vm5064_vm8 = vcmp.eq.s32.totalorder %v12605_v44, %v13249_v42  ;;  %v5475_v13 = vmin.f32 %v5467_v14, %v5474_v6  ;;  %vm5065_vm7 = vcmp.eq.s32.totalorder %v15891_v27, %v13249_v42  ;;  %v15995_v6 = vld [vmem:[#allocation78_spill] sm:$0xff] }
 0x5fa   :  { %6943 = vperm.xlu1 %6940, %v6942_v8   ;;  %v6962_v21 = vpack.i.bf16 %v6533_v23, %v6532_v47  ;;  %v6528_v56 = vsel %vm5064_vm8, 1.0, %v15991_v26  ;;  %v6529_v19 = vsel %vm5065_vm7, 1.0, %v15991_v26  ;;  %vm5072_vm0 = vcmp.eq.s32.totalorder %v12659_v57, %v13249_v42 }
 0x5fb   :  { %vm5073_vm15 = vcmp.eq.s32.totalorder %v12656_v4, %v13249_v42  ;;  %vm5066_vm11 = vcmp.eq.s32.totalorder %v12626_v34, %v13249_v42  ;;  %v5479_v61 = vmin.f32 %v5475_v13, %v5477_v50  ;;  %v6952_v8 = vpack.i.bf16 %v6529_v19, %v6528_v56  ;;  %v15996_v50 = vld [vmem:[#allocation94_spill] sm:$0xff]  ;;  %v15998_v56 = vld [vmem:[#allocation160_spill] sm:$0xff] }
 0x5fc   :  { %v6536_v14 = vsel %vm5072_vm0, 1.0, %v15991_v26  ;;  %v6537_v24 = vsel %vm5073_vm15, 1.0, %v15991_v26  ;;  %v6134_v9 = vsel %vm15994_vm9, %v15941_v40, 0.0  ;;  %6963 = vperm.xlu0 %6941, %v6962_v21   ;;  %vm5067_vm2 = vcmp.eq.s32.totalorder %v15995_v6, %v13249_v42  ;;  %v15997_v13 = vld [vmem:[#allocation22_spill] sm:$0xff] }
 0x5fd   :  { %v6530_v47 = vsel %vm5066_vm11, 1.0, %v15991_v26  ;;  %v5480_v23 = vmin.f32 %v5478_v16, %v5479_v61  ;;  %v6531_v12 = vsel %vm5067_vm2, 1.0, %v15991_v26  ;;  %vm5070_vm14 = vcmp.eq.s32.totalorder %v15996_v50, %v13249_v42 }
 0x5fe   :  { %6953 = vperm.xlu1 %6940, %v6952_v8   ;;  %vm5071_vm3 = vcmp.eq.s32.totalorder %v15997_v13, %v13249_v42  ;;  %v6135_v19 = vadd.f32 %v6134_v9, %v15998_v56  ;;  %v6972_v48 = vpack.i.bf16 %v6537_v24, %v6536_v14  ;;  %v6957_v21 = vpack.i.bf16 %v6531_v12, %v6530_v47  ;;  %v15999_v8 = vld [vmem:[#allocation97_spill] sm:$0xff] }
 0x5ff   :  { %v5481_v40 = vrot.slane %v5480_v23, 4  ;;  %v6534_v60 = vsel %vm5070_vm14, 1.0, %v15991_v26  ;;  %v6535_v20 = vsel %vm5071_vm3, 1.0, %v15991_v26  ;;  %v6136_v16 = vsel %vm15990_vm5, %v15947_v41, 0.0 }
 0x600   :  { %6973 = vperm.xlu0 %6941, %v6972_v48   ;;  %vm5074_vm6 = vcmp.eq.s32.totalorder %v12667_v2, %v13249_v42  ;;  %vm5075_vm12 = vcmp.eq.s32.totalorder %v15999_v8, %v13249_v42  ;;  %v6137_v9 = vadd.f32 %v6136_v16, %v6135_v19  ;;  %v6967_v24 = vpack.i.bf16 %v6535_v20, %v6534_v60  ;;  %v16002_v20 = vld [vmem:[#allocation112_spill] sm:$0xff]  ;;  %v16003_v60 = vld [vmem:[#allocation199_spill] sm:$0xff]  ;;  %v16023_v42 = vld [vmem:[#allocation101_spill] sm:$0xff] }
 0x601   :  { %v5482_v61 = vmin.f32 %v5480_v23, %v5481_v40  ;;  %v6538_v48 = vsel %vm5074_vm6, 1.0, %v15991_v26  ;;  %v6539_v12 = vsel %vm5075_vm12, 1.0, %v15991_v26  ;;  %v6138_v47 = vsel %vm16000_vm1, %v15945_v1, 0.0  ;;  %v16004_v1 = vld [vmem:[#allocation202_spill] sm:$0xff]  ;;  %v16005_v16 = vld [vmem:[#allocation200_spill] sm:$0xff] }
 0x602   :  { %6958 = vperm.xlu1 %6940, %v6957_v21   ;;  %v6139_v41 = vadd.f32 %v6138_v47, %v6137_v9  ;;  %v6140_v23 = vsel %vm16001_vm10, %v15951_v17, 0.0  ;;  %v6977_v21 = vpack.i.bf16 %v6539_v12, %v6538_v48  ;;  %v16006_v17 = vld [vmem:[#allocation109_spill] sm:$0xff]  ;;  %v16011_v48 = vld [vmem:[#allocation207_spill] sm:$0xff]  ;;  %v16012_v12 = vld [vmem:[#allocation118_spill] sm:$0xff] }
 0x603   :  { %v5483_v14 = vrot.slane %v5482_v61, 2  ;;  %v16008_v9 = vld [vmem:[#allocation205_spill] sm:$0xff] }
 0x604   :  { %v13330_v19 = vadd.f32 %v6140_v23, %v6139_v41  ;;  %v16013_v47 = vld [vmem:[#allocation77_spill] sm:$0xff] }
 0x605   :  { %v5484_v56 = vmin.f32 %v5482_v61, %v5483_v14  ;;  %v16007_v61 = vld [vmem:[#allocation108_spill] sm:$0xff] }
 0x606   :  { %6968 = vperm.xlu1 %6940, %v6967_v24   ;;  %v16009_v14 = vld [vmem:[#allocation204_spill] sm:$0xff]  ;;  %v16010_v24 = vld [vmem:[#allocation209_spill] sm:$0xff] }
 0x607   :  { %v5485_v40 = vrot.slane %v5484_v56, 1 }
 0x609   :  { %v13328_v10 = vmin.f32 %v5484_v56, %v5485_v40 }
 0x60a   :  { %6978 = vperm.xlu1 %6940, %v6977_v21  }
 0x60b   :  { %vm5487_vm4 = vcmp.le.f32.partialorder %v16002_v20, %v13328_v10  ;;  %vm5488_vm13 = vcmp.le.f32.partialorder %v16003_v60, %v13328_v10  ;;  %vm5489_vm8 = vcmp.le.f32.partialorder %v16004_v1, %v13328_v10  ;;  %vm5490_vm7 = vcmp.le.f32.partialorder %v16005_v16, %v13328_v10 }
 0x60c   :  { %vm5491_vm0 = vcmp.le.f32.partialorder %v16006_v17, %v13328_v10  ;;  %vm5492_vm15 = vcmp.le.f32.partialorder %v16007_v61, %v13328_v10  ;;  %vm5493_vm11 = vcmp.le.f32.partialorder %v16008_v9, %v13328_v10  ;;  %vm5494_vm9 = vcmp.le.f32.partialorder %v16009_v14, %v13328_v10 }
 0x60d   :  { %vm5495_vm2 = vcmp.le.f32.partialorder %v16010_v24, %v13328_v10  ;;  %vm5512_vm5 = vcmp.le.f32.partialorder %v13222_v22, %v13328_v10  ;;  %vm5513_vm6 = vcmp.le.f32.partialorder %v13241_v58, %v13328_v10  ;;  %vm5514_vm12 = vcmp.le.f32.partialorder %v13235_v63, %v13328_v10 }
 0x60e   :  { %vm5515_vm1 = vcmp.le.f32.partialorder %v13255_v29, %v13328_v10  ;;  %vm5516_vm10 = vcmp.le.f32.partialorder %v13247_v18, %v13328_v10  ;;  %vm5517_vm14 = vcmp.le.f32.partialorder %v13279_v53, %v13328_v10  ;;  %vm5518_vm3 = vcmp.le.f32.partialorder %v13261_v25, %v13328_v10 }
 0x60f   :  { %v5519_v56 = vsel %vm5487_vm4, %v15992_v52, 256  ;;  %v5520_v41 = vsel %vm5488_vm13, %v15888_v55, 256  ;;  %v5521_v23 = vsel %vm5489_vm8, %v15889_v0, 256  ;;  %v5522_v40 = vsel %vm5490_vm7, %v15890_v3, 256 }
 0x610   :  { %v5523_v21 = vsel %vm5491_vm0, %v12605_v44, 256  ;;  %v5524_v20 = vsel %vm5492_vm15, %v15891_v27, 256  ;;  %v5525_v60 = vsel %vm5493_vm11, %v12626_v34, 256  ;;  %v5526_v1 = vsel %vm5494_vm9, %v15995_v6, 256 }
 0x611   :  { %v5527_v16 = vsel %vm5495_vm2, %v12636_v43, 256  ;;  %vm16014_vm4 = vcmp.le.f32.partialorder %v16011_v48, %v13328_v10  ;;  %vm16015_vm13 = vcmp.le.f32.partialorder %v16012_v12, %v13328_v10  ;;  %vm16016_vm8 = vcmp.le.f32.partialorder %v16013_v47, %v13328_v10  ;;  %v16021_v47 = vld [vmem:[#allocation85_spill] sm:$0xff] }
 0x612   :  { %v5528_v17 = vsel %vm16014_vm4, %v12629_v45, 256  ;;  %v5529_v61 = vsel %vm16015_vm13, %v15996_v50, 256  ;;  %v5530_v9 = vsel %vm16016_vm8, %v15997_v13, 256  ;;  %vm16017_vm7 = vcmp.le.f32.partialorder %v13133_v59, %v13328_v10 }
 0x613   :  { %v5531_v14 = vsel %vm16017_vm7, %v12659_v57, 256  ;;  %vm16018_vm0 = vcmp.le.f32.partialorder %v13124_v28, %v13328_v10  ;;  %vm16019_vm15 = vcmp.le.f32.partialorder %v13150_v46, %v13328_v10  ;;  %vm16020_vm11 = vcmp.le.f32.partialorder %v13142_v7, %v13328_v10 }
 0x614   :  { %v5532_v24 = vsel %vm16018_vm0, %v12656_v4, 256  ;;  %v5533_v48 = vsel %vm16019_vm15, %v12667_v2, 256  ;;  %v5534_v12 = vsel %vm16020_vm11, %v15999_v8, 256  ;;  %vm16022_vm9 = vcmp.le.f32.partialorder %v13169_v51, %v13328_v10  ;;  %v16025_v4 = vld [vmem:[#allocation15_spill] sm:$0xff]  ;;  %v16029_v8 = vld [vmem:[#allocation86_spill] sm:$0xff] }
 0x615   :  { %v5535_v59 = vsel %vm16022_vm9, %v16021_v47, 256  ;;  %vm16024_vm2 = vcmp.le.f32.partialorder %v13160_v30, %v13328_v10  ;;  %vm16026_vm4 = vcmp.le.f32.partialorder %v13182_v11, %v13328_v10  ;;  %v16027_v2 = vld [vmem:[#allocation83_spill] sm:$0xff]  ;;  %vm16028_vm13 = vcmp.le.f32.partialorder %v13177_v36, %v13328_v10  ;;  %v16033_v11 = vld [vmem:[#allocation93_spill] sm:$0xff] }
 0x616   :  { %v5536_v28 = vsel %vm16024_vm2, %v16023_v42, 256  ;;  %v13472_v46 = vsel %vm16026_vm4, %v16025_v4, 256  ;;  %v13478_v7 = vsel %vm16028_vm13, %v16027_v2, 256  ;;  %vm16030_vm8 = vcmp.le.f32.partialorder %v13201_v38, %v13328_v10  ;;  %v16031_v30 = vld [vmem:[#allocation103_spill] sm:$0xff]  ;;  %v13504_v38 = vld [vmem:[#allocation5] sm:$0x1] }
 0x617   :  { %v13484_v51 = vsel %vm16030_vm8, %v16029_v8, 256  ;;  %vm16032_vm7 = vcmp.le.f32.partialorder %v13193_v33, %v13328_v10  ;;  %vm16034_vm0 = vcmp.le.f32.partialorder %v13215_v31, %v13328_v10  ;;  %v16035_v36 = vld [vmem:[#allocation71_spill] sm:$0xff]  ;;  %vm16036_vm15 = vcmp.le.f32.partialorder %v13206_v49, %v13328_v10  ;;  %16037 = vst [vmem:[#allocation29_spill] sm:$0xff] %v13504_v38  ;;  %v16038_v8 = vld [vmem:[#allocation20_spill] sm:$0xff] }
 0x618   :  { %v13490_v42 = vsel %vm16032_vm7, %v16031_v30, 256  ;;  %v13496_v4 = vsel %vm16034_vm0, %v16033_v11, 256  ;;  %v13502_v2 = vsel %vm16036_vm15, %v16035_v36, 256  ;;  %vm16039_vm11 = vcmp.le.f32.partialorder %v13226_v15, %v13328_v10  ;;  %v16040_v30 = vld [vmem:[#allocation106_spill] sm:$0xff]  ;;  %v16041_v11 = vld [vmem:[#allocation99_spill] sm:$0xff]  ;;  %v16042_v36 = vld [vmem:[#allocation88_spill] sm:$0xff] }
 0x619   :  { %v13510_v33 = vsel %vm16039_vm11, %v16038_v8, 256  ;;  %v13516_v31 = vsel %vm5512_vm5, %v16040_v30, 256  ;;  %v13522_v49 = vsel %vm5513_vm6, %v16041_v11, 256  ;;  %v13528_v47 = vsel %vm5514_vm12, %v16042_v36, 256  ;;  %v6036_v15 = vld [vmem:[#allocation5] sm:$0x1] }
 0x61a   :  { %v16043_v8 = vld [vmem:[#allocation151_spill] sm:$0xff]  ;;  %v16044_v30 = vld [vmem:[#allocation197_spill] sm:$0xff]  ;;  %v16046_v36 = vld [vmem:[#allocation130_spill] sm:$0xff]  ;;  %vm16047_vm5 = vcmask 7168   ;;  %v6037_v57 = vmin.f32 %v13328_v10, %v6036_v15  ;;  %vm16055_vm0 = vcmask 0  }
 0x61b   :  { %v13534_v22 = vsel %vm5515_vm1, %v16043_v8, 256  ;;  %v13540_v58 = vsel %vm5516_vm10, %v16044_v30, 256  ;;  %v16045_v11 = vld [vmem:[#allocation73_spill] sm:$0xff]  ;;  %v13552_v13 = vsel %vm5518_vm3, %v16046_v36, 256  ;;  %v5551_v29 = vsel %vm16047_vm5, %v5519_v56, 2147483647  ;;  %vm16048_vm6 = vmmov %vm16047_vm5 }
 0x61c   :  { %v13546_v63 = vsel %vm5517_vm14, %v16045_v11, 256  ;;  %v5552_v8 = vsel %vm16048_vm6, %v5520_v41, 2147483647  ;;  %vm16049_vm12 = vmmov %vm16047_vm5  ;;  %vm6027_vm1 = vcmp.lt.f32.partialorder %v13328_v10, %v13504_v38  ;;  %6038 = vst.msk [vmem:[#allocation5] sm:$0x1] %vm16055_vm0, %v6037_v57 }
 0x61d   :  { %v5553_v18 = vsel %vm16049_vm12, %v5521_v23, 2147483647  ;;  %vm16050_vm10 = vmmov %vm16047_vm5 }
 0x61e   :  { %v5554_v30 = vsel %vm16050_vm10, %v5522_v40, 2147483647  ;;  %vm16051_vm9 = vmmov %vm16047_vm5 }
 0x61f   :  { %v5555_v53 = vsel %vm16051_vm9, %v5523_v21, 2147483647  ;;  %vm16052_vm14 = vmmov %vm16047_vm5 }
 0x620   :  { %v5558_v11 = vsel %vm16052_vm14, %v5524_v20, 2147483647  ;;  %vm5556_vm2 = vcmp.lt.s32.totalorder %v5551_v29, %v5555_v53  ;;  %vm16053_vm4 = vmmov %vm16047_vm5 }
 0x621   :  { %vm5559_vm3 = vcmp.lt.s32.totalorder %v5552_v8, %v5558_v11  ;;  %v5561_v25 = vsel %vm16053_vm4, %v5525_v60, 2147483647  ;;  %vm16054_vm13 = vmmov %vm16053_vm4  ;;  %v5557_v41 = vsel %vm5556_vm2, %v5551_v29, %v5555_v53 }
 0x622   :  { %v5564_v56 = vsel %vm16054_vm13, %v5526_v1, 2147483647  ;;  %v5560_v36 = vsel %vm5559_vm3, %v5552_v8, %v5558_v11  ;;  %vm5562_vm8 = vcmp.lt.s32.totalorder %v5553_v18, %v5561_v25  ;;  %vm16056_vm15 = vmmov %vm16053_vm4 }
 0x623   :  { %vm5565_vm7 = vcmp.lt.s32.totalorder %v5554_v30, %v5564_v56  ;;  %v5563_v23 = vsel %vm5562_vm8, %v5553_v18, %v5561_v25  ;;  %v5567_v21 = vsel %vm16056_vm15, %v5527_v16, 2147483647  ;;  %vm16057_vm11 = vmmov %vm16053_vm4 }
 0x624   :  { %v5566_v40 = vsel %vm5565_vm7, %v5554_v30, %v5564_v56  ;;  %v5570_v20 = vsel %vm16057_vm11, %v5528_v17, 2147483647  ;;  %vm5568_vm5 = vcmp.lt.s32.totalorder %v5557_v41, %v5567_v21  ;;  %vm16058_vm12 = vmmov %vm16053_vm4 }
 0x625   :  { %vm5571_vm6 = vcmp.lt.s32.totalorder %v5560_v36, %v5570_v20  ;;  %v5573_v15 = vsel %vm16058_vm12, %v5529_v61, 2147483647  ;;  %vm16059_vm10 = vmmov %vm16053_vm4  ;;  %v5569_v38 = vsel %vm5568_vm5, %v5557_v41, %v5567_v21 }
 0x626   :  { %v5576_v60 = vsel %vm16059_vm10, %v5530_v9, 2147483647  ;;  %v5572_v1 = vsel %vm5571_vm6, %v5560_v36, %v5570_v20  ;;  %vm5574_vm9 = vcmp.lt.s32.totalorder %v5563_v23, %v5573_v15  ;;  %vm16060_vm2 = vmmov %vm16053_vm4 }
 0x627   :  { %vm5577_vm14 = vcmp.lt.s32.totalorder %v5566_v40, %v5576_v60  ;;  %v5575_v8 = vsel %vm5574_vm9, %v5563_v23, %v5573_v15  ;;  %v5579_v57 = vsel %vm16060_vm2, %v5531_v14, 2147483647  ;;  %vm16061_vm3 = vmmov %vm16060_vm2 }
 0x628   :  { %v5578_v11 = vsel %vm5577_vm14, %v5566_v40, %v5576_v60  ;;  %v5582_v30 = vsel %vm16061_vm3, %v5532_v24, 2147483647  ;;  %vm5580_vm4 = vcmp.lt.s32.totalorder %v5569_v38, %v5579_v57  ;;  %vm16062_vm8 = vmmov %vm16060_vm2  ;;  %v5603_v56 = vsel %vm16061_vm3, %v13484_v51, 2147483647 }
 0x629   :  { %vm5583_vm13 = vcmp.lt.s32.totalorder %v5572_v1, %v5582_v30  ;;  %v5585_v16 = vsel %vm16062_vm8, %v5533_v48, 2147483647  ;;  %vm16063_vm7 = vmmov %vm16060_vm2  ;;  %v5581_v29 = vsel %vm5580_vm4, %v5569_v38, %v5579_v57 }
 0x62a   :  { %v5588_v17 = vsel %vm16063_vm7, %v5534_v12, 2147483647  ;;  %v5584_v61 = vsel %vm5583_vm13, %v5572_v1, %v5582_v30  ;;  %vm5586_vm0 = vcmp.lt.s32.totalorder %v5575_v8, %v5585_v16  ;;  %vm16064_vm11 = vmmov %vm16060_vm2 }
 0x62b   :  { %vm5589_vm15 = vcmp.lt.s32.totalorder %v5578_v11, %v5588_v17  ;;  %v5587_v9 = vsel %vm5586_vm0, %v5575_v8, %v5585_v16  ;;  %v5591_v18 = vsel %vm16064_vm11, %v5535_v59, 2147483647  ;;  %vm16065_vm5 = vmmov %vm16060_vm2 }
 0x62c   :  { %v5590_v36 = vsel %vm5589_vm15, %v5578_v11, %v5588_v17  ;;  %v5594_v53 = vsel %vm16065_vm5, %v5536_v28, 2147483647  ;;  %vm5592_vm6 = vcmp.lt.s32.totalorder %v5581_v29, %v5591_v18  ;;  %vm16066_vm10 = vmmov %vm16060_vm2 }
 0x62d   :  { %vm5595_vm12 = vcmp.lt.s32.totalorder %v5584_v61, %v5594_v53  ;;  %v5597_v14 = vsel %vm16066_vm10, %v13472_v46, 2147483647  ;;  %vm16067_vm9 = vmmov %vm16060_vm2  ;;  %v5593_v48 = vsel %vm5592_vm6, %v5581_v29, %v5591_v18 }
 0x62e   :  { %v5600_v24 = vsel %vm16067_vm9, %v13478_v7, 2147483647  ;;  %v5596_v12 = vsel %vm5595_vm12, %v5584_v61, %v5594_v53  ;;  %vm5598_vm14 = vcmp.lt.s32.totalorder %v5587_v9, %v5597_v14  ;;  %vm16068_vm4 = vmmov %vm16061_vm3  ;;  %vm5604_vm13 = vcmp.lt.s32.totalorder %v5593_v48, %v5603_v56 }
 0x62f   :  { %vm5601_vm2 = vcmp.lt.s32.totalorder %v5590_v36, %v5600_v24  ;;  %v5599_v38 = vsel %vm5598_vm14, %v5587_v9, %v5597_v14  ;;  %v5606_v59 = vsel %vm16068_vm4, %v13490_v42, 2147483647  ;;  %vm16069_vm7 = vmmov %vm16061_vm3  ;;  %v5605_v7 = vsel %vm5604_vm13, %v5593_v48, %v5603_v56 }
 0x630   :  { %v5602_v25 = vsel %vm5601_vm2, %v5590_v36, %v5600_v24  ;;  %vm5607_vm8 = vcmp.lt.s32.totalorder %v5596_v12, %v5606_v59  ;;  %v5609_v28 = vsel %vm16069_vm7, %v13496_v4, 2147483647  ;;  %vm16070_vm0 = vmmov %vm16061_vm3 }
 0x631   :  { %v5612_v46 = vsel %vm16070_vm0, %v13502_v2, 2147483647  ;;  %v5608_v41 = vsel %vm5607_vm8, %v5596_v12, %v5606_v59  ;;  %vm5610_vm15 = vcmp.lt.s32.totalorder %v5599_v38, %v5609_v28  ;;  %vm16071_vm5 = vmmov %vm16070_vm0 }
 0x632   :  { %vm5613_vm11 = vcmp.lt.s32.totalorder %v5602_v25, %v5612_v46  ;;  %v5611_v23 = vsel %vm5610_vm15, %v5599_v38, %v5609_v28  ;;  %v5615_v51 = vsel %vm16071_vm5, %v13510_v33, 2147483647  ;;  %vm16072_vm6 = vmmov %vm16070_vm0 }
 0x633   :  { %v5614_v40 = vsel %vm5613_vm11, %v5602_v25, %v5612_v46  ;;  %v5618_v42 = vsel %vm16072_vm6, %v13516_v31, 2147483647  ;;  %vm5616_vm12 = vcmp.lt.s32.totalorder %v5605_v7, %v5615_v51  ;;  %vm16073_vm9 = vmmov %vm16070_vm0 }
 0x634   :  { %vm5619_vm10 = vcmp.lt.s32.totalorder %v5608_v41, %v5618_v42  ;;  %v5621_v4 = vsel %vm16073_vm9, %v13522_v49, 2147483647  ;;  %vm16074_vm14 = vmmov %vm16070_vm0  ;;  %v5617_v21 = vsel %vm5616_vm12, %v5605_v7, %v5615_v51  ;;  %v5633_v49 = vsel %vm16070_vm0, %v13546_v63, 2147483647 }
 0x635   :  { %v5624_v2 = vsel %vm16074_vm14, %v13528_v47, 2147483647  ;;  %v5620_v20 = vsel %vm5619_vm10, %v5608_v41, %v5618_v42  ;;  %vm5622_vm2 = vcmp.lt.s32.totalorder %v5611_v23, %v5621_v4  ;;  %vm16075_vm4 = vmmov %vm16070_vm0  ;;  %v16092_v42 = vld [vmem:[#allocation82_spill] sm:$0xff] }
 0x636   :  { %vm5625_vm3 = vcmp.lt.s32.totalorder %v5614_v40, %v5624_v2  ;;  %v5623_v15 = vsel %vm5622_vm2, %v5611_v23, %v5621_v4  ;;  %v5627_v33 = vsel %vm16075_vm4, %v13534_v22, 2147483647  ;;  %vm16076_vm13 = vmmov %vm16070_vm0  ;;  %v16090_v23 = vld [vmem:[#allocation41_spill] sm:$0xff] }
 0x637   :  { %v5626_v60 = vsel %vm5625_vm3, %v5614_v40, %v5624_v2  ;;  %v5630_v31 = vsel %vm16076_vm13, %v13540_v58, 2147483647  ;;  %vm5628_vm8 = vcmp.lt.s32.totalorder %v5617_v21, %v5627_v33  ;;  %vm16077_vm15 = vmmov %vm16070_vm0  ;;  %vm5634_vm11 = vcmp.lt.s32.totalorder %v5623_v15, %v5633_v49  ;;  %v16093_v2 = vld [vmem:[#allocation80_spill] sm:$0xff] }
 0x638   :  { %vm5631_vm7 = vcmp.lt.s32.totalorder %v5620_v20, %v5630_v31  ;;  %v5636_v47 = vsel %vm16077_vm15, %v13552_v13, 2147483647  ;;  %v5629_v1 = vsel %vm5628_vm8, %v5617_v21, %v5627_v33  ;;  %v5635_v11 = vsel %vm5634_vm11, %v5623_v15, %v5633_v49  ;;  %vm16078_vm10 = vmmov %vm16070_vm0  ;;  %v16094_v21 = vld [vmem:[#allocation21_spill] sm:$0xff] }
 0x639   :  { %v5632_v8 = vsel %vm5631_vm7, %v5620_v20, %v5630_v31  ;;  %vm5637_vm5 = vcmp.lt.s32.totalorder %v5626_v60, %v5636_v47  ;;  %v6142_v22 = vsel %vm16078_vm10, %v15950_v62, 0.0  ;;  %vm16079_vm14 = vmmov %vm16070_vm0  ;;  %v16096_v33 = vld [vmem:[#allocation85_spill] sm:$0xff] }
 0x63a   :  { %v5638_v57 = vsel %vm5637_vm5, %v5626_v60, %v5636_v47  ;;  %vm5639_vm6 = vcmp.lt.s32.totalorder %v5629_v1, %v5632_v8  ;;  %v6143_v16 = vadd.f32 %v6142_v22, %v13330_v19  ;;  %v6144_v13 = vsel %vm16079_vm14, %v15955_v32, 0.0  ;;  %vm16080_vm3 = vmmov %vm16070_vm0  ;;  %v16097_v31 = vld [vmem:[#allocation165_spill] sm:$0xff] }
 0x63b   :  { %v5640_v30 = vsel %vm5639_vm6, %v5629_v1, %v5632_v8  ;;  %vm5641_vm12 = vcmp.lt.s32.totalorder %v5635_v11, %v5638_v57  ;;  %v6146_v36 = vsel %vm16080_vm3, %v15954_v54, 0.0  ;;  %vm16081_vm13 = vmmov %vm16070_vm0  ;;  %v16099_v1 = vld [vmem:[#allocation97_spill] sm:$0xff] }
 0x63c   :  { %v5642_v58 = vsel %vm5641_vm12, %v5635_v11, %v5638_v57  ;;  %v6145_v29 = vadd.f32 %v6144_v13, %v6143_v16  ;;  %v6148_v62 = vsel %vm16081_vm13, %v15959_v37, 0.0  ;;  %vm16082_vm11 = vmmov %vm16080_vm3  ;;  %v16100_v57 = vld [vmem:[#allocation15_spill] sm:$0xff]  ;;  %v16101_v22 = vld [vmem:[#allocation101_spill] sm:$0xff] }
 0x63d   :  { %vm5643_vm9 = vcmp.lt.s32.totalorder %v5640_v30, %v5642_v58  ;;  %v6150_v54 = vsel %vm16082_vm11, %v15958_v35, 0.0  ;;  %vm16083_vm12 = vmmov %vm16080_vm3  ;;  %v16104_v13 = vld [vmem:[#allocation86_spill] sm:$0xff] }
 0x63e   :  { %v5644_v63 = vsel %vm5643_vm9, %v5640_v30, %v5642_v58  ;;  %v6147_v18 = vadd.f32 %v6146_v36, %v6145_v29  ;;  %vm16084_vm14 = vmmov %vm16080_vm3  ;;  %v16102_v58 = vld [vmem:[#allocation149_spill] sm:$0xff] }
 0x63f   :  { %v5645_v17 = vrot.slane %v5644_v63, 4  ;;  %vm16091_vm11 = vmmov %vm16080_vm3 }
 0x640   :  { %v6149_v14 = vadd.f32 %v6148_v62, %v6147_v18  ;;  %v6160_v40 = vsel %vm16091_vm11, %v16090_v23, 0.0  ;;  %v16121_v23 = vmov 0  }
 0x641   :  { %vm5646_vm2 = vcmp.lt.s32.totalorder %v5644_v63, %v5645_v17 }
 0x642   :  { %v5647_v61 = vsel %vm5646_vm2, %v5644_v63, %v5645_v17  ;;  %v6151_v12 = vadd.f32 %v6150_v54, %v6149_v14  ;;  %v16109_v14 = vld [vmem:[#allocation103_spill] sm:$0xff]  ;;  %v16110_v54 = vld [vmem:[#allocation28_spill] sm:$0xff] }
 0x643   :  { %v5648_v9 = vrot.slane %v5647_v61, 2 }
 0x645   :  { %vm5649_vm4 = vcmp.lt.s32.totalorder %v5647_v61, %v5648_v9 }
 0x646   :  { %v5650_v53 = vsel %vm5649_vm4, %v5647_v61, %v5648_v9  ;;  %v16105_v61 = vld [vmem:[#allocation83_spill] sm:$0xff] }
 0x647   :  { %v5651_v19 = vrot.slane %v5650_v53, 1  ;;  %v16106_v9 = vld [vmem:[#allocation39_spill] sm:$0xff] }
 0x649   :  { %vm5652_vm8 = vcmp.lt.s32.totalorder %v5650_v53, %v5651_v19 }
 0x64a   :  { %v13613_v24 = vsel %vm5652_vm8, %v5650_v53, %v5651_v19  ;;  %v16108_v53 = vld [vmem:[#allocation93_spill] sm:$0xff] }
 0x64b   :  { %vm5656_vm7 = vcmp.eq.s32.totalorder %v15889_v0, %v13613_v24  ;;  %vm5654_vm0 = vcmp.eq.s32.totalorder %v15992_v52, %v13613_v24  ;;  %vm5655_vm15 = vcmp.eq.s32.totalorder %v15888_v55, %v13613_v24  ;;  %vm5658_vm5 = vcmp.eq.s32.totalorder %v12605_v44, %v13613_v24 }
 0x64c   :  { %v6558_v32 = vsel %vm5656_vm7, 1.0, %v15991_v26  ;;  %v6556_v37 = vsel %vm5654_vm0, 1.0, %v15991_v26  ;;  %v6557_v48 = vsel %vm5655_vm15, 1.0, %v15991_v26  ;;  %vm5657_vm6 = vcmp.eq.s32.totalorder %v15890_v3, %v13613_v24  ;;  %vm16087_vm7 = vmmov %vm16080_vm3 }
 0x64d   :  { %5762 = vperm.xlu1 %6940, %v6558_v32   ;;  %v6982_v38 = vpack.i.bf16 %v6557_v48, %v6556_v37  ;;  %v6152_v0 = vsel %vm16083_vm12, %v15962_v5, 0.0  ;;  %v6560_v55 = vsel %vm5658_vm5, 1.0, %v15991_v26  ;;  %vm5660_vm10 = vcmp.eq.s32.totalorder %v12626_v34, %v13613_v24  ;;  %v16085_v5 = vld [vmem:[#allocation194_spill] sm:$0xff]  ;;  %vm16095_vm12 = vmmov %vm16080_vm3  ;;  %v16112_v48 = vld [vmem:[#allocation20_spill] sm:$0xff] }
 0x64e   :  { %v6153_v35 = vadd.f32 %v6152_v0, %v6151_v12  ;;  %v6559_v52 = vsel %vm5657_vm6, 1.0, %v15991_v26  ;;  %vm5659_vm9 = vcmp.eq.s32.totalorder %v15891_v27, %v13613_v24  ;;  %v6154_v44 = vsel %vm16084_vm14, %v15960_v39, 0.0  ;;  %v16113_v0 = vld [vmem:[#allocation71_spill] sm:$0xff] }
 0x64f   :  { %6983 = vperm.xlu0 %6941, %v6982_v38   ;;  %v6562_v3 = vsel %vm5660_vm10, 1.0, %v15991_v26  ;;  %vm5662_vm2 = vcmp.eq.s32.totalorder %v12636_v43, %v13613_v24  ;;  %v6156_v56 = vsel %vm16080_vm3, %v16085_v5, 0.0  ;;  %v6561_v34 = vsel %vm5659_vm9, 1.0, %v15991_v26  ;;  %v16086_v43 = vld [vmem:[#allocation145_spill] sm:$0xff]  ;;  %vm16098_vm9 = vmmov %vm16080_vm3  ;;  %v16116_v5 = vld [vmem:[#allocation151_spill] sm:$0xff] }
 0x650   :  { %v6155_v25 = vadd.f32 %v6154_v44, %v6153_v35  ;;  %vm5661_vm4 = vcmp.eq.s32.totalorder %v15995_v6, %v13613_v24  ;;  %v6564_v27 = vsel %vm5662_vm2, 1.0, %v15991_v26  ;;  %vm5664_vm13 = vcmp.eq.s32.totalorder %v15996_v50, %v13613_v24  ;;  %v16088_v6 = vld [vmem:[#allocation34_spill] sm:$0xff]  ;;  %v16114_v35 = vld [vmem:[#allocation99_spill] sm:$0xff] }
 0x651   :  { %5772 = vperm.xlu1 %6940, %v6560_v55   ;;  %v6563_v39 = vsel %vm5661_vm4, 1.0, %v15991_v26  ;;  %vm5663_vm8 = vcmp.eq.s32.totalorder %v12629_v45, %v13613_v24  ;;  %v6158_v28 = vsel %vm16087_vm7, %v16086_v43, 0.0  ;;  %v6566_v46 = vsel %vm5664_vm13, 1.0, %v15991_v26  ;;  %v16089_v50 = vld [vmem:[#allocation22_spill] sm:$0xff]  ;;  %vm16103_vm4 = vmmov %vm16087_vm7 }
 0x652   :  { %v6157_v59 = vadd.f32 %v6156_v56, %v6155_v25  ;;  %vm5666_vm0 = vcmp.eq.s32.totalorder %v16088_v6, %v13613_v24  ;;  %v6565_v41 = vsel %vm5663_vm8, 1.0, %v15991_v26  ;;  %vm5665_vm15 = vcmp.eq.s32.totalorder %v16089_v50, %v13613_v24  ;;  %vm16107_vm7 = vmmov %vm16103_vm4  ;;  %v16120_v50 = vld [vmem:[#allocation130_spill] sm:$0xff] }
 0x653   :  { %5767 = vperm.xlu0 %6941, %v6559_v52   ;;  %v6568_v45 = vsel %vm5666_vm0, 1.0, %v15991_v26  ;;  %vm5668_vm5 = vcmp.eq.s32.totalorder %v16092_v42, %v13613_v24  ;;  %v6567_v4 = vsel %vm5665_vm15, 1.0, %v15991_v26  ;;  %vm5667_vm6 = vcmp.eq.s32.totalorder %v16093_v2, %v13613_v24  ;;  %vm16111_vm11 = vmmov %vm16103_vm4 }
 0x654   :  { %v6159_v7 = vadd.f32 %v6158_v28, %v6157_v59  ;;  %v6162_v20 = vsel %vm16095_vm12, %v16094_v21, 0.0  ;;  %v6570_v15 = vsel %vm5668_vm5, 1.0, %v15991_v26  ;;  %vm5670_vm10 = vcmp.eq.s32.totalorder %v16096_v33, %v13613_v24 }
 0x655   :  { %5782 = vperm.xlu1 %6940, %v6562_v3   ;;  %v6164_v49 = vsel %vm16098_vm9, %v16097_v31, 0.0  ;;  %v6569_v47 = vsel %vm5667_vm6, 1.0, %v15991_v26  ;;  %vm5669_vm14 = vcmp.eq.s32.totalorder %v16099_v1, %v13613_v24  ;;  %v6572_v8 = vsel %vm5670_vm10, 1.0, %v15991_v26  ;;  %v16115_v3 = vld [vmem:[#allocation106_spill] sm:$0xff] }
 0x656   :  { %v6161_v51 = vadd.f32 %v6160_v40, %v6159_v7  ;;  %vm5672_vm2 = vcmp.eq.s32.totalorder %v16100_v57, %v13613_v24  ;;  %v6571_v30 = vsel %vm5669_vm14, 1.0, %v15991_v26  ;;  %vm5671_vm3 = vcmp.eq.s32.totalorder %v16101_v22, %v13613_v24 }
 0x657   :  { %5777 = vperm.xlu0 %6941, %v6561_v34   ;;  %v6166_v16 = vsel %vm16103_vm4, %v16102_v58, 0.0  ;;  %v6574_v63 = vsel %vm5672_vm2, 1.0, %v15991_v26  ;;  %vm5674_vm13 = vcmp.eq.s32.totalorder %v16104_v13, %v13613_v24  ;;  %v6573_v29 = vsel %vm5671_vm3, 1.0, %v15991_v26  ;;  %v16125_v58 = vld [vmem:[#allocation154_spill] sm:$0xff] }
 0x658   :  { %v6163_v60 = vadd.f32 %v6162_v20, %v6161_v51  ;;  %vm5673_vm8 = vcmp.eq.s32.totalorder %v16105_v61, %v13613_v24  ;;  %v6168_v36 = vsel %vm16107_vm7, %v16106_v9, 0.0  ;;  %v6576_v18 = vsel %vm5674_vm13, 1.0, %v15991_v26  ;;  %v16123_v51 = vld [vmem:[#allocation172_spill] sm:$0xff] }
 0x659   :  { %5792 = vperm.xlu1 %6940, %v6564_v27   ;;  %vm5676_vm0 = vcmp.eq.s32.totalorder %v16108_v53, %v13613_v24  ;;  %v6575_v19 = vsel %vm5673_vm8, 1.0, %v15991_v26  ;;  %vm5675_vm15 = vcmp.eq.s32.totalorder %v16109_v14, %v13613_v24  ;;  %v6170_v32 = vsel %vm16111_vm11, %v16110_v54, 0.0  ;;  %v16117_v27 = vld [vmem:[#allocation88_spill] sm:$0xff] }
 0x65a   :  { %v6165_v11 = vadd.f32 %v6164_v49, %v6163_v60  ;;  %v6578_v37 = vsel %vm5676_vm0, 1.0, %v15991_v26  ;;  %vm5678_vm5 = vcmp.eq.s32.totalorder %v16112_v48, %v13613_v24  ;;  %v6577_v38 = vsel %vm5675_vm15, 1.0, %v15991_v26 }
 0x65b   :  { %5787 = vperm.xlu0 %6941, %v6563_v39   ;;  %vm5677_vm6 = vcmp.eq.s32.totalorder %v16113_v0, %v13613_v24  ;;  %v6580_v55 = vsel %vm5678_vm5, 1.0, %v15991_v26  ;;  %vm5680_vm12 = vcmp.eq.s32.totalorder %v16114_v35, %v13613_v24  ;;  %vm5679_vm10 = vcmp.eq.s32.totalorder %v16115_v3, %v13613_v24  ;;  %v16118_v39 = vld [vmem:[#allocation73_spill] sm:$0xff] }
 0x65c   :  { %v6167_v17 = vadd.f32 %v6166_v16, %v6165_v11  ;;  %v6579_v44 = vsel %vm5677_vm6, 1.0, %v15991_v26  ;;  %v6582_v25 = vsel %vm5680_vm12, 1.0, %v15991_v26  ;;  %vm5682_vm9 = vcmp.eq.s32.totalorder %v16116_v5, %v13613_v24 }
 0x65d   :  { %5802 = vperm.xlu1 %6940, %v6566_v46   ;;  %v6581_v34 = vsel %vm5679_vm10, 1.0, %v15991_v26  ;;  %vm5681_vm14 = vcmp.eq.s32.totalorder %v16117_v27, %v13613_v24  ;;  %v6584_v59 = vsel %vm5682_vm9, 1.0, %v15991_v26  ;;  %vm5684_vm2 = vcmp.eq.s32.totalorder %v16118_v39, %v13613_v24  ;;  %v16119_v46 = vld [vmem:[#allocation197_spill] sm:$0xff] }
 0x65e   :  { %v6169_v62 = vadd.f32 %v6168_v36, %v6167_v17  ;;  %v6583_v28 = vsel %vm5681_vm14, 1.0, %v15991_v26  ;;  %vm5683_vm3 = vcmp.eq.s32.totalorder %v16119_v46, %v13613_v24  ;;  %v6586_v7 = vsel %vm5684_vm2, 1.0, %v15991_v26 }
 0x65f   :  { %5797 = vperm.xlu0 %6941, %v6565_v41   ;;  %v6585_v41 = vsel %vm5683_vm3, 1.0, %v15991_v26  ;;  %vm5685_vm4 = vcmp.eq.s32.totalorder %v16120_v50, %v13613_v24  ;;  %vm5076_vm13 = vcmp.eq.s32.totalorder %v16096_v33, %v16123_v51  ;;  %vm44_vm8 = vcmask 122880  }
 0x660   :  { %v6171_v12 = vadd.f32 %v6170_v32, %v6169_v62  ;;  %v6540_v2 = vsel %vm5076_vm13, 1.0, %v15991_v26  ;;  %vm5078_vm7 = vcmp.eq.s32.totalorder %v16100_v57, %v16123_v51  ;;  %46 = vst.msk [vmem:[#allocation3] sm:$0x1] %vm44_vm8, %v15991_v26  ;;  %45 = vst.msk [vmem:[#allocation2] sm:$0x1] %vm44_vm8, %v15991_v26  ;;  %vm5080_vm0 = vcmp.eq.s32.totalorder %v16104_v13, %v16123_v51  ;;  %v16130_v32 = vld [vmem:[#allocation79_spill] sm:$0xff] }
 0x661   :  { %5812 = vperm.xlu1 %6940, %v6568_v45   ;;  %v6029_v45 = vsel %vm6027_vm1, 1, %v16121_v23  ;;  %vm5077_vm1 = vcmp.eq.s32.totalorder %v16101_v22, %v16123_v51  ;;  %v6542_v10 = vsel %vm5078_vm7, 1.0, %v15991_v26  ;;  %vm5079_vm15 = vcmp.eq.s32.totalorder %v16105_v61, %v16123_v51  ;;  %v16124_v22 = vld [vmem:[#allocation158_spill] sm:$0xff] }
 0x662   :  { %v6172_v52 = vrot.slane %v6171_v12, 4  ;;  %v6541_v24 = vsel %vm5077_vm1, 1.0, %v15991_v26  ;;  %v6544_v20 = vsel %vm5080_vm0, 1.0, %v15991_v26  ;;  %vm5082_vm11 = vcmp.eq.s32.totalorder %v16108_v53, %v16123_v51 }
 0x663   :  { %5807 = vperm.xlu0 %6941, %v6567_v4   ;;  %v6587_v4 = vsel %vm5685_vm4, 1.0, %v15991_v26  ;;  %vm5081_vm5 = vcmp.eq.s32.totalorder %v16109_v14, %v16123_v51  ;;  %v6546_v60 = vsel %vm5082_vm11, 1.0, %v15991_v26  ;;  %vm5084_vm6 = vcmp.eq.s32.totalorder %v16112_v48, %v16123_v51  ;;  %v16128_v14 = vld [vmem:[#allocation17_spill] sm:$0xff] }
 0x664   :  { %v6173_v56 = vadd.f32 %v6172_v52, %v6171_v12  ;;  %v6545_v33 = vsel %vm5081_vm5, 1.0, %v15991_v26  ;;  %vm5083_vm12 = vcmp.eq.s32.totalorder %v16113_v0, %v16123_v51  ;;  %v6548_v31 = vsel %vm5084_vm6, 1.0, %v15991_v26  ;;  %v16132_v0 = vld [vmem:[#allocation137_spill] sm:$0xff] }
 0x665   :  { %5822 = vperm.xlu1 %6940, %v6570_v15   ;;  %v6543_v15 = vsel %vm5079_vm15, 1.0, %v15991_v26  ;;  %vm5086_vm10 = vcmp.eq.s32.totalorder %v16114_v35, %v16123_v51  ;;  %v6547_v49 = vsel %vm5083_vm12, 1.0, %v15991_v26  ;;  %vm5085_vm9 = vcmp.eq.s32.totalorder %v16115_v3, %v16123_v51 }
 0x666   :  { %v6174_v43 = vrot.slane %v6173_v56, 2  ;;  %vm50_vm14 = vcmask 8192   ;;  %vm5088_vm2 = vcmp.eq.s32.totalorder %v16116_v5, %v16123_v51  ;;  %v6549_v1 = vsel %vm5085_vm9, 1.0, %v15991_v26  ;;  %v16134_v5 = vld [vmem:[#allocation76_spill] sm:$0xff] }
 0x667   :  { %5817 = vperm.xlu0 %6941, %v6569_v47   ;;  %v6550_v47 = vsel %vm5086_vm10, 1.0, %v15991_v26  ;;  %51 = vst.msk [vmem:[#allocation6] sm:$0x1] %vm50_vm14, %v15991_v26  ;;  %vm5087_vm3 = vcmp.eq.s32.totalorder %v16117_v27, %v16123_v51  ;;  %vm5090_vm4 = vcmp.eq.s32.totalorder %v16118_v39, %v16123_v51  ;;  %vm5089_vm13 = vcmp.eq.s32.totalorder %v16119_v46, %v16123_v51  ;;  %v16135_v39 = vld [vmem:[#allocation46_spill] sm:$0xff] }
 0x668   :  { %v6175_v6 = vadd.f32 %v6174_v43, %v6173_v56  ;;  %v6551_v11 = vsel %vm5087_vm3, 1.0, %v15991_v26  ;;  %v6554_v57 = vsel %vm5090_vm4, 1.0, %v15991_v26  ;;  %vm5091_vm7 = vcmp.eq.s32.totalorder %v16120_v50, %v16123_v51  ;;  %v16136_v43 = vld [vmem:[#allocation81_spill] sm:$0xff] }
 0x669   :  { %5832 = vperm.xlu1 %6940, %v6572_v8   ;;  %v6552_v8 = vsel %vm5088_vm2, 1.0, %v15991_v26  ;;  %vm16126_vm1 = vcmp.gt.f32.partialorder %v16124_v22, %v16125_v58  ;;  %vm5348_vm0 = vcmask 130048   ;;  %v16137_v51 = vld [vmem:[#allocation45_spill] sm:$0xff]  ;;  %vm16192_vm15 = vcmask 7168  }
 0x66a   :  { %v6176_v42 = vrot.slane %v6175_v6, 1  ;;  %v6014_v16 = vsel %vm16126_vm1, 1, %v16121_v23  ;;  %v16142_v22 = vld [vmem:[#allocation177_spill] sm:$0xff]  ;;  %vm6201_vm6 = vcmask 254080   ;;  %vm6212_vm12 = vcmask 270592  }
 0x66b   :  { %5827 = vperm.xlu0 %6941, %v6571_v30   ;;  %v6553_v30 = vsel %vm5089_vm13, 1.0, %v15991_v26  ;;  %vm6223_vm10 = vcmask 278800   ;;  %vm6234_vm9 = vcmask 287000  }
 0x66c   :  { %v6177_v21 = vadd.f32 %v6176_v42, %v6175_v6  ;;  %v16138_v42 = vld [vmem:[#allocation147_spill] sm:$0xff] }
 0x66d   :  { %5842 = vperm.xlu1 %6940, %v6574_v63   ;;  %v6555_v63 = vsel %vm5091_vm7, 1.0, %v15991_v26  ;;  %v16129_v26 = vld [vmem:[#allocation60_spill] sm:$0xff] }
 0x66f   :  { %5837 = vperm.xlu0 %6941, %v6573_v29  }
 0x671   :  { %5852 = vperm.xlu1 %6940, %v6576_v18  }
 0x673   :  { %5847 = vperm.xlu0 %6941, %v6575_v19   ;;  %v16127_v19 = vld [vmem:[#allocation65_spill] sm:$0xff] }
 0x674   :  { %v2594_v54 = vadd.f32 %v16128_v14, %v16127_v19 }
 0x675   :  { %5862 = vperm.xlu1 %6940, %v6578_v37   ;;  %v2596_v37 = vadd.f32 %v16130_v32, %v16129_v26  ;;  %v16144_v26 = vld [vmem:[#allocation131_spill] sm:$0xff] }
 0x677   :  { %5857 = vperm.xlu0 %6941, %v6577_v38   ;;  %v6949_v61 = vpop.permute.xlu0 %6948  ;;  %v16131_v38 = vld [vmem:[#allocation42_spill] sm:$0xff] }
 0x679   :  { %5872 = vperm.xlu1 %6940, %v6580_v55   ;;  %v6944_v17 = vpop.permute.xlu1 %6943  ;;  %v2595_v55 = vadd.f32 %v16132_v0, %v16131_v38  ;;  %v16146_v38 = vld [vmem:[#allocation178_spill] sm:$0xff] }
 0x67a   :  { %v6946_v48 = vunpack.i.h.bf16 %v6944_v17  ;;  %v6945_v35 = vunpack.i.l.bf16 %v6944_v17 }
 0x67b   :  { %5867 = vperm.xlu0 %6941, %v6579_v44   ;;  %v13801_v36 = vpop.permute.xlu0 %6963 }
 0x67c   :  { %v5317_v46 = vmul.f32 %v6946_v48, %v2595_v55  ;;  %v5316_v6 = vmul.f32 %v6945_v35, %v2594_v54 }
 0x67d   :  { %5882 = vperm.xlu1 %6940, %v6582_v25   ;;  %v13795_v13 = vpop.permute.xlu1 %6953  ;;  %v16133_v25 = vld [vmem:[#allocation66_spill] sm:$0xff] }
 0x67e   :  { %v2597_v56 = vadd.f32 %v16134_v5, %v16133_v25 }
 0x67f   :  { %5877 = vperm.xlu0 %6941, %v6581_v34   ;;  %v13805_v62 = vpop.permute.xlu0 %6973 }
 0x681   :  { %5892 = vperm.xlu1 %6940, %v6584_v59   ;;  %v13797_v29 = vpop.permute.xlu1 %6958 }
 0x683   :  { %5887 = vperm.xlu0 %6941, %v6583_v28   ;;  %v2598_v28 = vadd.f32 %v16136_v43, %v16135_v39  ;;  %v16148_v39 = vld [vmem:[#allocation134_spill] sm:$0xff] }
 0x685   :  { %5902 = vperm.xlu1 %6940, %v6586_v7   ;;  %v13799_v9 = vpop.permute.xlu1 %6968 }
 0x687   :  { %5897 = vperm.xlu0 %6941, %v6585_v41  }
 0x689   :  { %6031 = vperm.xlu1 %6940, %v6029_v45   ;;  %v13803_v18 = vpop.permute.xlu1 %6978 }
 0x68b   :  { %5907 = vperm.xlu0 %6941, %v6587_v4   ;;  %v2599_v4 = vadd.f32 %v16138_v42, %v16137_v51 }
 0x68d   :  { %5238 = vperm.xlu1 %6940, %v6540_v2   ;;  %v6950_v2 = vunpack.i.l.bf16 %v6949_v61 }
 0x68f   :  { %6179 = vrot.lane.b32.xlu0 %v6177_v21, %s7309_s3 }
 0x691   :  { %5248 = vperm.xlu1 %6940, %v6542_v10  }
 0x693   :  { %5243 = vperm.xlu0 %6941, %v6541_v24   ;;  %v16139_v24 = vld [vmem:[#allocation44_spill] sm:$0xff] }
 0x695   :  { %5258 = vperm.xlu1 %6940, %v6544_v20   ;;  %v16140_v20 = vld [vmem:[#allocation96_spill] sm:$0xff] }
 0x697   :  { %5253 = vperm.xlu0 %6941, %v6543_v15   ;;  %v13824_v15 = vadd.f32 %v16140_v20, %v16139_v24  ;;  %v16151_v20 = vld [vmem:[#allocation11_spill] sm:$0xff] }
 0x699   :  { %5268 = vperm.xlu1 %6940, %v6546_v60  }
 0x69b   :  { %5263 = vperm.xlu0 %6941, %v6545_v33  }
 0x69d   :  { %5278 = vperm.xlu1 %6940, %v6548_v31   ;;  %v5350_v31 = vsel %vm5348_vm0, %v5317_v46, 0.0 }
 0x69f   :  { %5273 = vperm.xlu0 %6941, %v6547_v49   ;;  %v5349_v49 = vsel %vm5348_vm0, %v5316_v6, 0.0  ;;  %v16150_v6 = vld [vmem:[#allocation179_spill] sm:$0xff] }
 0x6a1   :  { %5288 = vperm.xlu1 %6940, %v6550_v47  }
 0x6a3   :  { %5283 = vperm.xlu0 %6941, %v6549_v1  }
 0x6a5   :  { %5298 = vperm.xlu1 %6940, %v6552_v8   ;;  %v6951_v8 = vunpack.i.h.bf16 %v6949_v61 }
 0x6a7   :  { %5293 = vperm.xlu0 %6941, %v6551_v11  }
 0x6a9   :  { %5308 = vperm.xlu1 %6940, %v6554_v57  }
 0x6ab   :  { %5303 = vperm.xlu0 %6941, %v6553_v30   ;;  %v16141_v30 = vld [vmem:[#allocation72_spill] sm:$0xff] }
 0x6ac   :  { %v13831_v58 = vadd.f32 %v16142_v22, %v16141_v30  ;;  %v6960_v30 = vunpack.i.l.bf16 %v13797_v29 }
 0x6ad   :  { %6016 = vperm.xlu1 %6940, %v6014_v16   ;;  %v5318_v16 = vmul.f32 %v6950_v2, %v2596_v37 }
 0x6af   :  { %5313 = vperm.xlu0 %6941, %v6555_v63  }
 0x6cc   :  { %v5763_v53 = vpop.permute.xlu1 %5762 }
 0x6cd   :  { %v5912_v34 = vmul.f32 %v5763_v53, %v2596_v37  ;;  %v5351_v53 = vadd.f32 %v5350_v31, %v5349_v49  ;;  %v5319_v37 = vmul.f32 %v6951_v8, %v2597_v56  ;;  %v16153_v49 = vld [vmem:[#allocation56_spill] sm:$0xff] }
 0x6ce   :  { %v6984_v12 = vpop.permute.xlu0 %6983 }
 0x6cf   :  { %v6986_v52 = vunpack.i.h.bf16 %v6984_v12  ;;  %v6985_v44 = vunpack.i.l.bf16 %v6984_v12  ;;  %v5945_v21 = vsel %vm5348_vm0, %v5912_v34, 0.0  ;;  %v16145_v12 = vld [vmem:[#allocation52_spill] sm:$0xff] }
 0x6d0   :  { %v5773_v3 = vpop.permute.xlu1 %5772  ;;  %v13843_v0 = vadd.f32 %v16146_v38, %v16145_v12 }
 0x6d1   :  { %v5911_v27 = vmul.f32 %v6986_v52, %v2595_v55  ;;  %v5910_v59 = vmul.f32 %v6985_v44, %v2594_v54  ;;  %v5914_v10 = vmul.f32 %v5773_v3, %v2598_v28  ;;  %v16143_v54 = vld [vmem:[#allocation50_spill] sm:$0xff]  ;;  %v5352_v52 = vsel %vm5348_vm0, %v5318_v16, 0.0 }
 0x6d2   :  { %v5768_v7 = vpop.permute.xlu0 %5767  ;;  %v13837_v32 = vadd.f32 %v16144_v26, %v16143_v54  ;;  %v6955_v44 = vunpack.i.l.bf16 %v13795_v13  ;;  %v5353_v5 = vadd.f32 %v5352_v52, %v5351_v53  ;;  %v5322_v52 = vmul.f32 %v6960_v30, %v13824_v15 }
 0x6d3   :  { %v5943_v41 = vsel %vm5348_vm0, %v5911_v27, 0.0  ;;  %v5942_v50 = vsel %vm5348_vm0, %v5910_v59, 0.0  ;;  %v5913_v23 = vmul.f32 %v5768_v7, %v2597_v56  ;;  %v5949_v63 = vsel %vm5348_vm0, %v5914_v10, 0.0  ;;  %v16147_v59 = vld [vmem:[#allocation48_spill] sm:$0xff]  ;;  %v16149_v7 = vld [vmem:[#allocation47_spill] sm:$0xff] }
 0x6d4   :  { %v5944_v40 = vadd.f32 %v5943_v41, %v5942_v50  ;;  %v5783_v45 = vpop.permute.xlu1 %5782  ;;  %v13851_v43 = vadd.f32 %v16148_v39, %v16147_v59  ;;  %v13857_v41 = vadd.f32 %v16150_v6, %v16149_v7  ;;  %v6956_v50 = vunpack.i.h.bf16 %v13795_v13  ;;  %v16160_v59 = vld [vmem:[#allocation141_spill] sm:$0xff]  ;;  %v16161_v7 = vld [vmem:[#allocation51_spill] sm:$0xff]  ;;  %v16162_v6 = vld [vmem:[#allocation182_spill] sm:$0xff] }
 0x6d5   :  { %v5947_v47 = vsel %vm5348_vm0, %v5913_v23, 0.0  ;;  %v5916_v17 = vmul.f32 %v5783_v45, %v13824_v15  ;;  %v5354_v45 = vsel %vm5348_vm0, %v5319_v37, 0.0  ;;  %v5320_v51 = vmul.f32 %v6955_v44, %v2598_v28 }
 0x6d6   :  { %v5946_v60 = vadd.f32 %v5945_v21, %v5944_v40  ;;  %v5778_v33 = vpop.permute.xlu0 %5777  ;;  %v5355_v21 = vadd.f32 %v5354_v45, %v5353_v5  ;;  %v5321_v28 = vmul.f32 %v6956_v50, %v2599_v4  ;;  %v6965_v15 = vunpack.i.l.bf16 %v13801_v36 }
 0x6d7   :  { %v5915_v1 = vmul.f32 %v5778_v33, %v2599_v4  ;;  %v5953_v3 = vsel %vm5348_vm0, %v5916_v17, 0.0  ;;  %v5360_v45 = vsel %vm5348_vm0, %v5322_v52, 0.0  ;;  %v6970_v52 = vunpack.i.l.bf16 %v13799_v9 }
 0x6d8   :  { %v5948_v11 = vadd.f32 %v5947_v47, %v5946_v60  ;;  %v5793_v57 = vpop.permute.xlu1 %5792  ;;  %v16152_v60 = vld [vmem:[#allocation135_spill] sm:$0xff]  ;;  %v16154_v47 = vld [vmem:[#allocation180_spill] sm:$0xff]  ;;  %v5358_v38 = vsel %vm5348_vm0, %v5321_v28, 0.0  ;;  %v6966_v28 = vunpack.i.h.bf16 %v13801_v36 }
 0x6d9   :  { %v5951_v61 = vsel %vm5348_vm0, %v5915_v1, 0.0  ;;  %v5918_v25 = vmul.f32 %v5793_v57, %v13837_v32  ;;  %v13865_v33 = vadd.f32 %v16152_v60, %v16151_v20  ;;  %v13871_v1 = vadd.f32 %v16154_v47, %v16153_v49  ;;  %v16164_v20 = vld [vmem:[#allocation144_spill] sm:$0xff]  ;;  %v16165_v49 = vld [vmem:[#allocation25_spill] sm:$0xff]  ;;  %v16166_v47 = vld [vmem:[#allocation183_spill] sm:$0xff] }
 0x6da   :  { %v5950_v19 = vadd.f32 %v5949_v63, %v5948_v11  ;;  %v5788_v14 = vpop.permute.xlu0 %5787  ;;  %v5356_v57 = vsel %vm5348_vm0, %v5320_v51, 0.0 }
 0x6db   :  { %v5917_v48 = vmul.f32 %v5788_v14, %v13831_v58  ;;  %v5957_v42 = vsel %vm5348_vm0, %v5918_v25, 0.0  ;;  %v5357_v63 = vadd.f32 %v5356_v57, %v5355_v21  ;;  %v16156_v14 = vld [vmem:[#allocation138_spill] sm:$0xff]  ;;  %v5324_v57 = vmul.f32 %v6965_v15, %v13837_v32 }
 0x6dc   :  { %v5952_v55 = vadd.f32 %v5951_v61, %v5950_v19  ;;  %v5803_v35 = vpop.permute.xlu1 %5802  ;;  %v16155_v19 = vld [vmem:[#allocation54_spill] sm:$0xff]  ;;  %v16157_v61 = vld [vmem:[#allocation49_spill] sm:$0xff] }
 0x6dd   :  { %v5955_v46 = vsel %vm5348_vm0, %v5917_v48, 0.0  ;;  %v5920_v2 = vmul.f32 %v5803_v35, %v13851_v43  ;;  %v13879_v54 = vadd.f32 %v16156_v14, %v16155_v19  ;;  %v16158_v48 = vld [vmem:[#allocation181_spill] sm:$0xff]  ;;  %v6961_v35 = vunpack.i.h.bf16 %v13797_v29  ;;  %v16168_v14 = vld [vmem:[#allocation148_spill] sm:$0xff] }
 0x6de   :  { %v5954_v34 = vadd.f32 %v5953_v3, %v5952_v55  ;;  %v5798_v27 = vpop.permute.xlu0 %5797  ;;  %v13885_v12 = vadd.f32 %v16158_v48, %v16157_v61  ;;  %v5359_v25 = vadd.f32 %v5358_v38, %v5357_v63  ;;  %v13900_v29 = vadd.f32 %v16162_v6, %v16161_v7  ;;  %v16167_v19 = vld [vmem:[#allocation13_spill] sm:$0xff]  ;;  %v16169_v61 = vld [vmem:[#allocation24_spill] sm:$0xff]  ;;  %v16173_v7 = vld [vmem:[#allocation55_spill] sm:$0xff] }
 0x6df   :  { %v5919_v56 = vmul.f32 %v5798_v27, %v13843_v0  ;;  %v5961_v22 = vsel %vm5348_vm0, %v5920_v2, 0.0  ;;  %v16159_v27 = vld [vmem:[#allocation23_spill] sm:$0xff]  ;;  %v16170_v48 = vld [vmem:[#allocation184_spill] sm:$0xff]  ;;  %v5325_v38 = vmul.f32 %v6966_v28, %v13843_v0  ;;  %v16174_v6 = vld [vmem:[#allocation185_spill] sm:$0xff] }
 0x6e0   :  { %v5956_v23 = vadd.f32 %v5955_v46, %v5954_v34  ;;  %v5813_v40 = vpop.permute.xlu1 %5812  ;;  %v13894_v39 = vadd.f32 %v16160_v59, %v16159_v27  ;;  %v5361_v2 = vadd.f32 %v5360_v45, %v5359_v25  ;;  %v13930_v32 = vadd.f32 %v16170_v48, %v16169_v61  ;;  %v16171_v27 = vld [vmem:[#allocation53_spill] sm:$0xff]  ;;  %v16172_v59 = vld [vmem:[#allocation152_spill] sm:$0xff]  ;;  %v16181_v48 = vld [vmem:[#allocation159_spill] sm:$0xff] }
 0x6e1   :  { %v5959_v31 = vsel %vm5348_vm0, %v5919_v56, 0.0  ;;  %v5922_v16 = vmul.f32 %v5813_v40, %v13865_v33  ;;  %v5323_v40 = vmul.f32 %v6961_v35, %v13831_v58  ;;  %v13915_v58 = vadd.f32 %v16166_v47, %v16165_v49  ;;  %v16177_v49 = vld [vmem:[#allocation156_spill] sm:$0xff] }
 0x6e2   :  { %v5958_v10 = vadd.f32 %v5957_v42, %v5956_v23  ;;  %v5808_v24 = vpop.permute.xlu0 %5807  ;;  %v5364_v35 = vsel %vm5348_vm0, %v5324_v57, 0.0  ;;  %v13945_v15 = vadd.f32 %v16174_v6, %v16173_v7  ;;  %v16179_v57 = vld [vmem:[#allocation186_spill] sm:$0xff]  ;;  %v16180_v61 = vld [vmem:[#allocation36_spill] sm:$0xff] }
 0x6e3   :  { %v5921_v13 = vmul.f32 %v5808_v24, %v13857_v41  ;;  %v5965_v44 = vsel %vm5348_vm0, %v5922_v16, 0.0  ;;  %v16163_v24 = vld [vmem:[#allocation18_spill] sm:$0xff]  ;;  %v5362_v30 = vsel %vm5348_vm0, %v5323_v40, 0.0  ;;  %v5366_v40 = vsel %vm5348_vm0, %v5325_v38, 0.0 }
 0x6e4   :  { %v5960_v8 = vadd.f32 %v5959_v31, %v5958_v10  ;;  %v5823_v11 = vpop.permute.xlu1 %5822  ;;  %v13909_v60 = vadd.f32 %v16164_v20, %v16163_v24  ;;  %v5363_v63 = vadd.f32 %v5362_v30, %v5361_v2  ;;  %v5326_v2 = vmul.f32 %v6970_v52, %v13851_v43  ;;  %v16183_v52 = vld [vmem:[#allocation187_spill] sm:$0xff] }
 0x6e5   :  { %v5963_v26 = vsel %vm5348_vm0, %v5921_v13, 0.0  ;;  %v5924_v3 = vmul.f32 %v5823_v11, %v13879_v54  ;;  %v6975_v30 = vunpack.i.l.bf16 %v13805_v62  ;;  %v13971_v38 = vadd.f32 %v16181_v48, %v16180_v61 }
 0x6e6   :  { %v5962_v17 = vadd.f32 %v5961_v22, %v5960_v8  ;;  %v5818_v53 = vpop.permute.xlu0 %5817  ;;  %v5365_v25 = vadd.f32 %v5364_v35, %v5363_v63  ;;  %v16182_v35 = vld [vmem:[#allocation58_spill] sm:$0xff] }
 0x6e7   :  { %v5923_v4 = vmul.f32 %v5818_v53, %v13871_v1  ;;  %v5969_v51 = vsel %vm5348_vm0, %v5924_v3, 0.0 }
 0x6e8   :  { %v5964_v37 = vadd.f32 %v5963_v26, %v5962_v17  ;;  %v5833_v55 = vpop.permute.xlu1 %5832  ;;  %v13924_v26 = vadd.f32 %v16168_v14, %v16167_v19  ;;  %v5367_v24 = vadd.f32 %v5366_v40, %v5365_v25 }
 0x6e9   :  { %v5967_v46 = vsel %vm5348_vm0, %v5923_v4, 0.0  ;;  %v5926_v42 = vmul.f32 %v5833_v55, %v13894_v39 }
 0x6ea   :  { %v5966_v5 = vadd.f32 %v5965_v44, %v5964_v37  ;;  %v5828_v34 = vpop.permute.xlu0 %5827 }
 0x6eb   :  { %v5925_v56 = vmul.f32 %v5828_v34, %v13885_v12  ;;  %v5973_v22 = vsel %vm5348_vm0, %v5926_v42, 0.0  ;;  %v6971_v42 = vunpack.i.h.bf16 %v13799_v9 }
 0x6ec   :  { %v5968_v50 = vadd.f32 %v5967_v46, %v5966_v5  ;;  %v5843_v23 = vpop.permute.xlu1 %5842  ;;  %v13939_v46 = vadd.f32 %v16172_v59, %v16171_v27 }
 0x6ed   :  { %v5971_v31 = vsel %vm5348_vm0, %v5925_v56, 0.0  ;;  %v5928_v16 = vmul.f32 %v5843_v23, %v13909_v60  ;;  %v5327_v63 = vmul.f32 %v6971_v42, %v13857_v41  ;;  %v13977_v41 = vadd.f32 %v16183_v52, %v16182_v35  ;;  %v16187_v42 = vld [vmem:[#allocation188_spill] sm:$0xff] }
 0x6ee   :  { %v5970_v21 = vadd.f32 %v5969_v51, %v5968_v50  ;;  %v5838_v10 = vpop.permute.xlu0 %5837  ;;  %v16175_v50 = vld [vmem:[#allocation191_spill] sm:$0xff] }
 0x6ef   :  { %v5927_v13 = vmul.f32 %v5838_v10, %v13900_v29  ;;  %v5977_v44 = vsel %vm5348_vm0, %v5928_v16, 0.0  ;;  %v6103_v23 = vrot.slane %v16175_v50, 4  ;;  %v5370_v27 = vsel %vm5348_vm0, %v5327_v63, 0.0  ;;  %v16191_v63 = vld [vmem:[#allocation189_spill] sm:$0xff] }
 0x6f0   :  { %v5972_v8 = vadd.f32 %v5971_v31, %v5970_v21  ;;  %v5853_v11 = vpop.permute.xlu1 %5852 }
 0x6f1   :  { %v5975_v4 = vsel %vm5348_vm0, %v5927_v13, 0.0  ;;  %v5930_v3 = vmul.f32 %v5853_v11, %v13924_v26  ;;  %v16176_v13 = vld [vmem:[#allocation57_spill] sm:$0xff]  ;;  %v16178_v11 = vld [vmem:[#allocation59_spill] sm:$0xff]  ;;  %v6104_v43 = vadd.f32 %v6103_v23, %v16175_v50  ;;  %v16184_v50 = vld [vmem:[#allocation62_spill] sm:$0xff] }
 0x6f2   :  { %v5974_v17 = vadd.f32 %v5973_v22, %v5972_v8  ;;  %v5848_v53 = vpop.permute.xlu0 %5847  ;;  %v13955_v47 = vadd.f32 %v16177_v49, %v16176_v13  ;;  %v13961_v9 = vadd.f32 %v16179_v57, %v16178_v11  ;;  %v16185_v23 = vld [vmem:[#allocation162_spill] sm:$0xff]  ;;  %v16188_v57 = vld [vmem:[#allocation61_spill] sm:$0xff] }
 0x6f3   :  { %v5929_v36 = vmul.f32 %v5848_v53, %v13915_v58  ;;  %v5981_v21 = vsel %vm5348_vm0, %v5930_v3, 0.0  ;;  %v13986_v40 = vadd.f32 %v16185_v23, %v16184_v50 }
 0x6f4   :  { %v5976_v37 = vadd.f32 %v5975_v4, %v5974_v17  ;;  %v5863_v55 = vpop.permute.xlu1 %5862  ;;  %v5368_v17 = vsel %vm5348_vm0, %v5326_v2, 0.0 }
 0x6f5   :  { %v5979_v56 = vsel %vm5348_vm0, %v5929_v36, 0.0  ;;  %v5932_v10 = vmul.f32 %v5863_v55, %v13939_v46  ;;  %v5369_v14 = vadd.f32 %v5368_v17, %v5367_v24 }
 0x6f6   :  { %v5978_v5 = vadd.f32 %v5977_v44, %v5976_v37  ;;  %v5858_v34 = vpop.permute.xlu0 %5857  ;;  %v6976_v44 = vunpack.i.h.bf16 %v13805_v62 }
 0x6f7   :  { %v5931_v0 = vmul.f32 %v5858_v34, %v13930_v32  ;;  %v5985_v53 = vsel %vm5348_vm0, %v5932_v10, 0.0  ;;  %v5328_v34 = vmul.f32 %v6975_v30, %v13865_v33  ;;  %v16189_v30 = vld [vmem:[#allocation167_spill] sm:$0xff] }
 0x6f8   :  { %v5980_v45 = vadd.f32 %v5979_v56, %v5978_v5  ;;  %v5873_v51 = vpop.permute.xlu1 %5872  ;;  %v6105_v5 = vrot.slane %v6104_v43, 2  ;;  %v5329_v2 = vmul.f32 %v6976_v44, %v13871_v1 }
 0x6f9   :  { %v5983_v28 = vsel %vm5348_vm0, %v5931_v0, 0.0  ;;  %v5934_v19 = vmul.f32 %v5873_v51, %v13955_v47  ;;  %v5371_v0 = vadd.f32 %v5370_v27, %v5369_v14  ;;  %v16186_v51 = vld [vmem:[#allocation64_spill] sm:$0xff] }
 0x6fa   :  { %v5982_v20 = vadd.f32 %v5981_v21, %v5980_v45  ;;  %v5868_v31 = vpop.permute.xlu0 %5867  ;;  %v13992_v33 = vadd.f32 %v16187_v42, %v16186_v51  ;;  %v6106_v24 = vadd.f32 %v6105_v5, %v6104_v43  ;;  %v16190_v43 = vld [vmem:[#allocation63_spill] sm:$0xff] }
 0x6fb   :  { %v5933_v8 = vmul.f32 %v5868_v31, %v13945_v15  ;;  %v5989_v59 = vsel %vm5348_vm0, %v5934_v19, 0.0  ;;  %v6980_v31 = vunpack.i.l.bf16 %v13803_v18  ;;  %v14007_v17 = vadd.f32 %v16191_v63, %v16190_v43 }
 0x6fc   :  { %v5984_v22 = vadd.f32 %v5983_v28, %v5982_v20  ;;  %v5883_v16 = vpop.permute.xlu1 %5882  ;;  %v5372_v20 = vsel %vm5348_vm0, %v5328_v34, 0.0 }
 0x6fd   :  { %v5987_v37 = vsel %vm5348_vm0, %v5933_v8, 0.0  ;;  %v5936_v56 = vmul.f32 %v5883_v16, %v13971_v38  ;;  %v5373_v28 = vadd.f32 %v5372_v20, %v5371_v0  ;;  %v5330_v61 = vmul.f32 %v6980_v31, %v13879_v54 }
 0x6fe   :  { %v5986_v4 = vadd.f32 %v5985_v53, %v5984_v22  ;;  %v5878_v36 = vpop.permute.xlu0 %5877  ;;  %v14001_v22 = vadd.f32 %v16189_v30, %v16188_v57  ;;  %v5374_v53 = vsel %vm5348_vm0, %v5329_v2, 0.0 }
 0x6ff   :  { %v5935_v55 = vmul.f32 %v5878_v36, %v13961_v9  ;;  %v5993_v13 = vsel %vm5348_vm0, %v5936_v56, 0.0  ;;  %v6981_v36 = vunpack.i.h.bf16 %v13803_v18  ;;  %v5376_v18 = vsel %vm5348_vm0, %v5330_v61, 0.0  ;;  %v6039_v56 = vld [vmem:[#allocation6] sm:$0x1] }
 0x700   :  { %v5988_v3 = vadd.f32 %v5987_v37, %v5986_v4  ;;  %v5893_v25 = vpop.permute.xlu1 %5892  ;;  %v6107_v4 = vrot.slane %v6106_v24, 1 }
 0x701   :  { %v5991_v62 = vsel %vm5348_vm0, %v5935_v55, 0.0  ;;  %v5938_v49 = vmul.f32 %v5893_v25, %v13986_v40  ;;  %v5375_v55 = vadd.f32 %v5374_v53, %v5373_v28  ;;  %v5331_v27 = vmul.f32 %v6981_v36, %v13885_v12  ;;  %v6028_v36 = vld [vmem:[#allocation3] sm:$0x1] }
 0x702   :  { %v5990_v7 = vadd.f32 %v5989_v59, %v5988_v3  ;;  %v5888_v6 = vpop.permute.xlu0 %5887  ;;  %v6108_v34 = vadd.f32 %v6107_v4, %v6106_v24 }
 0x703   :  { %v5937_v45 = vmul.f32 %v5888_v6, %v13977_v41  ;;  %v5997_v48 = vsel %vm5348_vm0, %v5938_v49, 0.0  ;;  %v5377_v0 = vadd.f32 %v5376_v18, %v5375_v55  ;;  %v5378_v42 = vsel %vm5348_vm0, %v5331_v27, 0.0 }
 0x704   :  { %v5992_v21 = vadd.f32 %v5991_v62, %v5990_v7  ;;  %v5903_v10 = vpop.permute.xlu1 %5902 }
 0x705   :  { %v5995_v1 = vsel %vm5348_vm0, %v5937_v45, 0.0  ;;  %v5940_v37 = vmul.f32 %v5903_v10, %v14001_v22 }
 0x706   :  { %v5994_v8 = vadd.f32 %v5993_v13, %v5992_v21  ;;  %v5898_v11 = vpop.permute.xlu0 %5897  ;;  %v5379_v21 = vadd.f32 %v5378_v42, %v5377_v0 }
 0x707   :  { %v5939_v16 = vmul.f32 %v5898_v11, %v13992_v33  ;;  %v6001_v54 = vsel %vm5348_vm0, %v5940_v37, 0.0 }
 0x708   :  { %v5996_v19 = vadd.f32 %v5995_v1, %v5994_v8  ;;  %v14010_v14 = vpop.permute.xlu1 %6031 }
 0x709   :  { %v5999_v44 = vsel %vm5348_vm0, %v5939_v16, 0.0  ;;  %vm6033_vm11 = vcmp.eq.s32.totalorder %v14010_v14, 1 }
 0x70a   :  { %v5998_v35 = vadd.f32 %v5997_v48, %v5996_v19  ;;  %v5908_v52 = vpop.permute.xlu0 %5907 }
 0x70b   :  { %v5941_v3 = vmul.f32 %v5908_v52, %v14007_v17  ;;  %v6591_v52 = vld [vmem:[#allocation5] ss:$0 sm:$0xff] }
 0x70c   :  { %v6000_v25 = vadd.f32 %v5999_v44, %v5998_v35  ;;  %v5239_v5 = vpop.permute.xlu1 %5238 }
 0x70d   :  { %v5332_v59 = vmul.f32 %v5239_v5, %v13894_v39  ;;  %v6003_v50 = vsel %vm5348_vm0, %v5941_v3, 0.0 }
 0x70e   :  { %v6002_v7 = vadd.f32 %v6001_v54, %v6000_v25  ;;  %v6180_v6 = vpop.permute.xlu0 %6179 }
 0x70f   :  { %v6182_v23 = vsel %vm16192_vm15, %v6108_v34, %v6180_v6  ;;  %v5380_v12 = vsel %vm5348_vm0, %v5332_v59, 0.0 }
 0x710   :  { %v6004_v62 = vadd.f32 %v6003_v50, %v6002_v7  ;;  %v6183_v45 = vadd.f32 %v6182_v23, %v6039_v56  ;;  %v5249_v51 = vpop.permute.xlu1 %5248  ;;  %v5381_v31 = vadd.f32 %v5380_v12, %v5379_v21  ;;  %v6590_v21 = vld [vmem:[#allocation4] ss:$0 sm:$0xff] }
 0x711   :  { %v5334_v10 = vmul.f32 %v5249_v51, %v13909_v60 }
 0x712   :  { %v6005_v2 = vrot.slane %v6004_v62, 4  ;;  %6185 = vst.msk [vmem:[#allocation6] sm:$0x1] %vm50_vm14, %v6183_v45  ;;  %v5244_v39 = vpop.permute.xlu0 %5243 }
 0x713   :  { %v5333_v24 = vmul.f32 %v5244_v39, %v13900_v29  ;;  %v5384_v57 = vsel %vm5348_vm0, %v5334_v10, 0.0 }
 0x714   :  { %v6006_v20 = vadd.f32 %v6005_v2, %v6004_v62  ;;  %v5259_v13 = vpop.permute.xlu1 %5258 }
 0x715   :  { %v5382_v49 = vsel %vm5348_vm0, %v5333_v24, 0.0  ;;  %v5336_v30 = vmul.f32 %v5259_v13, %v13924_v26 }
 0x716   :  { %v6007_v28 = vrot.slane %v6006_v20, 2  ;;  %v5383_v8 = vadd.f32 %v5382_v49, %v5381_v31  ;;  %v5254_v11 = vpop.permute.xlu0 %5253 }
 0x717   :  { %v5335_v1 = vmul.f32 %v5254_v11, %v13915_v58  ;;  %v5388_v61 = vsel %vm5348_vm0, %v5336_v30, 0.0 }
 0x718   :  { %v6008_v16 = vadd.f32 %v6007_v28, %v6006_v20  ;;  %v5385_v43 = vadd.f32 %v5384_v57, %v5383_v8  ;;  %v5269_v63 = vpop.permute.xlu1 %5268 }
 0x719   :  { %v5386_v60 = vsel %vm5348_vm0, %v5335_v1, 0.0  ;;  %v6589_v29 = vld [vmem:[#allocation6] ss:$0 sm:$0xff]  ;;  %v5338_v48 = vmul.f32 %v5269_v63, %v13939_v46 }
 0x71a   :  { %v6009_v53 = vrot.slane %v6008_v16, 1  ;;  %v5387_v19 = vadd.f32 %v5386_v60, %v5385_v43  ;;  %v5264_v4 = vpop.permute.xlu0 %5263  ;;  %6209 = vrot.lane.b32.xlu1 %v6589_v29, %s7310_s23  ;;  %v6013_v43 = vld [vmem:[#allocation2] sm:$0x1] }
 0x71b   :  { %v5337_v26 = vmul.f32 %v5264_v4, %v13930_v32  ;;  %v5392_v5 = vsel %vm5348_vm0, %v5338_v48, 0.0 }
 0x71c   :  { %v6010_v37 = vadd.f32 %v6009_v53, %v6008_v16  ;;  %v5389_v58 = vadd.f32 %v5388_v61, %v5387_v19  ;;  %v5279_v55 = vpop.permute.xlu1 %5278 }
 0x71d   :  { %v5390_v35 = vsel %vm5348_vm0, %v5337_v26, 0.0  ;;  %v5340_v46 = vmul.f32 %v5279_v55, %v13955_v47 }
 0x71e   :  { %v6034_v44 = vsel %vm6033_vm11, %v6010_v37, %v6028_v36  ;;  %v5391_v3 = vadd.f32 %v5390_v35, %v5389_v58  ;;  %v5274_v25 = vpop.permute.xlu0 %5273  ;;  %6231 = vrot.lane.b32.xlu1 %v6591_v52, %s7311_s24 }
 0x71f   :  { %6035 = vst.msk [vmem:[#allocation3] sm:$0x1] %vm44_vm8, %v6034_v44  ;;  %v5339_v32 = vmul.f32 %v5274_v25, %v13945_v15  ;;  %v5396_v59 = vsel %vm5348_vm0, %v5340_v46, 0.0 }
 0x720   :  { %v5393_v34 = vadd.f32 %v5392_v5, %v5391_v3  ;;  %v5289_v27 = vpop.permute.xlu1 %5288 }
 0x721   :  { %v5394_v14 = vsel %vm5348_vm0, %v5339_v32, 0.0  ;;  %v5342_v56 = vmul.f32 %v5289_v27, %v13971_v38 }
 0x722   :  { %v5395_v18 = vadd.f32 %v5394_v14, %v5393_v34  ;;  %v5284_v54 = vpop.permute.xlu0 %5283 }
 0x723   :  { %v5341_v0 = vmul.f32 %v5284_v54, %v13961_v9  ;;  %v5400_v15 = vsel %vm5348_vm0, %v5342_v56, 0.0 }
 0x724   :  { %v5397_v7 = vadd.f32 %v5396_v59, %v5395_v18  ;;  %v5299_v6 = vpop.permute.xlu1 %5298 }
 0x725   :  { %v5398_v50 = vsel %vm5348_vm0, %v5341_v0, 0.0  ;;  %v5344_v45 = vmul.f32 %v5299_v6, %v13986_v40 }
 0x726   :  { %v5399_v23 = vadd.f32 %v5398_v50, %v5397_v7  ;;  %v5294_v47 = vpop.permute.xlu0 %5293  ;;  %v6588_v62 = vld [vmem:[#allocation3] ss:$0 sm:$0xff] }
 0x727   :  { %v5343_v51 = vmul.f32 %v5294_v47, %v13977_v41  ;;  %6198 = vrot.lane.b32.xlu0 %v6588_v62, %s7312_s25  ;;  %v5404_v39 = vsel %vm5348_vm0, %v5344_v45, 0.0 }
 0x728   :  { %v5401_v42 = vadd.f32 %v5400_v15, %v5399_v23  ;;  %v5309_v12 = vpop.permute.xlu1 %5308 }
 0x729   :  { %v5402_v38 = vsel %vm5348_vm0, %v5343_v51, 0.0  ;;  %v5346_v10 = vmul.f32 %v5309_v12, %v14001_v22 }
 0x72a   :  { %v5403_v9 = vadd.f32 %v5402_v38, %v5401_v42  ;;  %v5304_v2 = vpop.permute.xlu0 %5303 }
 0x72b   :  { %v5345_v24 = vmul.f32 %v5304_v2, %v13992_v33  ;;  %6220 = vrot.lane.b32.xlu0 %v6590_v21, %s7313_s8  ;;  %v5408_v13 = vsel %vm5348_vm0, %v5346_v10, 0.0 }
 0x72c   :  { %v5405_v40 = vadd.f32 %v5404_v39, %v5403_v9  ;;  %v6017_v33 = vpop.permute.xlu1 %6016 }
 0x72d   :  { %v5406_v41 = vsel %vm5348_vm0, %v5345_v24, 0.0  ;;  %vm6018_vm5 = vcmp.eq.s32.totalorder %v6017_v33, 1 }
 0x72e   :  { %v5407_v20 = vadd.f32 %v5406_v41, %v5405_v40  ;;  %v5314_v31 = vpop.permute.xlu0 %5313 }
 0x72f   :  { %v5347_v49 = vmul.f32 %v5314_v31, %v14007_v17 }
 0x730   :  { %v5409_v28 = vadd.f32 %v5408_v13, %v5407_v20 }
 0x731   :  { %v5410_v8 = vsel %vm5348_vm0, %v5347_v49, 0.0 }
 0x732   :  { %v5411_v11 = vadd.f32 %v5410_v8, %v5409_v28 }
 0x734   :  { %v5412_v57 = vrot.slane %v5411_v11, 4 }
 0x736   :  { %v5413_v30 = vadd.f32 %v5412_v57, %v5411_v11 }
 0x738   :  { %v5414_v22 = vrot.slane %v5413_v30, 2 }
 0x73a   :  { %v5415_v1 = vadd.f32 %v5414_v22, %v5413_v30 }
 0x73c   :  { %v5416_v16 = vrot.slane %v5415_v1, 1 }
 0x73e   :  { %v5417_v63 = vadd.f32 %v5416_v16, %v5415_v1 }
 0x740   :  { %v6019_v60 = vsel %vm6018_vm5, %v5417_v63, %v6013_v43 }
 0x741   :  { %6021 = vst.msk [vmem:[#allocation2] sm:$0x1] %vm44_vm8, %v6019_v60 }
 0x748   :  { %v6190_v29 = vld [vmem:[#allocation2] sm:$0x1] }
 0x749   :  { %6191 = vst.msk [vmem:[#allocation7] sm:$0x1] %vm44_vm8, %v6190_v29 }
 0x78c   :  { %v6210_v17 = vpop.permute.xlu1 %6209 }
 0x790   :  { %v6232_v4 = vpop.permute.xlu1 %6231 }
 0x799   :  { %v6199_v53 = vpop.permute.xlu0 %6198 }
 0x79a   :  { %6202 = vst.msk [vmem:[#allocation7] sm:$0x1] %vm6201_vm6, %v6199_v53 }
 0x79b   :  { %6213 = vst.msk [vmem:[#allocation7] sm:$0x1] %vm6212_vm12, %v6210_v17 }
 0x79d   :  { %v6221_v19 = vpop.permute.xlu0 %6220 }
 0x79e   :  { %6224 = vst.msk [vmem:[#allocation7] sm:$0x1] %vm6223_vm10, %v6221_v19 }
 0x79f   :  { %6235 = vst.msk [vmem:[#allocation7] sm:$0x1] %vm6234_vm9, %v6232_v4 }
 0x7a0   :  { %7286 = shalt.err (!%p7283_p4)
}
 0x7a1   :  { %s7287_s12 = scalar_lea.hbm %s14084_s11, 16 }
 0x7a2   :  { %p7288_p5 = scmp.ne.s32.totalorder %s14084_s11, %s7287_s12  ;;  %p7291_p6 = scmp.lt.u32.totalorder %s7287_s12, %s14084_s11 }
 0x7a4   :  { %p7293_p7 = pnand %p7291_p6, %p7288_p5 }
 0x7a6   :  { %7296 = shalt.err (!%p7293_p7)
}
 0x7a7   :  { %6245 = dma.vmem_to_hbm [thread:$0]  %s6243_s27, 16, %s14084_s11, [#allocation8]  }
 0x7a8   :  { %7297 = dma.done.wait [#allocation8], 16  }
 0x7a9   :  { %7298 = vsyncadd [#allocation8], 4294967280 }
 0x7aa   :  { %6249 = vsyncpa [#allocation8], 1 }

</bundles_post_ra>
